<compile_context>
chip_gen: v6e
topology: v6e:2x2x1
jax: 0.10.0
libtpu: 0.0.40
codegen_flags: <defaults>
</compile_context>

<pallas_src>
import jax
import jax.numpy as jnp
from jax.experimental import pallas as pl
from jax.experimental.pallas import tpu as pltpu


def lstm_kernel(x_ref, wih1_ref, wihr_ref, whhbd_ref, bflat_ref, wlb_ref,
                out_ref, xp_ref):
    B = out_ref.shape[0]
    H4 = wih1_ref.shape[1]          # 4H
    H = H4 // 4
    TB = x_ref.shape[0]
    T = TB // B
    OUT = out_ref.shape[1] // T

    # ---- Off-critical-path precompute --------------------------------------
    # Cell-1 input projection for ALL timesteps in one (T*B,IN)@(IN,4H) matmul,
    # parked in VMEM scratch so it never occupies vregs across the recurrence.
    xp_ref[...] = jnp.dot(x_ref[...], wih1_ref[...],
                          preferred_element_type=jnp.float32)

    # Hoisted gate-scale constant ([1,1,2,1] per quarter): lets us take a
    # single whole-vreg sigmoid and recover tanh(g) = 2*sigmoid(2g) - 1.
    lane = jax.lax.broadcasted_iota(jnp.int32, (1, H4), 1)
    gate_scale = jnp.where((lane >= 2 * H) & (lane < 3 * H),
                           jnp.float32(2.0), jnp.float32(1.0))

    # Recurrent state stays in values: 12 tiny (B, H) f32 arrays.
    hs = [jnp.zeros((B, H), jnp.float32) for _ in range(6)]
    cs = [jnp.zeros((B, H), jnp.float32) for _ in range(6)]

    for t in range(T):               # fully unrolled static time loop
        # All six cells' recurrent contributions (+ all biases) in ONE matmul,
        # pulled off the per-cell serial chain.
        h_stack = jnp.concatenate(hs, axis=1)                       # (B, 6H)
        hh_pre = jnp.dot(h_stack, whhbd_ref[...],
                         preferred_element_type=jnp.float32) + bflat_ref[...]

        inp = None
        for k in range(6):
            if k == 0:
                pre = xp_ref[t * B:(t + 1) * B, :]                  # VMEM slice
            else:
                pre = jnp.dot(inp, wihr_ref[k - 1],                 # K = H
                              preferred_element_type=jnp.float32)
            gates = pre + hh_pre[:, k * H4:(k + 1) * H4]

            sig = jax.nn.sigmoid(gates * gate_scale)   # single EUP push
            i = sig[:, 0:H]
            f = sig[:, H:2 * H]
            g = 2.0 * sig[:, 2 * H:3 * H] - 1.0        # == tanh(raw g)
            o = sig[:, 3 * H:4 * H]
            c_new = f * cs[k] + i * g
            h_new = o * jnp.tanh(c_new)
            cs[k] = c_new
            hs[k] = h_new
            inp = h_new
            # TODO(synk): Dropout(p=0.5) after cells 2/4/6 is identity (eval).

        # linear1∘linear2 fused offline into one affine map; store straight
        # into the output tile (HBM writeback is still one dense (8,128) tile).
        w_l = wlb_ref[0:H, :]
        b_l = wlb_ref[H:H + 1, :]
        y = jnp.dot(inp, w_l, preferred_element_type=jnp.float32) + b_l
        out_ref[:, t * OUT:(t + 1) * OUT] = y.astype(out_ref.dtype)

    # TODO(synk): (t, cell) wavefront scheduling (T*6 -> T+5 chain stages) is a
    # further restructure not applied here.


@jax.jit
def custom_lstm_forward(x, params):
    """x: (T, B, IN) time-major. Returns (B, T*OUT) like torch.cat(., dim=1)."""
    T, B, IN = x.shape
    H = params["w_hh"].shape[-2]
    OUT = params["b_l2"].shape[-1]
    H4 = 4 * H

    # Offline weight prep (tiny, traced once under jit):
    # (a) block-diagonal recurrent weight (6H, 6*4H) for the batched hh matmul
    rows = []
    for k in range(6):
        left = jnp.zeros((H, H4 * k), jnp.float32)
        right = jnp.zeros((H, H4 * (5 - k)), jnp.float32)
        rows.append(jnp.concatenate([left, params["w_hh"][k], right], axis=1))
    w_hh_bd = jnp.concatenate(rows, axis=0)

    # (b) all 6 combined biases flattened to one (1, 24H) row, added once per
    #     timestep to the batched hh result.
    b_flat = params["b"].reshape(1, 6 * H4)

    # (c) linear1 ∘ linear2 fused into one (H, OUT) affine map, packed with its
    #     bias (and sublane padding) into a single small buffer.
    w_l = jnp.dot(params["w_l1"], params["w_l2"],
                  precision=jax.lax.Precision.HIGHEST)
    b_l = jnp.dot(params["b_l1"], params["w_l2"],
                  precision=jax.lax.Precision.HIGHEST) + params["b_l2"]
    wlb = jnp.concatenate([w_l, b_l, jnp.zeros((7, OUT), jnp.float32)], axis=0)

    x2d = x.reshape(T * B, IN)       # time-major flatten for the precompute

    out = pl.pallas_call(
        lstm_kernel,
        out_shape=jax.ShapeDtypeStruct((B, T * OUT), jnp.float32),
        grid_spec=pltpu.PrefetchScalarGridSpec(
            num_scalar_prefetch=0,
            grid=(1,),                # single invocation; T unrolled inside
            in_specs=[
                pl.BlockSpec((T * B, IN), lambda i: (0, 0)),        # x (flat)
                pl.BlockSpec((IN, H4), lambda i: (0, 0)),           # w_ih cell1
                pl.BlockSpec((5, H, H4), lambda i: (0, 0, 0)),      # w_ih cells2-6
                pl.BlockSpec((6 * H, 6 * H4), lambda i: (0, 0)),    # block-diag w_hh
                pl.BlockSpec((1, 6 * H4), lambda i: (0, 0)),        # all biases
                pl.BlockSpec((H + 8, OUT), lambda i: (0, 0)),       # fused linear W|b
            ],
            out_specs=pl.BlockSpec((B, T * OUT), lambda i: (0, 0)),
            scratch_shapes=[pltpu.VMEM((T * B, H4), jnp.float32)],  # xp scratch
        ),
        compiler_params=pltpu.CompilerParams(
            dimension_semantics=("arbitrary",)),
    )(x2d, params["w_ih1"], params["w_ih_rest"], w_hh_bd, b_flat, wlb)
    return out


def init_params(key, in_size, hidden, out_size):
    ks = jax.random.split(key, 10)

    def u(k, shape, scale=0.1):
        return jax.random.uniform(k, shape, jnp.float32, -scale, scale)

    b_ih = u(ks[3], (6, 4 * hidden))
    b_hh = u(ks[4], (6, 4 * hidden))
    return {
        "w_ih1": u(ks[0], (in_size, 4 * hidden)),
        "w_ih_rest": u(ks[1], (5, hidden, 4 * hidden)),
        "w_hh": u(ks[2], (6, hidden, 4 * hidden)),
        "b": b_ih + b_hh,
        "w_l1": u(ks[5], (hidden, hidden)),
        "b_l1": u(ks[6], (1, hidden)),
        "w_l2": u(ks[7], (hidden, out_size)),
        "b_l2": u(ks[8], (1, out_size)),
    }


def reference_forward(x, p):
    """Pure-JAX reference of the (fixed) CustomLSTM forward (unfused linears)."""
    T, B, _ = x.shape
    H = p["w_hh"].shape[-2]
    hs = [jnp.zeros((B, H), jnp.float32) for _ in range(6)]
    cs = [jnp.zeros((B, H), jnp.float32) for _ in range(6)]
    outs = []
    for t in range(T):
        inp = x[t]
        for k in range(6):
            w_ih = p["w_ih1"] if k == 0 else p["w_ih_rest"][k - 1]
            gates = inp @ w_ih + hs[k] @ p["w_hh"][k] + p["b"][k]
            i = jax.nn.sigmoid(gates[:, :H])
            f = jax.nn.sigmoid(gates[:, H:2 * H])
            g = jnp.tanh(gates[:, 2 * H:3 * H])
            o = jax.nn.sigmoid(gates[:, 3 * H:4 * H])
            cs[k] = f * cs[k] + i * g
            hs[k] = o * jnp.tanh(cs[k])
            inp = hs[k]
        y = inp @ p["w_l1"] + p["b_l1"]
        y = y @ p["w_l2"] + p["b_l2"]
        outs.append(y)
    return jnp.concatenate(outs, axis=1)


if __name__ == "__main__":
    # Small shapes consistent with the module: seq=8, batch=8, inSize=16,
    # n_hidden=32, outSize=16  (so T*OUT = 128 → one lane-dense output vreg).
    T, B, IN, H, OUT = 8, 8, 16, 32, 16

    key = jax.random.PRNGKey(0)
    kx, kp = jax.random.split(key)
    x = jax.random.normal(kx, (T, B, IN), jnp.float32)
    params = init_params(kp, IN, H, OUT)

    out = custom_lstm_forward(x, params)
    out = jax.block_until_ready(out)

    ref = reference_forward(x, params)
    assert out.shape == (B, T * OUT), out.shape
    # Tolerance: in-kernel MXU f32 dots (bf16 multiply passes), the offline
    # linear1∘linear2 fusion, the block-diagonal hh batching and the
    # tanh(g)=2*sigmoid(2g)-1 identity all reassociate roundings vs the
    # two-step f32 reference.
    assert jnp.allclose(out, ref, atol=2e-3, rtol=2e-3), (
        float(jnp.max(jnp.abs(out - ref))))
    print("KERNEL_OK")
</pallas_src>

<mosaic_0001>
module attributes {stable_mosaic.version = 11 : i64} {
  func.func @lstm_kernel(%arg0: i32, %arg1: memref<64x16xf32, #tpu.memory_space<vmem>>, %arg2: memref<16x128xf32, #tpu.memory_space<vmem>>, %arg3: memref<5x32x128xf32, #tpu.memory_space<vmem>>, %arg4: memref<192x768xf32, #tpu.memory_space<vmem>>, %arg5: memref<1x768xf32, #tpu.memory_space<vmem>>, %arg6: memref<40x16xf32, #tpu.memory_space<vmem>>, %arg7: memref<8x128xf32, #tpu.memory_space<vmem>>, %arg8: memref<64x128xf32, #tpu.memory_space<vmem>>) attributes {dimension_semantics = [#tpu.dimension_semantics<arbitrary>], iteration_bounds = array<i64: 1>, scalar_prefetch = 0 : i64, scratch_operands = 1 : i64, tpu.core_type = #tpu.core_type<tc>, window_params = [{pipeline_mode = #tpu.pipeline_mode<synchronous>, transform_indices = @transform_0, window_bounds = array<i64: 64, 16>}, {pipeline_mode = #tpu.pipeline_mode<synchronous>, transform_indices = @transform_1, window_bounds = array<i64: 16, 128>}, {pipeline_mode = #tpu.pipeline_mode<synchronous>, transform_indices = @transform_2, window_bounds = array<i64: 5, 32, 128>}, {pipeline_mode = #tpu.pipeline_mode<synchronous>, transform_indices = @transform_3, window_bounds = array<i64: 192, 768>}, {pipeline_mode = #tpu.pipeline_mode<synchronous>, transform_indices = @transform_4, window_bounds = array<i64: 1, 768>}, {pipeline_mode = #tpu.pipeline_mode<synchronous>, transform_indices = @transform_5, window_bounds = array<i64: 40, 16>}, {pipeline_mode = #tpu.pipeline_mode<synchronous>, transform_indices = @transform_6, window_bounds = array<i64: 8, 128>}]} {
    %c0 = arith.constant 0 : index
    %c0_0 = arith.constant 0 : index
    %0 = vector.load %arg1[%c0, %c0_0] : memref<64x16xf32, #tpu.memory_space<vmem>>, vector<64x16xf32>
    %c0_1 = arith.constant 0 : index
    %c0_2 = arith.constant 0 : index
    %1 = vector.load %arg2[%c0_1, %c0_2] : memref<16x128xf32, #tpu.memory_space<vmem>>, vector<16x128xf32>
    %cst = arith.constant dense<0.000000e+00> : vector<64x128xf32>
    %2 = tpu.matmul %0, %1, %cst {dimension_numbers = #tpu.dot_dimension_numbers<[1], [0], [0], [1], [0, 0, 1, 1], [], []>} : vector<64x16xf32>, vector<16x128xf32>, vector<64x128xf32> -> vector<64x128xf32>
    %c0_3 = arith.constant 0 : index
    %c0_4 = arith.constant 0 : index
    %3 = vector.load %arg8[%c0_3, %c0_4] : memref<64x128xf32, #tpu.memory_space<vmem>>, vector<64x128xf32>
    tpu.vector_store %arg8[%c0_3, %c0_4], %2 {strides = array<i32>} : memref<64x128xf32, #tpu.memory_space<vmem>>, vector<64x128xf32>,
    %4 = tpu.iota {dimensions = array<i32: 1>} : vector<1x128xi32>
    %c64_i32 = arith.constant 64 : i32
    %5 = vector.broadcast %c64_i32 : i32 to vector<1x128xi32>
    %6 = arith.cmpi sge, %4, %5 : vector<1x128xi32>
    %c96_i32 = arith.constant 96 : i32
    %7 = vector.broadcast %c96_i32 : i32 to vector<1x128xi32>
    %8 = arith.cmpi slt, %4, %7 : vector<1x128xi32>
    %9 = arith.andi %6, %8 : vector<1x128xi1>
    %cst_5 = arith.constant 2.000000e+00 : f32
    %cst_6 = arith.constant 1.000000e+00 : f32
    %10 = vector.broadcast %cst_5 : f32 to vector<1x128xf32>
    %11 = vector.broadcast %cst_6 : f32 to vector<1x128xf32>
    %12 = arith.select %9, %10, %11 : vector<1x128xi1>, vector<1x128xf32>
    %cst_7 = arith.constant 0.000000e+00 : f32
    %13 = vector.broadcast %cst_7 : f32 to vector<8x32xf32>
    %cst_8 = arith.constant 0.000000e+00 : f32
    %14 = vector.broadcast %cst_8 : f32 to vector<8x32xf32>
    %cst_9 = arith.constant 0.000000e+00 : f32
    %15 = vector.broadcast %cst_9 : f32 to vector<8x32xf32>
    %cst_10 = arith.constant 0.000000e+00 : f32
    %16 = vector.broadcast %cst_10 : f32 to vector<8x32xf32>
    %cst_11 = arith.constant 0.000000e+00 : f32
    %17 = vector.broadcast %cst_11 : f32 to vector<8x32xf32>
    %cst_12 = arith.constant 0.000000e+00 : f32
    %18 = vector.broadcast %cst_12 : f32 to vector<8x32xf32>
    %cst_13 = arith.constant 0.000000e+00 : f32
    %19 = vector.broadcast %cst_13 : f32 to vector<8x32xf32>
    %cst_14 = arith.constant 0.000000e+00 : f32
    %20 = vector.broadcast %cst_14 : f32 to vector<8x32xf32>
    %cst_15 = arith.constant 0.000000e+00 : f32
    %21 = vector.broadcast %cst_15 : f32 to vector<8x32xf32>
    %cst_16 = arith.constant 0.000000e+00 : f32
    %22 = vector.broadcast %cst_16 : f32 to vector<8x32xf32>
    %cst_17 = arith.constant 0.000000e+00 : f32
    %23 = vector.broadcast %cst_17 : f32 to vector<8x32xf32>
    %cst_18 = arith.constant 0.000000e+00 : f32
    %24 = vector.broadcast %cst_18 : f32 to vector<8x32xf32>
    %25 = tpu.concatenate %13, %14, %15, %16, %17, %18 in 1 : vector<8x32xf32>, vector<8x32xf32>, vector<8x32xf32>, vector<8x32xf32>, vector<8x32xf32>, vector<8x32xf32> -> vector<8x192xf32>
    %c0_19 = arith.constant 0 : index
    %c0_20 = arith.constant 0 : index
    %26 = vector.load %arg4[%c0_19, %c0_20] : memref<192x768xf32, #tpu.memory_space<vmem>>, vector<192x768xf32>
    %cst_21 = arith.constant dense<0.000000e+00> : vector<8x768xf32>
    %27 = tpu.matmul %25, %26, %cst_21 {dimension_numbers = #tpu.dot_dimension_numbers<[1], [0], [0], [1], [0, 0, 1, 1], [], []>} : vector<8x192xf32>, vector<192x768xf32>, vector<8x768xf32> -> vector<8x768xf32>
    %c0_22 = arith.constant 0 : index
    %c0_23 = arith.constant 0 : index
    %28 = vector.load %arg5[%c0_22, %c0_23] : memref<1x768xf32, #tpu.memory_space<vmem>>, vector<1x768xf32>
    %29 = vector.broadcast %28 : vector<1x768xf32> to vector<8x768xf32>
    %30 = arith.addf %27, %29 : vector<8x768xf32>
    %c0_24 = arith.constant 0 : index
    %c0_25 = arith.constant 0 : index
    %31 = vector.load %arg8[%c0_24, %c0_25] : memref<64x128xf32, #tpu.memory_space<vmem>>, vector<8x128xf32>
    %32 = vector.extract_strided_slice %30 {offsets = [0, 0], sizes = [8, 128], strides = [1, 1]} : vector<8x768xf32> to vector<8x128xf32>
    %33 = arith.addf %31, %32 : vector<8x128xf32>
    %34 = vector.broadcast %12 : vector<1x128xf32> to vector<8x128xf32>
    %35 = arith.mulf %33, %34 : vector<8x128xf32>
    %36 = arith.negf %35 : vector<8x128xf32>
    %37 = math.exp %36 : vector<8x128xf32>
    %cst_26 = arith.constant 1.000000e+00 : f32
    %38 = vector.broadcast %cst_26 : f32 to vector<8x128xf32>
    %39 = arith.addf %38, %37 : vector<8x128xf32>
    %40 = arith.divf %38, %39 : vector<8x128xf32>
    %41 = vector.extract_strided_slice %40 {offsets = [0, 0], sizes = [8, 32], strides = [1, 1]} : vector<8x128xf32> to vector<8x32xf32>
    %42 = vector.extract_strided_slice %40 {offsets = [0, 32], sizes = [8, 32], strides = [1, 1]} : vector<8x128xf32> to vector<8x32xf32>
    %43 = vector.extract_strided_slice %40 {offsets = [0, 64], sizes = [8, 32], strides = [1, 1]} : vector<8x128xf32> to vector<8x32xf32>
    %cst_27 = arith.constant 2.000000e+00 : f32
    %44 = vector.broadcast %cst_27 : f32 to vector<8x32xf32>
    %45 = arith.mulf %44, %43 : vector<8x32xf32>
    %cst_28 = arith.constant 1.000000e+00 : f32
    %46 = vector.broadcast %cst_28 : f32 to vector<8x32xf32>
    %47 = arith.subf %45, %46 : vector<8x32xf32>
    %48 = vector.extract_strided_slice %40 {offsets = [0, 96], sizes = [8, 32], strides = [1, 1]} : vector<8x128xf32> to vector<8x32xf32>
    %49 = arith.mulf %42, %19 : vector<8x32xf32>
    %50 = arith.mulf %41, %47 : vector<8x32xf32>
    %51 = arith.addf %49, %50 : vector<8x32xf32>
    %52 = math.tanh %51 : vector<8x32xf32>
    %53 = arith.mulf %48, %52 : vector<8x32xf32>
    %c0_29 = arith.constant 0 : index
    %c0_30 = arith.constant 0 : index
    %c0_31 = arith.constant 0 : index
    %54 = vector.load %arg3[%c0_29, %c0_30, %c0_31] : memref<5x32x128xf32, #tpu.memory_space<vmem>>, vector<1x32x128xf32>
    %55 = vector.shape_cast %54 : vector<1x32x128xf32> to vector<32x128xf32>
    %cst_32 = arith.constant dense<0.000000e+00> : vector<8x128xf32>
    %56 = tpu.matmul %53, %55, %cst_32 {dimension_numbers = #tpu.dot_dimension_numbers<[1], [0], [0], [1], [0, 0, 1, 1], [], []>} : vector<8x32xf32>, vector<32x128xf32>, vector<8x128xf32> -> vector<8x128xf32>
    %57 = vector.extract_strided_slice %30 {offsets = [0, 128], sizes = [8, 128], strides = [1, 1]} : vector<8x768xf32> to vector<8x128xf32>
    %58 = arith.addf %56, %57 : vector<8x128xf32>
    %59 = vector.broadcast %12 : vector<1x128xf32> to vector<8x128xf32>
    %60 = arith.mulf %58, %59 : vector<8x128xf32>
    %61 = arith.negf %60 : vector<8x128xf32>
    %62 = math.exp %61 : vector<8x128xf32>
    %cst_33 = arith.constant 1.000000e+00 : f32
    %63 = vector.broadcast %cst_33 : f32 to vector<8x128xf32>
    %64 = arith.addf %63, %62 : vector<8x128xf32>
    %65 = arith.divf %63, %64 : vector<8x128xf32>
    %66 = vector.extract_strided_slice %65 {offsets = [0, 0], sizes = [8, 32], strides = [1, 1]} : vector<8x128xf32> to vector<8x32xf32>
    %67 = vector.extract_strided_slice %65 {offsets = [0, 32], sizes = [8, 32], strides = [1, 1]} : vector<8x128xf32> to vector<8x32xf32>
    %68 = vector.extract_strided_slice %65 {offsets = [0, 64], sizes = [8, 32], strides = [1, 1]} : vector<8x128xf32> to vector<8x32xf32>
    %cst_34 = arith.constant 2.000000e+00 : f32
    %69 = vector.broadcast %cst_34 : f32 to vector<8x32xf32>
    %70 = arith.mulf %69, %68 : vector<8x32xf32>
    %cst_35 = arith.constant 1.000000e+00 : f32
    %71 = vector.broadcast %cst_35 : f32 to vector<8x32xf32>
    %72 = arith.subf %70, %71 : vector<8x32xf32>
    %73 = vector.extract_strided_slice %65 {offsets = [0, 96], sizes = [8, 32], strides = [1, 1]} : vector<8x128xf32> to vector<8x32xf32>
    %74 = arith.mulf %67, %20 : vector<8x32xf32>
    %75 = arith.mulf %66, %72 : vector<8x32xf32>
    %76 = arith.addf %74, %75 : vector<8x32xf32>
    %77 = math.tanh %76 : vector<8x32xf32>
    %78 = arith.mulf %73, %77 : vector<8x32xf32>
    %c1 = arith.constant 1 : index
    %c0_36 = arith.constant 0 : index
    %c0_37 = arith.constant 0 : index
    %79 = vector.load %arg3[%c1, %c0_36, %c0_37] : memref<5x32x128xf32, #tpu.memory_space<vmem>>, vector<1x32x128xf32>
    %80 = vector.shape_cast %79 : vector<1x32x128xf32> to vector<32x128xf32>
    %cst_38 = arith.constant dense<0.000000e+00> : vector<8x128xf32>
    %81 = tpu.matmul %78, %80, %cst_38 {dimension_numbers = #tpu.dot_dimension_numbers<[1], [0], [0], [1], [0, 0, 1, 1], [], []>} : vector<8x32xf32>, vector<32x128xf32>, vector<8x128xf32> -> vector<8x128xf32>
    %82 = vector.extract_strided_slice %30 {offsets = [0, 256], sizes = [8, 128], strides = [1, 1]} : vector<8x768xf32> to vector<8x128xf32>
    %83 = arith.addf %81, %82 : vector<8x128xf32>
    %84 = vector.broadcast %12 : vector<1x128xf32> to vector<8x128xf32>
    %85 = arith.mulf %83, %84 : vector<8x128xf32>
    %86 = arith.negf %85 : vector<8x128xf32>
    %87 = math.exp %86 : vector<8x128xf32>
    %cst_39 = arith.constant 1.000000e+00 : f32
    %88 = vector.broadcast %cst_39 : f32 to vector<8x128xf32>
    %89 = arith.addf %88, %87 : vector<8x128xf32>
    %90 = arith.divf %88, %89 : vector<8x128xf32>
    %91 = vector.extract_strided_slice %90 {offsets = [0, 0], sizes = [8, 32], strides = [1, 1]} : vector<8x128xf32> to vector<8x32xf32>
    %92 = vector.extract_strided_slice %90 {offsets = [0, 32], sizes = [8, 32], strides = [1, 1]} : vector<8x128xf32> to vector<8x32xf32>
    %93 = vector.extract_strided_slice %90 {offsets = [0, 64], sizes = [8, 32], strides = [1, 1]} : vector<8x128xf32> to vector<8x32xf32>
    %cst_40 = arith.constant 2.000000e+00 : f32
    %94 = vector.broadcast %cst_40 : f32 to vector<8x32xf32>
    %95 = arith.mulf %94, %93 : vector<8x32xf32>
    %cst_41 = arith.constant 1.000000e+00 : f32
    %96 = vector.broadcast %cst_41 : f32 to vector<8x32xf32>
    %97 = arith.subf %95, %96 : vector<8x32xf32>
    %98 = vector.extract_strided_slice %90 {offsets = [0, 96], sizes = [8, 32], strides = [1, 1]} : vector<8x128xf32> to vector<8x32xf32>
    %99 = arith.mulf %92, %21 : vector<8x32xf32>
    %100 = arith.mulf %91, %97 : vector<8x32xf32>
    %101 = arith.addf %99, %100 : vector<8x32xf32>
    %102 = math.tanh %101 : vector<8x32xf32>
    %103 = arith.mulf %98, %102 : vector<8x32xf32>
    %c2 = arith.constant 2 : index
    %c0_42 = arith.constant 0 : index
    %c0_43 = arith.constant 0 : index
    %104 = vector.load %arg3[%c2, %c0_42, %c0_43] : memref<5x32x128xf32, #tpu.memory_space<vmem>>, vector<1x32x128xf32>
    %105 = vector.shape_cast %104 : vector<1x32x128xf32> to vector<32x128xf32>
    %cst_44 = arith.constant dense<0.000000e+00> : vector<8x128xf32>
    %106 = tpu.matmul %103, %105, %cst_44 {dimension_numbers = #tpu.dot_dimension_numbers<[1], [0], [0], [1], [0, 0, 1, 1], [], []>} : vector<8x32xf32>, vector<32x128xf32>, vector<8x128xf32> -> vector<8x128xf32>
    %107 = vector.extract_strided_slice %30 {offsets = [0, 384], sizes = [8, 128], strides = [1, 1]} : vector<8x768xf32> to vector<8x128xf32>
    %108 = arith.addf %106, %107 : vector<8x128xf32>
    %109 = vector.broadcast %12 : vector<1x128xf32> to vector<8x128xf32>
    %110 = arith.mulf %108, %109 : vector<8x128xf32>
    %111 = arith.negf %110 : vector<8x128xf32>
    %112 = math.exp %111 : vector<8x128xf32>
    %cst_45 = arith.constant 1.000000e+00 : f32
    %113 = vector.broadcast %cst_45 : f32 to vector<8x128xf32>
    %114 = arith.addf %113, %112 : vector<8x128xf32>
    %115 = arith.divf %113, %114 : vector<8x128xf32>
    %116 = vector.extract_strided_slice %115 {offsets = [0, 0], sizes = [8, 32], strides = [1, 1]} : vector<8x128xf32> to vector<8x32xf32>
    %117 = vector.extract_strided_slice %115 {offsets = [0, 32], sizes = [8, 32], strides = [1, 1]} : vector<8x128xf32> to vector<8x32xf32>
    %118 = vector.extract_strided_slice %115 {offsets = [0, 64], sizes = [8, 32], strides = [1, 1]} : vector<8x128xf32> to vector<8x32xf32>
    %cst_46 = arith.constant 2.000000e+00 : f32
    %119 = vector.broadcast %cst_46 : f32 to vector<8x32xf32>
    %120 = arith.mulf %119, %118 : vector<8x32xf32>
    %cst_47 = arith.constant 1.000000e+00 : f32
    %121 = vector.broadcast %cst_47 : f32 to vector<8x32xf32>
    %122 = arith.subf %120, %121 : vector<8x32xf32>
    %123 = vector.extract_strided_slice %115 {offsets = [0, 96], sizes = [8, 32], strides = [1, 1]} : vector<8x128xf32> to vector<8x32xf32>
    %124 = arith.mulf %117, %22 : vector<8x32xf32>
    %125 = arith.mulf %116, %122 : vector<8x32xf32>
    %126 = arith.addf %124, %125 : vector<8x32xf32>
    %127 = math.tanh %126 : vector<8x32xf32>
    %128 = arith.mulf %123, %127 : vector<8x32xf32>
    %c3 = arith.constant 3 : index
    %c0_48 = arith.constant 0 : index
    %c0_49 = arith.constant 0 : index
    %129 = vector.load %arg3[%c3, %c0_48, %c0_49] : memref<5x32x128xf32, #tpu.memory_space<vmem>>, vector<1x32x128xf32>
    %130 = vector.shape_cast %129 : vector<1x32x128xf32> to vector<32x128xf32>
    %cst_50 = arith.constant dense<0.000000e+00> : vector<8x128xf32>
    %131 = tpu.matmul %128, %130, %cst_50 {dimension_numbers = #tpu.dot_dimension_numbers<[1], [0], [0], [1], [0, 0, 1, 1], [], []>} : vector<8x32xf32>, vector<32x128xf32>, vector<8x128xf32> -> vector<8x128xf32>
    %132 = vector.extract_strided_slice %30 {offsets = [0, 512], sizes = [8, 128], strides = [1, 1]} : vector<8x768xf32> to vector<8x128xf32>
    %133 = arith.addf %131, %132 : vector<8x128xf32>
    %134 = vector.broadcast %12 : vector<1x128xf32> to vector<8x128xf32>
    %135 = arith.mulf %133, %134 : vector<8x128xf32>
    %136 = arith.negf %135 : vector<8x128xf32>
    %137 = math.exp %136 : vector<8x128xf32>
    %cst_51 = arith.constant 1.000000e+00 : f32
    %138 = vector.broadcast %cst_51 : f32 to vector<8x128xf32>
    %139 = arith.addf %138, %137 : vector<8x128xf32>
    %140 = arith.divf %138, %139 : vector<8x128xf32>
    %141 = vector.extract_strided_slice %140 {offsets = [0, 0], sizes = [8, 32], strides = [1, 1]} : vector<8x128xf32> to vector<8x32xf32>
    %142 = vector.extract_strided_slice %140 {offsets = [0, 32], sizes = [8, 32], strides = [1, 1]} : vector<8x128xf32> to vector<8x32xf32>
    %143 = vector.extract_strided_slice %140 {offsets = [0, 64], sizes = [8, 32], strides = [1, 1]} : vector<8x128xf32> to vector<8x32xf32>
    %cst_52 = arith.constant 2.000000e+00 : f32
    %144 = vector.broadcast %cst_52 : f32 to vector<8x32xf32>
    %145 = arith.mulf %144, %143 : vector<8x32xf32>
    %cst_53 = arith.constant 1.000000e+00 : f32
    %146 = vector.broadcast %cst_53 : f32 to vector<8x32xf32>
    %147 = arith.subf %145, %146 : vector<8x32xf32>
    %148 = vector.extract_strided_slice %140 {offsets = [0, 96], sizes = [8, 32], strides = [1, 1]} : vector<8x128xf32> to vector<8x32xf32>
    %149 = arith.mulf %142, %23 : vector<8x32xf32>
    %150 = arith.mulf %141, %147 : vector<8x32xf32>
    %151 = arith.addf %149, %150 : vector<8x32xf32>
    %152 = math.tanh %151 : vector<8x32xf32>
    %153 = arith.mulf %148, %152 : vector<8x32xf32>
    %c4 = arith.constant 4 : index
    %c0_54 = arith.constant 0 : index
    %c0_55 = arith.constant 0 : index
    %154 = vector.load %arg3[%c4, %c0_54, %c0_55] : memref<5x32x128xf32, #tpu.memory_space<vmem>>, vector<1x32x128xf32>
    %155 = vector.shape_cast %154 : vector<1x32x128xf32> to vector<32x128xf32>
    %cst_56 = arith.constant dense<0.000000e+00> : vector<8x128xf32>
    %156 = tpu.matmul %153, %155, %cst_56 {dimension_numbers = #tpu.dot_dimension_numbers<[1], [0], [0], [1], [0, 0, 1, 1], [], []>} : vector<8x32xf32>, vector<32x128xf32>, vector<8x128xf32> -> vector<8x128xf32>
    %157 = vector.extract_strided_slice %30 {offsets = [0, 640], sizes = [8, 128], strides = [1, 1]} : vector<8x768xf32> to vector<8x128xf32>
    %158 = arith.addf %156, %157 : vector<8x128xf32>
    %159 = vector.broadcast %12 : vector<1x128xf32> to vector<8x128xf32>
    %160 = arith.mulf %158, %159 : vector<8x128xf32>
    %161 = arith.negf %160 : vector<8x128xf32>
    %162 = math.exp %161 : vector<8x128xf32>
    %cst_57 = arith.constant 1.000000e+00 : f32
    %163 = vector.broadcast %cst_57 : f32 to vector<8x128xf32>
    %164 = arith.addf %163, %162 : vector<8x128xf32>
    %165 = arith.divf %163, %164 : vector<8x128xf32>
    %166 = vector.extract_strided_slice %165 {offsets = [0, 0], sizes = [8, 32], strides = [1, 1]} : vector<8x128xf32> to vector<8x32xf32>
    %167 = vector.extract_strided_slice %165 {offsets = [0, 32], sizes = [8, 32], strides = [1, 1]} : vector<8x128xf32> to vector<8x32xf32>
    %168 = vector.extract_strided_slice %165 {offsets = [0, 64], sizes = [8, 32], strides = [1, 1]} : vector<8x128xf32> to vector<8x32xf32>
    %cst_58 = arith.constant 2.000000e+00 : f32
    %169 = vector.broadcast %cst_58 : f32 to vector<8x32xf32>
    %170 = arith.mulf %169, %168 : vector<8x32xf32>
    %cst_59 = arith.constant 1.000000e+00 : f32
    %171 = vector.broadcast %cst_59 : f32 to vector<8x32xf32>
    %172 = arith.subf %170, %171 : vector<8x32xf32>
    %173 = vector.extract_strided_slice %165 {offsets = [0, 96], sizes = [8, 32], strides = [1, 1]} : vector<8x128xf32> to vector<8x32xf32>
    %174 = arith.mulf %167, %24 : vector<8x32xf32>
    %175 = arith.mulf %166, %172 : vector<8x32xf32>
    %176 = arith.addf %174, %175 : vector<8x32xf32>
    %177 = math.tanh %176 : vector<8x32xf32>
    %178 = arith.mulf %173, %177 : vector<8x32xf32>
    %c0_60 = arith.constant 0 : index
    %c0_61 = arith.constant 0 : index
    %179 = vector.load %arg6[%c0_60, %c0_61] : memref<40x16xf32, #tpu.memory_space<vmem>>, vector<32x16xf32>
    %c32 = arith.constant 32 : index
    %c0_62 = arith.constant 0 : index
    %180 = vector.load %arg6[%c32, %c0_62] : memref<40x16xf32, #tpu.memory_space<vmem>>, vector<1x16xf32>
    %cst_63 = arith.constant dense<0.000000e+00> : vector<8x16xf32>
    %181 = tpu.matmul %178, %179, %cst_63 {dimension_numbers = #tpu.dot_dimension_numbers<[1], [0], [0], [1], [0, 0, 1, 1], [], []>} : vector<8x32xf32>, vector<32x16xf32>, vector<8x16xf32> -> vector<8x16xf32>
    %182 = vector.broadcast %180 : vector<1x16xf32> to vector<8x16xf32>
    %183 = arith.addf %181, %182 : vector<8x16xf32>
    %c0_64 = arith.constant 0 : index
    %c0_65 = arith.constant 0 : index
    %184 = vector.load %arg7[%c0_64, %c0_65] : memref<8x128xf32, #tpu.memory_space<vmem>>, vector<8x16xf32>
    tpu.vector_store %arg7[%c0_64, %c0_65], %183 {strides = array<i32>} : memref<8x128xf32, #tpu.memory_space<vmem>>, vector<8x16xf32>,
    %185 = tpu.concatenate %53, %78, %103, %128, %153, %178 in 1 : vector<8x32xf32>, vector<8x32xf32>, vector<8x32xf32>, vector<8x32xf32>, vector<8x32xf32>, vector<8x32xf32> -> vector<8x192xf32>
    %c0_66 = arith.constant 0 : index
    %c0_67 = arith.constant 0 : index
    %186 = vector.load %arg4[%c0_66, %c0_67] : memref<192x768xf32, #tpu.memory_space<vmem>>, vector<192x768xf32>
    %cst_68 = arith.constant dense<0.000000e+00> : vector<8x768xf32>
    %187 = tpu.matmul %185, %186, %cst_68 {dimension_numbers = #tpu.dot_dimension_numbers<[1], [0], [0], [1], [0, 0, 1, 1], [], []>} : vector<8x192xf32>, vector<192x768xf32>, vector<8x768xf32> -> vector<8x768xf32>
    %c0_69 = arith.constant 0 : index
    %c0_70 = arith.constant 0 : index
    %188 = vector.load %arg5[%c0_69, %c0_70] : memref<1x768xf32, #tpu.memory_space<vmem>>, vector<1x768xf32>
    %189 = vector.broadcast %188 : vector<1x768xf32> to vector<8x768xf32>
    %190 = arith.addf %187, %189 : vector<8x768xf32>
    %c8 = arith.constant 8 : index
    %c0_71 = arith.constant 0 : index
    %191 = vector.load %arg8[%c8, %c0_71] : memref<64x128xf32, #tpu.memory_space<vmem>>, vector<8x128xf32>
    %192 = vector.extract_strided_slice %190 {offsets = [0, 0], sizes = [8, 128], strides = [1, 1]} : vector<8x768xf32> to vector<8x128xf32>
    %193 = arith.addf %191, %192 : vector<8x128xf32>
    %194 = vector.broadcast %12 : vector<1x128xf32> to vector<8x128xf32>
    %195 = arith.mulf %193, %194 : vector<8x128xf32>
    %196 = arith.negf %195 : vector<8x128xf32>
    %197 = math.exp %196 : vector<8x128xf32>
    %cst_72 = arith.constant 1.000000e+00 : f32
    %198 = vector.broadcast %cst_72 : f32 to vector<8x128xf32>
    %199 = arith.addf %198, %197 : vector<8x128xf32>
    %200 = arith.divf %198, %199 : vector<8x128xf32>
    %201 = vector.extract_strided_slice %200 {offsets = [0, 0], sizes = [8, 32], strides = [1, 1]} : vector<8x128xf32> to vector<8x32xf32>
    %202 = vector.extract_strided_slice %200 {offsets = [0, 32], sizes = [8, 32], strides = [1, 1]} : vector<8x128xf32> to vector<8x32xf32>
    %203 = vector.extract_strided_slice %200 {offsets = [0, 64], sizes = [8, 32], strides = [1, 1]} : vector<8x128xf32> to vector<8x32xf32>
    %cst_73 = arith.constant 2.000000e+00 : f32
    %204 = vector.broadcast %cst_73 : f32 to vector<8x32xf32>
    %205 = arith.mulf %204, %203 : vector<8x32xf32>
    %cst_74 = arith.constant 1.000000e+00 : f32
    %206 = vector.broadcast %cst_74 : f32 to vector<8x32xf32>
    %207 = arith.subf %205, %206 : vector<8x32xf32>
    %208 = vector.extract_strided_slice %200 {offsets = [0, 96], sizes = [8, 32], strides = [1, 1]} : vector<8x128xf32> to vector<8x32xf32>
    %209 = arith.mulf %202, %51 : vector<8x32xf32>
    %210 = arith.mulf %201, %207 : vector<8x32xf32>
    %211 = arith.addf %209, %210 : vector<8x32xf32>
    %212 = math.tanh %211 : vector<8x32xf32>
    %213 = arith.mulf %208, %212 : vector<8x32xf32>
    %c0_75 = arith.constant 0 : index
    %c0_76 = arith.constant 0 : index
    %c0_77 = arith.constant 0 : index
    %214 = vector.load %arg3[%c0_75, %c0_76, %c0_77] : memref<5x32x128xf32, #tpu.memory_space<vmem>>, vector<1x32x128xf32>
    %215 = vector.shape_cast %214 : vector<1x32x128xf32> to vector<32x128xf32>
    %cst_78 = arith.constant dense<0.000000e+00> : vector<8x128xf32>
    %216 = tpu.matmul %213, %215, %cst_78 {dimension_numbers = #tpu.dot_dimension_numbers<[1], [0], [0], [1], [0, 0, 1, 1], [], []>} : vector<8x32xf32>, vector<32x128xf32>, vector<8x128xf32> -> vector<8x128xf32>
    %217 = vector.extract_strided_slice %190 {offsets = [0, 128], sizes = [8, 128], strides = [1, 1]} : vector<8x768xf32> to vector<8x128xf32>
    %218 = arith.addf %216, %217 : vector<8x128xf32>
    %219 = vector.broadcast %12 : vector<1x128xf32> to vector<8x128xf32>
    %220 = arith.mulf %218, %219 : vector<8x128xf32>
    %221 = arith.negf %220 : vector<8x128xf32>
    %222 = math.exp %221 : vector<8x128xf32>
    %cst_79 = arith.constant 1.000000e+00 : f32
    %223 = vector.broadcast %cst_79 : f32 to vector<8x128xf32>
    %224 = arith.addf %223, %222 : vector<8x128xf32>
    %225 = arith.divf %223, %224 : vector<8x128xf32>
    %226 = vector.extract_strided_slice %225 {offsets = [0, 0], sizes = [8, 32], strides = [1, 1]} : vector<8x128xf32> to vector<8x32xf32>
    %227 = vector.extract_strided_slice %225 {offsets = [0, 32], sizes = [8, 32], strides = [1, 1]} : vector<8x128xf32> to vector<8x32xf32>
    %228 = vector.extract_strided_slice %225 {offsets = [0, 64], sizes = [8, 32], strides = [1, 1]} : vector<8x128xf32> to vector<8x32xf32>
    %cst_80 = arith.constant 2.000000e+00 : f32
    %229 = vector.broadcast %cst_80 : f32 to vector<8x32xf32>
    %230 = arith.mulf %229, %228 : vector<8x32xf32>
    %cst_81 = arith.constant 1.000000e+00 : f32
    %231 = vector.broadcast %cst_81 : f32 to vector<8x32xf32>
    %232 = arith.subf %230, %231 : vector<8x32xf32>
    %233 = vector.extract_strided_slice %225 {offsets = [0, 96], sizes = [8, 32], strides = [1, 1]} : vector<8x128xf32> to vector<8x32xf32>
    %234 = arith.mulf %227, %76 : vector<8x32xf32>
    %235 = arith.mulf %226, %232 : vector<8x32xf32>
    %236 = arith.addf %234, %235 : vector<8x32xf32>
    %237 = math.tanh %236 : vector<8x32xf32>
    %238 = arith.mulf %233, %237 : vector<8x32xf32>
    %c1_82 = arith.constant 1 : index
    %c0_83 = arith.constant 0 : index
    %c0_84 = arith.constant 0 : index
    %239 = vector.load %arg3[%c1_82, %c0_83, %c0_84] : memref<5x32x128xf32, #tpu.memory_space<vmem>>, vector<1x32x128xf32>
    %240 = vector.shape_cast %239 : vector<1x32x128xf32> to vector<32x128xf32>
    %cst_85 = arith.constant dense<0.000000e+00> : vector<8x128xf32>
    %241 = tpu.matmul %238, %240, %cst_85 {dimension_numbers = #tpu.dot_dimension_numbers<[1], [0], [0], [1], [0, 0, 1, 1], [], []>} : vector<8x32xf32>, vector<32x128xf32>, vector<8x128xf32> -> vector<8x128xf32>
    %242 = vector.extract_strided_slice %190 {offsets = [0, 256], sizes = [8, 128], strides = [1, 1]} : vector<8x768xf32> to vector<8x128xf32>
    %243 = arith.addf %241, %242 : vector<8x128xf32>
    %244 = vector.broadcast %12 : vector<1x128xf32> to vector<8x128xf32>
    %245 = arith.mulf %243, %244 : vector<8x128xf32>
    %246 = arith.negf %245 : vector<8x128xf32>
    %247 = math.exp %246 : vector<8x128xf32>
    %cst_86 = arith.constant 1.000000e+00 : f32
    %248 = vector.broadcast %cst_86 : f32 to vector<8x128xf32>
    %249 = arith.addf %248, %247 : vector<8x128xf32>
    %250 = arith.divf %248, %249 : vector<8x128xf32>
    %251 = vector.extract_strided_slice %250 {offsets = [0, 0], sizes = [8, 32], strides = [1, 1]} : vector<8x128xf32> to vector<8x32xf32>
    %252 = vector.extract_strided_slice %250 {offsets = [0, 32], sizes = [8, 32], strides = [1, 1]} : vector<8x128xf32> to vector<8x32xf32>
    %253 = vector.extract_strided_slice %250 {offsets = [0, 64], sizes = [8, 32], strides = [1, 1]} : vector<8x128xf32> to vector<8x32xf32>
    %cst_87 = arith.constant 2.000000e+00 : f32
    %254 = vector.broadcast %cst_87 : f32 to vector<8x32xf32>
    %255 = arith.mulf %254, %253 : vector<8x32xf32>
    %cst_88 = arith.constant 1.000000e+00 : f32
    %256 = vector.broadcast %cst_88 : f32 to vector<8x32xf32>
    %257 = arith.subf %255, %256 : vector<8x32xf32>
    %258 = vector.extract_strided_slice %250 {offsets = [0, 96], sizes = [8, 32], strides = [1, 1]} : vector<8x128xf32> to vector<8x32xf32>
    %259 = arith.mulf %252, %101 : vector<8x32xf32>
    %260 = arith.mulf %251, %257 : vector<8x32xf32>
    %261 = arith.addf %259, %260 : vector<8x32xf32>
    %262 = math.tanh %261 : vector<8x32xf32>
    %263 = arith.mulf %258, %262 : vector<8x32xf32>
    %c2_89 = arith.constant 2 : index
    %c0_90 = arith.constant 0 : index
    %c0_91 = arith.constant 0 : index
    %264 = vector.load %arg3[%c2_89, %c0_90, %c0_91] : memref<5x32x128xf32, #tpu.memory_space<vmem>>, vector<1x32x128xf32>
    %265 = vector.shape_cast %264 : vector<1x32x128xf32> to vector<32x128xf32>
    %cst_92 = arith.constant dense<0.000000e+00> : vector<8x128xf32>
    %266 = tpu.matmul %263, %265, %cst_92 {dimension_numbers = #tpu.dot_dimension_numbers<[1], [0], [0], [1], [0, 0, 1, 1], [], []>} : vector<8x32xf32>, vector<32x128xf32>, vector<8x128xf32> -> vector<8x128xf32>
    %267 = vector.extract_strided_slice %190 {offsets = [0, 384], sizes = [8, 128], strides = [1, 1]} : vector<8x768xf32> to vector<8x128xf32>
    %268 = arith.addf %266, %267 : vector<8x128xf32>
    %269 = vector.broadcast %12 : vector<1x128xf32> to vector<8x128xf32>
    %270 = arith.mulf %268, %269 : vector<8x128xf32>
    %271 = arith.negf %270 : vector<8x128xf32>
    %272 = math.exp %271 : vector<8x128xf32>
    %cst_93 = arith.constant 1.000000e+00 : f32
    %273 = vector.broadcast %cst_93 : f32 to vector<8x128xf32>
    %274 = arith.addf %273, %272 : vector<8x128xf32>
    %275 = arith.divf %273, %274 : vector<8x128xf32>
    %276 = vector.extract_strided_slice %275 {offsets = [0, 0], sizes = [8, 32], strides = [1, 1]} : vector<8x128xf32> to vector<8x32xf32>
    %277 = vector.extract_strided_slice %275 {offsets = [0, 32], sizes = [8, 32], strides = [1, 1]} : vector<8x128xf32> to vector<8x32xf32>
    %278 = vector.extract_strided_slice %275 {offsets = [0, 64], sizes = [8, 32], strides = [1, 1]} : vector<8x128xf32> to vector<8x32xf32>
    %cst_94 = arith.constant 2.000000e+00 : f32
    %279 = vector.broadcast %cst_94 : f32 to vector<8x32xf32>
    %280 = arith.mulf %279, %278 : vector<8x32xf32>
    %cst_95 = arith.constant 1.000000e+00 : f32
    %281 = vector.broadcast %cst_95 : f32 to vector<8x32xf32>
    %282 = arith.subf %280, %281 : vector<8x32xf32>
    %283 = vector.extract_strided_slice %275 {offsets = [0, 96], sizes = [8, 32], strides = [1, 1]} : vector<8x128xf32> to vector<8x32xf32>
    %284 = arith.mulf %277, %126 : vector<8x32xf32>
    %285 = arith.mulf %276, %282 : vector<8x32xf32>
    %286 = arith.addf %284, %285 : vector<8x32xf32>
    %287 = math.tanh %286 : vector<8x32xf32>
    %288 = arith.mulf %283, %287 : vector<8x32xf32>
    %c3_96 = arith.constant 3 : index
    %c0_97 = arith.constant 0 : index
    %c0_98 = arith.constant 0 : index
    %289 = vector.load %arg3[%c3_96, %c0_97, %c0_98] : memref<5x32x128xf32, #tpu.memory_space<vmem>>, vector<1x32x128xf32>
    %290 = vector.shape_cast %289 : vector<1x32x128xf32> to vector<32x128xf32>
    %cst_99 = arith.constant dense<0.000000e+00> : vector<8x128xf32>
    %291 = tpu.matmul %288, %290, %cst_99 {dimension_numbers = #tpu.dot_dimension_numbers<[1], [0], [0], [1], [0, 0, 1, 1], [], []>} : vector<8x32xf32>, vector<32x128xf32>, vector<8x128xf32> -> vector<8x128xf32>
    %292 = vector.extract_strided_slice %190 {offsets = [0, 512], sizes = [8, 128], strides = [1, 1]} : vector<8x768xf32> to vector<8x128xf32>
    %293 = arith.addf %291, %292 : vector<8x128xf32>
    %294 = vector.broadcast %12 : vector<1x128xf32> to vector<8x128xf32>
    %295 = arith.mulf %293, %294 : vector<8x128xf32>
    %296 = arith.negf %295 : vector<8x128xf32>
    %297 = math.exp %296 : vector<8x128xf32>
    %cst_100 = arith.constant 1.000000e+00 : f32
    %298 = vector.broadcast %cst_100 : f32 to vector<8x128xf32>
    %299 = arith.addf %298, %297 : vector<8x128xf32>
    %300 = arith.divf %298, %299 : vector<8x128xf32>
    %301 = vector.extract_strided_slice %300 {offsets = [0, 0], sizes = [8, 32], strides = [1, 1]} : vector<8x128xf32> to vector<8x32xf32>
    %302 = vector.extract_strided_slice %300 {offsets = [0, 32], sizes = [8, 32], strides = [1, 1]} : vector<8x128xf32> to vector<8x32xf32>
    %303 = vector.extract_strided_slice %300 {offsets = [0, 64], sizes = [8, 32], strides = [1, 1]} : vector<8x128xf32> to vector<8x32xf32>
    %cst_101 = arith.constant 2.000000e+00 : f32
    %304 = vector.broadcast %cst_101 : f32 to vector<8x32xf32>
    %305 = arith.mulf %304, %303 : vector<8x32xf32>
    %cst_102 = arith.constant 1.000000e+00 : f32
    %306 = vector.broadcast %cst_102 : f32 to vector<8x32xf32>
    %307 = arith.subf %305, %306 : vector<8x32xf32>
    %308 = vector.extract_strided_slice %300 {offsets = [0, 96], sizes = [8, 32], strides = [1, 1]} : vector<8x128xf32> to vector<8x32xf32>
    %309 = arith.mulf %302, %151 : vector<8x32xf32>
    %310 = arith.mulf %301, %307 : vector<8x32xf32>
    %311 = arith.addf %309, %310 : vector<8x32xf32>
    %312 = math.tanh %311 : vector<8x32xf32>
    %313 = arith.mulf %308, %312 : vector<8x32xf32>
    %c4_103 = arith.constant 4 : index
    %c0_104 = arith.constant 0 : index
    %c0_105 = arith.constant 0 : index
    %314 = vector.load %arg3[%c4_103, %c0_104, %c0_105] : memref<5x32x128xf32, #tpu.memory_space<vmem>>, vector<1x32x128xf32>
    %315 = vector.shape_cast %314 : vector<1x32x128xf32> to vector<32x128xf32>
    %cst_106 = arith.constant dense<0.000000e+00> : vector<8x128xf32>
    %316 = tpu.matmul %313, %315, %cst_106 {dimension_numbers = #tpu.dot_dimension_numbers<[1], [0], [0], [1], [0, 0, 1, 1], [], []>} : vector<8x32xf32>, vector<32x128xf32>, vector<8x128xf32> -> vector<8x128xf32>
    %317 = vector.extract_strided_slice %190 {offsets = [0, 640], sizes = [8, 128], strides = [1, 1]} : vector<8x768xf32> to vector<8x128xf32>
    %318 = arith.addf %316, %317 : vector<8x128xf32>
    %319 = vector.broadcast %12 : vector<1x128xf32> to vector<8x128xf32>
    %320 = arith.mulf %318, %319 : vector<8x128xf32>
    %321 = arith.negf %320 : vector<8x128xf32>
    %322 = math.exp %321 : vector<8x128xf32>
    %cst_107 = arith.constant 1.000000e+00 : f32
    %323 = vector.broadcast %cst_107 : f32 to vector<8x128xf32>
    %324 = arith.addf %323, %322 : vector<8x128xf32>
    %325 = arith.divf %323, %324 : vector<8x128xf32>
    %326 = vector.extract_strided_slice %325 {offsets = [0, 0], sizes = [8, 32], strides = [1, 1]} : vector<8x128xf32> to vector<8x32xf32>
    %327 = vector.extract_strided_slice %325 {offsets = [0, 32], sizes = [8, 32], strides = [1, 1]} : vector<8x128xf32> to vector<8x32xf32>
    %328 = vector.extract_strided_slice %325 {offsets = [0, 64], sizes = [8, 32], strides = [1, 1]} : vector<8x128xf32> to vector<8x32xf32>
    %cst_108 = arith.constant 2.000000e+00 : f32
    %329 = vector.broadcast %cst_108 : f32 to vector<8x32xf32>
    %330 = arith.mulf %329, %328 : vector<8x32xf32>
    %cst_109 = arith.constant 1.000000e+00 : f32
    %331 = vector.broadcast %cst_109 : f32 to vector<8x32xf32>
    %332 = arith.subf %330, %331 : vector<8x32xf32>
    %333 = vector.extract_strided_slice %325 {offsets = [0, 96], sizes = [8, 32], strides = [1, 1]} : vector<8x128xf32> to vector<8x32xf32>
    %334 = arith.mulf %327, %176 : vector<8x32xf32>
    %335 = arith.mulf %326, %332 : vector<8x32xf32>
    %336 = arith.addf %334, %335 : vector<8x32xf32>
    %337 = math.tanh %336 : vector<8x32xf32>
    %338 = arith.mulf %333, %337 : vector<8x32xf32>
    %c0_110 = arith.constant 0 : index
    %c0_111 = arith.constant 0 : index
    %339 = vector.load %arg6[%c0_110, %c0_111] : memref<40x16xf32, #tpu.memory_space<vmem>>, vector<32x16xf32>
    %c32_112 = arith.constant 32 : index
    %c0_113 = arith.constant 0 : index
    %340 = vector.load %arg6[%c32_112, %c0_113] : memref<40x16xf32, #tpu.memory_space<vmem>>, vector<1x16xf32>
    %cst_114 = arith.constant dense<0.000000e+00> : vector<8x16xf32>
    %341 = tpu.matmul %338, %339, %cst_114 {dimension_numbers = #tpu.dot_dimension_numbers<[1], [0], [0], [1], [0, 0, 1, 1], [], []>} : vector<8x32xf32>, vector<32x16xf32>, vector<8x16xf32> -> vector<8x16xf32>
    %342 = vector.broadcast %340 : vector<1x16xf32> to vector<8x16xf32>
    %343 = arith.addf %341, %342 : vector<8x16xf32>
    %c0_115 = arith.constant 0 : index
    %c16 = arith.constant 16 : index
    %344 = vector.load %arg7[%c0_115, %c16] : memref<8x128xf32, #tpu.memory_space<vmem>>, vector<8x16xf32>
    tpu.vector_store %arg7[%c0_115, %c16], %343 {strides = array<i32>} : memref<8x128xf32, #tpu.memory_space<vmem>>, vector<8x16xf32>,
    %345 = tpu.concatenate %213, %238, %263, %288, %313, %338 in 1 : vector<8x32xf32>, vector<8x32xf32>, vector<8x32xf32>, vector<8x32xf32>, vector<8x32xf32>, vector<8x32xf32> -> vector<8x192xf32>
    %c0_116 = arith.constant 0 : index
    %c0_117 = arith.constant 0 : index
    %346 = vector.load %arg4[%c0_116, %c0_117] : memref<192x768xf32, #tpu.memory_space<vmem>>, vector<192x768xf32>
    %cst_118 = arith.constant dense<0.000000e+00> : vector<8x768xf32>
    %347 = tpu.matmul %345, %346, %cst_118 {dimension_numbers = #tpu.dot_dimension_numbers<[1], [0], [0], [1], [0, 0, 1, 1], [], []>} : vector<8x192xf32>, vector<192x768xf32>, vector<8x768xf32> -> vector<8x768xf32>
    %c0_119 = arith.constant 0 : index
    %c0_120 = arith.constant 0 : index
    %348 = vector.load %arg5[%c0_119, %c0_120] : memref<1x768xf32, #tpu.memory_space<vmem>>, vector<1x768xf32>
    %349 = vector.broadcast %348 : vector<1x768xf32> to vector<8x768xf32>
    %350 = arith.addf %347, %349 : vector<8x768xf32>
    %c16_121 = arith.constant 16 : index
    %c0_122 = arith.constant 0 : index
    %351 = vector.load %arg8[%c16_121, %c0_122] : memref<64x128xf32, #tpu.memory_space<vmem>>, vector<8x128xf32>
    %352 = vector.extract_strided_slice %350 {offsets = [0, 0], sizes = [8, 128], strides = [1, 1]} : vector<8x768xf32> to vector<8x128xf32>
    %353 = arith.addf %351, %352 : vector<8x128xf32>
    %354 = vector.broadcast %12 : vector<1x128xf32> to vector<8x128xf32>
    %355 = arith.mulf %353, %354 : vector<8x128xf32>
    %356 = arith.negf %355 : vector<8x128xf32>
    %357 = math.exp %356 : vector<8x128xf32>
    %cst_123 = arith.constant 1.000000e+00 : f32
    %358 = vector.broadcast %cst_123 : f32 to vector<8x128xf32>
    %359 = arith.addf %358, %357 : vector<8x128xf32>
    %360 = arith.divf %358, %359 : vector<8x128xf32>
    %361 = vector.extract_strided_slice %360 {offsets = [0, 0], sizes = [8, 32], strides = [1, 1]} : vector<8x128xf32> to vector<8x32xf32>
    %362 = vector.extract_strided_slice %360 {offsets = [0, 32], sizes = [8, 32], strides = [1, 1]} : vector<8x128xf32> to vector<8x32xf32>
    %363 = vector.extract_strided_slice %360 {offsets = [0, 64], sizes = [8, 32], strides = [1, 1]} : vector<8x128xf32> to vector<8x32xf32>
    %cst_124 = arith.constant 2.000000e+00 : f32
    %364 = vector.broadcast %cst_124 : f32 to vector<8x32xf32>
    %365 = arith.mulf %364, %363 : vector<8x32xf32>
    %cst_125 = arith.constant 1.000000e+00 : f32
    %366 = vector.broadcast %cst_125 : f32 to vector<8x32xf32>
    %367 = arith.subf %365, %366 : vector<8x32xf32>
    %368 = vector.extract_strided_slice %360 {offsets = [0, 96], sizes = [8, 32], strides = [1, 1]} : vector<8x128xf32> to vector<8x32xf32>
    %369 = arith.mulf %362, %211 : vector<8x32xf32>
    %370 = arith.mulf %361, %367 : vector<8x32xf32>
    %371 = arith.addf %369, %370 : vector<8x32xf32>
    %372 = math.tanh %371 : vector<8x32xf32>
    %373 = arith.mulf %368, %372 : vector<8x32xf32>
    %c0_126 = arith.constant 0 : index
    %c0_127 = arith.constant 0 : index
    %c0_128 = arith.constant 0 : index
    %374 = vector.load %arg3[%c0_126, %c0_127, %c0_128] : memref<5x32x128xf32, #tpu.memory_space<vmem>>, vector<1x32x128xf32>
    %375 = vector.shape_cast %374 : vector<1x32x128xf32> to vector<32x128xf32>
    %cst_129 = arith.constant dense<0.000000e+00> : vector<8x128xf32>
    %376 = tpu.matmul %373, %375, %cst_129 {dimension_numbers = #tpu.dot_dimension_numbers<[1], [0], [0], [1], [0, 0, 1, 1], [], []>} : vector<8x32xf32>, vector<32x128xf32>, vector<8x128xf32> -> vector<8x128xf32>
    %377 = vector.extract_strided_slice %350 {offsets = [0, 128], sizes = [8, 128], strides = [1, 1]} : vector<8x768xf32> to vector<8x128xf32>
    %378 = arith.addf %376, %377 : vector<8x128xf32>
    %379 = vector.broadcast %12 : vector<1x128xf32> to vector<8x128xf32>
    %380 = arith.mulf %378, %379 : vector<8x128xf32>
    %381 = arith.negf %380 : vector<8x128xf32>
    %382 = math.exp %381 : vector<8x128xf32>
    %cst_130 = arith.constant 1.000000e+00 : f32
    %383 = vector.broadcast %cst_130 : f32 to vector<8x128xf32>
    %384 = arith.addf %383, %382 : vector<8x128xf32>
    %385 = arith.divf %383, %384 : vector<8x128xf32>
    %386 = vector.extract_strided_slice %385 {offsets = [0, 0], sizes = [8, 32], strides = [1, 1]} : vector<8x128xf32> to vector<8x32xf32>
    %387 = vector.extract_strided_slice %385 {offsets = [0, 32], sizes = [8, 32], strides = [1, 1]} : vector<8x128xf32> to vector<8x32xf32>
    %388 = vector.extract_strided_slice %385 {offsets = [0, 64], sizes = [8, 32], strides = [1, 1]} : vector<8x128xf32> to vector<8x32xf32>
    %cst_131 = arith.constant 2.000000e+00 : f32
    %389 = vector.broadcast %cst_131 : f32 to vector<8x32xf32>
    %390 = arith.mulf %389, %388 : vector<8x32xf32>
    %cst_132 = arith.constant 1.000000e+00 : f32
    %391 = vector.broadcast %cst_132 : f32 to vector<8x32xf32>
    %392 = arith.subf %390, %391 : vector<8x32xf32>
    %393 = vector.extract_strided_slice %385 {offsets = [0, 96], sizes = [8, 32], strides = [1, 1]} : vector<8x128xf32> to vector<8x32xf32>
    %394 = arith.mulf %387, %236 : vector<8x32xf32>
    %395 = arith.mulf %386, %392 : vector<8x32xf32>
    %396 = arith.addf %394, %395 : vector<8x32xf32>
    %397 = math.tanh %396 : vector<8x32xf32>
    %398 = arith.mulf %393, %397 : vector<8x32xf32>
    %c1_133 = arith.constant 1 : index
    %c0_134 = arith.constant 0 : index
    %c0_135 = arith.constant 0 : index
    %399 = vector.load %arg3[%c1_133, %c0_134, %c0_135] : memref<5x32x128xf32, #tpu.memory_space<vmem>>, vector<1x32x128xf32>
    %400 = vector.shape_cast %399 : vector<1x32x128xf32> to vector<32x128xf32>
    %cst_136 = arith.constant dense<0.000000e+00> : vector<8x128xf32>
    %401 = tpu.matmul %398, %400, %cst_136 {dimension_numbers = #tpu.dot_dimension_numbers<[1], [0], [0], [1], [0, 0, 1, 1], [], []>} : vector<8x32xf32>, vector<32x128xf32>, vector<8x128xf32> -> vector<8x128xf32>
    %402 = vector.extract_strided_slice %350 {offsets = [0, 256], sizes = [8, 128], strides = [1, 1]} : vector<8x768xf32> to vector<8x128xf32>
    %403 = arith.addf %401, %402 : vector<8x128xf32>
    %404 = vector.broadcast %12 : vector<1x128xf32> to vector<8x128xf32>
    %405 = arith.mulf %403, %404 : vector<8x128xf32>
    %406 = arith.negf %405 : vector<8x128xf32>
    %407 = math.exp %406 : vector<8x128xf32>
    %cst_137 = arith.constant 1.000000e+00 : f32
    %408 = vector.broadcast %cst_137 : f32 to vector<8x128xf32>
    %409 = arith.addf %408, %407 : vector<8x128xf32>
    %410 = arith.divf %408, %409 : vector<8x128xf32>
    %411 = vector.extract_strided_slice %410 {offsets = [0, 0], sizes = [8, 32], strides = [1, 1]} : vector<8x128xf32> to vector<8x32xf32>
    %412 = vector.extract_strided_slice %410 {offsets = [0, 32], sizes = [8, 32], strides = [1, 1]} : vector<8x128xf32> to vector<8x32xf32>
    %413 = vector.extract_strided_slice %410 {offsets = [0, 64], sizes = [8, 32], strides = [1, 1]} : vector<8x128xf32> to vector<8x32xf32>
    %cst_138 = arith.constant 2.000000e+00 : f32
    %414 = vector.broadcast %cst_138 : f32 to vector<8x32xf32>
    %415 = arith.mulf %414, %413 : vector<8x32xf32>
    %cst_139 = arith.constant 1.000000e+00 : f32
    %416 = vector.broadcast %cst_139 : f32 to vector<8x32xf32>
    %417 = arith.subf %415, %416 : vector<8x32xf32>
    %418 = vector.extract_strided_slice %410 {offsets = [0, 96], sizes = [8, 32], strides = [1, 1]} : vector<8x128xf32> to vector<8x32xf32>
    %419 = arith.mulf %412, %261 : vector<8x32xf32>
    %420 = arith.mulf %411, %417 : vector<8x32xf32>
    %421 = arith.addf %419, %420 : vector<8x32xf32>
    %422 = math.tanh %421 : vector<8x32xf32>
    %423 = arith.mulf %418, %422 : vector<8x32xf32>
    %c2_140 = arith.constant 2 : index
    %c0_141 = arith.constant 0 : index
    %c0_142 = arith.constant 0 : index
    %424 = vector.load %arg3[%c2_140, %c0_141, %c0_142] : memref<5x32x128xf32, #tpu.memory_space<vmem>>, vector<1x32x128xf32>
    %425 = vector.shape_cast %424 : vector<1x32x128xf32> to vector<32x128xf32>
    %cst_143 = arith.constant dense<0.000000e+00> : vector<8x128xf32>
    %426 = tpu.matmul %423, %425, %cst_143 {dimension_numbers = #tpu.dot_dimension_numbers<[1], [0], [0], [1], [0, 0, 1, 1], [], []>} : vector<8x32xf32>, vector<32x128xf32>, vector<8x128xf32> -> vector<8x128xf32>
    %427 = vector.extract_strided_slice %350 {offsets = [0, 384], sizes = [8, 128], strides = [1, 1]} : vector<8x768xf32> to vector<8x128xf32>
    %428 = arith.addf %426, %427 : vector<8x128xf32>
    %429 = vector.broadcast %12 : vector<1x128xf32> to vector<8x128xf32>
    %430 = arith.mulf %428, %429 : vector<8x128xf32>
    %431 = arith.negf %430 : vector<8x128xf32>
    %432 = math.exp %431 : vector<8x128xf32>
    %cst_144 = arith.constant 1.000000e+00 : f32
    %433 = vector.broadcast %cst_144 : f32 to vector<8x128xf32>
    %434 = arith.addf %433, %432 : vector<8x128xf32>
    %435 = arith.divf %433, %434 : vector<8x128xf32>
    %436 = vector.extract_strided_slice %435 {offsets = [0, 0], sizes = [8, 32], strides = [1, 1]} : vector<8x128xf32> to vector<8x32xf32>
    %437 = vector.extract_strided_slice %435 {offsets = [0, 32], sizes = [8, 32], strides = [1, 1]} : vector<8x128xf32> to vector<8x32xf32>
    %438 = vector.extract_strided_slice %435 {offsets = [0, 64], sizes = [8, 32], strides = [1, 1]} : vector<8x128xf32> to vector<8x32xf32>
    %cst_145 = arith.constant 2.000000e+00 : f32
    %439 = vector.broadcast %cst_145 : f32 to vector<8x32xf32>
    %440 = arith.mulf %439, %438 : vector<8x32xf32>
    %cst_146 = arith.constant 1.000000e+00 : f32
    %441 = vector.broadcast %cst_146 : f32 to vector<8x32xf32>
    %442 = arith.subf %440, %441 : vector<8x32xf32>
    %443 = vector.extract_strided_slice %435 {offsets = [0, 96], sizes = [8, 32], strides = [1, 1]} : vector<8x128xf32> to vector<8x32xf32>
    %444 = arith.mulf %437, %286 : vector<8x32xf32>
    %445 = arith.mulf %436, %442 : vector<8x32xf32>
    %446 = arith.addf %444, %445 : vector<8x32xf32>
    %447 = math.tanh %446 : vector<8x32xf32>
    %448 = arith.mulf %443, %447 : vector<8x32xf32>
    %c3_147 = arith.constant 3 : index
    %c0_148 = arith.constant 0 : index
    %c0_149 = arith.constant 0 : index
    %449 = vector.load %arg3[%c3_147, %c0_148, %c0_149] : memref<5x32x128xf32, #tpu.memory_space<vmem>>, vector<1x32x128xf32>
    %450 = vector.shape_cast %449 : vector<1x32x128xf32> to vector<32x128xf32>
    %cst_150 = arith.constant dense<0.000000e+00> : vector<8x128xf32>
    %451 = tpu.matmul %448, %450, %cst_150 {dimension_numbers = #tpu.dot_dimension_numbers<[1], [0], [0], [1], [0, 0, 1, 1], [], []>} : vector<8x32xf32>, vector<32x128xf32>, vector<8x128xf32> -> vector<8x128xf32>
    %452 = vector.extract_strided_slice %350 {offsets = [0, 512], sizes = [8, 128], strides = [1, 1]} : vector<8x768xf32> to vector<8x128xf32>
    %453 = arith.addf %451, %452 : vector<8x128xf32>
    %454 = vector.broadcast %12 : vector<1x128xf32> to vector<8x128xf32>
    %455 = arith.mulf %453, %454 : vector<8x128xf32>
    %456 = arith.negf %455 : vector<8x128xf32>
    %457 = math.exp %456 : vector<8x128xf32>
    %cst_151 = arith.constant 1.000000e+00 : f32
    %458 = vector.broadcast %cst_151 : f32 to vector<8x128xf32>
    %459 = arith.addf %458, %457 : vector<8x128xf32>
    %460 = arith.divf %458, %459 : vector<8x128xf32>
    %461 = vector.extract_strided_slice %460 {offsets = [0, 0], sizes = [8, 32], strides = [1, 1]} : vector<8x128xf32> to vector<8x32xf32>
    %462 = vector.extract_strided_slice %460 {offsets = [0, 32], sizes = [8, 32], strides = [1, 1]} : vector<8x128xf32> to vector<8x32xf32>
    %463 = vector.extract_strided_slice %460 {offsets = [0, 64], sizes = [8, 32], strides = [1, 1]} : vector<8x128xf32> to vector<8x32xf32>
    %cst_152 = arith.constant 2.000000e+00 : f32
    %464 = vector.broadcast %cst_152 : f32 to vector<8x32xf32>
    %465 = arith.mulf %464, %463 : vector<8x32xf32>
    %cst_153 = arith.constant 1.000000e+00 : f32
    %466 = vector.broadcast %cst_153 : f32 to vector<8x32xf32>
    %467 = arith.subf %465, %466 : vector<8x32xf32>
    %468 = vector.extract_strided_slice %460 {offsets = [0, 96], sizes = [8, 32], strides = [1, 1]} : vector<8x128xf32> to vector<8x32xf32>
    %469 = arith.mulf %462, %311 : vector<8x32xf32>
    %470 = arith.mulf %461, %467 : vector<8x32xf32>
    %471 = arith.addf %469, %470 : vector<8x32xf32>
    %472 = math.tanh %471 : vector<8x32xf32>
    %473 = arith.mulf %468, %472 : vector<8x32xf32>
    %c4_154 = arith.constant 4 : index
    %c0_155 = arith.constant 0 : index
    %c0_156 = arith.constant 0 : index
    %474 = vector.load %arg3[%c4_154, %c0_155, %c0_156] : memref<5x32x128xf32, #tpu.memory_space<vmem>>, vector<1x32x128xf32>
    %475 = vector.shape_cast %474 : vector<1x32x128xf32> to vector<32x128xf32>
    %cst_157 = arith.constant dense<0.000000e+00> : vector<8x128xf32>
    %476 = tpu.matmul %473, %475, %cst_157 {dimension_numbers = #tpu.dot_dimension_numbers<[1], [0], [0], [1], [0, 0, 1, 1], [], []>} : vector<8x32xf32>, vector<32x128xf32>, vector<8x128xf32> -> vector<8x128xf32>
    %477 = vector.extract_strided_slice %350 {offsets = [0, 640], sizes = [8, 128], strides = [1, 1]} : vector<8x768xf32> to vector<8x128xf32>
    %478 = arith.addf %476, %477 : vector<8x128xf32>
    %479 = vector.broadcast %12 : vector<1x128xf32> to vector<8x128xf32>
    %480 = arith.mulf %478, %479 : vector<8x128xf32>
    %481 = arith.negf %480 : vector<8x128xf32>
    %482 = math.exp %481 : vector<8x128xf32>
    %cst_158 = arith.constant 1.000000e+00 : f32
    %483 = vector.broadcast %cst_158 : f32 to vector<8x128xf32>
    %484 = arith.addf %483, %482 : vector<8x128xf32>
    %485 = arith.divf %483, %484 : vector<8x128xf32>
    %486 = vector.extract_strided_slice %485 {offsets = [0, 0], sizes = [8, 32], strides = [1, 1]} : vector<8x128xf32> to vector<8x32xf32>
    %487 = vector.extract_strided_slice %485 {offsets = [0, 32], sizes = [8, 32], strides = [1, 1]} : vector<8x128xf32> to vector<8x32xf32>
    %488 = vector.extract_strided_slice %485 {offsets = [0, 64], sizes = [8, 32], strides = [1, 1]} : vector<8x128xf32> to vector<8x32xf32>
    %cst_159 = arith.constant 2.000000e+00 : f32
    %489 = vector.broadcast %cst_159 : f32 to vector<8x32xf32>
    %490 = arith.mulf %489, %488 : vector<8x32xf32>
    %cst_160 = arith.constant 1.000000e+00 : f32
    %491 = vector.broadcast %cst_160 : f32 to vector<8x32xf32>
    %492 = arith.subf %490, %491 : vector<8x32xf32>
    %493 = vector.extract_strided_slice %485 {offsets = [0, 96], sizes = [8, 32], strides = [1, 1]} : vector<8x128xf32> to vector<8x32xf32>
    %494 = arith.mulf %487, %336 : vector<8x32xf32>
    %495 = arith.mulf %486, %492 : vector<8x32xf32>
    %496 = arith.addf %494, %495 : vector<8x32xf32>
    %497 = math.tanh %496 : vector<8x32xf32>
    %498 = arith.mulf %493, %497 : vector<8x32xf32>
    %c0_161 = arith.constant 0 : index
    %c0_162 = arith.constant 0 : index
    %499 = vector.load %arg6[%c0_161, %c0_162] : memref<40x16xf32, #tpu.memory_space<vmem>>, vector<32x16xf32>
    %c32_163 = arith.constant 32 : index
    %c0_164 = arith.constant 0 : index
    %500 = vector.load %arg6[%c32_163, %c0_164] : memref<40x16xf32, #tpu.memory_space<vmem>>, vector<1x16xf32>
    %cst_165 = arith.constant dense<0.000000e+00> : vector<8x16xf32>
    %501 = tpu.matmul %498, %499, %cst_165 {dimension_numbers = #tpu.dot_dimension_numbers<[1], [0], [0], [1], [0, 0, 1, 1], [], []>} : vector<8x32xf32>, vector<32x16xf32>, vector<8x16xf32> -> vector<8x16xf32>
    %502 = vector.broadcast %500 : vector<1x16xf32> to vector<8x16xf32>
    %503 = arith.addf %501, %502 : vector<8x16xf32>
    %c0_166 = arith.constant 0 : index
    %c32_167 = arith.constant 32 : index
    %504 = vector.load %arg7[%c0_166, %c32_167] : memref<8x128xf32, #tpu.memory_space<vmem>>, vector<8x16xf32>
    tpu.vector_store %arg7[%c0_166, %c32_167], %503 {strides = array<i32>} : memref<8x128xf32, #tpu.memory_space<vmem>>, vector<8x16xf32>,
    %505 = tpu.concatenate %373, %398, %423, %448, %473, %498 in 1 : vector<8x32xf32>, vector<8x32xf32>, vector<8x32xf32>, vector<8x32xf32>, vector<8x32xf32>, vector<8x32xf32> -> vector<8x192xf32>
    %c0_168 = arith.constant 0 : index
    %c0_169 = arith.constant 0 : index
    %506 = vector.load %arg4[%c0_168, %c0_169] : memref<192x768xf32, #tpu.memory_space<vmem>>, vector<192x768xf32>
    %cst_170 = arith.constant dense<0.000000e+00> : vector<8x768xf32>
    %507 = tpu.matmul %505, %506, %cst_170 {dimension_numbers = #tpu.dot_dimension_numbers<[1], [0], [0], [1], [0, 0, 1, 1], [], []>} : vector<8x192xf32>, vector<192x768xf32>, vector<8x768xf32> -> vector<8x768xf32>
    %c0_171 = arith.constant 0 : index
    %c0_172 = arith.constant 0 : index
    %508 = vector.load %arg5[%c0_171, %c0_172] : memref<1x768xf32, #tpu.memory_space<vmem>>, vector<1x768xf32>
    %509 = vector.broadcast %508 : vector<1x768xf32> to vector<8x768xf32>
    %510 = arith.addf %507, %509 : vector<8x768xf32>
    %c24 = arith.constant 24 : index
    %c0_173 = arith.constant 0 : index
    %511 = vector.load %arg8[%c24, %c0_173] : memref<64x128xf32, #tpu.memory_space<vmem>>, vector<8x128xf32>
    %512 = vector.extract_strided_slice %510 {offsets = [0, 0], sizes = [8, 128], strides = [1, 1]} : vector<8x768xf32> to vector<8x128xf32>
    %513 = arith.addf %511, %512 : vector<8x128xf32>
    %514 = vector.broadcast %12 : vector<1x128xf32> to vector<8x128xf32>
    %515 = arith.mulf %513, %514 : vector<8x128xf32>
    %516 = arith.negf %515 : vector<8x128xf32>
    %517 = math.exp %516 : vector<8x128xf32>
    %cst_174 = arith.constant 1.000000e+00 : f32
    %518 = vector.broadcast %cst_174 : f32 to vector<8x128xf32>
    %519 = arith.addf %518, %517 : vector<8x128xf32>
    %520 = arith.divf %518, %519 : vector<8x128xf32>
    %521 = vector.extract_strided_slice %520 {offsets = [0, 0], sizes = [8, 32], strides = [1, 1]} : vector<8x128xf32> to vector<8x32xf32>
    %522 = vector.extract_strided_slice %520 {offsets = [0, 32], sizes = [8, 32], strides = [1, 1]} : vector<8x128xf32> to vector<8x32xf32>
    %523 = vector.extract_strided_slice %520 {offsets = [0, 64], sizes = [8, 32], strides = [1, 1]} : vector<8x128xf32> to vector<8x32xf32>
    %cst_175 = arith.constant 2.000000e+00 : f32
    %524 = vector.broadcast %cst_175 : f32 to vector<8x32xf32>
    %525 = arith.mulf %524, %523 : vector<8x32xf32>
    %cst_176 = arith.constant 1.000000e+00 : f32
    %526 = vector.broadcast %cst_176 : f32 to vector<8x32xf32>
    %527 = arith.subf %525, %526 : vector<8x32xf32>
    %528 = vector.extract_strided_slice %520 {offsets = [0, 96], sizes = [8, 32], strides = [1, 1]} : vector<8x128xf32> to vector<8x32xf32>
    %529 = arith.mulf %522, %371 : vector<8x32xf32>
    %530 = arith.mulf %521, %527 : vector<8x32xf32>
    %531 = arith.addf %529, %530 : vector<8x32xf32>
    %532 = math.tanh %531 : vector<8x32xf32>
    %533 = arith.mulf %528, %532 : vector<8x32xf32>
    %c0_177 = arith.constant 0 : index
    %c0_178 = arith.constant 0 : index
    %c0_179 = arith.constant 0 : index
    %534 = vector.load %arg3[%c0_177, %c0_178, %c0_179] : memref<5x32x128xf32, #tpu.memory_space<vmem>>, vector<1x32x128xf32>
    %535 = vector.shape_cast %534 : vector<1x32x128xf32> to vector<32x128xf32>
    %cst_180 = arith.constant dense<0.000000e+00> : vector<8x128xf32>
    %536 = tpu.matmul %533, %535, %cst_180 {dimension_numbers = #tpu.dot_dimension_numbers<[1], [0], [0], [1], [0, 0, 1, 1], [], []>} : vector<8x32xf32>, vector<32x128xf32>, vector<8x128xf32> -> vector<8x128xf32>
    %537 = vector.extract_strided_slice %510 {offsets = [0, 128], sizes = [8, 128], strides = [1, 1]} : vector<8x768xf32> to vector<8x128xf32>
    %538 = arith.addf %536, %537 : vector<8x128xf32>
    %539 = vector.broadcast %12 : vector<1x128xf32> to vector<8x128xf32>
    %540 = arith.mulf %538, %539 : vector<8x128xf32>
    %541 = arith.negf %540 : vector<8x128xf32>
    %542 = math.exp %541 : vector<8x128xf32>
    %cst_181 = arith.constant 1.000000e+00 : f32
    %543 = vector.broadcast %cst_181 : f32 to vector<8x128xf32>
    %544 = arith.addf %543, %542 : vector<8x128xf32>
    %545 = arith.divf %543, %544 : vector<8x128xf32>
    %546 = vector.extract_strided_slice %545 {offsets = [0, 0], sizes = [8, 32], strides = [1, 1]} : vector<8x128xf32> to vector<8x32xf32>
    %547 = vector.extract_strided_slice %545 {offsets = [0, 32], sizes = [8, 32], strides = [1, 1]} : vector<8x128xf32> to vector<8x32xf32>
    %548 = vector.extract_strided_slice %545 {offsets = [0, 64], sizes = [8, 32], strides = [1, 1]} : vector<8x128xf32> to vector<8x32xf32>
    %cst_182 = arith.constant 2.000000e+00 : f32
    %549 = vector.broadcast %cst_182 : f32 to vector<8x32xf32>
    %550 = arith.mulf %549, %548 : vector<8x32xf32>
    %cst_183 = arith.constant 1.000000e+00 : f32
    %551 = vector.broadcast %cst_183 : f32 to vector<8x32xf32>
    %552 = arith.subf %550, %551 : vector<8x32xf32>
    %553 = vector.extract_strided_slice %545 {offsets = [0, 96], sizes = [8, 32], strides = [1, 1]} : vector<8x128xf32> to vector<8x32xf32>
    %554 = arith.mulf %547, %396 : vector<8x32xf32>
    %555 = arith.mulf %546, %552 : vector<8x32xf32>
    %556 = arith.addf %554, %555 : vector<8x32xf32>
    %557 = math.tanh %556 : vector<8x32xf32>
    %558 = arith.mulf %553, %557 : vector<8x32xf32>
    %c1_184 = arith.constant 1 : index
    %c0_185 = arith.constant 0 : index
    %c0_186 = arith.constant 0 : index
    %559 = vector.load %arg3[%c1_184, %c0_185, %c0_186] : memref<5x32x128xf32, #tpu.memory_space<vmem>>, vector<1x32x128xf32>
    %560 = vector.shape_cast %559 : vector<1x32x128xf32> to vector<32x128xf32>
    %cst_187 = arith.constant dense<0.000000e+00> : vector<8x128xf32>
    %561 = tpu.matmul %558, %560, %cst_187 {dimension_numbers = #tpu.dot_dimension_numbers<[1], [0], [0], [1], [0, 0, 1, 1], [], []>} : vector<8x32xf32>, vector<32x128xf32>, vector<8x128xf32> -> vector<8x128xf32>
    %562 = vector.extract_strided_slice %510 {offsets = [0, 256], sizes = [8, 128], strides = [1, 1]} : vector<8x768xf32> to vector<8x128xf32>
    %563 = arith.addf %561, %562 : vector<8x128xf32>
    %564 = vector.broadcast %12 : vector<1x128xf32> to vector<8x128xf32>
    %565 = arith.mulf %563, %564 : vector<8x128xf32>
    %566 = arith.negf %565 : vector<8x128xf32>
    %567 = math.exp %566 : vector<8x128xf32>
    %cst_188 = arith.constant 1.000000e+00 : f32
    %568 = vector.broadcast %cst_188 : f32 to vector<8x128xf32>
    %569 = arith.addf %568, %567 : vector<8x128xf32>
    %570 = arith.divf %568, %569 : vector<8x128xf32>
    %571 = vector.extract_strided_slice %570 {offsets = [0, 0], sizes = [8, 32], strides = [1, 1]} : vector<8x128xf32> to vector<8x32xf32>
    %572 = vector.extract_strided_slice %570 {offsets = [0, 32], sizes = [8, 32], strides = [1, 1]} : vector<8x128xf32> to vector<8x32xf32>
    %573 = vector.extract_strided_slice %570 {offsets = [0, 64], sizes = [8, 32], strides = [1, 1]} : vector<8x128xf32> to vector<8x32xf32>
    %cst_189 = arith.constant 2.000000e+00 : f32
    %574 = vector.broadcast %cst_189 : f32 to vector<8x32xf32>
    %575 = arith.mulf %574, %573 : vector<8x32xf32>
    %cst_190 = arith.constant 1.000000e+00 : f32
    %576 = vector.broadcast %cst_190 : f32 to vector<8x32xf32>
    %577 = arith.subf %575, %576 : vector<8x32xf32>
    %578 = vector.extract_strided_slice %570 {offsets = [0, 96], sizes = [8, 32], strides = [1, 1]} : vector<8x128xf32> to vector<8x32xf32>
    %579 = arith.mulf %572, %421 : vector<8x32xf32>
    %580 = arith.mulf %571, %577 : vector<8x32xf32>
    %581 = arith.addf %579, %580 : vector<8x32xf32>
    %582 = math.tanh %581 : vector<8x32xf32>
    %583 = arith.mulf %578, %582 : vector<8x32xf32>
    %c2_191 = arith.constant 2 : index
    %c0_192 = arith.constant 0 : index
    %c0_193 = arith.constant 0 : index
    %584 = vector.load %arg3[%c2_191, %c0_192, %c0_193] : memref<5x32x128xf32, #tpu.memory_space<vmem>>, vector<1x32x128xf32>
    %585 = vector.shape_cast %584 : vector<1x32x128xf32> to vector<32x128xf32>
    %cst_194 = arith.constant dense<0.000000e+00> : vector<8x128xf32>
    %586 = tpu.matmul %583, %585, %cst_194 {dimension_numbers = #tpu.dot_dimension_numbers<[1], [0], [0], [1], [0, 0, 1, 1], [], []>} : vector<8x32xf32>, vector<32x128xf32>, vector<8x128xf32> -> vector<8x128xf32>
    %587 = vector.extract_strided_slice %510 {offsets = [0, 384], sizes = [8, 128], strides = [1, 1]} : vector<8x768xf32> to vector<8x128xf32>
    %588 = arith.addf %586, %587 : vector<8x128xf32>
    %589 = vector.broadcast %12 : vector<1x128xf32> to vector<8x128xf32>
    %590 = arith.mulf %588, %589 : vector<8x128xf32>
    %591 = arith.negf %590 : vector<8x128xf32>
    %592 = math.exp %591 : vector<8x128xf32>
    %cst_195 = arith.constant 1.000000e+00 : f32
    %593 = vector.broadcast %cst_195 : f32 to vector<8x128xf32>
    %594 = arith.addf %593, %592 : vector<8x128xf32>
    %595 = arith.divf %593, %594 : vector<8x128xf32>
    %596 = vector.extract_strided_slice %595 {offsets = [0, 0], sizes = [8, 32], strides = [1, 1]} : vector<8x128xf32> to vector<8x32xf32>
    %597 = vector.extract_strided_slice %595 {offsets = [0, 32], sizes = [8, 32], strides = [1, 1]} : vector<8x128xf32> to vector<8x32xf32>
    %598 = vector.extract_strided_slice %595 {offsets = [0, 64], sizes = [8, 32], strides = [1, 1]} : vector<8x128xf32> to vector<8x32xf32>
    %cst_196 = arith.constant 2.000000e+00 : f32
    %599 = vector.broadcast %cst_196 : f32 to vector<8x32xf32>
    %600 = arith.mulf %599, %598 : vector<8x32xf32>
    %cst_197 = arith.constant 1.000000e+00 : f32
    %601 = vector.broadcast %cst_197 : f32 to vector<8x32xf32>
    %602 = arith.subf %600, %601 : vector<8x32xf32>
    %603 = vector.extract_strided_slice %595 {offsets = [0, 96], sizes = [8, 32], strides = [1, 1]} : vector<8x128xf32> to vector<8x32xf32>
    %604 = arith.mulf %597, %446 : vector<8x32xf32>
    %605 = arith.mulf %596, %602 : vector<8x32xf32>
    %606 = arith.addf %604, %605 : vector<8x32xf32>
    %607 = math.tanh %606 : vector<8x32xf32>
    %608 = arith.mulf %603, %607 : vector<8x32xf32>
    %c3_198 = arith.constant 3 : index
    %c0_199 = arith.constant 0 : index
    %c0_200 = arith.constant 0 : index
    %609 = vector.load %arg3[%c3_198, %c0_199, %c0_200] : memref<5x32x128xf32, #tpu.memory_space<vmem>>, vector<1x32x128xf32>
    %610 = vector.shape_cast %609 : vector<1x32x128xf32> to vector<32x128xf32>
    %cst_201 = arith.constant dense<0.000000e+00> : vector<8x128xf32>
    %611 = tpu.matmul %608, %610, %cst_201 {dimension_numbers = #tpu.dot_dimension_numbers<[1], [0], [0], [1], [0, 0, 1, 1], [], []>} : vector<8x32xf32>, vector<32x128xf32>, vector<8x128xf32> -> vector<8x128xf32>
    %612 = vector.extract_strided_slice %510 {offsets = [0, 512], sizes = [8, 128], strides = [1, 1]} : vector<8x768xf32> to vector<8x128xf32>
    %613 = arith.addf %611, %612 : vector<8x128xf32>
    %614 = vector.broadcast %12 : vector<1x128xf32> to vector<8x128xf32>
    %615 = arith.mulf %613, %614 : vector<8x128xf32>
    %616 = arith.negf %615 : vector<8x128xf32>
    %617 = math.exp %616 : vector<8x128xf32>
    %cst_202 = arith.constant 1.000000e+00 : f32
    %618 = vector.broadcast %cst_202 : f32 to vector<8x128xf32>
    %619 = arith.addf %618, %617 : vector<8x128xf32>
    %620 = arith.divf %618, %619 : vector<8x128xf32>
    %621 = vector.extract_strided_slice %620 {offsets = [0, 0], sizes = [8, 32], strides = [1, 1]} : vector<8x128xf32> to vector<8x32xf32>
    %622 = vector.extract_strided_slice %620 {offsets = [0, 32], sizes = [8, 32], strides = [1, 1]} : vector<8x128xf32> to vector<8x32xf32>
    %623 = vector.extract_strided_slice %620 {offsets = [0, 64], sizes = [8, 32], strides = [1, 1]} : vector<8x128xf32> to vector<8x32xf32>
    %cst_203 = arith.constant 2.000000e+00 : f32
    %624 = vector.broadcast %cst_203 : f32 to vector<8x32xf32>
    %625 = arith.mulf %624, %623 : vector<8x32xf32>
    %cst_204 = arith.constant 1.000000e+00 : f32
    %626 = vector.broadcast %cst_204 : f32 to vector<8x32xf32>
    %627 = arith.subf %625, %626 : vector<8x32xf32>
    %628 = vector.extract_strided_slice %620 {offsets = [0, 96], sizes = [8, 32], strides = [1, 1]} : vector<8x128xf32> to vector<8x32xf32>
    %629 = arith.mulf %622, %471 : vector<8x32xf32>
    %630 = arith.mulf %621, %627 : vector<8x32xf32>
    %631 = arith.addf %629, %630 : vector<8x32xf32>
    %632 = math.tanh %631 : vector<8x32xf32>
    %633 = arith.mulf %628, %632 : vector<8x32xf32>
    %c4_205 = arith.constant 4 : index
    %c0_206 = arith.constant 0 : index
    %c0_207 = arith.constant 0 : index
    %634 = vector.load %arg3[%c4_205, %c0_206, %c0_207] : memref<5x32x128xf32, #tpu.memory_space<vmem>>, vector<1x32x128xf32>
    %635 = vector.shape_cast %634 : vector<1x32x128xf32> to vector<32x128xf32>
    %cst_208 = arith.constant dense<0.000000e+00> : vector<8x128xf32>
    %636 = tpu.matmul %633, %635, %cst_208 {dimension_numbers = #tpu.dot_dimension_numbers<[1], [0], [0], [1], [0, 0, 1, 1], [], []>} : vector<8x32xf32>, vector<32x128xf32>, vector<8x128xf32> -> vector<8x128xf32>
    %637 = vector.extract_strided_slice %510 {offsets = [0, 640], sizes = [8, 128], strides = [1, 1]} : vector<8x768xf32> to vector<8x128xf32>
    %638 = arith.addf %636, %637 : vector<8x128xf32>
    %639 = vector.broadcast %12 : vector<1x128xf32> to vector<8x128xf32>
    %640 = arith.mulf %638, %639 : vector<8x128xf32>
    %641 = arith.negf %640 : vector<8x128xf32>
    %642 = math.exp %641 : vector<8x128xf32>
    %cst_209 = arith.constant 1.000000e+00 : f32
    %643 = vector.broadcast %cst_209 : f32 to vector<8x128xf32>
    %644 = arith.addf %643, %642 : vector<8x128xf32>
    %645 = arith.divf %643, %644 : vector<8x128xf32>
    %646 = vector.extract_strided_slice %645 {offsets = [0, 0], sizes = [8, 32], strides = [1, 1]} : vector<8x128xf32> to vector<8x32xf32>
    %647 = vector.extract_strided_slice %645 {offsets = [0, 32], sizes = [8, 32], strides = [1, 1]} : vector<8x128xf32> to vector<8x32xf32>
    %648 = vector.extract_strided_slice %645 {offsets = [0, 64], sizes = [8, 32], strides = [1, 1]} : vector<8x128xf32> to vector<8x32xf32>
    %cst_210 = arith.constant 2.000000e+00 : f32
    %649 = vector.broadcast %cst_210 : f32 to vector<8x32xf32>
    %650 = arith.mulf %649, %648 : vector<8x32xf32>
    %cst_211 = arith.constant 1.000000e+00 : f32
    %651 = vector.broadcast %cst_211 : f32 to vector<8x32xf32>
    %652 = arith.subf %650, %651 : vector<8x32xf32>
    %653 = vector.extract_strided_slice %645 {offsets = [0, 96], sizes = [8, 32], strides = [1, 1]} : vector<8x128xf32> to vector<8x32xf32>
    %654 = arith.mulf %647, %496 : vector<8x32xf32>
    %655 = arith.mulf %646, %652 : vector<8x32xf32>
    %656 = arith.addf %654, %655 : vector<8x32xf32>
    %657 = math.tanh %656 : vector<8x32xf32>
    %658 = arith.mulf %653, %657 : vector<8x32xf32>
    %c0_212 = arith.constant 0 : index
    %c0_213 = arith.constant 0 : index
    %659 = vector.load %arg6[%c0_212, %c0_213] : memref<40x16xf32, #tpu.memory_space<vmem>>, vector<32x16xf32>
    %c32_214 = arith.constant 32 : index
    %c0_215 = arith.constant 0 : index
    %660 = vector.load %arg6[%c32_214, %c0_215] : memref<40x16xf32, #tpu.memory_space<vmem>>, vector<1x16xf32>
    %cst_216 = arith.constant dense<0.000000e+00> : vector<8x16xf32>
    %661 = tpu.matmul %658, %659, %cst_216 {dimension_numbers = #tpu.dot_dimension_numbers<[1], [0], [0], [1], [0, 0, 1, 1], [], []>} : vector<8x32xf32>, vector<32x16xf32>, vector<8x16xf32> -> vector<8x16xf32>
    %662 = vector.broadcast %660 : vector<1x16xf32> to vector<8x16xf32>
    %663 = arith.addf %661, %662 : vector<8x16xf32>
    %c0_217 = arith.constant 0 : index
    %c48 = arith.constant 48 : index
    %664 = vector.load %arg7[%c0_217, %c48] : memref<8x128xf32, #tpu.memory_space<vmem>>, vector<8x16xf32>
    tpu.vector_store %arg7[%c0_217, %c48], %663 {strides = array<i32>} : memref<8x128xf32, #tpu.memory_space<vmem>>, vector<8x16xf32>,
    %665 = tpu.concatenate %533, %558, %583, %608, %633, %658 in 1 : vector<8x32xf32>, vector<8x32xf32>, vector<8x32xf32>, vector<8x32xf32>, vector<8x32xf32>, vector<8x32xf32> -> vector<8x192xf32>
    %c0_218 = arith.constant 0 : index
    %c0_219 = arith.constant 0 : index
    %666 = vector.load %arg4[%c0_218, %c0_219] : memref<192x768xf32, #tpu.memory_space<vmem>>, vector<192x768xf32>
    %cst_220 = arith.constant dense<0.000000e+00> : vector<8x768xf32>
    %667 = tpu.matmul %665, %666, %cst_220 {dimension_numbers = #tpu.dot_dimension_numbers<[1], [0], [0], [1], [0, 0, 1, 1], [], []>} : vector<8x192xf32>, vector<192x768xf32>, vector<8x768xf32> -> vector<8x768xf32>
    %c0_221 = arith.constant 0 : index
    %c0_222 = arith.constant 0 : index
    %668 = vector.load %arg5[%c0_221, %c0_222] : memref<1x768xf32, #tpu.memory_space<vmem>>, vector<1x768xf32>
    %669 = vector.broadcast %668 : vector<1x768xf32> to vector<8x768xf32>
    %670 = arith.addf %667, %669 : vector<8x768xf32>
    %c32_223 = arith.constant 32 : index
    %c0_224 = arith.constant 0 : index
    %671 = vector.load %arg8[%c32_223, %c0_224] : memref<64x128xf32, #tpu.memory_space<vmem>>, vector<8x128xf32>
    %672 = vector.extract_strided_slice %670 {offsets = [0, 0], sizes = [8, 128], strides = [1, 1]} : vector<8x768xf32> to vector<8x128xf32>
    %673 = arith.addf %671, %672 : vector<8x128xf32>
    %674 = vector.broadcast %12 : vector<1x128xf32> to vector<8x128xf32>
    %675 = arith.mulf %673, %674 : vector<8x128xf32>
    %676 = arith.negf %675 : vector<8x128xf32>
    %677 = math.exp %676 : vector<8x128xf32>
    %cst_225 = arith.constant 1.000000e+00 : f32
    %678 = vector.broadcast %cst_225 : f32 to vector<8x128xf32>
    %679 = arith.addf %678, %677 : vector<8x128xf32>
    %680 = arith.divf %678, %679 : vector<8x128xf32>
    %681 = vector.extract_strided_slice %680 {offsets = [0, 0], sizes = [8, 32], strides = [1, 1]} : vector<8x128xf32> to vector<8x32xf32>
    %682 = vector.extract_strided_slice %680 {offsets = [0, 32], sizes = [8, 32], strides = [1, 1]} : vector<8x128xf32> to vector<8x32xf32>
    %683 = vector.extract_strided_slice %680 {offsets = [0, 64], sizes = [8, 32], strides = [1, 1]} : vector<8x128xf32> to vector<8x32xf32>
    %cst_226 = arith.constant 2.000000e+00 : f32
    %684 = vector.broadcast %cst_226 : f32 to vector<8x32xf32>
    %685 = arith.mulf %684, %683 : vector<8x32xf32>
    %cst_227 = arith.constant 1.000000e+00 : f32
    %686 = vector.broadcast %cst_227 : f32 to vector<8x32xf32>
    %687 = arith.subf %685, %686 : vector<8x32xf32>
    %688 = vector.extract_strided_slice %680 {offsets = [0, 96], sizes = [8, 32], strides = [1, 1]} : vector<8x128xf32> to vector<8x32xf32>
    %689 = arith.mulf %682, %531 : vector<8x32xf32>
    %690 = arith.mulf %681, %687 : vector<8x32xf32>
    %691 = arith.addf %689, %690 : vector<8x32xf32>
    %692 = math.tanh %691 : vector<8x32xf32>
    %693 = arith.mulf %688, %692 : vector<8x32xf32>
    %c0_228 = arith.constant 0 : index
    %c0_229 = arith.constant 0 : index
    %c0_230 = arith.constant 0 : index
    %694 = vector.load %arg3[%c0_228, %c0_229, %c0_230] : memref<5x32x128xf32, #tpu.memory_space<vmem>>, vector<1x32x128xf32>
    %695 = vector.shape_cast %694 : vector<1x32x128xf32> to vector<32x128xf32>
    %cst_231 = arith.constant dense<0.000000e+00> : vector<8x128xf32>
    %696 = tpu.matmul %693, %695, %cst_231 {dimension_numbers = #tpu.dot_dimension_numbers<[1], [0], [0], [1], [0, 0, 1, 1], [], []>} : vector<8x32xf32>, vector<32x128xf32>, vector<8x128xf32> -> vector<8x128xf32>
    %697 = vector.extract_strided_slice %670 {offsets = [0, 128], sizes = [8, 128], strides = [1, 1]} : vector<8x768xf32> to vector<8x128xf32>
    %698 = arith.addf %696, %697 : vector<8x128xf32>
    %699 = vector.broadcast %12 : vector<1x128xf32> to vector<8x128xf32>
    %700 = arith.mulf %698, %699 : vector<8x128xf32>
    %701 = arith.negf %700 : vector<8x128xf32>
    %702 = math.exp %701 : vector<8x128xf32>
    %cst_232 = arith.constant 1.000000e+00 : f32
    %703 = vector.broadcast %cst_232 : f32 to vector<8x128xf32>
    %704 = arith.addf %703, %702 : vector<8x128xf32>
    %705 = arith.divf %703, %704 : vector<8x128xf32>
    %706 = vector.extract_strided_slice %705 {offsets = [0, 0], sizes = [8, 32], strides = [1, 1]} : vector<8x128xf32> to vector<8x32xf32>
    %707 = vector.extract_strided_slice %705 {offsets = [0, 32], sizes = [8, 32], strides = [1, 1]} : vector<8x128xf32> to vector<8x32xf32>
    %708 = vector.extract_strided_slice %705 {offsets = [0, 64], sizes = [8, 32], strides = [1, 1]} : vector<8x128xf32> to vector<8x32xf32>
    %cst_233 = arith.constant 2.000000e+00 : f32
    %709 = vector.broadcast %cst_233 : f32 to vector<8x32xf32>
    %710 = arith.mulf %709, %708 : vector<8x32xf32>
    %cst_234 = arith.constant 1.000000e+00 : f32
    %711 = vector.broadcast %cst_234 : f32 to vector<8x32xf32>
    %712 = arith.subf %710, %711 : vector<8x32xf32>
    %713 = vector.extract_strided_slice %705 {offsets = [0, 96], sizes = [8, 32], strides = [1, 1]} : vector<8x128xf32> to vector<8x32xf32>
    %714 = arith.mulf %707, %556 : vector<8x32xf32>
    %715 = arith.mulf %706, %712 : vector<8x32xf32>
    %716 = arith.addf %714, %715 : vector<8x32xf32>
    %717 = math.tanh %716 : vector<8x32xf32>
    %718 = arith.mulf %713, %717 : vector<8x32xf32>
    %c1_235 = arith.constant 1 : index
    %c0_236 = arith.constant 0 : index
    %c0_237 = arith.constant 0 : index
    %719 = vector.load %arg3[%c1_235, %c0_236, %c0_237] : memref<5x32x128xf32, #tpu.memory_space<vmem>>, vector<1x32x128xf32>
    %720 = vector.shape_cast %719 : vector<1x32x128xf32> to vector<32x128xf32>
    %cst_238 = arith.constant dense<0.000000e+00> : vector<8x128xf32>
    %721 = tpu.matmul %718, %720, %cst_238 {dimension_numbers = #tpu.dot_dimension_numbers<[1], [0], [0], [1], [0, 0, 1, 1], [], []>} : vector<8x32xf32>, vector<32x128xf32>, vector<8x128xf32> -> vector<8x128xf32>
    %722 = vector.extract_strided_slice %670 {offsets = [0, 256], sizes = [8, 128], strides = [1, 1]} : vector<8x768xf32> to vector<8x128xf32>
    %723 = arith.addf %721, %722 : vector<8x128xf32>
    %724 = vector.broadcast %12 : vector<1x128xf32> to vector<8x128xf32>
    %725 = arith.mulf %723, %724 : vector<8x128xf32>
    %726 = arith.negf %725 : vector<8x128xf32>
    %727 = math.exp %726 : vector<8x128xf32>
    %cst_239 = arith.constant 1.000000e+00 : f32
    %728 = vector.broadcast %cst_239 : f32 to vector<8x128xf32>
    %729 = arith.addf %728, %727 : vector<8x128xf32>
    %730 = arith.divf %728, %729 : vector<8x128xf32>
    %731 = vector.extract_strided_slice %730 {offsets = [0, 0], sizes = [8, 32], strides = [1, 1]} : vector<8x128xf32> to vector<8x32xf32>
    %732 = vector.extract_strided_slice %730 {offsets = [0, 32], sizes = [8, 32], strides = [1, 1]} : vector<8x128xf32> to vector<8x32xf32>
    %733 = vector.extract_strided_slice %730 {offsets = [0, 64], sizes = [8, 32], strides = [1, 1]} : vector<8x128xf32> to vector<8x32xf32>
    %cst_240 = arith.constant 2.000000e+00 : f32
    %734 = vector.broadcast %cst_240 : f32 to vector<8x32xf32>
    %735 = arith.mulf %734, %733 : vector<8x32xf32>
    %cst_241 = arith.constant 1.000000e+00 : f32
    %736 = vector.broadcast %cst_241 : f32 to vector<8x32xf32>
    %737 = arith.subf %735, %736 : vector<8x32xf32>
    %738 = vector.extract_strided_slice %730 {offsets = [0, 96], sizes = [8, 32], strides = [1, 1]} : vector<8x128xf32> to vector<8x32xf32>
    %739 = arith.mulf %732, %581 : vector<8x32xf32>
    %740 = arith.mulf %731, %737 : vector<8x32xf32>
    %741 = arith.addf %739, %740 : vector<8x32xf32>
    %742 = math.tanh %741 : vector<8x32xf32>
    %743 = arith.mulf %738, %742 : vector<8x32xf32>
    %c2_242 = arith.constant 2 : index
    %c0_243 = arith.constant 0 : index
    %c0_244 = arith.constant 0 : index
    %744 = vector.load %arg3[%c2_242, %c0_243, %c0_244] : memref<5x32x128xf32, #tpu.memory_space<vmem>>, vector<1x32x128xf32>
    %745 = vector.shape_cast %744 : vector<1x32x128xf32> to vector<32x128xf32>
    %cst_245 = arith.constant dense<0.000000e+00> : vector<8x128xf32>
    %746 = tpu.matmul %743, %745, %cst_245 {dimension_numbers = #tpu.dot_dimension_numbers<[1], [0], [0], [1], [0, 0, 1, 1], [], []>} : vector<8x32xf32>, vector<32x128xf32>, vector<8x128xf32> -> vector<8x128xf32>
    %747 = vector.extract_strided_slice %670 {offsets = [0, 384], sizes = [8, 128], strides = [1, 1]} : vector<8x768xf32> to vector<8x128xf32>
    %748 = arith.addf %746, %747 : vector<8x128xf32>
    %749 = vector.broadcast %12 : vector<1x128xf32> to vector<8x128xf32>
    %750 = arith.mulf %748, %749 : vector<8x128xf32>
    %751 = arith.negf %750 : vector<8x128xf32>
    %752 = math.exp %751 : vector<8x128xf32>
    %cst_246 = arith.constant 1.000000e+00 : f32
    %753 = vector.broadcast %cst_246 : f32 to vector<8x128xf32>
    %754 = arith.addf %753, %752 : vector<8x128xf32>
    %755 = arith.divf %753, %754 : vector<8x128xf32>
    %756 = vector.extract_strided_slice %755 {offsets = [0, 0], sizes = [8, 32], strides = [1, 1]} : vector<8x128xf32> to vector<8x32xf32>
    %757 = vector.extract_strided_slice %755 {offsets = [0, 32], sizes = [8, 32], strides = [1, 1]} : vector<8x128xf32> to vector<8x32xf32>
    %758 = vector.extract_strided_slice %755 {offsets = [0, 64], sizes = [8, 32], strides = [1, 1]} : vector<8x128xf32> to vector<8x32xf32>
    %cst_247 = arith.constant 2.000000e+00 : f32
    %759 = vector.broadcast %cst_247 : f32 to vector<8x32xf32>
    %760 = arith.mulf %759, %758 : vector<8x32xf32>
    %cst_248 = arith.constant 1.000000e+00 : f32
    %761 = vector.broadcast %cst_248 : f32 to vector<8x32xf32>
    %762 = arith.subf %760, %761 : vector<8x32xf32>
    %763 = vector.extract_strided_slice %755 {offsets = [0, 96], sizes = [8, 32], strides = [1, 1]} : vector<8x128xf32> to vector<8x32xf32>
    %764 = arith.mulf %757, %606 : vector<8x32xf32>
    %765 = arith.mulf %756, %762 : vector<8x32xf32>
    %766 = arith.addf %764, %765 : vector<8x32xf32>
    %767 = math.tanh %766 : vector<8x32xf32>
    %768 = arith.mulf %763, %767 : vector<8x32xf32>
    %c3_249 = arith.constant 3 : index
    %c0_250 = arith.constant 0 : index
    %c0_251 = arith.constant 0 : index
    %769 = vector.load %arg3[%c3_249, %c0_250, %c0_251] : memref<5x32x128xf32, #tpu.memory_space<vmem>>, vector<1x32x128xf32>
    %770 = vector.shape_cast %769 : vector<1x32x128xf32> to vector<32x128xf32>
    %cst_252 = arith.constant dense<0.000000e+00> : vector<8x128xf32>
    %771 = tpu.matmul %768, %770, %cst_252 {dimension_numbers = #tpu.dot_dimension_numbers<[1], [0], [0], [1], [0, 0, 1, 1], [], []>} : vector<8x32xf32>, vector<32x128xf32>, vector<8x128xf32> -> vector<8x128xf32>
    %772 = vector.extract_strided_slice %670 {offsets = [0, 512], sizes = [8, 128], strides = [1, 1]} : vector<8x768xf32> to vector<8x128xf32>
    %773 = arith.addf %771, %772 : vector<8x128xf32>
    %774 = vector.broadcast %12 : vector<1x128xf32> to vector<8x128xf32>
    %775 = arith.mulf %773, %774 : vector<8x128xf32>
    %776 = arith.negf %775 : vector<8x128xf32>
    %777 = math.exp %776 : vector<8x128xf32>
    %cst_253 = arith.constant 1.000000e+00 : f32
    %778 = vector.broadcast %cst_253 : f32 to vector<8x128xf32>
    %779 = arith.addf %778, %777 : vector<8x128xf32>
    %780 = arith.divf %778, %779 : vector<8x128xf32>
    %781 = vector.extract_strided_slice %780 {offsets = [0, 0], sizes = [8, 32], strides = [1, 1]} : vector<8x128xf32> to vector<8x32xf32>
    %782 = vector.extract_strided_slice %780 {offsets = [0, 32], sizes = [8, 32], strides = [1, 1]} : vector<8x128xf32> to vector<8x32xf32>
    %783 = vector.extract_strided_slice %780 {offsets = [0, 64], sizes = [8, 32], strides = [1, 1]} : vector<8x128xf32> to vector<8x32xf32>
    %cst_254 = arith.constant 2.000000e+00 : f32
    %784 = vector.broadcast %cst_254 : f32 to vector<8x32xf32>
    %785 = arith.mulf %784, %783 : vector<8x32xf32>
    %cst_255 = arith.constant 1.000000e+00 : f32
    %786 = vector.broadcast %cst_255 : f32 to vector<8x32xf32>
    %787 = arith.subf %785, %786 : vector<8x32xf32>
    %788 = vector.extract_strided_slice %780 {offsets = [0, 96], sizes = [8, 32], strides = [1, 1]} : vector<8x128xf32> to vector<8x32xf32>
    %789 = arith.mulf %782, %631 : vector<8x32xf32>
    %790 = arith.mulf %781, %787 : vector<8x32xf32>
    %791 = arith.addf %789, %790 : vector<8x32xf32>
    %792 = math.tanh %791 : vector<8x32xf32>
    %793 = arith.mulf %788, %792 : vector<8x32xf32>
    %c4_256 = arith.constant 4 : index
    %c0_257 = arith.constant 0 : index
    %c0_258 = arith.constant 0 : index
    %794 = vector.load %arg3[%c4_256, %c0_257, %c0_258] : memref<5x32x128xf32, #tpu.memory_space<vmem>>, vector<1x32x128xf32>
    %795 = vector.shape_cast %794 : vector<1x32x128xf32> to vector<32x128xf32>
    %cst_259 = arith.constant dense<0.000000e+00> : vector<8x128xf32>
    %796 = tpu.matmul %793, %795, %cst_259 {dimension_numbers = #tpu.dot_dimension_numbers<[1], [0], [0], [1], [0, 0, 1, 1], [], []>} : vector<8x32xf32>, vector<32x128xf32>, vector<8x128xf32> -> vector<8x128xf32>
    %797 = vector.extract_strided_slice %670 {offsets = [0, 640], sizes = [8, 128], strides = [1, 1]} : vector<8x768xf32> to vector<8x128xf32>
    %798 = arith.addf %796, %797 : vector<8x128xf32>
    %799 = vector.broadcast %12 : vector<1x128xf32> to vector<8x128xf32>
    %800 = arith.mulf %798, %799 : vector<8x128xf32>
    %801 = arith.negf %800 : vector<8x128xf32>
    %802 = math.exp %801 : vector<8x128xf32>
    %cst_260 = arith.constant 1.000000e+00 : f32
    %803 = vector.broadcast %cst_260 : f32 to vector<8x128xf32>
    %804 = arith.addf %803, %802 : vector<8x128xf32>
    %805 = arith.divf %803, %804 : vector<8x128xf32>
    %806 = vector.extract_strided_slice %805 {offsets = [0, 0], sizes = [8, 32], strides = [1, 1]} : vector<8x128xf32> to vector<8x32xf32>
    %807 = vector.extract_strided_slice %805 {offsets = [0, 32], sizes = [8, 32], strides = [1, 1]} : vector<8x128xf32> to vector<8x32xf32>
    %808 = vector.extract_strided_slice %805 {offsets = [0, 64], sizes = [8, 32], strides = [1, 1]} : vector<8x128xf32> to vector<8x32xf32>
    %cst_261 = arith.constant 2.000000e+00 : f32
    %809 = vector.broadcast %cst_261 : f32 to vector<8x32xf32>
    %810 = arith.mulf %809, %808 : vector<8x32xf32>
    %cst_262 = arith.constant 1.000000e+00 : f32
    %811 = vector.broadcast %cst_262 : f32 to vector<8x32xf32>
    %812 = arith.subf %810, %811 : vector<8x32xf32>
    %813 = vector.extract_strided_slice %805 {offsets = [0, 96], sizes = [8, 32], strides = [1, 1]} : vector<8x128xf32> to vector<8x32xf32>
    %814 = arith.mulf %807, %656 : vector<8x32xf32>
    %815 = arith.mulf %806, %812 : vector<8x32xf32>
    %816 = arith.addf %814, %815 : vector<8x32xf32>
    %817 = math.tanh %816 : vector<8x32xf32>
    %818 = arith.mulf %813, %817 : vector<8x32xf32>
    %c0_263 = arith.constant 0 : index
    %c0_264 = arith.constant 0 : index
    %819 = vector.load %arg6[%c0_263, %c0_264] : memref<40x16xf32, #tpu.memory_space<vmem>>, vector<32x16xf32>
    %c32_265 = arith.constant 32 : index
    %c0_266 = arith.constant 0 : index
    %820 = vector.load %arg6[%c32_265, %c0_266] : memref<40x16xf32, #tpu.memory_space<vmem>>, vector<1x16xf32>
    %cst_267 = arith.constant dense<0.000000e+00> : vector<8x16xf32>
    %821 = tpu.matmul %818, %819, %cst_267 {dimension_numbers = #tpu.dot_dimension_numbers<[1], [0], [0], [1], [0, 0, 1, 1], [], []>} : vector<8x32xf32>, vector<32x16xf32>, vector<8x16xf32> -> vector<8x16xf32>
    %822 = vector.broadcast %820 : vector<1x16xf32> to vector<8x16xf32>
    %823 = arith.addf %821, %822 : vector<8x16xf32>
    %c0_268 = arith.constant 0 : index
    %c64 = arith.constant 64 : index
    %824 = vector.load %arg7[%c0_268, %c64] : memref<8x128xf32, #tpu.memory_space<vmem>>, vector<8x16xf32>
    tpu.vector_store %arg7[%c0_268, %c64], %823 {strides = array<i32>} : memref<8x128xf32, #tpu.memory_space<vmem>>, vector<8x16xf32>,
    %825 = tpu.concatenate %693, %718, %743, %768, %793, %818 in 1 : vector<8x32xf32>, vector<8x32xf32>, vector<8x32xf32>, vector<8x32xf32>, vector<8x32xf32>, vector<8x32xf32> -> vector<8x192xf32>
    %c0_269 = arith.constant 0 : index
    %c0_270 = arith.constant 0 : index
    %826 = vector.load %arg4[%c0_269, %c0_270] : memref<192x768xf32, #tpu.memory_space<vmem>>, vector<192x768xf32>
    %cst_271 = arith.constant dense<0.000000e+00> : vector<8x768xf32>
    %827 = tpu.matmul %825, %826, %cst_271 {dimension_numbers = #tpu.dot_dimension_numbers<[1], [0], [0], [1], [0, 0, 1, 1], [], []>} : vector<8x192xf32>, vector<192x768xf32>, vector<8x768xf32> -> vector<8x768xf32>
    %c0_272 = arith.constant 0 : index
    %c0_273 = arith.constant 0 : index
    %828 = vector.load %arg5[%c0_272, %c0_273] : memref<1x768xf32, #tpu.memory_space<vmem>>, vector<1x768xf32>
    %829 = vector.broadcast %828 : vector<1x768xf32> to vector<8x768xf32>
    %830 = arith.addf %827, %829 : vector<8x768xf32>
    %c40 = arith.constant 40 : index
    %c0_274 = arith.constant 0 : index
    %831 = vector.load %arg8[%c40, %c0_274] : memref<64x128xf32, #tpu.memory_space<vmem>>, vector<8x128xf32>
    %832 = vector.extract_strided_slice %830 {offsets = [0, 0], sizes = [8, 128], strides = [1, 1]} : vector<8x768xf32> to vector<8x128xf32>
    %833 = arith.addf %831, %832 : vector<8x128xf32>
    %834 = vector.broadcast %12 : vector<1x128xf32> to vector<8x128xf32>
    %835 = arith.mulf %833, %834 : vector<8x128xf32>
    %836 = arith.negf %835 : vector<8x128xf32>
    %837 = math.exp %836 : vector<8x128xf32>
    %cst_275 = arith.constant 1.000000e+00 : f32
    %838 = vector.broadcast %cst_275 : f32 to vector<8x128xf32>
    %839 = arith.addf %838, %837 : vector<8x128xf32>
    %840 = arith.divf %838, %839 : vector<8x128xf32>
    %841 = vector.extract_strided_slice %840 {offsets = [0, 0], sizes = [8, 32], strides = [1, 1]} : vector<8x128xf32> to vector<8x32xf32>
    %842 = vector.extract_strided_slice %840 {offsets = [0, 32], sizes = [8, 32], strides = [1, 1]} : vector<8x128xf32> to vector<8x32xf32>
    %843 = vector.extract_strided_slice %840 {offsets = [0, 64], sizes = [8, 32], strides = [1, 1]} : vector<8x128xf32> to vector<8x32xf32>
    %cst_276 = arith.constant 2.000000e+00 : f32
    %844 = vector.broadcast %cst_276 : f32 to vector<8x32xf32>
    %845 = arith.mulf %844, %843 : vector<8x32xf32>
    %cst_277 = arith.constant 1.000000e+00 : f32
    %846 = vector.broadcast %cst_277 : f32 to vector<8x32xf32>
    %847 = arith.subf %845, %846 : vector<8x32xf32>
    %848 = vector.extract_strided_slice %840 {offsets = [0, 96], sizes = [8, 32], strides = [1, 1]} : vector<8x128xf32> to vector<8x32xf32>
    %849 = arith.mulf %842, %691 : vector<8x32xf32>
    %850 = arith.mulf %841, %847 : vector<8x32xf32>
    %851 = arith.addf %849, %850 : vector<8x32xf32>
    %852 = math.tanh %851 : vector<8x32xf32>
    %853 = arith.mulf %848, %852 : vector<8x32xf32>
    %c0_278 = arith.constant 0 : index
    %c0_279 = arith.constant 0 : index
    %c0_280 = arith.constant 0 : index
    %854 = vector.load %arg3[%c0_278, %c0_279, %c0_280] : memref<5x32x128xf32, #tpu.memory_space<vmem>>, vector<1x32x128xf32>
    %855 = vector.shape_cast %854 : vector<1x32x128xf32> to vector<32x128xf32>
    %cst_281 = arith.constant dense<0.000000e+00> : vector<8x128xf32>
    %856 = tpu.matmul %853, %855, %cst_281 {dimension_numbers = #tpu.dot_dimension_numbers<[1], [0], [0], [1], [0, 0, 1, 1], [], []>} : vector<8x32xf32>, vector<32x128xf32>, vector<8x128xf32> -> vector<8x128xf32>
    %857 = vector.extract_strided_slice %830 {offsets = [0, 128], sizes = [8, 128], strides = [1, 1]} : vector<8x768xf32> to vector<8x128xf32>
    %858 = arith.addf %856, %857 : vector<8x128xf32>
    %859 = vector.broadcast %12 : vector<1x128xf32> to vector<8x128xf32>
    %860 = arith.mulf %858, %859 : vector<8x128xf32>
    %861 = arith.negf %860 : vector<8x128xf32>
    %862 = math.exp %861 : vector<8x128xf32>
    %cst_282 = arith.constant 1.000000e+00 : f32
    %863 = vector.broadcast %cst_282 : f32 to vector<8x128xf32>
    %864 = arith.addf %863, %862 : vector<8x128xf32>
    %865 = arith.divf %863, %864 : vector<8x128xf32>
    %866 = vector.extract_strided_slice %865 {offsets = [0, 0], sizes = [8, 32], strides = [1, 1]} : vector<8x128xf32> to vector<8x32xf32>
    %867 = vector.extract_strided_slice %865 {offsets = [0, 32], sizes = [8, 32], strides = [1, 1]} : vector<8x128xf32> to vector<8x32xf32>
    %868 = vector.extract_strided_slice %865 {offsets = [0, 64], sizes = [8, 32], strides = [1, 1]} : vector<8x128xf32> to vector<8x32xf32>
    %cst_283 = arith.constant 2.000000e+00 : f32
    %869 = vector.broadcast %cst_283 : f32 to vector<8x32xf32>
    %870 = arith.mulf %869, %868 : vector<8x32xf32>
    %cst_284 = arith.constant 1.000000e+00 : f32
    %871 = vector.broadcast %cst_284 : f32 to vector<8x32xf32>
    %872 = arith.subf %870, %871 : vector<8x32xf32>
    %873 = vector.extract_strided_slice %865 {offsets = [0, 96], sizes = [8, 32], strides = [1, 1]} : vector<8x128xf32> to vector<8x32xf32>
    %874 = arith.mulf %867, %716 : vector<8x32xf32>
    %875 = arith.mulf %866, %872 : vector<8x32xf32>
    %876 = arith.addf %874, %875 : vector<8x32xf32>
    %877 = math.tanh %876 : vector<8x32xf32>
    %878 = arith.mulf %873, %877 : vector<8x32xf32>
    %c1_285 = arith.constant 1 : index
    %c0_286 = arith.constant 0 : index
    %c0_287 = arith.constant 0 : index
    %879 = vector.load %arg3[%c1_285, %c0_286, %c0_287] : memref<5x32x128xf32, #tpu.memory_space<vmem>>, vector<1x32x128xf32>
    %880 = vector.shape_cast %879 : vector<1x32x128xf32> to vector<32x128xf32>
    %cst_288 = arith.constant dense<0.000000e+00> : vector<8x128xf32>
    %881 = tpu.matmul %878, %880, %cst_288 {dimension_numbers = #tpu.dot_dimension_numbers<[1], [0], [0], [1], [0, 0, 1, 1], [], []>} : vector<8x32xf32>, vector<32x128xf32>, vector<8x128xf32> -> vector<8x128xf32>
    %882 = vector.extract_strided_slice %830 {offsets = [0, 256], sizes = [8, 128], strides = [1, 1]} : vector<8x768xf32> to vector<8x128xf32>
    %883 = arith.addf %881, %882 : vector<8x128xf32>
    %884 = vector.broadcast %12 : vector<1x128xf32> to vector<8x128xf32>
    %885 = arith.mulf %883, %884 : vector<8x128xf32>
    %886 = arith.negf %885 : vector<8x128xf32>
    %887 = math.exp %886 : vector<8x128xf32>
    %cst_289 = arith.constant 1.000000e+00 : f32
    %888 = vector.broadcast %cst_289 : f32 to vector<8x128xf32>
    %889 = arith.addf %888, %887 : vector<8x128xf32>
    %890 = arith.divf %888, %889 : vector<8x128xf32>
    %891 = vector.extract_strided_slice %890 {offsets = [0, 0], sizes = [8, 32], strides = [1, 1]} : vector<8x128xf32> to vector<8x32xf32>
    %892 = vector.extract_strided_slice %890 {offsets = [0, 32], sizes = [8, 32], strides = [1, 1]} : vector<8x128xf32> to vector<8x32xf32>
    %893 = vector.extract_strided_slice %890 {offsets = [0, 64], sizes = [8, 32], strides = [1, 1]} : vector<8x128xf32> to vector<8x32xf32>
    %cst_290 = arith.constant 2.000000e+00 : f32
    %894 = vector.broadcast %cst_290 : f32 to vector<8x32xf32>
    %895 = arith.mulf %894, %893 : vector<8x32xf32>
    %cst_291 = arith.constant 1.000000e+00 : f32
    %896 = vector.broadcast %cst_291 : f32 to vector<8x32xf32>
    %897 = arith.subf %895, %896 : vector<8x32xf32>
    %898 = vector.extract_strided_slice %890 {offsets = [0, 96], sizes = [8, 32], strides = [1, 1]} : vector<8x128xf32> to vector<8x32xf32>
    %899 = arith.mulf %892, %741 : vector<8x32xf32>
    %900 = arith.mulf %891, %897 : vector<8x32xf32>
    %901 = arith.addf %899, %900 : vector<8x32xf32>
    %902 = math.tanh %901 : vector<8x32xf32>
    %903 = arith.mulf %898, %902 : vector<8x32xf32>
    %c2_292 = arith.constant 2 : index
    %c0_293 = arith.constant 0 : index
    %c0_294 = arith.constant 0 : index
    %904 = vector.load %arg3[%c2_292, %c0_293, %c0_294] : memref<5x32x128xf32, #tpu.memory_space<vmem>>, vector<1x32x128xf32>
    %905 = vector.shape_cast %904 : vector<1x32x128xf32> to vector<32x128xf32>
    %cst_295 = arith.constant dense<0.000000e+00> : vector<8x128xf32>
    %906 = tpu.matmul %903, %905, %cst_295 {dimension_numbers = #tpu.dot_dimension_numbers<[1], [0], [0], [1], [0, 0, 1, 1], [], []>} : vector<8x32xf32>, vector<32x128xf32>, vector<8x128xf32> -> vector<8x128xf32>
    %907 = vector.extract_strided_slice %830 {offsets = [0, 384], sizes = [8, 128], strides = [1, 1]} : vector<8x768xf32> to vector<8x128xf32>
    %908 = arith.addf %906, %907 : vector<8x128xf32>
    %909 = vector.broadcast %12 : vector<1x128xf32> to vector<8x128xf32>
    %910 = arith.mulf %908, %909 : vector<8x128xf32>
    %911 = arith.negf %910 : vector<8x128xf32>
    %912 = math.exp %911 : vector<8x128xf32>
    %cst_296 = arith.constant 1.000000e+00 : f32
    %913 = vector.broadcast %cst_296 : f32 to vector<8x128xf32>
    %914 = arith.addf %913, %912 : vector<8x128xf32>
    %915 = arith.divf %913, %914 : vector<8x128xf32>
    %916 = vector.extract_strided_slice %915 {offsets = [0, 0], sizes = [8, 32], strides = [1, 1]} : vector<8x128xf32> to vector<8x32xf32>
    %917 = vector.extract_strided_slice %915 {offsets = [0, 32], sizes = [8, 32], strides = [1, 1]} : vector<8x128xf32> to vector<8x32xf32>
    %918 = vector.extract_strided_slice %915 {offsets = [0, 64], sizes = [8, 32], strides = [1, 1]} : vector<8x128xf32> to vector<8x32xf32>
    %cst_297 = arith.constant 2.000000e+00 : f32
    %919 = vector.broadcast %cst_297 : f32 to vector<8x32xf32>
    %920 = arith.mulf %919, %918 : vector<8x32xf32>
    %cst_298 = arith.constant 1.000000e+00 : f32
    %921 = vector.broadcast %cst_298 : f32 to vector<8x32xf32>
    %922 = arith.subf %920, %921 : vector<8x32xf32>
    %923 = vector.extract_strided_slice %915 {offsets = [0, 96], sizes = [8, 32], strides = [1, 1]} : vector<8x128xf32> to vector<8x32xf32>
    %924 = arith.mulf %917, %766 : vector<8x32xf32>
    %925 = arith.mulf %916, %922 : vector<8x32xf32>
    %926 = arith.addf %924, %925 : vector<8x32xf32>
    %927 = math.tanh %926 : vector<8x32xf32>
    %928 = arith.mulf %923, %927 : vector<8x32xf32>
    %c3_299 = arith.constant 3 : index
    %c0_300 = arith.constant 0 : index
    %c0_301 = arith.constant 0 : index
    %929 = vector.load %arg3[%c3_299, %c0_300, %c0_301] : memref<5x32x128xf32, #tpu.memory_space<vmem>>, vector<1x32x128xf32>
    %930 = vector.shape_cast %929 : vector<1x32x128xf32> to vector<32x128xf32>
    %cst_302 = arith.constant dense<0.000000e+00> : vector<8x128xf32>
    %931 = tpu.matmul %928, %930, %cst_302 {dimension_numbers = #tpu.dot_dimension_numbers<[1], [0], [0], [1], [0, 0, 1, 1], [], []>} : vector<8x32xf32>, vector<32x128xf32>, vector<8x128xf32> -> vector<8x128xf32>
    %932 = vector.extract_strided_slice %830 {offsets = [0, 512], sizes = [8, 128], strides = [1, 1]} : vector<8x768xf32> to vector<8x128xf32>
    %933 = arith.addf %931, %932 : vector<8x128xf32>
    %934 = vector.broadcast %12 : vector<1x128xf32> to vector<8x128xf32>
    %935 = arith.mulf %933, %934 : vector<8x128xf32>
    %936 = arith.negf %935 : vector<8x128xf32>
    %937 = math.exp %936 : vector<8x128xf32>
    %cst_303 = arith.constant 1.000000e+00 : f32
    %938 = vector.broadcast %cst_303 : f32 to vector<8x128xf32>
    %939 = arith.addf %938, %937 : vector<8x128xf32>
    %940 = arith.divf %938, %939 : vector<8x128xf32>
    %941 = vector.extract_strided_slice %940 {offsets = [0, 0], sizes = [8, 32], strides = [1, 1]} : vector<8x128xf32> to vector<8x32xf32>
    %942 = vector.extract_strided_slice %940 {offsets = [0, 32], sizes = [8, 32], strides = [1, 1]} : vector<8x128xf32> to vector<8x32xf32>
    %943 = vector.extract_strided_slice %940 {offsets = [0, 64], sizes = [8, 32], strides = [1, 1]} : vector<8x128xf32> to vector<8x32xf32>
    %cst_304 = arith.constant 2.000000e+00 : f32
    %944 = vector.broadcast %cst_304 : f32 to vector<8x32xf32>
    %945 = arith.mulf %944, %943 : vector<8x32xf32>
    %cst_305 = arith.constant 1.000000e+00 : f32
    %946 = vector.broadcast %cst_305 : f32 to vector<8x32xf32>
    %947 = arith.subf %945, %946 : vector<8x32xf32>
    %948 = vector.extract_strided_slice %940 {offsets = [0, 96], sizes = [8, 32], strides = [1, 1]} : vector<8x128xf32> to vector<8x32xf32>
    %949 = arith.mulf %942, %791 : vector<8x32xf32>
    %950 = arith.mulf %941, %947 : vector<8x32xf32>
    %951 = arith.addf %949, %950 : vector<8x32xf32>
    %952 = math.tanh %951 : vector<8x32xf32>
    %953 = arith.mulf %948, %952 : vector<8x32xf32>
    %c4_306 = arith.constant 4 : index
    %c0_307 = arith.constant 0 : index
    %c0_308 = arith.constant 0 : index
    %954 = vector.load %arg3[%c4_306, %c0_307, %c0_308] : memref<5x32x128xf32, #tpu.memory_space<vmem>>, vector<1x32x128xf32>
    %955 = vector.shape_cast %954 : vector<1x32x128xf32> to vector<32x128xf32>
    %cst_309 = arith.constant dense<0.000000e+00> : vector<8x128xf32>
    %956 = tpu.matmul %953, %955, %cst_309 {dimension_numbers = #tpu.dot_dimension_numbers<[1], [0], [0], [1], [0, 0, 1, 1], [], []>} : vector<8x32xf32>, vector<32x128xf32>, vector<8x128xf32> -> vector<8x128xf32>
    %957 = vector.extract_strided_slice %830 {offsets = [0, 640], sizes = [8, 128], strides = [1, 1]} : vector<8x768xf32> to vector<8x128xf32>
    %958 = arith.addf %956, %957 : vector<8x128xf32>
    %959 = vector.broadcast %12 : vector<1x128xf32> to vector<8x128xf32>
    %960 = arith.mulf %958, %959 : vector<8x128xf32>
    %961 = arith.negf %960 : vector<8x128xf32>
    %962 = math.exp %961 : vector<8x128xf32>
    %cst_310 = arith.constant 1.000000e+00 : f32
    %963 = vector.broadcast %cst_310 : f32 to vector<8x128xf32>
    %964 = arith.addf %963, %962 : vector<8x128xf32>
    %965 = arith.divf %963, %964 : vector<8x128xf32>
    %966 = vector.extract_strided_slice %965 {offsets = [0, 0], sizes = [8, 32], strides = [1, 1]} : vector<8x128xf32> to vector<8x32xf32>
    %967 = vector.extract_strided_slice %965 {offsets = [0, 32], sizes = [8, 32], strides = [1, 1]} : vector<8x128xf32> to vector<8x32xf32>
    %968 = vector.extract_strided_slice %965 {offsets = [0, 64], sizes = [8, 32], strides = [1, 1]} : vector<8x128xf32> to vector<8x32xf32>
    %cst_311 = arith.constant 2.000000e+00 : f32
    %969 = vector.broadcast %cst_311 : f32 to vector<8x32xf32>
    %970 = arith.mulf %969, %968 : vector<8x32xf32>
    %cst_312 = arith.constant 1.000000e+00 : f32
    %971 = vector.broadcast %cst_312 : f32 to vector<8x32xf32>
    %972 = arith.subf %970, %971 : vector<8x32xf32>
    %973 = vector.extract_strided_slice %965 {offsets = [0, 96], sizes = [8, 32], strides = [1, 1]} : vector<8x128xf32> to vector<8x32xf32>
    %974 = arith.mulf %967, %816 : vector<8x32xf32>
    %975 = arith.mulf %966, %972 : vector<8x32xf32>
    %976 = arith.addf %974, %975 : vector<8x32xf32>
    %977 = math.tanh %976 : vector<8x32xf32>
    %978 = arith.mulf %973, %977 : vector<8x32xf32>
    %c0_313 = arith.constant 0 : index
    %c0_314 = arith.constant 0 : index
    %979 = vector.load %arg6[%c0_313, %c0_314] : memref<40x16xf32, #tpu.memory_space<vmem>>, vector<32x16xf32>
    %c32_315 = arith.constant 32 : index
    %c0_316 = arith.constant 0 : index
    %980 = vector.load %arg6[%c32_315, %c0_316] : memref<40x16xf32, #tpu.memory_space<vmem>>, vector<1x16xf32>
    %cst_317 = arith.constant dense<0.000000e+00> : vector<8x16xf32>
    %981 = tpu.matmul %978, %979, %cst_317 {dimension_numbers = #tpu.dot_dimension_numbers<[1], [0], [0], [1], [0, 0, 1, 1], [], []>} : vector<8x32xf32>, vector<32x16xf32>, vector<8x16xf32> -> vector<8x16xf32>
    %982 = vector.broadcast %980 : vector<1x16xf32> to vector<8x16xf32>
    %983 = arith.addf %981, %982 : vector<8x16xf32>
    %c0_318 = arith.constant 0 : index
    %c80 = arith.constant 80 : index
    %984 = vector.load %arg7[%c0_318, %c80] : memref<8x128xf32, #tpu.memory_space<vmem>>, vector<8x16xf32>
    tpu.vector_store %arg7[%c0_318, %c80], %983 {strides = array<i32>} : memref<8x128xf32, #tpu.memory_space<vmem>>, vector<8x16xf32>,
    %985 = tpu.concatenate %853, %878, %903, %928, %953, %978 in 1 : vector<8x32xf32>, vector<8x32xf32>, vector<8x32xf32>, vector<8x32xf32>, vector<8x32xf32>, vector<8x32xf32> -> vector<8x192xf32>
    %c0_319 = arith.constant 0 : index
    %c0_320 = arith.constant 0 : index
    %986 = vector.load %arg4[%c0_319, %c0_320] : memref<192x768xf32, #tpu.memory_space<vmem>>, vector<192x768xf32>
    %cst_321 = arith.constant dense<0.000000e+00> : vector<8x768xf32>
    %987 = tpu.matmul %985, %986, %cst_321 {dimension_numbers = #tpu.dot_dimension_numbers<[1], [0], [0], [1], [0, 0, 1, 1], [], []>} : vector<8x192xf32>, vector<192x768xf32>, vector<8x768xf32> -> vector<8x768xf32>
    %c0_322 = arith.constant 0 : index
    %c0_323 = arith.constant 0 : index
    %988 = vector.load %arg5[%c0_322, %c0_323] : memref<1x768xf32, #tpu.memory_space<vmem>>, vector<1x768xf32>
    %989 = vector.broadcast %988 : vector<1x768xf32> to vector<8x768xf32>
    %990 = arith.addf %987, %989 : vector<8x768xf32>
    %c48_324 = arith.constant 48 : index
    %c0_325 = arith.constant 0 : index
    %991 = vector.load %arg8[%c48_324, %c0_325] : memref<64x128xf32, #tpu.memory_space<vmem>>, vector<8x128xf32>
    %992 = vector.extract_strided_slice %990 {offsets = [0, 0], sizes = [8, 128], strides = [1, 1]} : vector<8x768xf32> to vector<8x128xf32>
    %993 = arith.addf %991, %992 : vector<8x128xf32>
    %994 = vector.broadcast %12 : vector<1x128xf32> to vector<8x128xf32>
    %995 = arith.mulf %993, %994 : vector<8x128xf32>
    %996 = arith.negf %995 : vector<8x128xf32>
    %997 = math.exp %996 : vector<8x128xf32>
    %cst_326 = arith.constant 1.000000e+00 : f32
    %998 = vector.broadcast %cst_326 : f32 to vector<8x128xf32>
    %999 = arith.addf %998, %997 : vector<8x128xf32>
    %1000 = arith.divf %998, %999 : vector<8x128xf32>
    %1001 = vector.extract_strided_slice %1000 {offsets = [0, 0], sizes = [8, 32], strides = [1, 1]} : vector<8x128xf32> to vector<8x32xf32>
    %1002 = vector.extract_strided_slice %1000 {offsets = [0, 32], sizes = [8, 32], strides = [1, 1]} : vector<8x128xf32> to vector<8x32xf32>
    %1003 = vector.extract_strided_slice %1000 {offsets = [0, 64], sizes = [8, 32], strides = [1, 1]} : vector<8x128xf32> to vector<8x32xf32>
    %cst_327 = arith.constant 2.000000e+00 : f32
    %1004 = vector.broadcast %cst_327 : f32 to vector<8x32xf32>
    %1005 = arith.mulf %1004, %1003 : vector<8x32xf32>
    %cst_328 = arith.constant 1.000000e+00 : f32
    %1006 = vector.broadcast %cst_328 : f32 to vector<8x32xf32>
    %1007 = arith.subf %1005, %1006 : vector<8x32xf32>
    %1008 = vector.extract_strided_slice %1000 {offsets = [0, 96], sizes = [8, 32], strides = [1, 1]} : vector<8x128xf32> to vector<8x32xf32>
    %1009 = arith.mulf %1002, %851 : vector<8x32xf32>
    %1010 = arith.mulf %1001, %1007 : vector<8x32xf32>
    %1011 = arith.addf %1009, %1010 : vector<8x32xf32>
    %1012 = math.tanh %1011 : vector<8x32xf32>
    %1013 = arith.mulf %1008, %1012 : vector<8x32xf32>
    %c0_329 = arith.constant 0 : index
    %c0_330 = arith.constant 0 : index
    %c0_331 = arith.constant 0 : index
    %1014 = vector.load %arg3[%c0_329, %c0_330, %c0_331] : memref<5x32x128xf32, #tpu.memory_space<vmem>>, vector<1x32x128xf32>
    %1015 = vector.shape_cast %1014 : vector<1x32x128xf32> to vector<32x128xf32>
    %cst_332 = arith.constant dense<0.000000e+00> : vector<8x128xf32>
    %1016 = tpu.matmul %1013, %1015, %cst_332 {dimension_numbers = #tpu.dot_dimension_numbers<[1], [0], [0], [1], [0, 0, 1, 1], [], []>} : vector<8x32xf32>, vector<32x128xf32>, vector<8x128xf32> -> vector<8x128xf32>
    %1017 = vector.extract_strided_slice %990 {offsets = [0, 128], sizes = [8, 128], strides = [1, 1]} : vector<8x768xf32> to vector<8x128xf32>
    %1018 = arith.addf %1016, %1017 : vector<8x128xf32>
    %1019 = vector.broadcast %12 : vector<1x128xf32> to vector<8x128xf32>
    %1020 = arith.mulf %1018, %1019 : vector<8x128xf32>
    %1021 = arith.negf %1020 : vector<8x128xf32>
    %1022 = math.exp %1021 : vector<8x128xf32>
    %cst_333 = arith.constant 1.000000e+00 : f32
    %1023 = vector.broadcast %cst_333 : f32 to vector<8x128xf32>
    %1024 = arith.addf %1023, %1022 : vector<8x128xf32>
    %1025 = arith.divf %1023, %1024 : vector<8x128xf32>
    %1026 = vector.extract_strided_slice %1025 {offsets = [0, 0], sizes = [8, 32], strides = [1, 1]} : vector<8x128xf32> to vector<8x32xf32>
    %1027 = vector.extract_strided_slice %1025 {offsets = [0, 32], sizes = [8, 32], strides = [1, 1]} : vector<8x128xf32> to vector<8x32xf32>
    %1028 = vector.extract_strided_slice %1025 {offsets = [0, 64], sizes = [8, 32], strides = [1, 1]} : vector<8x128xf32> to vector<8x32xf32>
    %cst_334 = arith.constant 2.000000e+00 : f32
    %1029 = vector.broadcast %cst_334 : f32 to vector<8x32xf32>
    %1030 = arith.mulf %1029, %1028 : vector<8x32xf32>
    %cst_335 = arith.constant 1.000000e+00 : f32
    %1031 = vector.broadcast %cst_335 : f32 to vector<8x32xf32>
    %1032 = arith.subf %1030, %1031 : vector<8x32xf32>
    %1033 = vector.extract_strided_slice %1025 {offsets = [0, 96], sizes = [8, 32], strides = [1, 1]} : vector<8x128xf32> to vector<8x32xf32>
    %1034 = arith.mulf %1027, %876 : vector<8x32xf32>
    %1035 = arith.mulf %1026, %1032 : vector<8x32xf32>
    %1036 = arith.addf %1034, %1035 : vector<8x32xf32>
    %1037 = math.tanh %1036 : vector<8x32xf32>
    %1038 = arith.mulf %1033, %1037 : vector<8x32xf32>
    %c1_336 = arith.constant 1 : index
    %c0_337 = arith.constant 0 : index
    %c0_338 = arith.constant 0 : index
    %1039 = vector.load %arg3[%c1_336, %c0_337, %c0_338] : memref<5x32x128xf32, #tpu.memory_space<vmem>>, vector<1x32x128xf32>
    %1040 = vector.shape_cast %1039 : vector<1x32x128xf32> to vector<32x128xf32>
    %cst_339 = arith.constant dense<0.000000e+00> : vector<8x128xf32>
    %1041 = tpu.matmul %1038, %1040, %cst_339 {dimension_numbers = #tpu.dot_dimension_numbers<[1], [0], [0], [1], [0, 0, 1, 1], [], []>} : vector<8x32xf32>, vector<32x128xf32>, vector<8x128xf32> -> vector<8x128xf32>
    %1042 = vector.extract_strided_slice %990 {offsets = [0, 256], sizes = [8, 128], strides = [1, 1]} : vector<8x768xf32> to vector<8x128xf32>
    %1043 = arith.addf %1041, %1042 : vector<8x128xf32>
    %1044 = vector.broadcast %12 : vector<1x128xf32> to vector<8x128xf32>
    %1045 = arith.mulf %1043, %1044 : vector<8x128xf32>
    %1046 = arith.negf %1045 : vector<8x128xf32>
    %1047 = math.exp %1046 : vector<8x128xf32>
    %cst_340 = arith.constant 1.000000e+00 : f32
    %1048 = vector.broadcast %cst_340 : f32 to vector<8x128xf32>
    %1049 = arith.addf %1048, %1047 : vector<8x128xf32>
    %1050 = arith.divf %1048, %1049 : vector<8x128xf32>
    %1051 = vector.extract_strided_slice %1050 {offsets = [0, 0], sizes = [8, 32], strides = [1, 1]} : vector<8x128xf32> to vector<8x32xf32>
    %1052 = vector.extract_strided_slice %1050 {offsets = [0, 32], sizes = [8, 32], strides = [1, 1]} : vector<8x128xf32> to vector<8x32xf32>
    %1053 = vector.extract_strided_slice %1050 {offsets = [0, 64], sizes = [8, 32], strides = [1, 1]} : vector<8x128xf32> to vector<8x32xf32>
    %cst_341 = arith.constant 2.000000e+00 : f32
    %1054 = vector.broadcast %cst_341 : f32 to vector<8x32xf32>
    %1055 = arith.mulf %1054, %1053 : vector<8x32xf32>
    %cst_342 = arith.constant 1.000000e+00 : f32
    %1056 = vector.broadcast %cst_342 : f32 to vector<8x32xf32>
    %1057 = arith.subf %1055, %1056 : vector<8x32xf32>
    %1058 = vector.extract_strided_slice %1050 {offsets = [0, 96], sizes = [8, 32], strides = [1, 1]} : vector<8x128xf32> to vector<8x32xf32>
    %1059 = arith.mulf %1052, %901 : vector<8x32xf32>
    %1060 = arith.mulf %1051, %1057 : vector<8x32xf32>
    %1061 = arith.addf %1059, %1060 : vector<8x32xf32>
    %1062 = math.tanh %1061 : vector<8x32xf32>
    %1063 = arith.mulf %1058, %1062 : vector<8x32xf32>
    %c2_343 = arith.constant 2 : index
    %c0_344 = arith.constant 0 : index
    %c0_345 = arith.constant 0 : index
    %1064 = vector.load %arg3[%c2_343, %c0_344, %c0_345] : memref<5x32x128xf32, #tpu.memory_space<vmem>>, vector<1x32x128xf32>
    %1065 = vector.shape_cast %1064 : vector<1x32x128xf32> to vector<32x128xf32>
    %cst_346 = arith.constant dense<0.000000e+00> : vector<8x128xf32>
    %1066 = tpu.matmul %1063, %1065, %cst_346 {dimension_numbers = #tpu.dot_dimension_numbers<[1], [0], [0], [1], [0, 0, 1, 1], [], []>} : vector<8x32xf32>, vector<32x128xf32>, vector<8x128xf32> -> vector<8x128xf32>
    %1067 = vector.extract_strided_slice %990 {offsets = [0, 384], sizes = [8, 128], strides = [1, 1]} : vector<8x768xf32> to vector<8x128xf32>
    %1068 = arith.addf %1066, %1067 : vector<8x128xf32>
    %1069 = vector.broadcast %12 : vector<1x128xf32> to vector<8x128xf32>
    %1070 = arith.mulf %1068, %1069 : vector<8x128xf32>
    %1071 = arith.negf %1070 : vector<8x128xf32>
    %1072 = math.exp %1071 : vector<8x128xf32>
    %cst_347 = arith.constant 1.000000e+00 : f32
    %1073 = vector.broadcast %cst_347 : f32 to vector<8x128xf32>
    %1074 = arith.addf %1073, %1072 : vector<8x128xf32>
    %1075 = arith.divf %1073, %1074 : vector<8x128xf32>
    %1076 = vector.extract_strided_slice %1075 {offsets = [0, 0], sizes = [8, 32], strides = [1, 1]} : vector<8x128xf32> to vector<8x32xf32>
    %1077 = vector.extract_strided_slice %1075 {offsets = [0, 32], sizes = [8, 32], strides = [1, 1]} : vector<8x128xf32> to vector<8x32xf32>
    %1078 = vector.extract_strided_slice %1075 {offsets = [0, 64], sizes = [8, 32], strides = [1, 1]} : vector<8x128xf32> to vector<8x32xf32>
    %cst_348 = arith.constant 2.000000e+00 : f32
    %1079 = vector.broadcast %cst_348 : f32 to vector<8x32xf32>
    %1080 = arith.mulf %1079, %1078 : vector<8x32xf32>
    %cst_349 = arith.constant 1.000000e+00 : f32
    %1081 = vector.broadcast %cst_349 : f32 to vector<8x32xf32>
    %1082 = arith.subf %1080, %1081 : vector<8x32xf32>
    %1083 = vector.extract_strided_slice %1075 {offsets = [0, 96], sizes = [8, 32], strides = [1, 1]} : vector<8x128xf32> to vector<8x32xf32>
    %1084 = arith.mulf %1077, %926 : vector<8x32xf32>
    %1085 = arith.mulf %1076, %1082 : vector<8x32xf32>
    %1086 = arith.addf %1084, %1085 : vector<8x32xf32>
    %1087 = math.tanh %1086 : vector<8x32xf32>
    %1088 = arith.mulf %1083, %1087 : vector<8x32xf32>
    %c3_350 = arith.constant 3 : index
    %c0_351 = arith.constant 0 : index
    %c0_352 = arith.constant 0 : index
    %1089 = vector.load %arg3[%c3_350, %c0_351, %c0_352] : memref<5x32x128xf32, #tpu.memory_space<vmem>>, vector<1x32x128xf32>
    %1090 = vector.shape_cast %1089 : vector<1x32x128xf32> to vector<32x128xf32>
    %cst_353 = arith.constant dense<0.000000e+00> : vector<8x128xf32>
    %1091 = tpu.matmul %1088, %1090, %cst_353 {dimension_numbers = #tpu.dot_dimension_numbers<[1], [0], [0], [1], [0, 0, 1, 1], [], []>} : vector<8x32xf32>, vector<32x128xf32>, vector<8x128xf32> -> vector<8x128xf32>
    %1092 = vector.extract_strided_slice %990 {offsets = [0, 512], sizes = [8, 128], strides = [1, 1]} : vector<8x768xf32> to vector<8x128xf32>
    %1093 = arith.addf %1091, %1092 : vector<8x128xf32>
    %1094 = vector.broadcast %12 : vector<1x128xf32> to vector<8x128xf32>
    %1095 = arith.mulf %1093, %1094 : vector<8x128xf32>
    %1096 = arith.negf %1095 : vector<8x128xf32>
    %1097 = math.exp %1096 : vector<8x128xf32>
    %cst_354 = arith.constant 1.000000e+00 : f32
    %1098 = vector.broadcast %cst_354 : f32 to vector<8x128xf32>
    %1099 = arith.addf %1098, %1097 : vector<8x128xf32>
    %1100 = arith.divf %1098, %1099 : vector<8x128xf32>
    %1101 = vector.extract_strided_slice %1100 {offsets = [0, 0], sizes = [8, 32], strides = [1, 1]} : vector<8x128xf32> to vector<8x32xf32>
    %1102 = vector.extract_strided_slice %1100 {offsets = [0, 32], sizes = [8, 32], strides = [1, 1]} : vector<8x128xf32> to vector<8x32xf32>
    %1103 = vector.extract_strided_slice %1100 {offsets = [0, 64], sizes = [8, 32], strides = [1, 1]} : vector<8x128xf32> to vector<8x32xf32>
    %cst_355 = arith.constant 2.000000e+00 : f32
    %1104 = vector.broadcast %cst_355 : f32 to vector<8x32xf32>
    %1105 = arith.mulf %1104, %1103 : vector<8x32xf32>
    %cst_356 = arith.constant 1.000000e+00 : f32
    %1106 = vector.broadcast %cst_356 : f32 to vector<8x32xf32>
    %1107 = arith.subf %1105, %1106 : vector<8x32xf32>
    %1108 = vector.extract_strided_slice %1100 {offsets = [0, 96], sizes = [8, 32], strides = [1, 1]} : vector<8x128xf32> to vector<8x32xf32>
    %1109 = arith.mulf %1102, %951 : vector<8x32xf32>
    %1110 = arith.mulf %1101, %1107 : vector<8x32xf32>
    %1111 = arith.addf %1109, %1110 : vector<8x32xf32>
    %1112 = math.tanh %1111 : vector<8x32xf32>
    %1113 = arith.mulf %1108, %1112 : vector<8x32xf32>
    %c4_357 = arith.constant 4 : index
    %c0_358 = arith.constant 0 : index
    %c0_359 = arith.constant 0 : index
    %1114 = vector.load %arg3[%c4_357, %c0_358, %c0_359] : memref<5x32x128xf32, #tpu.memory_space<vmem>>, vector<1x32x128xf32>
    %1115 = vector.shape_cast %1114 : vector<1x32x128xf32> to vector<32x128xf32>
    %cst_360 = arith.constant dense<0.000000e+00> : vector<8x128xf32>
    %1116 = tpu.matmul %1113, %1115, %cst_360 {dimension_numbers = #tpu.dot_dimension_numbers<[1], [0], [0], [1], [0, 0, 1, 1], [], []>} : vector<8x32xf32>, vector<32x128xf32>, vector<8x128xf32> -> vector<8x128xf32>
    %1117 = vector.extract_strided_slice %990 {offsets = [0, 640], sizes = [8, 128], strides = [1, 1]} : vector<8x768xf32> to vector<8x128xf32>
    %1118 = arith.addf %1116, %1117 : vector<8x128xf32>
    %1119 = vector.broadcast %12 : vector<1x128xf32> to vector<8x128xf32>
    %1120 = arith.mulf %1118, %1119 : vector<8x128xf32>
    %1121 = arith.negf %1120 : vector<8x128xf32>
    %1122 = math.exp %1121 : vector<8x128xf32>
    %cst_361 = arith.constant 1.000000e+00 : f32
    %1123 = vector.broadcast %cst_361 : f32 to vector<8x128xf32>
    %1124 = arith.addf %1123, %1122 : vector<8x128xf32>
    %1125 = arith.divf %1123, %1124 : vector<8x128xf32>
    %1126 = vector.extract_strided_slice %1125 {offsets = [0, 0], sizes = [8, 32], strides = [1, 1]} : vector<8x128xf32> to vector<8x32xf32>
    %1127 = vector.extract_strided_slice %1125 {offsets = [0, 32], sizes = [8, 32], strides = [1, 1]} : vector<8x128xf32> to vector<8x32xf32>
    %1128 = vector.extract_strided_slice %1125 {offsets = [0, 64], sizes = [8, 32], strides = [1, 1]} : vector<8x128xf32> to vector<8x32xf32>
    %cst_362 = arith.constant 2.000000e+00 : f32
    %1129 = vector.broadcast %cst_362 : f32 to vector<8x32xf32>
    %1130 = arith.mulf %1129, %1128 : vector<8x32xf32>
    %cst_363 = arith.constant 1.000000e+00 : f32
    %1131 = vector.broadcast %cst_363 : f32 to vector<8x32xf32>
    %1132 = arith.subf %1130, %1131 : vector<8x32xf32>
    %1133 = vector.extract_strided_slice %1125 {offsets = [0, 96], sizes = [8, 32], strides = [1, 1]} : vector<8x128xf32> to vector<8x32xf32>
    %1134 = arith.mulf %1127, %976 : vector<8x32xf32>
    %1135 = arith.mulf %1126, %1132 : vector<8x32xf32>
    %1136 = arith.addf %1134, %1135 : vector<8x32xf32>
    %1137 = math.tanh %1136 : vector<8x32xf32>
    %1138 = arith.mulf %1133, %1137 : vector<8x32xf32>
    %c0_364 = arith.constant 0 : index
    %c0_365 = arith.constant 0 : index
    %1139 = vector.load %arg6[%c0_364, %c0_365] : memref<40x16xf32, #tpu.memory_space<vmem>>, vector<32x16xf32>
    %c32_366 = arith.constant 32 : index
    %c0_367 = arith.constant 0 : index
    %1140 = vector.load %arg6[%c32_366, %c0_367] : memref<40x16xf32, #tpu.memory_space<vmem>>, vector<1x16xf32>
    %cst_368 = arith.constant dense<0.000000e+00> : vector<8x16xf32>
    %1141 = tpu.matmul %1138, %1139, %cst_368 {dimension_numbers = #tpu.dot_dimension_numbers<[1], [0], [0], [1], [0, 0, 1, 1], [], []>} : vector<8x32xf32>, vector<32x16xf32>, vector<8x16xf32> -> vector<8x16xf32>
    %1142 = vector.broadcast %1140 : vector<1x16xf32> to vector<8x16xf32>
    %1143 = arith.addf %1141, %1142 : vector<8x16xf32>
    %c0_369 = arith.constant 0 : index
    %c96 = arith.constant 96 : index
    %1144 = vector.load %arg7[%c0_369, %c96] : memref<8x128xf32, #tpu.memory_space<vmem>>, vector<8x16xf32>
    tpu.vector_store %arg7[%c0_369, %c96], %1143 {strides = array<i32>} : memref<8x128xf32, #tpu.memory_space<vmem>>, vector<8x16xf32>,
    %1145 = tpu.concatenate %1013, %1038, %1063, %1088, %1113, %1138 in 1 : vector<8x32xf32>, vector<8x32xf32>, vector<8x32xf32>, vector<8x32xf32>, vector<8x32xf32>, vector<8x32xf32> -> vector<8x192xf32>
    %c0_370 = arith.constant 0 : index
    %c0_371 = arith.constant 0 : index
    %1146 = vector.load %arg4[%c0_370, %c0_371] : memref<192x768xf32, #tpu.memory_space<vmem>>, vector<192x768xf32>
    %cst_372 = arith.constant dense<0.000000e+00> : vector<8x768xf32>
    %1147 = tpu.matmul %1145, %1146, %cst_372 {dimension_numbers = #tpu.dot_dimension_numbers<[1], [0], [0], [1], [0, 0, 1, 1], [], []>} : vector<8x192xf32>, vector<192x768xf32>, vector<8x768xf32> -> vector<8x768xf32>
    %c0_373 = arith.constant 0 : index
    %c0_374 = arith.constant 0 : index
    %1148 = vector.load %arg5[%c0_373, %c0_374] : memref<1x768xf32, #tpu.memory_space<vmem>>, vector<1x768xf32>
    %1149 = vector.broadcast %1148 : vector<1x768xf32> to vector<8x768xf32>
    %1150 = arith.addf %1147, %1149 : vector<8x768xf32>
    %c56 = arith.constant 56 : index
    %c0_375 = arith.constant 0 : index
    %1151 = vector.load %arg8[%c56, %c0_375] : memref<64x128xf32, #tpu.memory_space<vmem>>, vector<8x128xf32>
    %1152 = vector.extract_strided_slice %1150 {offsets = [0, 0], sizes = [8, 128], strides = [1, 1]} : vector<8x768xf32> to vector<8x128xf32>
    %1153 = arith.addf %1151, %1152 : vector<8x128xf32>
    %1154 = vector.broadcast %12 : vector<1x128xf32> to vector<8x128xf32>
    %1155 = arith.mulf %1153, %1154 : vector<8x128xf32>
    %1156 = arith.negf %1155 : vector<8x128xf32>
    %1157 = math.exp %1156 : vector<8x128xf32>
    %cst_376 = arith.constant 1.000000e+00 : f32
    %1158 = vector.broadcast %cst_376 : f32 to vector<8x128xf32>
    %1159 = arith.addf %1158, %1157 : vector<8x128xf32>
    %1160 = arith.divf %1158, %1159 : vector<8x128xf32>
    %1161 = vector.extract_strided_slice %1160 {offsets = [0, 0], sizes = [8, 32], strides = [1, 1]} : vector<8x128xf32> to vector<8x32xf32>
    %1162 = vector.extract_strided_slice %1160 {offsets = [0, 32], sizes = [8, 32], strides = [1, 1]} : vector<8x128xf32> to vector<8x32xf32>
    %1163 = vector.extract_strided_slice %1160 {offsets = [0, 64], sizes = [8, 32], strides = [1, 1]} : vector<8x128xf32> to vector<8x32xf32>
    %cst_377 = arith.constant 2.000000e+00 : f32
    %1164 = vector.broadcast %cst_377 : f32 to vector<8x32xf32>
    %1165 = arith.mulf %1164, %1163 : vector<8x32xf32>
    %cst_378 = arith.constant 1.000000e+00 : f32
    %1166 = vector.broadcast %cst_378 : f32 to vector<8x32xf32>
    %1167 = arith.subf %1165, %1166 : vector<8x32xf32>
    %1168 = vector.extract_strided_slice %1160 {offsets = [0, 96], sizes = [8, 32], strides = [1, 1]} : vector<8x128xf32> to vector<8x32xf32>
    %1169 = arith.mulf %1162, %1011 : vector<8x32xf32>
    %1170 = arith.mulf %1161, %1167 : vector<8x32xf32>
    %1171 = arith.addf %1169, %1170 : vector<8x32xf32>
    %1172 = math.tanh %1171 : vector<8x32xf32>
    %1173 = arith.mulf %1168, %1172 : vector<8x32xf32>
    %c0_379 = arith.constant 0 : index
    %c0_380 = arith.constant 0 : index
    %c0_381 = arith.constant 0 : index
    %1174 = vector.load %arg3[%c0_379, %c0_380, %c0_381] : memref<5x32x128xf32, #tpu.memory_space<vmem>>, vector<1x32x128xf32>
    %1175 = vector.shape_cast %1174 : vector<1x32x128xf32> to vector<32x128xf32>
    %cst_382 = arith.constant dense<0.000000e+00> : vector<8x128xf32>
    %1176 = tpu.matmul %1173, %1175, %cst_382 {dimension_numbers = #tpu.dot_dimension_numbers<[1], [0], [0], [1], [0, 0, 1, 1], [], []>} : vector<8x32xf32>, vector<32x128xf32>, vector<8x128xf32> -> vector<8x128xf32>
    %1177 = vector.extract_strided_slice %1150 {offsets = [0, 128], sizes = [8, 128], strides = [1, 1]} : vector<8x768xf32> to vector<8x128xf32>
    %1178 = arith.addf %1176, %1177 : vector<8x128xf32>
    %1179 = vector.broadcast %12 : vector<1x128xf32> to vector<8x128xf32>
    %1180 = arith.mulf %1178, %1179 : vector<8x128xf32>
    %1181 = arith.negf %1180 : vector<8x128xf32>
    %1182 = math.exp %1181 : vector<8x128xf32>
    %cst_383 = arith.constant 1.000000e+00 : f32
    %1183 = vector.broadcast %cst_383 : f32 to vector<8x128xf32>
    %1184 = arith.addf %1183, %1182 : vector<8x128xf32>
    %1185 = arith.divf %1183, %1184 : vector<8x128xf32>
    %1186 = vector.extract_strided_slice %1185 {offsets = [0, 0], sizes = [8, 32], strides = [1, 1]} : vector<8x128xf32> to vector<8x32xf32>
    %1187 = vector.extract_strided_slice %1185 {offsets = [0, 32], sizes = [8, 32], strides = [1, 1]} : vector<8x128xf32> to vector<8x32xf32>
    %1188 = vector.extract_strided_slice %1185 {offsets = [0, 64], sizes = [8, 32], strides = [1, 1]} : vector<8x128xf32> to vector<8x32xf32>
    %cst_384 = arith.constant 2.000000e+00 : f32
    %1189 = vector.broadcast %cst_384 : f32 to vector<8x32xf32>
    %1190 = arith.mulf %1189, %1188 : vector<8x32xf32>
    %cst_385 = arith.constant 1.000000e+00 : f32
    %1191 = vector.broadcast %cst_385 : f32 to vector<8x32xf32>
    %1192 = arith.subf %1190, %1191 : vector<8x32xf32>
    %1193 = vector.extract_strided_slice %1185 {offsets = [0, 96], sizes = [8, 32], strides = [1, 1]} : vector<8x128xf32> to vector<8x32xf32>
    %1194 = arith.mulf %1187, %1036 : vector<8x32xf32>
    %1195 = arith.mulf %1186, %1192 : vector<8x32xf32>
    %1196 = arith.addf %1194, %1195 : vector<8x32xf32>
    %1197 = math.tanh %1196 : vector<8x32xf32>
    %1198 = arith.mulf %1193, %1197 : vector<8x32xf32>
    %c1_386 = arith.constant 1 : index
    %c0_387 = arith.constant 0 : index
    %c0_388 = arith.constant 0 : index
    %1199 = vector.load %arg3[%c1_386, %c0_387, %c0_388] : memref<5x32x128xf32, #tpu.memory_space<vmem>>, vector<1x32x128xf32>
    %1200 = vector.shape_cast %1199 : vector<1x32x128xf32> to vector<32x128xf32>
    %cst_389 = arith.constant dense<0.000000e+00> : vector<8x128xf32>
    %1201 = tpu.matmul %1198, %1200, %cst_389 {dimension_numbers = #tpu.dot_dimension_numbers<[1], [0], [0], [1], [0, 0, 1, 1], [], []>} : vector<8x32xf32>, vector<32x128xf32>, vector<8x128xf32> -> vector<8x128xf32>
    %1202 = vector.extract_strided_slice %1150 {offsets = [0, 256], sizes = [8, 128], strides = [1, 1]} : vector<8x768xf32> to vector<8x128xf32>
    %1203 = arith.addf %1201, %1202 : vector<8x128xf32>
    %1204 = vector.broadcast %12 : vector<1x128xf32> to vector<8x128xf32>
    %1205 = arith.mulf %1203, %1204 : vector<8x128xf32>
    %1206 = arith.negf %1205 : vector<8x128xf32>
    %1207 = math.exp %1206 : vector<8x128xf32>
    %cst_390 = arith.constant 1.000000e+00 : f32
    %1208 = vector.broadcast %cst_390 : f32 to vector<8x128xf32>
    %1209 = arith.addf %1208, %1207 : vector<8x128xf32>
    %1210 = arith.divf %1208, %1209 : vector<8x128xf32>
    %1211 = vector.extract_strided_slice %1210 {offsets = [0, 0], sizes = [8, 32], strides = [1, 1]} : vector<8x128xf32> to vector<8x32xf32>
    %1212 = vector.extract_strided_slice %1210 {offsets = [0, 32], sizes = [8, 32], strides = [1, 1]} : vector<8x128xf32> to vector<8x32xf32>
    %1213 = vector.extract_strided_slice %1210 {offsets = [0, 64], sizes = [8, 32], strides = [1, 1]} : vector<8x128xf32> to vector<8x32xf32>
    %cst_391 = arith.constant 2.000000e+00 : f32
    %1214 = vector.broadcast %cst_391 : f32 to vector<8x32xf32>
    %1215 = arith.mulf %1214, %1213 : vector<8x32xf32>
    %cst_392 = arith.constant 1.000000e+00 : f32
    %1216 = vector.broadcast %cst_392 : f32 to vector<8x32xf32>
    %1217 = arith.subf %1215, %1216 : vector<8x32xf32>
    %1218 = vector.extract_strided_slice %1210 {offsets = [0, 96], sizes = [8, 32], strides = [1, 1]} : vector<8x128xf32> to vector<8x32xf32>
    %1219 = arith.mulf %1212, %1061 : vector<8x32xf32>
    %1220 = arith.mulf %1211, %1217 : vector<8x32xf32>
    %1221 = arith.addf %1219, %1220 : vector<8x32xf32>
    %1222 = math.tanh %1221 : vector<8x32xf32>
    %1223 = arith.mulf %1218, %1222 : vector<8x32xf32>
    %c2_393 = arith.constant 2 : index
    %c0_394 = arith.constant 0 : index
    %c0_395 = arith.constant 0 : index
    %1224 = vector.load %arg3[%c2_393, %c0_394, %c0_395] : memref<5x32x128xf32, #tpu.memory_space<vmem>>, vector<1x32x128xf32>
    %1225 = vector.shape_cast %1224 : vector<1x32x128xf32> to vector<32x128xf32>
    %cst_396 = arith.constant dense<0.000000e+00> : vector<8x128xf32>
    %1226 = tpu.matmul %1223, %1225, %cst_396 {dimension_numbers = #tpu.dot_dimension_numbers<[1], [0], [0], [1], [0, 0, 1, 1], [], []>} : vector<8x32xf32>, vector<32x128xf32>, vector<8x128xf32> -> vector<8x128xf32>
    %1227 = vector.extract_strided_slice %1150 {offsets = [0, 384], sizes = [8, 128], strides = [1, 1]} : vector<8x768xf32> to vector<8x128xf32>
    %1228 = arith.addf %1226, %1227 : vector<8x128xf32>
    %1229 = vector.broadcast %12 : vector<1x128xf32> to vector<8x128xf32>
    %1230 = arith.mulf %1228, %1229 : vector<8x128xf32>
    %1231 = arith.negf %1230 : vector<8x128xf32>
    %1232 = math.exp %1231 : vector<8x128xf32>
    %cst_397 = arith.constant 1.000000e+00 : f32
    %1233 = vector.broadcast %cst_397 : f32 to vector<8x128xf32>
    %1234 = arith.addf %1233, %1232 : vector<8x128xf32>
    %1235 = arith.divf %1233, %1234 : vector<8x128xf32>
    %1236 = vector.extract_strided_slice %1235 {offsets = [0, 0], sizes = [8, 32], strides = [1, 1]} : vector<8x128xf32> to vector<8x32xf32>
    %1237 = vector.extract_strided_slice %1235 {offsets = [0, 32], sizes = [8, 32], strides = [1, 1]} : vector<8x128xf32> to vector<8x32xf32>
    %1238 = vector.extract_strided_slice %1235 {offsets = [0, 64], sizes = [8, 32], strides = [1, 1]} : vector<8x128xf32> to vector<8x32xf32>
    %cst_398 = arith.constant 2.000000e+00 : f32
    %1239 = vector.broadcast %cst_398 : f32 to vector<8x32xf32>
    %1240 = arith.mulf %1239, %1238 : vector<8x32xf32>
    %cst_399 = arith.constant 1.000000e+00 : f32
    %1241 = vector.broadcast %cst_399 : f32 to vector<8x32xf32>
    %1242 = arith.subf %1240, %1241 : vector<8x32xf32>
    %1243 = vector.extract_strided_slice %1235 {offsets = [0, 96], sizes = [8, 32], strides = [1, 1]} : vector<8x128xf32> to vector<8x32xf32>
    %1244 = arith.mulf %1237, %1086 : vector<8x32xf32>
    %1245 = arith.mulf %1236, %1242 : vector<8x32xf32>
    %1246 = arith.addf %1244, %1245 : vector<8x32xf32>
    %1247 = math.tanh %1246 : vector<8x32xf32>
    %1248 = arith.mulf %1243, %1247 : vector<8x32xf32>
    %c3_400 = arith.constant 3 : index
    %c0_401 = arith.constant 0 : index
    %c0_402 = arith.constant 0 : index
    %1249 = vector.load %arg3[%c3_400, %c0_401, %c0_402] : memref<5x32x128xf32, #tpu.memory_space<vmem>>, vector<1x32x128xf32>
    %1250 = vector.shape_cast %1249 : vector<1x32x128xf32> to vector<32x128xf32>
    %cst_403 = arith.constant dense<0.000000e+00> : vector<8x128xf32>
    %1251 = tpu.matmul %1248, %1250, %cst_403 {dimension_numbers = #tpu.dot_dimension_numbers<[1], [0], [0], [1], [0, 0, 1, 1], [], []>} : vector<8x32xf32>, vector<32x128xf32>, vector<8x128xf32> -> vector<8x128xf32>
    %1252 = vector.extract_strided_slice %1150 {offsets = [0, 512], sizes = [8, 128], strides = [1, 1]} : vector<8x768xf32> to vector<8x128xf32>
    %1253 = arith.addf %1251, %1252 : vector<8x128xf32>
    %1254 = vector.broadcast %12 : vector<1x128xf32> to vector<8x128xf32>
    %1255 = arith.mulf %1253, %1254 : vector<8x128xf32>
    %1256 = arith.negf %1255 : vector<8x128xf32>
    %1257 = math.exp %1256 : vector<8x128xf32>
    %cst_404 = arith.constant 1.000000e+00 : f32
    %1258 = vector.broadcast %cst_404 : f32 to vector<8x128xf32>
    %1259 = arith.addf %1258, %1257 : vector<8x128xf32>
    %1260 = arith.divf %1258, %1259 : vector<8x128xf32>
    %1261 = vector.extract_strided_slice %1260 {offsets = [0, 0], sizes = [8, 32], strides = [1, 1]} : vector<8x128xf32> to vector<8x32xf32>
    %1262 = vector.extract_strided_slice %1260 {offsets = [0, 32], sizes = [8, 32], strides = [1, 1]} : vector<8x128xf32> to vector<8x32xf32>
    %1263 = vector.extract_strided_slice %1260 {offsets = [0, 64], sizes = [8, 32], strides = [1, 1]} : vector<8x128xf32> to vector<8x32xf32>
    %cst_405 = arith.constant 2.000000e+00 : f32
    %1264 = vector.broadcast %cst_405 : f32 to vector<8x32xf32>
    %1265 = arith.mulf %1264, %1263 : vector<8x32xf32>
    %cst_406 = arith.constant 1.000000e+00 : f32
    %1266 = vector.broadcast %cst_406 : f32 to vector<8x32xf32>
    %1267 = arith.subf %1265, %1266 : vector<8x32xf32>
    %1268 = vector.extract_strided_slice %1260 {offsets = [0, 96], sizes = [8, 32], strides = [1, 1]} : vector<8x128xf32> to vector<8x32xf32>
    %1269 = arith.mulf %1262, %1111 : vector<8x32xf32>
    %1270 = arith.mulf %1261, %1267 : vector<8x32xf32>
    %1271 = arith.addf %1269, %1270 : vector<8x32xf32>
    %1272 = math.tanh %1271 : vector<8x32xf32>
    %1273 = arith.mulf %1268, %1272 : vector<8x32xf32>
    %c4_407 = arith.constant 4 : index
    %c0_408 = arith.constant 0 : index
    %c0_409 = arith.constant 0 : index
    %1274 = vector.load %arg3[%c4_407, %c0_408, %c0_409] : memref<5x32x128xf32, #tpu.memory_space<vmem>>, vector<1x32x128xf32>
    %1275 = vector.shape_cast %1274 : vector<1x32x128xf32> to vector<32x128xf32>
    %cst_410 = arith.constant dense<0.000000e+00> : vector<8x128xf32>
    %1276 = tpu.matmul %1273, %1275, %cst_410 {dimension_numbers = #tpu.dot_dimension_numbers<[1], [0], [0], [1], [0, 0, 1, 1], [], []>} : vector<8x32xf32>, vector<32x128xf32>, vector<8x128xf32> -> vector<8x128xf32>
    %1277 = vector.extract_strided_slice %1150 {offsets = [0, 640], sizes = [8, 128], strides = [1, 1]} : vector<8x768xf32> to vector<8x128xf32>
    %1278 = arith.addf %1276, %1277 : vector<8x128xf32>
    %1279 = vector.broadcast %12 : vector<1x128xf32> to vector<8x128xf32>
    %1280 = arith.mulf %1278, %1279 : vector<8x128xf32>
    %1281 = arith.negf %1280 : vector<8x128xf32>
    %1282 = math.exp %1281 : vector<8x128xf32>
    %cst_411 = arith.constant 1.000000e+00 : f32
    %1283 = vector.broadcast %cst_411 : f32 to vector<8x128xf32>
    %1284 = arith.addf %1283, %1282 : vector<8x128xf32>
    %1285 = arith.divf %1283, %1284 : vector<8x128xf32>
    %1286 = vector.extract_strided_slice %1285 {offsets = [0, 0], sizes = [8, 32], strides = [1, 1]} : vector<8x128xf32> to vector<8x32xf32>
    %1287 = vector.extract_strided_slice %1285 {offsets = [0, 32], sizes = [8, 32], strides = [1, 1]} : vector<8x128xf32> to vector<8x32xf32>
    %1288 = vector.extract_strided_slice %1285 {offsets = [0, 64], sizes = [8, 32], strides = [1, 1]} : vector<8x128xf32> to vector<8x32xf32>
    %cst_412 = arith.constant 2.000000e+00 : f32
    %1289 = vector.broadcast %cst_412 : f32 to vector<8x32xf32>
    %1290 = arith.mulf %1289, %1288 : vector<8x32xf32>
    %cst_413 = arith.constant 1.000000e+00 : f32
    %1291 = vector.broadcast %cst_413 : f32 to vector<8x32xf32>
    %1292 = arith.subf %1290, %1291 : vector<8x32xf32>
    %1293 = vector.extract_strided_slice %1285 {offsets = [0, 96], sizes = [8, 32], strides = [1, 1]} : vector<8x128xf32> to vector<8x32xf32>
    %1294 = arith.mulf %1287, %1136 : vector<8x32xf32>
    %1295 = arith.mulf %1286, %1292 : vector<8x32xf32>
    %1296 = arith.addf %1294, %1295 : vector<8x32xf32>
    %1297 = math.tanh %1296 : vector<8x32xf32>
    %1298 = arith.mulf %1293, %1297 : vector<8x32xf32>
    %c0_414 = arith.constant 0 : index
    %c0_415 = arith.constant 0 : index
    %1299 = vector.load %arg6[%c0_414, %c0_415] : memref<40x16xf32, #tpu.memory_space<vmem>>, vector<32x16xf32>
    %c32_416 = arith.constant 32 : index
    %c0_417 = arith.constant 0 : index
    %1300 = vector.load %arg6[%c32_416, %c0_417] : memref<40x16xf32, #tpu.memory_space<vmem>>, vector<1x16xf32>
    %cst_418 = arith.constant dense<0.000000e+00> : vector<8x16xf32>
    %1301 = tpu.matmul %1298, %1299, %cst_418 {dimension_numbers = #tpu.dot_dimension_numbers<[1], [0], [0], [1], [0, 0, 1, 1], [], []>} : vector<8x32xf32>, vector<32x16xf32>, vector<8x16xf32> -> vector<8x16xf32>
    %1302 = vector.broadcast %1300 : vector<1x16xf32> to vector<8x16xf32>
    %1303 = arith.addf %1301, %1302 : vector<8x16xf32>
    %c0_419 = arith.constant 0 : index
    %c112 = arith.constant 112 : index
    %1304 = vector.load %arg7[%c0_419, %c112] : memref<8x128xf32, #tpu.memory_space<vmem>>, vector<8x16xf32>
    tpu.vector_store %arg7[%c0_419, %c112], %1303 {strides = array<i32>} : memref<8x128xf32, #tpu.memory_space<vmem>>, vector<8x16xf32>,
    return
  }
  func.func @transform_0(%arg0: i32) -> (i32, i32) {
    %c0_i32 = arith.constant 0 : i32
    %c0_i32_0 = arith.constant 0 : i32
    %c0_i32_1 = arith.constant 0 : i32
    return %c0_i32, %c0_i32_0 : i32, i32
  }
  func.func @transform_1(%arg0: i32) -> (i32, i32) {
    %c0_i32 = arith.constant 0 : i32
    %c0_i32_0 = arith.constant 0 : i32
    %c0_i32_1 = arith.constant 0 : i32
    return %c0_i32, %c0_i32_0 : i32, i32
  }
  func.func @transform_2(%arg0: i32) -> (i32, i32, i32) {
    %c0_i32 = arith.constant 0 : i32
    %c0_i32_0 = arith.constant 0 : i32
    %c0_i32_1 = arith.constant 0 : i32
    %c0_i32_2 = arith.constant 0 : i32
    return %c0_i32, %c0_i32_0, %c0_i32_1 : i32, i32, i32
  }
  func.func @transform_3(%arg0: i32) -> (i32, i32) {
    %c0_i32 = arith.constant 0 : i32
    %c0_i32_0 = arith.constant 0 : i32
    %c0_i32_1 = arith.constant 0 : i32
    return %c0_i32, %c0_i32_0 : i32, i32
  }
  func.func @transform_4(%arg0: i32) -> (i32, i32) {
    %c0_i32 = arith.constant 0 : i32
    %c0_i32_0 = arith.constant 0 : i32
    %c0_i32_1 = arith.constant 0 : i32
    return %c0_i32, %c0_i32_0 : i32, i32
  }
  func.func @transform_5(%arg0: i32) -> (i32, i32) {
    %c0_i32 = arith.constant 0 : i32
    %c0_i32_0 = arith.constant 0 : i32
    %c0_i32_1 = arith.constant 0 : i32
    return %c0_i32, %c0_i32_0 : i32, i32
  }
  func.func @transform_6(%arg0: i32) -> (i32, i32) {
    %c0_i32 = arith.constant 0 : i32
    %c0_i32_0 = arith.constant 0 : i32
    %c0_i32_1 = arith.constant 0 : i32
    return %c0_i32, %c0_i32_0 : i32, i32
  }
}

</mosaic_0001>

<bundles_post_ra>
// kernel: custom_lstm_forward.1
= control target key start
LH: loop header
LB: loop body
LE: loop exit
PB: predicated region body
PF: predicated region fallthrough
CT: control target
= control target key end

     0   :  { %v15581_v4 = vmov 0.0   ;;  %vm34_vm0 = vcmask 130048   ;;  %s15574_s0 = inlined_call_operand.vmem [shape: f32[64,16], index: 0, kind: input, shape index: {}]   ;;  %s15575_s1 = inlined_call_operand.vmem [shape: f32[16,128], index: 1, kind: input, shape index: {}]   ;;  %s15576_s2 = inlined_call_operand.vmem [shape: f32[5,32,128], index: 2, kind: input, shape index: {}]   ;;  %s15577_s3 = inlined_call_operand.vmem [shape: f32[192,768], index: 3, kind: input, shape index: {}]   ;;  %s15578_s4 = inlined_call_operand.vmem [shape: f32[1,768], index: 4, kind: input, shape index: {}]   ;;  %s15579_s5 = inlined_call_operand.vmem [shape: f32[40,16], index: 5, kind: input, shape index: {}]   ;;  %s15580_s6 = inlined_call_operand.hbm [shape: f32[8,128], index: 6, kind: output, shape index: {}]  }
   0x1   :  { %v269_v0 = vld [vmem:[%s15577_s3 + $0x2d8] sm:$0xff]  ;;  %v268_v1 = vld [vmem:[%s15577_s3 + $0x2d0] sm:$0xff]  ;;  %v263_v2 = vld [vmem:[%s15577_s3 + $0x2a8] sm:$0xff]  ;;  %422 = vmatprep.mubr.f32.mxu1 %v15581_v4 }
   0x2   :  { %358 = vmatprep.subr.mxu1 %v269_v0  ;;  %v262_v3 = vld [vmem:[%s15577_s3 + $0x2a0] sm:$0xff]  ;;  %v257_v5 = vld [vmem:[%s15577_s3 + $0x278] sm:$0xff]  ;;  %v256_v6 = vld [vmem:[%s15577_s3 + $0x270] sm:$0xff] }
   0x3   :  { %359 = vmatpush1.msra.mxu1 %v268_v1  ;;  %v251_v7 = vld [vmem:[%s15577_s3 + $0x248] sm:$0xff]  ;;  %v250_v8 = vld [vmem:[%s15577_s3 + $0x240] sm:$0xff]  ;;  %v245_v9 = vld [vmem:[%s15577_s3 + $0x218] sm:$0xff] }
   0x4   :  { %360 = vmatprep.subr.mxu1 %v263_v2  ;;  %v244_v10 = vld [vmem:[%s15577_s3 + $0x210] sm:$0xff]  ;;  %v239_v11 = vld [vmem:[%s15577_s3 + $0x1e8] sm:$0xff]  ;;  %v238_v12 = vld [vmem:[%s15577_s3 + $0x1e0] sm:$0xff] }
   0x5   :  { %361 = vmatpush1.msra.mxu1 %v262_v3  ;;  %v233_v13 = vld [vmem:[%s15577_s3 + $0x1b8] sm:$0xff]  ;;  %v232_v14 = vld [vmem:[%s15577_s3 + $0x1b0] sm:$0xff]  ;;  %v227_v15 = vld [vmem:[%s15577_s3 + $0x188] sm:$0xff] }
   0x6   :  { %362 = vmatprep.subr.mxu1 %v257_v5  ;;  %v226_v16 = vld [vmem:[%s15577_s3 + $0x180] sm:$0xff]  ;;  %v221_v17 = vld [vmem:[%s15577_s3 + $0x158] sm:$0xff]  ;;  %v33_v18 = vld [vmem:[%s15575_s1 + $0x8] sm:$0xff] }
   0x7   :  { %363 = vmatpush1.msra.mxu1 %v256_v6  ;;  %v220_v19 = vld [vmem:[%s15577_s3 + $0x150] sm:$0xff]  ;;  %9138 = vmatprep.subr.mxu0 %v33_v18  ;;  %v32_v20 = vld [vmem:[%s15575_s1] sm:$0xff]  ;;  %v215_v21 = vld [vmem:[%s15577_s3 + $0x128] sm:$0xff] }
   0x8   :  { %364 = vmatprep.subr.mxu1 %v251_v7  ;;  %9139 = vmatpush3.msra.mxu0 %v33_v18  ;;  %v24_v22 = vld [vmem:[%s15574_s0] sm:$0xff]  ;;  %v25_v24 = vld [vmem:[%s15574_s0 + $0x8] sm:$0xff] }
   0x9   :  { %365 = vmatpush1.msra.mxu1 %v250_v8  ;;  %v214_v23 = vld [vmem:[%s15577_s3 + $0x120] sm:$0xff]  ;;  %9140 = vmatprep.subr.mxu0 %v32_v20 }
   0xa   :  { %366 = vmatprep.subr.mxu1 %v245_v9 }
   0xb   :  { %367 = vmatpush1.msra.mxu1 %v244_v10 }
   0xc   :  { %368 = vmatprep.subr.mxu1 %v239_v11 }
   0xd   :  { %369 = vmatpush1.msra.mxu1 %v238_v12 }
   0xe   :  { %370 = vmatprep.subr.mxu1 %v233_v13 }
   0xf   :  { %371 = vmatpush1.msra.mxu1 %v232_v14 }
  0x10   :  { %372 = vmatprep.subr.mxu1 %v227_v15 }
  0x11   :  { %373 = vmatpush1.msra.mxu1 %v226_v16 }
  0x12   :  { %374 = vmatprep.subr.mxu1 %v221_v17 }
  0x13   :  { %11 = vsyncpa [#allocation4], 0  ;;  %375 = vmatpush1.msra.mxu1 %v220_v19  ;;  %v209_v25 = vld [vmem:[%s15577_s3 + $0xf8] sm:$0xff]  ;;  %9141 = vmatpush3.msra.mxu0 %v32_v20  ;;  %v208_v26 = vld [vmem:[%s15577_s3 + $0xf0] sm:$0xff]  ;;  %v172_v53 = vlaneseq  ;;  %v10004_v63 = vmov 1.0   ;;  %s10005_s28 = smov 64  }
  0x14   :  { %376 = vmatprep.subr.mxu1 %v215_v21  ;;  %9142 = vmatprep.mubr.msk.f32.mxu0 %vm34_vm0, %v24_v22  ;;  %v203_v27 = vld [vmem:[%s15577_s3 + $0xc8] sm:$0xff]  ;;  %v202_v28 = vld [vmem:[%s15577_s3 + $0xc0] sm:$0xff]  ;;  %v197_v29 = vld [vmem:[%s15577_s3 + $0x98] sm:$0xff]  ;;  %s10006_s29 = smov 32   ;;  %vm10007_vm4 = vmmov 0   ;;  %vm606_vm5 = vcmask 261120  }
  0x15   :  { %377 = vmatpush1.msra.mxu1 %v214_v23  ;;  %9143 = vmatmul.mubr.msk.f32.vlgmr.msra.gmra.mxu0 %vm34_vm0, %v25_v24  ;;  %v196_v30 = vld [vmem:[%s15577_s3 + $0x90] sm:$0xff]  ;;  %v191_v31 = vld [vmem:[%s15577_s3 + $0x68] sm:$0xff]  ;;  %v190_v32 = vld [vmem:[%s15577_s3 + $0x60] sm:$0xff]  ;;  %v10210_v54 = vshrl.u32 %v172_v53, 7  ;;  %v173_v55 = vand.u32 127, %v172_v53  ;;  %s10008_s18 = smov 96  }
  0x16   :  { %378 = vmatprep.subr.mxu1 %v209_v25  ;;  %v185_v33 = vld [vmem:[%s15577_s3 + $0x38] sm:$0xff]  ;;  %v184_v34 = vld [vmem:[%s15577_s3 + $0x30] sm:$0xff]  ;;  %v179_v35 = vld [vmem:[%s15577_s3 + $0x8] sm:$0xff]  ;;  %vm354_vm6 = vcmask 523264   ;;  %vm1227_vm7 = vcmask 785408   ;;  %s10009_s23 = smov 16  }
  0x17   :  { %379 = vmatpush1.msra.mxu1 %v208_v26  ;;  %v178_v36 = vld [vmem:[%s15577_s3] sm:$0xff]  ;;  %v317_v37 = vld [vmem:[%s15577_s3 + $0x458] sm:$0xff]  ;;  %v316_v38 = vld [vmem:[%s15577_s3 + $0x450] sm:$0xff]  ;;  %v10213_v56 = vsub.s32 0, %v10210_v54  ;;  %vm174_vm1 = vcmp.ge.s32.totalorder %v173_v55, 64  ;;  %vm175_vm2 = vcmp.lt.s32.totalorder %v173_v55, 96 }
  0x18   :  { %380 = vmatprep.subr.mxu1 %v203_v27  ;;  %v311_v39 = vld [vmem:[%s15577_s3 + $0x428] sm:$0xff]  ;;  %v310_v40 = vld [vmem:[%s15577_s3 + $0x420] sm:$0xff]  ;;  %v305_v41 = vld [vmem:[%s15577_s3 + $0x3f8] sm:$0xff]  ;;  %s10010_s25 = smov 48   ;;  %s10011_s26 = smov 80   ;;  %vm2263_vm8 = vcmask 261248  }
  0x19   :  { %381 = vmatpush1.msra.mxu1 %v202_v28  ;;  %v304_v42 = vld [vmem:[%s15577_s3 + $0x3f0] sm:$0xff]  ;;  %v299_v43 = vld [vmem:[%s15577_s3 + $0x3c8] sm:$0xff]  ;;  %v298_v44 = vld [vmem:[%s15577_s3 + $0x3c0] sm:$0xff]  ;;  %15603 = vst [vmem:[#allocation6_spill] sm:$0xff] %v10213_v56  ;;  %vm3313_vm9 = vcmask 392448   ;;  %vm4363_vm10 = vcmask 523648  }
  0x1a   :  { %382 = vmatprep.subr.mxu1 %v197_v29  ;;  %v293_v45 = vld [vmem:[%s15577_s3 + $0x398] sm:$0xff]  ;;  %v292_v46 = vld [vmem:[%s15577_s3 + $0x390] sm:$0xff]  ;;  %v287_v47 = vld [vmem:[%s15577_s3 + $0x368] sm:$0xff]  ;;  %vm5413_vm11 = vcmask 654848   ;;  %vm6463_vm12 = vcmask 786048   ;;  %vm7513_vm13 = vcmask 917248  }
  0x1b   :  { %383 = vmatpush1.msra.mxu1 %v196_v30  ;;  %v286_v48 = vld [vmem:[%s15577_s3 + $0x360] sm:$0xff]  ;;  %v281_v49 = vld [vmem:[%s15577_s3 + $0x338] sm:$0xff]  ;;  %v280_v50 = vld [vmem:[%s15577_s3 + $0x330] sm:$0xff]  ;;  %vm8563_vm14 = vcmask 1048448  }
  0x1c   :  { %384 = vmatprep.subr.mxu1 %v191_v31  ;;  %v275_v51 = vld [vmem:[%s15577_s3 + $0x308] sm:$0xff]  ;;  %v274_v52 = vld [vmem:[%s15577_s3 + $0x300] sm:$0xff]  ;;  %vm176_vm3 = vmand %vm174_vm1, %vm175_vm2 }
  0x1d   :  { %385 = vmatpush1.msra.mxu1 %v190_v32  ;;  %v10218_v57 = vld [vmem:[%s15578_s4] sm:$0x3f]  ;;  %v10224_v0 = vsel %vm176_vm3, 2.0, %v10004_v63  ;;  %v271_v15 = vld [vmem:[%s15577_s3 + $0x2e8] sm:$0xff]  ;;  %v265_v17 = vld [vmem:[%s15577_s3 + $0x2b8] sm:$0xff] }
  0x1e   :  { %386 = vmatprep.subr.mxu1 %v185_v33  ;;  %v327_v58 = vrot.slane %v10218_v57, %v10213_v56  ;;  %v270_v16 = vld [vmem:[%s15577_s3 + $0x2e0] sm:$0xff]  ;;  %429 = vmatprep.subr.mxu0 %v271_v15  ;;  %v264_v18 = vld [vmem:[%s15577_s3 + $0x2b0] sm:$0xff]  ;;  %v259_v19 = vld [vmem:[%s15577_s3 + $0x288] sm:$0xff] }
  0x1f   :  { %387 = vmatpush1.msra.mxu1 %v184_v34  ;;  %430 = vmatpush1.msra.mxu0 %v270_v16  ;;  %v258_v20 = vld [vmem:[%s15577_s3 + $0x280] sm:$0xff]  ;;  %v253_v21 = vld [vmem:[%s15577_s3 + $0x258] sm:$0xff]  ;;  %v252_v22 = vld [vmem:[%s15577_s3 + $0x250] sm:$0xff] }
  0x20   :  { %388 = vmatprep.subr.mxu1 %v179_v35  ;;  %431 = vmatprep.subr.mxu0 %v265_v17  ;;  %v247_v23 = vld [vmem:[%s15577_s3 + $0x228] sm:$0xff]  ;;  %v246_v24 = vld [vmem:[%s15577_s3 + $0x220] sm:$0xff]  ;;  %v241_v25 = vld [vmem:[%s15577_s3 + $0x1f8] sm:$0xff] }
  0x21   :  { %389 = vmatpush1.msra.mxu1 %v178_v36  ;;  %432 = vmatpush1.msra.mxu0 %v264_v18  ;;  %v240_v26 = vld [vmem:[%s15577_s3 + $0x1f0] sm:$0xff]  ;;  %v235_v28 = vld [vmem:[%s15577_s3 + $0x1c8] sm:$0xff]  ;;  %v234_v29 = vld [vmem:[%s15577_s3 + $0x1c0] sm:$0xff] }
  0x22   :  { %406 = vmatprep.subr.mxu1 %v317_v37  ;;  %433 = vmatprep.subr.mxu0 %v259_v19  ;;  %v26_v30 = vld [vmem:[%s15574_s0 + $0x10] sm:$0xff]  ;;  %v229_v31 = vld [vmem:[%s15577_s3 + $0x198] sm:$0xff]  ;;  %v28_v34 = vld [vmem:[%s15574_s0 + $0x20] sm:$0xff] }
  0x23   :  { %407 = vmatpush2.msra.mxu1 %v316_v38  ;;  %434 = vmatpush1.msra.mxu0 %v258_v20  ;;  %v27_v32 = vld [vmem:[%s15574_s0 + $0x18] sm:$0xff]  ;;  %v228_v33 = vld [vmem:[%s15577_s3 + $0x190] sm:$0xff]  ;;  %v223_v35 = vld [vmem:[%s15577_s3 + $0x168] sm:$0xff] }
  0x24   :  { %408 = vmatprep.subr.mxu1 %v311_v39  ;;  %435 = vmatprep.subr.mxu0 %v253_v21  ;;  %v29_v36 = vld [vmem:[%s15574_s0 + $0x28] sm:$0xff]  ;;  %v222_v37 = vld [vmem:[%s15577_s3 + $0x160] sm:$0xff]  ;;  %v30_v38 = vld [vmem:[%s15574_s0 + $0x30] sm:$0xff] }
  0x25   :  { %409 = vmatpush2.msra.mxu1 %v310_v40  ;;  %436 = vmatpush1.msra.mxu0 %v252_v22  ;;  %v217_v39 = vld [vmem:[%s15577_s3 + $0x138] sm:$0xff]  ;;  %v216_v40 = vld [vmem:[%s15577_s3 + $0x130] sm:$0xff]  ;;  %v319_v55 = vld [vmem:[%s15577_s3 + $0x468] sm:$0xff] }
  0x26   :  { %410 = vmatprep.subr.mxu1 %v305_v41  ;;  %437 = vmatprep.subr.mxu0 %v247_v23  ;;  %v211_v41 = vld [vmem:[%s15577_s3 + $0x108] sm:$0xff]  ;;  %v180_v53 = vld [vmem:[%s15577_s3 + $0x10] sm:$0xff]  ;;  %v306_v63 = vld [vmem:[%s15577_s3 + $0x400] sm:$0xff] }
  0x27   :  { %411 = vmatpush2.msra.mxu1 %v304_v42  ;;  %438 = vmatpush1.msra.mxu0 %v246_v24  ;;  %v31_v42 = vld [vmem:[%s15574_s0 + $0x38] sm:$0xff]  ;;  %v601_v15 = vld [vmem:[%s15576_s2 + $0x10] sm:$0xff]  ;;  %v600_v16 = vld [vmem:[%s15576_s2 + $0x8] sm:$0xff] }
  0x28   :  { %412 = vmatprep.subr.mxu1 %v299_v43  ;;  %439 = vmatprep.subr.mxu0 %v241_v25  ;;  %v210_v43 = vld [vmem:[%s15577_s3 + $0x100] sm:$0xff] }
  0x29   :  { %413 = vmatpush2.msra.mxu1 %v298_v44  ;;  %440 = vmatpush1.msra.mxu0 %v240_v26  ;;  %v205_v44 = vld [vmem:[%s15577_s3 + $0xd8] sm:$0xff]  ;;  %v599_v17 = vld [vmem:[%s15576_s2] sm:$0xff]  ;;  %v10448_v26 = vsub.s32 1, %v10210_v54 }
  0x2a   :  { %414 = vmatprep.subr.mxu1 %v293_v45  ;;  %9145 = vmatprep.mubr.msk.f32.mxu0 %vm34_vm0, %v26_v30  ;;  %v204_v45 = vld [vmem:[%s15577_s3 + $0xd0] sm:$0xff] }
  0x2b   :  { %415 = vmatpush2.msra.mxu1 %v292_v46  ;;  %441 = vmatprep.subr.mxu0 %v235_v28  ;;  %v199_v46 = vld [vmem:[%s15577_s3 + $0xa8] sm:$0xff]  ;;  %15612 = vst [vmem:[#allocation15_spill] sm:$0xff] %v10448_v26  ;;  %v331_v28 = vrot.slane %v10218_v57, %v10448_v26 }
  0x2c   :  { %416 = vmatprep.subr.mxu1 %v287_v47  ;;  %9146 = vmatmul.mubr.msk.f32.gmra.mxu0 %vm34_vm0, %v27_v32  ;;  %v198_v47 = vld [vmem:[%s15577_s3 + $0xa0] sm:$0xff] }
  0x2d   :  { %417 = vmatpush2.msra.mxu1 %v286_v48  ;;  %442 = vmatpush1.msra.mxu0 %v234_v29  ;;  %v193_v48 = vld [vmem:[%s15577_s3 + $0x78] sm:$0xff] }
  0x2e   :  { %418 = vmatprep.subr.mxu1 %v281_v49  ;;  %9148 = vmatprep.mubr.msk.f32.mxu0 %vm34_vm0, %v28_v34  ;;  %v192_v49 = vld [vmem:[%s15577_s3 + $0x70] sm:$0xff] }
  0x2f   :  { %419 = vmatpush2.msra.mxu1 %v280_v50  ;;  %443 = vmatprep.subr.mxu0 %v229_v31  ;;  %v187_v50 = vld [vmem:[%s15577_s3 + $0x48] sm:$0xff] }
  0x30   :  { %420 = vmatprep.subr.mxu1 %v275_v51  ;;  %444 = vmatpush1.msra.mxu0 %v228_v33  ;;  %v186_v51 = vld [vmem:[%s15577_s3 + $0x40] sm:$0xff] }
  0x31   :  { %421 = vmatpush2.msra.mxu1 %v274_v52  ;;  %445 = vmatprep.subr.mxu0 %v223_v35  ;;  %v181_v52 = vld [vmem:[%s15577_s3 + $0x18] sm:$0xff] }
  0x32   :  { %423 = vmatmul.mubr.f32.vlgmr.msra.gmra.mxu1 %v15581_v4  ;;  %9149 = vmatmul.mubr.msk.f32.gmra.mxu0 %vm34_vm0, %v29_v36 }
  0x33   :  { %564 = vmatprep.mubr.f32.mxu1 %v15581_v4  ;;  %446 = vmatpush1.msra.mxu0 %v222_v37 }
  0x34   :  { %9151 = vmatprep.mubr.msk.f32.mxu0 %vm34_vm0, %v30_v38  ;;  %447 = vmatprep.subr.mxu0 %v217_v39 }
  0x35   :  { %448 = vmatpush1.msra.mxu0 %v216_v40 }
  0x36   :  { %449 = vmatprep.subr.mxu0 %v211_v41  ;;  %9152 = vmatmul.mubr.msk.f32.gmra.mxu0 %vm34_vm0, %v31_v42 }
  0x37   :  { %450 = vmatpush1.msra.mxu0 %v210_v43  ;;  %493 = vmatprep.mubr.f32.mxu0 %v15581_v4 }
  0x38   :  { %451 = vmatprep.subr.mxu0 %v205_v44 }
  0x39   :  { %452 = vmatpush1.msra.mxu0 %v204_v45 }
  0x3a   :  { %453 = vmatprep.subr.mxu0 %v199_v46 }
  0x3b   :  { %454 = vmatpush1.msra.mxu0 %v198_v47  ;;  %v8595_v47 = vld [vmem:[%s15576_s2 + $0x38] sm:$0xff] }
  0x3c   :  { %455 = vmatprep.subr.mxu0 %v193_v48  ;;  %v8594_v48 = vld [vmem:[%s15576_s2 + $0x30] sm:$0xff] }
  0x3d   :  { %456 = vmatpush1.msra.mxu0 %v192_v49  ;;  %v8593_v49 = vld [vmem:[%s15576_s2 + $0x28] sm:$0xff] }
  0x3e   :  { %457 = vmatprep.subr.mxu0 %v187_v50  ;;  %v8592_v50 = vld [vmem:[%s15576_s2 + $0x20] sm:$0xff] }
  0x3f   :  { %458 = vmatpush1.msra.mxu0 %v186_v51 }
  0x40   :  { %459 = vmatprep.subr.mxu0 %v181_v52 }
  0x41   :  { %460 = vmatpush1.msra.mxu0 %v180_v53 }
  0x42   :  { %477 = vmatprep.subr.mxu0 %v319_v55 }
  0xd5   :  { %v10222_v59 = vpop.f32.mrf.mxu0 }
  0xd6   :  { %15604 = vst [vmem:[#allocation7_spill] sm:$0xff] %v10222_v59 }
  0xd7   :  { %v125_v62 = vpop.f32.mrf.mxu0 }
  0xec   :  { %v10435_v21 = vpop.f32.mrf.mxu0 }
  0xed   :  { %15606 = vst [vmem:[#allocation9_spill] sm:$0xff] %v10435_v21  ;;  %v10830_v21 = vld [vmem:[%s15577_s3 + $0x328] sm:$0xff] }
  0xee   :  { %v10437_v22 = vpop.f32.mrf.mxu0  ;;  %15624 = vst [vmem:[#allocation27_spill] sm:$0xff] %v10830_v21 }
  0xef   :  { %15607 = vst [vmem:[#allocation10_spill] sm:$0xff] %v10437_v22  ;;  %v10836_v22 = vld [vmem:[%s15577_s3 + $0x320] sm:$0xff] }
  0xf0   :  { %15625 = vst [vmem:[#allocation28_spill] sm:$0xff] %v10836_v22 }
  0xf2   :  { %v424_v60 = vpop.f32.mrf.mxu1  ;;  %v10439_v23 = vpop.f32.mrf.mxu0 }
  0xf3   :  { %v425_v61 = vadd.f32 %v424_v60, %v327_v58  ;;  %v318_v58 = vld [vmem:[%s15577_s3 + $0x460] sm:$0xff]  ;;  %v313_v60 = vld [vmem:[%s15577_s3 + $0x438] sm:$0xff]  ;;  %15608 = vst [vmem:[#allocation11_spill] sm:$0xff] %v10439_v23 }
  0xf4   :  { %478 = vmatpush2.msra.mxu0 %v318_v58  ;;  %v10441_v24 = vpop.f32.mrf.mxu0  ;;  %v426_v29 = vpop.f32.mrf.mxu1  ;;  %v10485_v58 = vsub.s32 2, %v10210_v54  ;;  %v10818_v23 = vld [vmem:[%s15577_s3 + $0x358] sm:$0xff] }
  0xf5   :  { %v572_v1 = vadd.f32 %v425_v61, %v125_v62  ;;  %v312_v61 = vld [vmem:[%s15577_s3 + $0x430] sm:$0xff]  ;;  %v307_v62 = vld [vmem:[%s15577_s3 + $0x408] sm:$0xff]  ;;  %479 = vmatprep.subr.mxu0 %v313_v60  ;;  %15609 = vst [vmem:[#allocation12_spill] sm:$0xff] %v10441_v24  ;;  %v427_v31 = vadd.f32 %v426_v29, %v331_v28  ;;  %15622 = vst [vmem:[#allocation25_spill] sm:$0xff] %v10818_v23 }
  0xf6   :  { %480 = vmatpush2.msra.mxu0 %v312_v61  ;;  %15614 = vst [vmem:[#allocation17_spill] sm:$0xff] %v10485_v58  ;;  %v335_v60 = vrot.slane %v10218_v57, %v10485_v58  ;;  %v10824_v24 = vld [vmem:[%s15577_s3 + $0x350] sm:$0xff] }
  0xf7   :  { %v573_v2 = vmul.f32 %v572_v1, %v10224_v0  ;;  %v301_v1 = vld [vmem:[%s15577_s3 + $0x3d8] sm:$0xff]  ;;  %481 = vmatprep.subr.mxu0 %v307_v62  ;;  %15623 = vst [vmem:[#allocation26_spill] sm:$0xff] %v10824_v24 }
  0xf8   :  { %482 = vmatpush2.msra.mxu0 %v306_v63 }
  0xf9   :  { %v8587_v3 = vmul.f32 -1.442695, %v573_v2  ;;  %v300_v2 = vld [vmem:[%s15577_s3 + $0x3d0] sm:$0xff]  ;;  %483 = vmatprep.subr.mxu0 %v301_v1 }
  0xfa   :  { %484 = vmatpush2.msra.mxu0 %v300_v2 }
  0xfb   :  { %9693 = vpow2.f32 %v8587_v3  ;;  %v295_v3 = vld [vmem:[%s15577_s3 + $0x3a8] sm:$0xff] }
  0xfc   :  { %485 = vmatprep.subr.mxu0 %v295_v3 }
 0x108   :  { %v9694_v5 = vpop.eup %9693 }
 0x109   :  { %v577_v6 = vadd.f32 1.0, %v9694_v5  ;;  %v294_v5 = vld [vmem:[%s15577_s3 + $0x3a0] sm:$0xff] }
 0x10a   :  { %486 = vmatpush2.msra.mxu0 %v294_v5 }
 0x10b   :  { %9695 = vrcp.f32 %v577_v6  ;;  %v289_v6 = vld [vmem:[%s15577_s3 + $0x378] sm:$0xff] }
 0x10c   :  { %487 = vmatprep.subr.mxu0 %v289_v6 }
 0x118   :  { %v10227_v7 = vpop.eup %9695 }
 0x119   :  { %v580_v8 = vmul.f32 2.0, %v10227_v7  ;;  %v582_v12 = vmul.f32 0.0, %v10227_v7 }
 0x11b   :  { %v8588_v9 = vadd.f32 -1.0, %v580_v8  ;;  %v288_v8 = vld [vmem:[%s15577_s3 + $0x370] sm:$0xff] }
 0x11c   :  { %488 = vmatpush2.msra.mxu0 %v288_v8 }
 0x11d   :  { %584 = vrot.lane.b32.xlu0 %v8588_v9, %s10005_s28  ;;  %v283_v9 = vld [vmem:[%s15577_s3 + $0x348] sm:$0xff] }
 0x11e   :  { %489 = vmatprep.subr.mxu0 %v283_v9 }
 0x18f   :  { %v585_v10 = vpop.permute.xlu0 %584 }
 0x190   :  { %v587_v11 = vmul.f32 %v10227_v7, %v585_v10  ;;  %v282_v10 = vld [vmem:[%s15577_s3 + $0x340] sm:$0xff] }
 0x191   :  { %490 = vmatpush2.msra.mxu0 %v282_v10 }
 0x192   :  { %589 = vrot.lane.b32.xlu0 %v587_v11, %s10006_s29  ;;  %v277_v11 = vld [vmem:[%s15577_s3 + $0x318] sm:$0xff] }
 0x193   :  { %491 = vmatprep.subr.mxu0 %v277_v11 }
 0x204   :  { %v590_v13 = vpop.permute.xlu0 %589 }
 0x205   :  { %v10234_v14 = vadd.f32 %v590_v13, %v582_v12  ;;  %v276_v12 = vld [vmem:[%s15577_s3 + $0x310] sm:$0xff]  ;;  %v602_v13 = vld [vmem:[%s15576_s2 + $0x18] sm:$0xff] }
 0x206   :  { %492 = vmatpush2.msra.mxu0 %v276_v12 }
 0x207   :  { %15605 = vst [vmem:[#allocation8_spill] sm:$0xff] %v10234_v14  ;;  %9697 = vtanh.f32 %v10234_v14  ;;  %494 = vmatmul.mubr.f32.vlgmr.msra.gmra.mxu0 %v15581_v4  ;;  %9154 = vmatprep.subr.mxu0 %v15581_v4 }
 0x208   :  { %9155 = vmatpush3.msra.mxu0 %v602_v13  ;;  %9162 = vmatprep.mubr.msk.f32.mxu0 %vm10007_vm4, %v15581_v4 }
 0x209   :  { %9156 = vmatprep.subr.mxu0 %v15581_v4 }
 0x20a   :  { %9157 = vmatpush3.msra.mxu0 %v601_v15 }
 0x20b   :  { %9158 = vmatprep.subr.mxu0 %v15581_v4 }
 0x20c   :  { %9159 = vmatpush3.msra.mxu0 %v600_v16 }
 0x20d   :  { %9160 = vmatprep.subr.mxu0 %v15581_v4 }
 0x20e   :  { %9161 = vmatpush3.msra.mxu0 %v599_v17  ;;  %v8602_v17 = vld [vmem:[%s15576_s2 + $0x58] sm:$0xff] }
 0x20f   :  { %9165 = vmatprep.subr.mxu0 %v15581_v4 }
 0x214   :  { %v9698_v27 = vpop.eup %9697 }
 0x215   :  { %595 = vrot.lane.b32.xlu1 %v9698_v27, %s10005_s28 }
 0x287   :  { %v596_v18 = vpop.permute.xlu1 %595 }
 0x288   :  { %v598_v19 = vmul.f32 %v10227_v7, %v596_v18  ;;  %v10443_v7 = vpop.f32.mrf.mxu0  ;;  %v8601_v18 = vld [vmem:[%s15576_s2 + $0x50] sm:$0xff] }
 0x289   :  { %15610 = vst [vmem:[#allocation13_spill] sm:$0xff] %v10443_v7  ;;  %v10806_v7 = vld [vmem:[%s15577_s3 + $0x388] sm:$0xff] }
 0x28a   :  { %604 = vrot.lane.b32.xlu1 %v598_v19, %s10006_s29  ;;  %v10445_v25 = vpop.f32.mrf.mxu0  ;;  %v8600_v19 = vld [vmem:[%s15576_s2 + $0x48] sm:$0xff]  ;;  %15620 = vst [vmem:[#allocation23_spill] sm:$0xff] %v10806_v7 }
 0x28b   :  { %15611 = vst [vmem:[#allocation14_spill] sm:$0xff] %v10445_v25  ;;  %v10812_v25 = vld [vmem:[%s15577_s3 + $0x380] sm:$0xff] }
 0x28c   :  { %15621 = vst [vmem:[#allocation24_spill] sm:$0xff] %v10812_v25 }
 0x2c7   :  { %v495_v27 = vpop.f32.mrf.mxu0 }
 0x2c8   :  { %v496_v61 = vadd.f32 %v495_v27, %v335_v60  ;;  %v8599_v27 = vld [vmem:[%s15576_s2 + $0x40] sm:$0xff] }
 0x2c9   :  { %v10452_v30 = vpop.f32.mrf.mxu0  ;;  %v10555_v60 = vld [vmem:[%s15577_s3 + $0x2c0] sm:$0xff] }
 0x2fc   :  { %v10429_v20 = vpop.permute.xlu1 %604 }
 0x2fd   :  { %9163 = vmatmul.mubr.msk.f32.vlgmr.msra.gmra.mxu0 %vm606_vm5, %v10429_v20 }
 0x2fe   :  { %9173 = vmatprep.mubr.msk.f32.mxu0 %vm10007_vm4, %v15581_v4  ;;  %9166 = vmatpush3.msra.mxu0 %v8595_v47 }
 0x2ff   :  { %9167 = vmatprep.subr.mxu0 %v15581_v4 }
 0x300   :  { %9168 = vmatpush3.msra.mxu0 %v8594_v48 }
 0x301   :  { %9169 = vmatprep.subr.mxu0 %v15581_v4 }
 0x302   :  { %9170 = vmatpush3.msra.mxu0 %v8593_v49 }
 0x303   :  { %9171 = vmatprep.subr.mxu0 %v15581_v4 }
 0x304   :  { %9172 = vmatpush3.msra.mxu0 %v8592_v50 }
 0x305   :  { %9176 = vmatprep.subr.mxu0 %v15581_v4 }
 0x3bd   :  { %v675_v32 = vpop.f32.mrf.mxu0 }
 0x3be   :  { %v676_v33 = vadd.f32 %v675_v32, %v427_v31 }
 0x3bf   :  { %v9164_v34 = vpop.f32.mrf.mxu0 }
 0x3c0   :  { %v679_v35 = vmul.f32 %v676_v33, %v10224_v0  ;;  %v10520_v33 = vsub.s32 3, %v10210_v54 }
 0x3c2   :  { %v8590_v36 = vmul.f32 -1.442695, %v679_v35  ;;  %15616 = vst [vmem:[#allocation19_spill] sm:$0xff] %v10520_v33  ;;  %v339_v34 = vrot.slane %v10218_v57, %v10520_v33 }
 0x3c4   :  { %9699 = vpow2.f32 %v8590_v36  ;;  %v498_v35 = vadd.f32 %v10452_v30, %v339_v34  ;;  %v8606_v34 = vld [vmem:[%s15576_s2 + $0x60] sm:$0xff] }
 0x3d1   :  { %v9700_v37 = vpop.eup %9699 }
 0x3d2   :  { %v683_v38 = vadd.f32 1.0, %v9700_v37 }
 0x3d4   :  { %9701 = vrcp.f32 %v683_v38 }
 0x3e1   :  { %v9702_v39 = vpop.eup %9701 }
 0x3e2   :  { %v686_v40 = vmul.f32 2.0, %v9702_v39  ;;  %v688_v44 = vmul.f32 0.0, %v9702_v39 }
 0x3e4   :  { %v8591_v41 = vadd.f32 -1.0, %v686_v40 }
 0x3e6   :  { %690 = vrot.lane.b32.xlu0 %v8591_v41, %s10005_s28 }
 0x458   :  { %v691_v42 = vpop.permute.xlu0 %690 }
 0x459   :  { %v693_v43 = vmul.f32 %v9702_v39, %v691_v42 }
 0x45b   :  { %695 = vrot.lane.b32.xlu1 %v693_v43, %s10006_s29 }
 0x4cd   :  { %v696_v45 = vpop.permute.xlu1 %695 }
 0x4ce   :  { %v10457_v46 = vadd.f32 %v696_v45, %v688_v44 }
 0x4d0   :  { %15613 = vst [vmem:[#allocation16_spill] sm:$0xff] %v10457_v46  ;;  %9703 = vtanh.f32 %v10457_v46  ;;  %v10851_v46 = vsub.s32 4, %v10210_v54 }
 0x4d2   :  { %v343_v26 = vrot.slane %v10218_v57, %v10851_v46 }
 0x4dd   :  { %v9704_v51 = vpop.eup %9703 }
 0x4de   :  { %701 = vrot.lane.b32.xlu0 %v9704_v51, %s10005_s28  ;;  %v10539_v51 = vld [vmem:[%s15577_s3 + $0x2f8] sm:$0xff] }
 0x4df   :  { %500 = vmatprep.subr.mxu1 %v10539_v51 }
 0x550   :  { %v702_v52 = vpop.permute.xlu0 %701 }
 0x551   :  { %v10477_v53 = vmul.f32 %v9702_v39, %v702_v52  ;;  %v10544_v52 = vld [vmem:[%s15577_s3 + $0x2f0] sm:$0xff] }
 0x552   :  { %501 = vmatpush1.msra.mxu1 %v10544_v52 }
 0x553   :  { %711 = vrot.lane.b32.xlu1 %v10477_v53, %s10006_s29 }
 0x5c5   :  { %v712_v55 = vpop.permute.xlu1 %711 }
 0x5c6   :  { %9174 = vmatmul.mubr.msk.f32.vlgmr.msra.gmra.mxu0 %vm606_vm5, %v712_v55  ;;  %v10549_v55 = vld [vmem:[%s15577_s3 + $0x2c8] sm:$0xff] }
 0x5c7   :  { %9184 = vmatprep.mubr.msk.f32.mxu0 %vm10007_vm4, %v15581_v4  ;;  %9177 = vmatpush3.msra.mxu0 %v8602_v17  ;;  %v8609_v17 = vld [vmem:[%s15576_s2 + $0x78] sm:$0xff] }
 0x5c8   :  { %9178 = vmatprep.subr.mxu0 %v15581_v4  ;;  %502 = vmatprep.subr.mxu1 %v10549_v55 }
 0x5c9   :  { %9179 = vmatpush3.msra.mxu0 %v8601_v18  ;;  %503 = vmatpush1.msra.mxu1 %v10555_v60  ;;  %v10649_v18 = vld [vmem:[%s15577_s3 + $0x148] sm:$0xff] }
 0x5ca   :  { %9180 = vmatprep.subr.mxu0 %v15581_v4 }
 0x5cb   :  { %9181 = vmatpush3.msra.mxu0 %v8600_v19  ;;  %v8608_v19 = vld [vmem:[%s15576_s2 + $0x70] sm:$0xff] }
 0x5cc   :  { %9182 = vmatprep.subr.mxu0 %v15581_v4 }
 0x5cd   :  { %9183 = vmatpush3.msra.mxu0 %v8599_v27  ;;  %v10658_v27 = vld [vmem:[%s15577_s3 + $0x140] sm:$0xff] }
 0x5ce   :  { %9187 = vmatprep.subr.mxu0 %v15581_v4 }
 0x686   :  { %v781_v62 = vpop.f32.mrf.mxu0 }
 0x687   :  { %v782_v63 = vadd.f32 %v781_v62, %v496_v61  ;;  %v10561_v61 = vld [vmem:[%s15577_s3 + $0x298] sm:$0xff]  ;;  %v10567_v62 = vld [vmem:[%s15577_s3 + $0x290] sm:$0xff] }
 0x688   :  { %v9175_v1 = vpop.f32.mrf.mxu0  ;;  %504 = vmatprep.subr.mxu1 %v10561_v61 }
 0x689   :  { %v785_v2 = vmul.f32 %v782_v63, %v10224_v0  ;;  %v10573_v63 = vld [vmem:[%s15577_s3 + $0x268] sm:$0xff]  ;;  %v10579_v1 = vld [vmem:[%s15577_s3 + $0x260] sm:$0xff]  ;;  %505 = vmatpush1.msra.mxu1 %v10567_v62 }
 0x68a   :  { %506 = vmatprep.subr.mxu1 %v10573_v63 }
 0x68b   :  { %v8597_v3 = vmul.f32 -1.442695, %v785_v2  ;;  %v10585_v2 = vld [vmem:[%s15577_s3 + $0x238] sm:$0xff]  ;;  %507 = vmatpush1.msra.mxu1 %v10579_v1 }
 0x68c   :  { %508 = vmatprep.subr.mxu1 %v10585_v2 }
 0x68d   :  { %9705 = vpow2.f32 %v8597_v3  ;;  %v10591_v3 = vld [vmem:[%s15577_s3 + $0x230] sm:$0xff] }
 0x68e   :  { %509 = vmatpush1.msra.mxu1 %v10591_v3 }
 0x69a   :  { %v9706_v5 = vpop.eup %9705 }
 0x69b   :  { %v789_v6 = vadd.f32 1.0, %v9706_v5  ;;  %v10597_v5 = vld [vmem:[%s15577_s3 + $0x208] sm:$0xff] }
 0x69c   :  { %510 = vmatprep.subr.mxu1 %v10597_v5 }
 0x69d   :  { %9707 = vrcp.f32 %v789_v6  ;;  %v10603_v6 = vld [vmem:[%s15577_s3 + $0x200] sm:$0xff] }
 0x69e   :  { %511 = vmatpush1.msra.mxu1 %v10603_v6 }
 0x6aa   :  { %v9708_v8 = vpop.eup %9707 }
 0x6ab   :  { %v792_v9 = vmul.f32 2.0, %v9708_v8  ;;  %v794_v13 = vmul.f32 0.0, %v9708_v8 }
 0x6ad   :  { %v8598_v10 = vadd.f32 -1.0, %v792_v9  ;;  %v10609_v9 = vld [vmem:[%s15577_s3 + $0x1d8] sm:$0xff] }
 0x6ae   :  { %512 = vmatprep.subr.mxu1 %v10609_v9 }
 0x6af   :  { %796 = vrot.lane.b32.xlu0 %v8598_v10, %s10005_s28  ;;  %v10616_v10 = vld [vmem:[%s15577_s3 + $0x1d0] sm:$0xff] }
 0x6b0   :  { %513 = vmatpush1.msra.mxu1 %v10616_v10 }
 0x721   :  { %v797_v11 = vpop.permute.xlu0 %796 }
 0x722   :  { %v799_v12 = vmul.f32 %v9708_v8, %v797_v11  ;;  %v10622_v11 = vld [vmem:[%s15577_s3 + $0x1a8] sm:$0xff] }
 0x723   :  { %514 = vmatprep.subr.mxu1 %v10622_v11 }
 0x724   :  { %801 = vrot.lane.b32.xlu1 %v799_v12, %s10006_s29  ;;  %v10628_v12 = vld [vmem:[%s15577_s3 + $0x1a0] sm:$0xff] }
 0x725   :  { %515 = vmatpush1.msra.mxu1 %v10628_v12 }
 0x796   :  { %v802_v15 = vpop.permute.xlu1 %801 }
 0x797   :  { %v10492_v16 = vadd.f32 %v802_v15, %v794_v13  ;;  %v10634_v13 = vld [vmem:[%s15577_s3 + $0x178] sm:$0xff]  ;;  %v10640_v15 = vld [vmem:[%s15577_s3 + $0x170] sm:$0xff] }
 0x798   :  { %516 = vmatprep.subr.mxu1 %v10634_v13 }
 0x799   :  { %15615 = vst [vmem:[#allocation18_spill] sm:$0xff] %v10492_v16  ;;  %9709 = vtanh.f32 %v10492_v16  ;;  %517 = vmatpush1.msra.mxu1 %v10640_v15 }
 0x79a   :  { %518 = vmatprep.subr.mxu1 %v10649_v18 }
 0x79b   :  { %519 = vmatpush1.msra.mxu1 %v10658_v27 }
 0x7a6   :  { %v9710_v28 = vpop.eup %9709 }
 0x7a7   :  { %807 = vrot.lane.b32.xlu0 %v9710_v28, %s10005_s28  ;;  %v8607_v28 = vld [vmem:[%s15576_s2 + $0x68] sm:$0xff] }
 0x819   :  { %v808_v29 = vpop.permute.xlu0 %807 }
 0x81a   :  { %v10512_v31 = vmul.f32 %v9708_v8, %v808_v29  ;;  %v10668_v29 = vld [vmem:[%s15577_s3 + $0x118] sm:$0xff] }
 0x81b   :  { %520 = vmatprep.subr.mxu1 %v10668_v29 }
 0x81c   :  { %817 = vrot.lane.b32.xlu1 %v10512_v31, %s10006_s29 }
 0x88e   :  { %v818_v32 = vpop.permute.xlu1 %817 }
 0x88f   :  { %9185 = vmatmul.mubr.msk.f32.vlgmr.msra.gmra.mxu0 %vm606_vm5, %v818_v32  ;;  %v10674_v32 = vld [vmem:[%s15577_s3 + $0x110] sm:$0xff] }
 0x890   :  { %9195 = vmatprep.mubr.msk.f32.mxu0 %vm10007_vm4, %v15581_v4  ;;  %9188 = vmatpush3.msra.mxu0 %v8609_v17  ;;  %v10776_v17 = vld [vmem:[%s15577_s3 + $0x410] sm:$0xff] }
 0x891   :  { %9189 = vmatprep.subr.mxu0 %v15581_v4  ;;  %521 = vmatpush1.msra.mxu1 %v10674_v32 }
 0x892   :  { %9190 = vmatpush3.msra.mxu0 %v8608_v19  ;;  %v10782_v19 = vld [vmem:[%s15577_s3 + $0x3e8] sm:$0xff] }
 0x893   :  { %9191 = vmatprep.subr.mxu0 %v15581_v4 }
 0x894   :  { %9192 = vmatpush3.msra.mxu0 %v8607_v28  ;;  %v10788_v28 = vld [vmem:[%s15577_s3 + $0x3e0] sm:$0xff] }
 0x895   :  { %9193 = vmatprep.subr.mxu0 %v15581_v4 }
 0x896   :  { %9194 = vmatpush3.msra.mxu0 %v8606_v34  ;;  %v10794_v34 = vld [vmem:[%s15577_s3 + $0x3b8] sm:$0xff] }
 0x897   :  { %9198 = vmatprep.subr.mxu0 %v15581_v4  ;;  %15618 = vst [vmem:[#allocation21_spill] sm:$0xff] %v10794_v34  ;;  %v10800_v4 = vld [vmem:[%s15577_s3 + $0x3b0] sm:$0xff] }
 0x898   :  { %15619 = vst [vmem:[#allocation22_spill] sm:$0xff] %v10800_v4 }
 0x94f   :  { %v887_v36 = vpop.f32.mrf.mxu0 }
 0x950   :  { %v888_v37 = vadd.f32 %v887_v36, %v498_v35  ;;  %v10684_v35 = vld [vmem:[%s15577_s3 + $0xe8] sm:$0xff]  ;;  %v10690_v36 = vld [vmem:[%s15577_s3 + $0xe0] sm:$0xff] }
 0x951   :  { %v9186_v38 = vpop.f32.mrf.mxu0  ;;  %522 = vmatprep.subr.mxu1 %v10684_v35 }
 0x952   :  { %v891_v39 = vmul.f32 %v888_v37, %v10224_v0  ;;  %v10697_v37 = vld [vmem:[%s15577_s3 + $0xb8] sm:$0xff]  ;;  %v10703_v38 = vld [vmem:[%s15577_s3 + $0xb0] sm:$0xff]  ;;  %523 = vmatpush1.msra.mxu1 %v10690_v36 }
 0x953   :  { %524 = vmatprep.subr.mxu1 %v10697_v37 }
 0x954   :  { %v8604_v40 = vmul.f32 -1.442695, %v891_v39  ;;  %v10710_v39 = vld [vmem:[%s15577_s3 + $0x88] sm:$0xff]  ;;  %525 = vmatpush1.msra.mxu1 %v10703_v38 }
 0x955   :  { %526 = vmatprep.subr.mxu1 %v10710_v39 }
 0x956   :  { %9711 = vpow2.f32 %v8604_v40  ;;  %v10716_v40 = vld [vmem:[%s15577_s3 + $0x80] sm:$0xff] }
 0x957   :  { %527 = vmatpush1.msra.mxu1 %v10716_v40 }
 0x963   :  { %v9712_v41 = vpop.eup %9711 }
 0x964   :  { %v895_v42 = vadd.f32 1.0, %v9712_v41  ;;  %v10722_v41 = vld [vmem:[%s15577_s3 + $0x58] sm:$0xff] }
 0x965   :  { %528 = vmatprep.subr.mxu1 %v10722_v41 }
 0x966   :  { %9713 = vrcp.f32 %v895_v42  ;;  %v10728_v42 = vld [vmem:[%s15577_s3 + $0x50] sm:$0xff] }
 0x967   :  { %529 = vmatpush1.msra.mxu1 %v10728_v42 }
 0x973   :  { %v10526_v43 = vpop.eup %9713 }
 0x974   :  { %v898_v44 = vmul.f32 2.0, %v10526_v43  ;;  %v900_v48 = vmul.f32 0.0, %v10526_v43 }
 0x976   :  { %v8605_v45 = vadd.f32 -1.0, %v898_v44  ;;  %v10734_v44 = vld [vmem:[%s15577_s3 + $0x28] sm:$0xff] }
 0x977   :  { %530 = vmatprep.subr.mxu1 %v10734_v44 }
 0x978   :  { %902 = vrot.lane.b32.xlu0 %v8605_v45, %s10005_s28  ;;  %v10740_v45 = vld [vmem:[%s15577_s3 + $0x20] sm:$0xff] }
 0x979   :  { %531 = vmatpush1.msra.mxu1 %v10740_v45 }
 0x9ea   :  { %v903_v47 = vpop.permute.xlu0 %902 }
 0x9eb   :  { %v905_v30 = vmul.f32 %v10526_v43, %v903_v47  ;;  %v10746_v47 = vld [vmem:[%s15577_s3 + $0x478] sm:$0xff] }
 0x9ec   :  { %548 = vmatprep.subr.mxu1 %v10746_v47 }
 0x9ed   :  { %907 = vrot.lane.b32.xlu1 %v905_v30, %s10006_s29  ;;  %v10752_v30 = vld [vmem:[%s15577_s3 + $0x470] sm:$0xff] }
 0x9ee   :  { %549 = vmatpush2.msra.mxu1 %v10752_v30 }
 0xa5f   :  { %v908_v49 = vpop.permute.xlu1 %907 }
 0xa60   :  { %v10533_v50 = vadd.f32 %v908_v49, %v900_v48  ;;  %v10758_v48 = vld [vmem:[%s15577_s3 + $0x448] sm:$0xff]  ;;  %v10764_v49 = vld [vmem:[%s15577_s3 + $0x440] sm:$0xff] }
 0xa61   :  { %550 = vmatprep.subr.mxu1 %v10758_v48 }
 0xa62   :  { %15617 = vst [vmem:[#allocation20_spill] sm:$0xff] %v10533_v50  ;;  %9715 = vtanh.f32 %v10533_v50  ;;  %551 = vmatpush2.msra.mxu1 %v10764_v49  ;;  %v15626_v50 = vmov 0.0  }
 0xa6f   :  { %v9716_v8 = vpop.eup %9715 }
 0xa70   :  { %913 = vrot.lane.b32.xlu0 %v9716_v8, %s10005_s28  ;;  %v10770_v8 = vld [vmem:[%s15577_s3 + $0x418] sm:$0xff] }
 0xa71   :  { %552 = vmatprep.subr.mxu1 %v10770_v8 }
 0xa72   :  { %553 = vmatpush2.msra.mxu1 %v10776_v17 }
 0xa73   :  { %554 = vmatprep.subr.mxu1 %v10782_v19 }
 0xa74   :  { %555 = vmatpush2.msra.mxu1 %v10788_v28 }
 0xa75   :  { %556 = vmatprep.subr.mxu1 %v10794_v34 }
 0xa76   :  { %557 = vmatpush2.msra.mxu1 %v10800_v4 }
 0xa77   :  { %558 = vmatprep.subr.mxu1 %v10806_v7 }
 0xa78   :  { %559 = vmatpush2.msra.mxu1 %v10812_v25 }
 0xa79   :  { %560 = vmatprep.subr.mxu1 %v10818_v23 }
 0xa7a   :  { %561 = vmatpush2.msra.mxu1 %v10824_v24 }
 0xa7b   :  { %562 = vmatprep.subr.mxu1 %v10830_v21 }
 0xa7c   :  { %563 = vmatpush2.msra.mxu1 %v10836_v22 }
 0xa7d   :  { %565 = vmatmul.mubr.f32.vlgmr.msra.gmra.mxu1 %v15626_v50 }
 0xae2   :  { %v914_v33 = vpop.permute.xlu0 %913 }
 0xae3   :  { %v10843_v16 = vmul.f32 %v10526_v43, %v914_v33 }
 0xae5   :  { %923 = vrot.lane.b32.xlu1 %v10843_v16, %s10006_s29 }
 0xb3d   :  { %v566_v14 = vpop.f32.mrf.mxu1 }
 0xb3e   :  { %v567_v59 = vadd.f32 %v566_v14, %v343_v26 }
 0xb57   :  { %v924_v58 = vpop.permute.xlu1 %923 }
 0xb58   :  { %9196 = vmatmul.mubr.msk.f32.vlgmr.msra.gmra.mxu0 %vm606_vm5, %v924_v58 }
 0xb59   :  { %9206 = vmatprep.mubr.msk.f32.mxu0 %vm10007_vm4, %v15626_v50 }
 0xc18   :  { %v993_v56 = vpop.f32.mrf.mxu0 }
 0xc19   :  { %v994_v33 = vadd.f32 %v993_v56, %v567_v59  ;;  %v8616_v59 = vld [vmem:[%s15576_s2 + $0x98] sm:$0xff] }
 0xc1a   :  { %v9197_v43 = vpop.f32.mrf.mxu0  ;;  %9199 = vmatpush3.msra.mxu0 %v8616_v59 }
 0xc1b   :  { %v997_v22 = vmul.f32 %v994_v33, %v10224_v0  ;;  %9200 = vmatprep.subr.mxu0 %v15626_v50  ;;  %v10886_v33 = vsub.s32 5, %v10210_v54 }
 0xc1d   :  { %v8611_v21 = vmul.f32 -1.442695, %v997_v22  ;;  %v8613_v22 = vld [vmem:[%s15576_s2 + $0x80] sm:$0xff]  ;;  %v347_v43 = vrot.slane %v10218_v57, %v10886_v33 }
 0xc1f   :  { %9717 = vpow2.f32 %v8611_v21  ;;  %v8615_v21 = vld [vmem:[%s15576_s2 + $0x90] sm:$0xff] }
 0xc20   :  { %9201 = vmatpush3.msra.mxu0 %v8615_v21 }
 0xc21   :  { %9202 = vmatprep.subr.mxu0 %v15626_v50 }
 0xc2c   :  { %v9718_v24 = vpop.eup %9717 }
 0xc2d   :  { %v1001_v58 = vadd.f32 1.0, %v9718_v24 }
 0xc2f   :  { %9719 = vrcp.f32 %v1001_v58  ;;  %v568_v58 = vpop.f32.mrf.mxu1 }
 0xc3c   :  { %v9720_v23 = vpop.eup %9719 }
 0xc3d   :  { %v1004_v25 = vmul.f32 2.0, %v9720_v23  ;;  %v1006_v14 = vmul.f32 0.0, %v9720_v23 }
 0xc3f   :  { %v8612_v7 = vadd.f32 -1.0, %v1004_v25 }
 0xc41   :  { %1008 = vrot.lane.b32.xlu0 %v8612_v7, %s10005_s28 }
 0xcb3   :  { %v1009_v4 = vpop.permute.xlu0 %1008 }
 0xcb4   :  { %v1011_v34 = vmul.f32 %v9720_v23, %v1009_v4  ;;  %v8614_v4 = vld [vmem:[%s15576_s2 + $0x88] sm:$0xff] }
 0xcb5   :  { %9203 = vmatpush3.msra.mxu0 %v8614_v4 }
 0xcb6   :  { %1013 = vrot.lane.b32.xlu1 %v1011_v34, %s10006_s29  ;;  %9204 = vmatprep.subr.mxu0 %v15626_v50 }
 0xcb7   :  { %9205 = vmatpush3.msra.mxu0 %v8613_v22 }
 0xcb8   :  { %9209 = vmatprep.subr.mxu0 %v15626_v50 }
 0xd28   :  { %v1014_v26 = vpop.permute.xlu1 %1013 }
 0xd29   :  { %v10858_v56 = vadd.f32 %v1014_v26, %v1006_v14  ;;  %v569_v14 = vadd.f32 %v568_v58, %v347_v43 }
 0xd2b   :  { %9721 = vtanh.f32 %v10858_v56 }
 0xd38   :  { %v9722_v24 = vpop.eup %9721 }
 0xd39   :  { %1019 = vrot.lane.b32.xlu0 %v9722_v24, %s10005_s28 }
 0xdab   :  { %v1020_v7 = vpop.permute.xlu0 %1019 }
 0xdac   :  { %v1022_v25 = vmul.f32 %v9720_v23, %v1020_v7 }
 0xdae   :  { %1029 = vrot.lane.b32.xlu1 %v1022_v25, %s10006_s29 }
 0xe20   :  { %v10879_v34 = vpop.permute.xlu1 %1029 }
 0xe21   :  { %9207 = vmatmul.mubr.msk.f32.vlgmr.msra.gmra.mxu0 %vm606_vm5, %v10879_v34 }
 0xe22   :  { %9217 = vmatprep.mubr.msk.f32.mxu0 %vm10007_vm4, %v15626_v50 }
 0xee1   :  { %v1099_v26 = vpop.f32.mrf.mxu0 }
 0xee2   :  { %v1100_v23 = vadd.f32 %v1099_v26, %v569_v14 }
 0xee3   :  { %v9208_v59 = vpop.f32.mrf.mxu0 }
 0xee4   :  { %v1103_v21 = vmul.f32 %v1100_v23, %v10224_v0  ;;  %v1321_v23 = vld [vmem:[%s15577_s3 + $0x2d8] sm:$0xff]  ;;  %v1320_v59 = vld [vmem:[%s15577_s3 + $0x2d0] sm:$0xff] }
 0xee5   :  { %1409 = vmatprep.subr.mxu1 %v1321_v23  ;;  %v1285_v23 = vld [vmem:[%s15577_s3 + $0x1b8] sm:$0xff] }
 0xee6   :  { %v8618_v4 = vmul.f32 -1.442695, %v1103_v21  ;;  %v1315_v21 = vld [vmem:[%s15577_s3 + $0x2a8] sm:$0xff]  ;;  %1410 = vmatpush1.msra.mxu1 %v1320_v59  ;;  %v1284_v59 = vld [vmem:[%s15577_s3 + $0x1b0] sm:$0xff] }
 0xee7   :  { %1411 = vmatprep.subr.mxu1 %v1315_v21  ;;  %v1279_v21 = vld [vmem:[%s15577_s3 + $0x188] sm:$0xff] }
 0xee8   :  { %9723 = vpow2.f32 %v8618_v4  ;;  %v1309_v4 = vld [vmem:[%s15577_s3 + $0x278] sm:$0xff] }
 0xef5   :  { %v9724_v22 = vpop.eup %9723 }
 0xef6   :  { %v1107_v24 = vadd.f32 1.0, %v9724_v22  ;;  %v1308_v22 = vld [vmem:[%s15577_s3 + $0x270] sm:$0xff] }
 0xef8   :  { %9725 = vrcp.f32 %v1107_v24  ;;  %v1303_v24 = vld [vmem:[%s15577_s3 + $0x248] sm:$0xff] }
 0xf05   :  { %v10891_v7 = vpop.eup %9725 }
 0xf06   :  { %v1110_v54 = vmul.f32 2.0, %v10891_v7  ;;  %v1112_v58 = vmul.f32 0.0, %v10891_v7 }
 0xf08   :  { %v8619_v25 = vadd.f32 -1.0, %v1110_v54  ;;  %v1302_v54 = vld [vmem:[%s15577_s3 + $0x240] sm:$0xff] }
 0xf0a   :  { %1114 = vrot.lane.b32.xlu0 %v8619_v25, %s10005_s28  ;;  %v1297_v25 = vld [vmem:[%s15577_s3 + $0x218] sm:$0xff] }
 0xf7c   :  { %v1115_v57 = vpop.permute.xlu0 %1114 }
 0xf7d   :  { %v1117_v43 = vmul.f32 %v10891_v7, %v1115_v57  ;;  %v1296_v57 = vld [vmem:[%s15577_s3 + $0x210] sm:$0xff] }
 0xf7f   :  { %1119 = vrot.lane.b32.xlu1 %v1117_v43, %s10006_s29 }
 0xf83   :  { %1215 = vrot.lane.b32.xlu1 %v10477_v53, %s10005_s28  ;;  %v1314_v53 = vld [vmem:[%s15577_s3 + $0x2a0] sm:$0xff] }
 0xf84   :  { %1412 = vmatpush1.msra.mxu1 %v1314_v53  ;;  %v1278_v53 = vld [vmem:[%s15577_s3 + $0x180] sm:$0xff] }
 0xf85   :  { %1413 = vmatprep.subr.mxu1 %v1309_v4  ;;  %v1273_v4 = vld [vmem:[%s15577_s3 + $0x158] sm:$0xff] }
 0xf86   :  { %1414 = vmatpush1.msra.mxu1 %v1308_v22  ;;  %v1272_v22 = vld [vmem:[%s15577_s3 + $0x150] sm:$0xff] }
 0xf87   :  { %1415 = vmatprep.subr.mxu1 %v1303_v24  ;;  %v1266_v24 = vld [vmem:[%s15577_s3 + $0x120] sm:$0xff] }
 0xf88   :  { %1416 = vmatpush1.msra.mxu1 %v1302_v54  ;;  %v1261_v54 = vld [vmem:[%s15577_s3 + $0xf8] sm:$0xff] }
 0xf89   :  { %1417 = vmatprep.subr.mxu1 %v1297_v25  ;;  %v1260_v25 = vld [vmem:[%s15577_s3 + $0xf0] sm:$0xff] }
 0xf8a   :  { %1418 = vmatpush1.msra.mxu1 %v1296_v57  ;;  %v1255_v57 = vld [vmem:[%s15577_s3 + $0xc8] sm:$0xff] }
 0xff1   :  { %v1120_v14 = vpop.permute.xlu1 %1119 }
 0xff2   :  { %v10900_v26 = vadd.f32 %v1120_v14, %v1112_v58  ;;  %v1291_v58 = vld [vmem:[%s15577_s3 + $0x1e8] sm:$0xff]  ;;  %v1290_v14 = vld [vmem:[%s15577_s3 + $0x1e0] sm:$0xff] }
 0xff3   :  { %1419 = vmatprep.subr.mxu1 %v1291_v58  ;;  %v1249_v58 = vld [vmem:[%s15577_s3 + $0x98] sm:$0xff] }
 0xff4   :  { %9727 = vtanh.f32 %v10900_v26  ;;  %1420 = vmatpush1.msra.mxu1 %v1290_v14  ;;  %v1248_v14 = vld [vmem:[%s15577_s3 + $0x90] sm:$0xff] }
 0xff5   :  { %1421 = vmatprep.subr.mxu1 %v1285_v23  ;;  %v1243_v23 = vld [vmem:[%s15577_s3 + $0x68] sm:$0xff] }
 0xff6   :  { %1422 = vmatpush1.msra.mxu1 %v1284_v59  ;;  %v1242_v59 = vld [vmem:[%s15577_s3 + $0x60] sm:$0xff] }
 0xff7   :  { %1423 = vmatprep.subr.mxu1 %v1279_v21  ;;  %v1237_v21 = vld [vmem:[%s15577_s3 + $0x38] sm:$0xff] }
 0xff8   :  { %1424 = vmatpush1.msra.mxu1 %v1278_v53  ;;  %v1236_v53 = vld [vmem:[%s15577_s3 + $0x30] sm:$0xff] }
 0xff9   :  { %1425 = vmatprep.subr.mxu1 %v1273_v4  ;;  %v1231_v4 = vld [vmem:[%s15577_s3 + $0x8] sm:$0xff] }
 0xffa   :  { %1426 = vmatpush1.msra.mxu1 %v1272_v22  ;;  %v1230_v22 = vld [vmem:[%s15577_s3] sm:$0xff] }
0x1001   :  { %v9728_v43 = vpop.eup %9727 }
0x1002   :  { %1125 = vrot.lane.b32.xlu0 %v9728_v43, %s10005_s28  ;;  %v1254_v43 = vld [vmem:[%s15577_s3 + $0xc0] sm:$0xff] }
0x1006   :  { %1218 = vrot.lane.b32.xlu0 %v10512_v31, %s10008_s18  ;;  %v1267_v31 = vld [vmem:[%s15577_s3 + $0x128] sm:$0xff] }
0x1007   :  { %1427 = vmatprep.subr.mxu1 %v1267_v31  ;;  %v1369_v31 = vld [vmem:[%s15577_s3 + $0x458] sm:$0xff] }
0x1008   :  { %1428 = vmatpush1.msra.mxu1 %v1266_v24  ;;  %v1368_v24 = vld [vmem:[%s15577_s3 + $0x450] sm:$0xff] }
0x1009   :  { %1429 = vmatprep.subr.mxu1 %v1261_v54  ;;  %v1363_v54 = vld [vmem:[%s15577_s3 + $0x428] sm:$0xff] }
0x100a   :  { %1430 = vmatpush1.msra.mxu1 %v1260_v25  ;;  %v1362_v25 = vld [vmem:[%s15577_s3 + $0x420] sm:$0xff] }
0x100b   :  { %1431 = vmatprep.subr.mxu1 %v1255_v57  ;;  %v1357_v57 = vld [vmem:[%s15577_s3 + $0x3f8] sm:$0xff] }
0x100c   :  { %1432 = vmatpush1.msra.mxu1 %v1254_v43  ;;  %v1356_v43 = vld [vmem:[%s15577_s3 + $0x3f0] sm:$0xff] }
0x100d   :  { %1433 = vmatprep.subr.mxu1 %v1249_v58  ;;  %v1351_v58 = vld [vmem:[%s15577_s3 + $0x3c8] sm:$0xff] }
0x100e   :  { %1434 = vmatpush1.msra.mxu1 %v1248_v14  ;;  %v1350_v14 = vld [vmem:[%s15577_s3 + $0x3c0] sm:$0xff] }
0x100f   :  { %1435 = vmatprep.subr.mxu1 %v1243_v23  ;;  %v1345_v23 = vld [vmem:[%s15577_s3 + $0x398] sm:$0xff] }
0x1010   :  { %1436 = vmatpush1.msra.mxu1 %v1242_v59  ;;  %v1344_v59 = vld [vmem:[%s15577_s3 + $0x390] sm:$0xff] }
0x1011   :  { %1437 = vmatprep.subr.mxu1 %v1237_v21  ;;  %v1339_v21 = vld [vmem:[%s15577_s3 + $0x368] sm:$0xff] }
0x1012   :  { %1438 = vmatpush1.msra.mxu1 %v1236_v53  ;;  %v1338_v53 = vld [vmem:[%s15577_s3 + $0x360] sm:$0xff] }
0x1013   :  { %1439 = vmatprep.subr.mxu1 %v1231_v4  ;;  %v1333_v4 = vld [vmem:[%s15577_s3 + $0x338] sm:$0xff] }
0x1014   :  { %1440 = vmatpush1.msra.mxu1 %v1230_v22  ;;  %v1332_v22 = vld [vmem:[%s15577_s3 + $0x330] sm:$0xff] }
0x1015   :  { %1457 = vmatprep.subr.mxu1 %v1369_v31  ;;  %v1327_v31 = vld [vmem:[%s15577_s3 + $0x308] sm:$0xff] }
0x1016   :  { %1458 = vmatpush2.msra.mxu1 %v1368_v24  ;;  %v1326_v24 = vld [vmem:[%s15577_s3 + $0x300] sm:$0xff] }
0x1017   :  { %1459 = vmatprep.subr.mxu1 %v1363_v54 }
0x1018   :  { %1460 = vmatpush2.msra.mxu1 %v1362_v25 }
0x1019   :  { %1461 = vmatprep.subr.mxu1 %v1357_v57  ;;  %v1216_v57 = vpop.permute.xlu1 %1215 }
0x101a   :  { %1462 = vmatpush2.msra.mxu1 %v1356_v43 }
0x101b   :  { %1463 = vmatprep.subr.mxu1 %v1351_v58  ;;  %v1225_v58 = vsel %vm606_vm5, %v10429_v20, %v1216_v57  ;;  %v15627_v20 = vld [vmem:[#allocation21_spill] sm:$0xff] }
0x101c   :  { %1464 = vmatpush2.msra.mxu1 %v1350_v14  ;;  %v1274_v57 = vld [vmem:[%s15577_s3 + $0x160] sm:$0xff] }
0x101d   :  { %1465 = vmatprep.subr.mxu1 %v1345_v23 }
0x101e   :  { %1466 = vmatpush2.msra.mxu1 %v1344_v59  ;;  %v1298_v59 = vld [vmem:[%s15577_s3 + $0x220] sm:$0xff] }
0x101f   :  { %1467 = vmatprep.subr.mxu1 %v1339_v21  ;;  %v1293_v21 = vld [vmem:[%s15577_s3 + $0x1f8] sm:$0xff] }
0x1020   :  { %1468 = vmatpush2.msra.mxu1 %v1338_v53  ;;  %v1292_v53 = vld [vmem:[%s15577_s3 + $0x1f0] sm:$0xff] }
0x1021   :  { %1469 = vmatprep.subr.mxu1 %v1333_v4  ;;  %v1287_v4 = vld [vmem:[%s15577_s3 + $0x1c8] sm:$0xff] }
0x1022   :  { %1470 = vmatpush2.msra.mxu1 %v1332_v22  ;;  %v1286_v22 = vld [vmem:[%s15577_s3 + $0x1c0] sm:$0xff] }
0x1023   :  { %1471 = vmatprep.subr.mxu1 %v1327_v31 }
0x1024   :  { %1472 = vmatpush2.msra.mxu1 %v1326_v24  ;;  %v1281_v24 = vld [vmem:[%s15577_s3 + $0x198] sm:$0xff] }
0x1025   :  { %1551 = vmatprep.subr.mxu1 %v10539_v51 }
0x1074   :  { %v1126_v54 = vpop.permute.xlu0 %1125 }
0x1075   :  { %v11052_v25 = vmul.f32 %v10891_v7, %v1126_v54  ;;  %v1280_v54 = vld [vmem:[%s15577_s3 + $0x190] sm:$0xff] }
0x1077   :  { %1222 = vrot.lane.b32.xlu1 %v11052_v25, %s10005_s28 }
0x1078   :  { %v1219_v43 = vpop.permute.xlu0 %1218 }
0x1079   :  { %v1226_v14 = vsel %vm354_vm6, %v1225_v58, %v1219_v43  ;;  %v1269_v43 = vld [vmem:[%s15577_s3 + $0x138] sm:$0xff]  ;;  %v1268_v58 = vld [vmem:[%s15577_s3 + $0x130] sm:$0xff] }
0x107a   :  { %v11067_v7 = vsel %vm1227_vm7, %v1226_v14, %v10843_v16  ;;  %v15628_v16 = vld [vmem:[#allocation22_spill] sm:$0xff] }
0x107b   :  { %v1263_v14 = vld [vmem:[%s15577_s3 + $0x108] sm:$0xff] }
0x10e9   :  { %v1223_v23 = vpop.permute.xlu1 %1222 }
0x10ea   :  { %v11061_v51 = vsel %vm606_vm5, %v10879_v34, %v1223_v23  ;;  %v1299_v34 = vld [vmem:[%s15577_s3 + $0x228] sm:$0xff]  ;;  %v1262_v23 = vld [vmem:[%s15577_s3 + $0x100] sm:$0xff] }
0x10eb   :  { %8622 = vmatprep.mubr.msk.f32.mxu1 %vm354_vm6, %v11061_v51 }
0x10ec   :  { %1474 = vmatmul.mubr.f32.vlgmr.msra.gmra.mxu1 %v11067_v7 }
0x10ed   :  { %1552 = vmatpush1.msra.mxu1 %v10544_v52  ;;  %8624 = vmatprep.mubr.msk.f32.mxu1 %vm354_vm6, %v11061_v51  ;;  %v15629_v52 = vld [vmem:[#allocation23_spill] sm:$0xff] }
0x10ee   :  { %1553 = vmatprep.subr.mxu1 %v10549_v55  ;;  %v15630_v55 = vld [vmem:[#allocation24_spill] sm:$0xff] }
0x10ef   :  { %1554 = vmatpush1.msra.mxu1 %v10555_v60  ;;  %v15631_v60 = vld [vmem:[#allocation25_spill] sm:$0xff] }
0x10f0   :  { %1555 = vmatprep.subr.mxu1 %v10561_v61  ;;  %v15632_v61 = vld [vmem:[#allocation26_spill] sm:$0xff] }
0x10f1   :  { %1556 = vmatpush1.msra.mxu1 %v10567_v62  ;;  %v15633_v62 = vld [vmem:[#allocation27_spill] sm:$0xff] }
0x10f2   :  { %1557 = vmatprep.subr.mxu1 %v10573_v63  ;;  %v15634_v63 = vld [vmem:[#allocation28_spill] sm:$0xff] }
0x10f3   :  { %1558 = vmatpush1.msra.mxu1 %v10579_v1  ;;  %v11123_v1 = vld [vmem:[%s15578_s4] sm:$0x3f] }
0x10f4   :  { %1559 = vmatprep.subr.mxu1 %v10585_v2  ;;  %v15635_v2 = vld [vmem:[#allocation6_spill] sm:$0xff] }
0x10f5   :  { %1560 = vmatpush1.msra.mxu1 %v10591_v3  ;;  %v1379_v3 = vrot.slane %v11123_v1, %v15635_v2 }
0x10f6   :  { %1561 = vmatprep.subr.mxu1 %v10597_v5 }
0x10f7   :  { %1562 = vmatpush1.msra.mxu1 %v10603_v6 }
0x10f8   :  { %1563 = vmatprep.subr.mxu1 %v10609_v9  ;;  %v15636_v9 = vld [vmem:[#allocation7_spill] sm:$0xff] }
0x10f9   :  { %1564 = vmatpush1.msra.mxu1 %v10616_v10 }
0x10fa   :  { %1565 = vmatprep.subr.mxu1 %v10622_v11 }
0x10fb   :  { %1566 = vmatpush1.msra.mxu1 %v10628_v12 }
0x10fc   :  { %1567 = vmatprep.subr.mxu1 %v10634_v13 }
0x10fd   :  { %1568 = vmatpush1.msra.mxu1 %v10640_v15 }
0x10fe   :  { %1569 = vmatprep.subr.mxu1 %v10649_v18  ;;  %v1132_v18 = vld [vmem:[%s15579_s5 + $0x18] sm:$0xff] }
0x10ff   :  { %1570 = vmatpush1.msra.mxu1 %v10658_v27  ;;  %v1131_v27 = vld [vmem:[%s15579_s5 + $0x10] sm:$0xff]  ;;  %9210 = vmatpush3.msra.mxu0 %v1132_v18  ;;  %v1347_v18 = vld [vmem:[%s15577_s3 + $0x3a8] sm:$0xff] }
0x1100   :  { %1571 = vmatprep.subr.mxu1 %v10668_v29  ;;  %9211 = vmatprep.subr.mxu0 %v15626_v50 }
0x1101   :  { %1572 = vmatpush1.msra.mxu1 %v10674_v32  ;;  %9212 = vmatpush3.msra.mxu0 %v1131_v27  ;;  %v1346_v27 = vld [vmem:[%s15577_s3 + $0x3a0] sm:$0xff] }
0x1102   :  { %1573 = vmatprep.subr.mxu1 %v10684_v35  ;;  %9213 = vmatprep.subr.mxu0 %v15626_v50 }
0x1103   :  { %1574 = vmatpush1.msra.mxu1 %v10690_v36  ;;  %v1130_v36 = vld [vmem:[%s15579_s5 + $0x8] sm:$0xff] }
0x1104   :  { %1575 = vmatprep.subr.mxu1 %v10697_v37  ;;  %9214 = vmatpush3.msra.mxu0 %v1130_v36  ;;  %v1129_v37 = vld [vmem:[%s15579_s5] sm:$0xff]  ;;  %v1335_v36 = vld [vmem:[%s15577_s3 + $0x348] sm:$0xff] }
0x1105   :  { %1576 = vmatpush1.msra.mxu1 %v10703_v38  ;;  %9215 = vmatprep.subr.mxu0 %v15626_v50  ;;  %v1323_v38 = vld [vmem:[%s15577_s3 + $0x2e8] sm:$0xff] }
0x1106   :  { %1577 = vmatprep.subr.mxu1 %v10710_v39  ;;  %9216 = vmatpush3.msra.mxu0 %v1129_v37  ;;  %v1334_v37 = vld [vmem:[%s15577_s3 + $0x340] sm:$0xff] }
0x1107   :  { %1578 = vmatpush1.msra.mxu1 %v10716_v40  ;;  %1480 = vmatprep.subr.mxu0 %v1323_v38  ;;  %v1329_v38 = vld [vmem:[%s15577_s3 + $0x318] sm:$0xff] }
0x1108   :  { %1579 = vmatprep.subr.mxu1 %v10722_v41  ;;  %v15637_v41 = vld [vmem:[#allocation8_spill] sm:$0xff] }
0x1109   :  { %1580 = vmatpush1.msra.mxu1 %v10728_v42 }
0x110a   :  { %1581 = vmatprep.subr.mxu1 %v10734_v44 }
0x110b   :  { %1582 = vmatpush1.msra.mxu1 %v10740_v45 }
0x110c   :  { %1599 = vmatprep.subr.mxu1 %v10746_v47  ;;  %v1322_v47 = vld [vmem:[%s15577_s3 + $0x2e0] sm:$0xff] }
0x110d   :  { %1600 = vmatpush2.msra.mxu1 %v10752_v30 }
0x110e   :  { %1601 = vmatprep.subr.mxu1 %v10758_v48  ;;  %v1317_v48 = vld [vmem:[%s15577_s3 + $0x2b8] sm:$0xff] }
0x110f   :  { %1602 = vmatpush2.msra.mxu1 %v10764_v49  ;;  %v1316_v49 = vld [vmem:[%s15577_s3 + $0x2b0] sm:$0xff] }
0x1110   :  { %1603 = vmatprep.subr.mxu1 %v10770_v8  ;;  %v1311_v8 = vld [vmem:[%s15577_s3 + $0x288] sm:$0xff] }
0x1111   :  { %1604 = vmatpush2.msra.mxu1 %v10776_v17  ;;  %v1310_v17 = vld [vmem:[%s15577_s3 + $0x280] sm:$0xff] }
0x1112   :  { %1605 = vmatprep.subr.mxu1 %v10782_v19  ;;  %v1305_v19 = vld [vmem:[%s15577_s3 + $0x258] sm:$0xff] }
0x1113   :  { %1606 = vmatpush2.msra.mxu1 %v10788_v28  ;;  %v1304_v28 = vld [vmem:[%s15577_s3 + $0x250] sm:$0xff] }
0x1114   :  { %1607 = vmatprep.subr.mxu1 %v15627_v20  ;;  %v1256_v20 = vld [vmem:[%s15577_s3 + $0xd0] sm:$0xff] }
0x1115   :  { %1608 = vmatpush2.msra.mxu1 %v15628_v16  ;;  %v1251_v16 = vld [vmem:[%s15577_s3 + $0xa8] sm:$0xff] }
0x1116   :  { %1609 = vmatprep.subr.mxu1 %v15629_v52  ;;  %v1250_v52 = vld [vmem:[%s15577_s3 + $0xa0] sm:$0xff] }
0x1117   :  { %1610 = vmatpush2.msra.mxu1 %v15630_v55  ;;  %v1245_v55 = vld [vmem:[%s15577_s3 + $0x78] sm:$0xff] }
0x1118   :  { %1611 = vmatprep.subr.mxu1 %v15631_v60  ;;  %v1244_v60 = vld [vmem:[%s15577_s3 + $0x70] sm:$0xff] }
0x1119   :  { %1612 = vmatpush2.msra.mxu1 %v15632_v61  ;;  %v1239_v61 = vld [vmem:[%s15577_s3 + $0x48] sm:$0xff] }
0x111a   :  { %1613 = vmatprep.subr.mxu1 %v15633_v62  ;;  %v1238_v62 = vld [vmem:[%s15577_s3 + $0x40] sm:$0xff] }
0x111b   :  { %1614 = vmatpush2.msra.mxu1 %v15634_v63  ;;  %v1233_v63 = vld [vmem:[%s15577_s3 + $0x18] sm:$0xff] }
0x111c   :  { %1616 = vmatmul.mubr.f32.vlgmr.msra.gmra.mxu1 %v11067_v7 }
0x11ac   :  { %v1475_v5 = vpop.f32.mrf.mxu1 }
0x11ad   :  { %v1476_v6 = vadd.f32 %v1475_v5, %v1379_v3  ;;  %v1232_v3 = vld [vmem:[%s15577_s3 + $0x10] sm:$0xff]  ;;  %v1371_v5 = vld [vmem:[%s15577_s3 + $0x468] sm:$0xff] }
0x11af   :  { %v1623_v10 = vadd.f32 %v15636_v9, %v1476_v6  ;;  %v1370_v6 = vld [vmem:[%s15577_s3 + $0x460] sm:$0xff]  ;;  %v1365_v9 = vld [vmem:[%s15577_s3 + $0x438] sm:$0xff] }
0x11b1   :  { %v1624_v11 = vmul.f32 %v1623_v10, %v10224_v0  ;;  %v1364_v10 = vld [vmem:[%s15577_s3 + $0x430] sm:$0xff] }
0x11b3   :  { %v8625_v12 = vmul.f32 -1.442695, %v1624_v11  ;;  %v1359_v11 = vld [vmem:[%s15577_s3 + $0x408] sm:$0xff] }
0x11b5   :  { %9729 = vpow2.f32 %v8625_v12  ;;  %v1358_v12 = vld [vmem:[%s15577_s3 + $0x400] sm:$0xff] }
0x11c2   :  { %v9730_v13 = vpop.eup %9729 }
0x11c3   :  { %v1628_v15 = vadd.f32 1.0, %v9730_v13  ;;  %v1353_v13 = vld [vmem:[%s15577_s3 + $0x3d8] sm:$0xff] }
0x11c5   :  { %9731 = vrcp.f32 %v1628_v15  ;;  %v1352_v15 = vld [vmem:[%s15577_s3 + $0x3d0] sm:$0xff] }
0x11d2   :  { %v11135_v29 = vpop.eup %9731 }
0x11d3   :  { %v1631_v32 = vmul.f32 2.0, %v11135_v29  ;;  %v1633_v42 = vmul.f32 %v11135_v29, %v15637_v41  ;;  %v1652_v41 = vld [vmem:[%s15576_s2 + $0x10] sm:$0xff] }
0x11d5   :  { %v8626_v35 = vadd.f32 -1.0, %v1631_v32  ;;  %v1341_v32 = vld [vmem:[%s15577_s3 + $0x378] sm:$0xff] }
0x11d7   :  { %1635 = vrot.lane.b32.xlu0 %v8626_v35, %s10005_s28  ;;  %v1340_v35 = vld [vmem:[%s15577_s3 + $0x370] sm:$0xff] }
0x1249   :  { %v1636_v39 = vpop.permute.xlu0 %1635 }
0x124a   :  { %v1638_v40 = vmul.f32 %v11135_v29, %v1636_v39  ;;  %v1328_v39 = vld [vmem:[%s15577_s3 + $0x310] sm:$0xff] }
0x124c   :  { %1640 = vrot.lane.b32.xlu1 %v1638_v40, %s10006_s29  ;;  %v1653_v40 = vld [vmem:[%s15576_s2 + $0x18] sm:$0xff] }
0x1250   :  { %1139 = vrot.lane.b32.xlu1 %v11052_v25, %s10006_s29  ;;  %v1275_v25 = vld [vmem:[%s15577_s3 + $0x168] sm:$0xff] }
0x12be   :  { %v1641_v44 = vpop.permute.xlu1 %1640 }
0x12bf   :  { %v11157_v45 = vadd.f32 %v1641_v44, %v1633_v42  ;;  %v1650_v42 = vld [vmem:[%s15576_s2] sm:$0xff] }
0x12c1   :  { %9733 = vtanh.f32 %v11157_v45 }
0x12c2   :  { %v1140_v30 = vpop.permute.xlu1 %1139 }
0x12c3   :  { %9218 = vmatmul.mubr.msk.f32.vlgmr.msra.gmra.mxu0 %vm606_vm5, %v1140_v30  ;;  %v8620_v30 = vld [vmem:[%s15579_s5 + $0x20] ss:$0 sm:$0xff] }
0x12c4   :  { %1481 = vmatpush1.msra.mxu0 %v1322_v47  ;;  %8623 = vmatprep.mubr.msk.f32.mxu0 %vm354_vm6, %v11061_v51  ;;  %v1257_v51 = vld [vmem:[%s15577_s3 + $0xd8] sm:$0xff] }
0x12c5   :  { %1482 = vmatprep.subr.mxu0 %v1317_v48 }
0x12c6   :  { %1483 = vmatpush1.msra.mxu0 %v1316_v49 }
0x12c7   :  { %1484 = vmatprep.subr.mxu0 %v1311_v8 }
0x12c8   :  { %1485 = vmatpush1.msra.mxu0 %v1310_v17 }
0x12c9   :  { %1486 = vmatprep.subr.mxu0 %v1305_v19  ;;  %v15638_v19 = vld [vmem:[#allocation15_spill] sm:$0xff] }
0x12ca   :  { %1487 = vmatpush1.msra.mxu0 %v1304_v28  ;;  %v1383_v28 = vrot.slane %v11123_v1, %v15638_v19 }
0x12cb   :  { %1488 = vmatprep.subr.mxu0 %v1299_v34  ;;  %v1477_v34 = vpop.f32.mrf.mxu1 }
0x12cc   :  { %1489 = vmatpush1.msra.mxu0 %v1298_v59 }
0x12cd   :  { %1490 = vmatprep.subr.mxu0 %v1293_v21  ;;  %v1478_v21 = vadd.f32 %v1477_v34, %v1383_v28 }
0x12ce   :  { %v9734_v31 = vpop.eup %9733  ;;  %1491 = vmatpush1.msra.mxu0 %v1292_v53 }
0x12cf   :  { %1492 = vmatprep.subr.mxu0 %v1287_v4  ;;  %1646 = vrot.lane.b32.xlu0 %v9734_v31, %s10005_s28 }
0x12d0   :  { %1493 = vmatpush1.msra.mxu0 %v1286_v22 }
0x12d1   :  { %1494 = vmatprep.subr.mxu0 %v1281_v24 }
0x12d2   :  { %1495 = vmatpush1.msra.mxu0 %v1280_v54 }
0x12d3   :  { %1496 = vmatprep.subr.mxu0 %v1275_v25 }
0x12d4   :  { %1497 = vmatpush1.msra.mxu0 %v1274_v57 }
0x12d5   :  { %1498 = vmatprep.subr.mxu0 %v1269_v43 }
0x12d6   :  { %1499 = vmatpush1.msra.mxu0 %v1268_v58 }
0x12d7   :  { %1500 = vmatprep.subr.mxu0 %v1263_v14 }
0x12d8   :  { %1501 = vmatpush1.msra.mxu0 %v1262_v23 }
0x12d9   :  { %1502 = vmatprep.subr.mxu0 %v1257_v51  ;;  %v15639_v51 = vld [vmem:[#allocation16_spill] sm:$0xff] }
0x12da   :  { %1503 = vmatpush1.msra.mxu0 %v1256_v20 }
0x12db   :  { %1504 = vmatprep.subr.mxu0 %v1251_v16 }
0x12dc   :  { %1505 = vmatpush1.msra.mxu0 %v1250_v52 }
0x12dd   :  { %1506 = vmatprep.subr.mxu0 %v1245_v55  ;;  %v8633_v55 = vld [vmem:[%s15576_s2 + $0x38] sm:$0xff] }
0x12de   :  { %1507 = vmatpush1.msra.mxu0 %v1244_v60  ;;  %v8632_v60 = vld [vmem:[%s15576_s2 + $0x30] sm:$0xff] }
0x12df   :  { %1508 = vmatprep.subr.mxu0 %v1239_v61  ;;  %v8631_v61 = vld [vmem:[%s15576_s2 + $0x28] sm:$0xff] }
0x12e0   :  { %1509 = vmatpush1.msra.mxu0 %v1238_v62  ;;  %v8630_v62 = vld [vmem:[%s15576_s2 + $0x20] sm:$0xff] }
0x12e1   :  { %1510 = vmatprep.subr.mxu0 %v1233_v63 }
0x12e2   :  { %1511 = vmatpush1.msra.mxu0 %v1232_v3 }
0x12e3   :  { %1528 = vmatprep.subr.mxu0 %v1371_v5 }
0x12e4   :  { %1529 = vmatpush2.msra.mxu0 %v1370_v6 }
0x12e5   :  { %1530 = vmatprep.subr.mxu0 %v1365_v9  ;;  %v15640_v9 = vld [vmem:[#allocation17_spill] sm:$0xff] }
0x12e6   :  { %1531 = vmatpush2.msra.mxu0 %v1364_v10  ;;  %v1387_v10 = vrot.slane %v11123_v1, %v15640_v9 }
0x12e7   :  { %1532 = vmatprep.subr.mxu0 %v1359_v11 }
0x12e8   :  { %1533 = vmatpush2.msra.mxu0 %v1358_v12 }
0x12e9   :  { %1534 = vmatprep.subr.mxu0 %v1353_v13 }
0x12ea   :  { %1535 = vmatpush2.msra.mxu0 %v1352_v15 }
0x12eb   :  { %1536 = vmatprep.subr.mxu0 %v1347_v18 }
0x12ec   :  { %1537 = vmatpush2.msra.mxu0 %v1346_v27 }
0x12ed   :  { %1538 = vmatprep.subr.mxu0 %v1341_v32 }
0x12ee   :  { %1539 = vmatpush2.msra.mxu0 %v1340_v35 }
0x12ef   :  { %1540 = vmatprep.subr.mxu0 %v1335_v36 }
0x12f0   :  { %1541 = vmatpush2.msra.mxu0 %v1334_v37 }
0x12f1   :  { %1542 = vmatprep.subr.mxu0 %v1329_v38 }
0x12f2   :  { %1543 = vmatpush2.msra.mxu0 %v1328_v39 }
0x12f3   :  { %1545 = vmatmul.mubr.f32.vlgmr.msra.gmra.mxu0 %v11067_v7  ;;  %9220 = vmatprep.subr.mxu0 %v15626_v50  ;;  %v1651_v7 = vld [vmem:[%s15576_s2 + $0x8] sm:$0xff] }
0x12f4   :  { %9228 = vmatprep.mubr.msk.f32.mxu0 %vm10007_vm4, %v15626_v50  ;;  %9221 = vmatpush3.msra.mxu0 %v1653_v40 }
0x12f5   :  { %9222 = vmatprep.subr.mxu0 %v15626_v50 }
0x12f6   :  { %9223 = vmatpush3.msra.mxu0 %v1652_v41  ;;  %v15641_v41 = vld [vmem:[#allocation18_spill] sm:$0xff] }
0x12f7   :  { %9224 = vmatprep.subr.mxu0 %v15626_v50 }
0x12f8   :  { %9225 = vmatpush3.msra.mxu0 %v1651_v7 }
0x12f9   :  { %9226 = vmatprep.subr.mxu0 %v15626_v50 }
0x12fa   :  { %9227 = vmatpush3.msra.mxu0 %v1650_v42 }
0x12fb   :  { %9231 = vmatprep.subr.mxu0 %v15626_v50 }
0x1341   :  { %v1647_v44 = vpop.permute.xlu0 %1646 }
0x1342   :  { %v1649_v47 = vmul.f32 %v11135_v29, %v1647_v44 }
0x1344   :  { %1655 = vrot.lane.b32.xlu0 %v1649_v47, %s10006_s29  ;;  %v8640_v47 = vld [vmem:[%s15576_s2 + $0x58] sm:$0xff] }
0x1383   :  { %v1209_v48 = vpop.f32.mrf.mxu0 }
0x1384   :  { %v1210_v49 = vadd.f32 %v8620_v30, %v1209_v48  ;;  %v8639_v30 = vld [vmem:[%s15576_s2 + $0x50] sm:$0xff]  ;;  %v8638_v48 = vld [vmem:[%s15576_s2 + $0x48] sm:$0xff] }
0x1385   :  { %v9219_v8 = vpop.f32.mrf.mxu0 }
0x1386   :  { %1213 = vst.msk [vmem:[#allocation3] sm:$0xff] %vm34_vm0, %v1210_v49  ;;  %v8637_v49 = vld [vmem:[%s15576_s2 + $0x40] sm:$0xff] }
0x13b3   :  { %v1546_v29 = vpop.f32.mrf.mxu0 }
0x13b4   :  { %v1547_v11 = vadd.f32 %v1546_v29, %v1387_v10 }
0x13b5   :  { %v11339_v59 = vpop.f32.mrf.mxu0 }
0x13b6   :  { %v11331_v17 = vpop.permute.xlu0 %1655 }
0x13b7   :  { %9229 = vmatmul.mubr.msk.f32.vlgmr.msra.gmra.mxu0 %vm606_vm5, %v11331_v17 }
0x13b8   :  { %9239 = vmatprep.mubr.msk.f32.mxu0 %vm10007_vm4, %v15626_v50  ;;  %9232 = vmatpush3.msra.mxu0 %v8633_v55 }
0x13b9   :  { %9233 = vmatprep.subr.mxu0 %v15626_v50 }
0x13ba   :  { %9234 = vmatpush3.msra.mxu0 %v8632_v60 }
0x13bb   :  { %9235 = vmatprep.subr.mxu0 %v15626_v50 }
0x13bc   :  { %9236 = vmatpush3.msra.mxu0 %v8631_v61  ;;  %v8647_v61 = vld [vmem:[%s15576_s2 + $0x78] sm:$0xff] }
0x13bd   :  { %9237 = vmatprep.subr.mxu0 %v15626_v50 }
0x13be   :  { %9238 = vmatpush3.msra.mxu0 %v8630_v62  ;;  %v8646_v62 = vld [vmem:[%s15576_s2 + $0x70] sm:$0xff] }
0x13bf   :  { %9242 = vmatprep.subr.mxu0 %v15626_v50 }
0x1477   :  { %v1725_v53 = vpop.f32.mrf.mxu0 }
0x1478   :  { %v1726_v4 = vadd.f32 %v1725_v53, %v1478_v21  ;;  %v15642_v21 = vld [vmem:[#allocation19_spill] sm:$0xff] }
0x1479   :  { %v9230_v22 = vpop.f32.mrf.mxu0  ;;  %v1391_v53 = vrot.slane %v11123_v1, %v15642_v21 }
0x147a   :  { %v1729_v31 = vmul.f32 %v1726_v4, %v10224_v0 }
0x147b   :  { %v1549_v4 = vadd.f32 %v11339_v59, %v1391_v53  ;;  %v15643_v59 = vld [vmem:[#allocation20_spill] sm:$0xff] }
0x147c   :  { %v8628_v24 = vmul.f32 -1.442695, %v1729_v31 }
0x147e   :  { %9735 = vpow2.f32 %v8628_v24 }
0x148b   :  { %v9736_v54 = vpop.eup %9735 }
0x148c   :  { %v1733_v25 = vadd.f32 1.0, %v9736_v54 }
0x148e   :  { %9737 = vrcp.f32 %v1733_v25 }
0x149b   :  { %v9738_v57 = vpop.eup %9737 }
0x149c   :  { %v1736_v43 = vmul.f32 2.0, %v9738_v57  ;;  %v1738_v20 = vmul.f32 %v9738_v57, %v15639_v51 }
0x149e   :  { %v8629_v58 = vadd.f32 -1.0, %v1736_v43 }
0x14a0   :  { %1740 = vrot.lane.b32.xlu1 %v8629_v58, %s10005_s28 }
0x1512   :  { %v1741_v14 = vpop.permute.xlu1 %1740 }
0x1513   :  { %v1743_v23 = vmul.f32 %v9738_v57, %v1741_v14 }
0x1515   :  { %1745 = vrot.lane.b32.xlu0 %v1743_v23, %s10006_s29 }
0x1587   :  { %v1746_v16 = vpop.permute.xlu0 %1745 }
0x1588   :  { %v11345_v52 = vadd.f32 %v1746_v16, %v1738_v20 }
0x158a   :  { %9739 = vtanh.f32 %v11345_v52 }
0x1597   :  { %v9740_v63 = vpop.eup %9739 }
0x1598   :  { %1751 = vrot.lane.b32.xlu1 %v9740_v63, %s10005_s28  ;;  %v8645_v63 = vld [vmem:[%s15576_s2 + $0x68] sm:$0xff] }
0x160a   :  { %v1752_v3 = vpop.permute.xlu1 %1751 }
0x160b   :  { %v11365_v5 = vmul.f32 %v9738_v57, %v1752_v3  ;;  %v8644_v3 = vld [vmem:[%s15576_s2 + $0x60] sm:$0xff] }
0x160d   :  { %1760 = vrot.lane.b32.xlu0 %v11365_v5, %s10006_s29 }
0x167f   :  { %v1761_v6 = vpop.permute.xlu0 %1760 }
0x1680   :  { %9240 = vmatmul.mubr.msk.f32.vlgmr.msra.gmra.mxu0 %vm606_vm5, %v1761_v6 }
0x1681   :  { %9250 = vmatprep.mubr.msk.f32.mxu0 %vm10007_vm4, %v15626_v50  ;;  %9243 = vmatpush3.msra.mxu0 %v8640_v47 }
0x1682   :  { %9244 = vmatprep.subr.mxu0 %v15626_v50 }
0x1683   :  { %9245 = vmatpush3.msra.mxu0 %v8639_v30 }
0x1684   :  { %9246 = vmatprep.subr.mxu0 %v15626_v50 }
0x1685   :  { %9247 = vmatpush3.msra.mxu0 %v8638_v48 }
0x1686   :  { %9248 = vmatprep.subr.mxu0 %v15626_v50 }
0x1687   :  { %9249 = vmatpush3.msra.mxu0 %v8637_v49 }
0x1688   :  { %9253 = vmatprep.subr.mxu0 %v15626_v50 }
0x1740   :  { %v1830_v12 = vpop.f32.mrf.mxu0 }
0x1741   :  { %v1831_v13 = vadd.f32 %v1830_v12, %v1547_v11 }
0x1742   :  { %v9241_v15 = vpop.f32.mrf.mxu0 }
0x1743   :  { %v1834_v18 = vmul.f32 %v1831_v13, %v10224_v0  ;;  %v1395_v13 = vrot.slane %v11123_v1, %v10851_v46  ;;  %v1617_v15 = vpop.f32.mrf.mxu1 }
0x1745   :  { %v8635_v27 = vmul.f32 -1.442695, %v1834_v18  ;;  %v1618_v18 = vadd.f32 %v1617_v15, %v1395_v13  ;;  %v2358_v13 = vld [vmem:[%s15577_s3 + $0x270] sm:$0xff]  ;;  %v2353_v15 = vld [vmem:[%s15577_s3 + $0x248] sm:$0xff] }
0x1747   :  { %9741 = vpow2.f32 %v8635_v27 }
0x1754   :  { %v9742_v32 = vpop.eup %9741 }
0x1755   :  { %v1838_v35 = vadd.f32 1.0, %v9742_v32 }
0x1757   :  { %9743 = vrcp.f32 %v1838_v35 }
0x1764   :  { %v9744_v36 = vpop.eup %9743 }
0x1765   :  { %v1841_v37 = vmul.f32 2.0, %v9744_v36  ;;  %v1843_v7 = vmul.f32 %v9744_v36, %v15641_v41 }
0x1767   :  { %v8636_v38 = vadd.f32 -1.0, %v1841_v37 }
0x1769   :  { %1845 = vrot.lane.b32.xlu1 %v8636_v38, %s10005_s28 }
0x17db   :  { %v1846_v39 = vpop.permute.xlu1 %1845 }
0x17dc   :  { %v1848_v40 = vmul.f32 %v9744_v36, %v1846_v39 }
0x17de   :  { %1850 = vrot.lane.b32.xlu0 %v1848_v40, %s10006_s29 }
0x1850   :  { %v1851_v42 = vpop.permute.xlu0 %1850 }
0x1851   :  { %v11378_v44 = vadd.f32 %v1851_v42, %v1843_v7 }
0x1853   :  { %9745 = vtanh.f32 %v11378_v44 }
0x1860   :  { %v9746_v8 = vpop.eup %9745 }
0x1861   :  { %1856 = vrot.lane.b32.xlu1 %v9746_v8, %s10005_s28  ;;  %v8654_v8 = vld [vmem:[%s15576_s2 + $0x98] sm:$0xff] }
0x18d3   :  { %v1857_v29 = vpop.permute.xlu1 %1856 }
0x18d4   :  { %v11398_v28 = vmul.f32 %v9744_v36, %v1857_v29  ;;  %v8653_v29 = vld [vmem:[%s15576_s2 + $0x90] sm:$0xff] }
0x18d6   :  { %1865 = vrot.lane.b32.xlu0 %v11398_v28, %s10006_s29 }
0x1948   :  { %v1866_v34 = vpop.permute.xlu0 %1865 }
0x1949   :  { %9251 = vmatmul.mubr.msk.f32.vlgmr.msra.gmra.mxu0 %vm606_vm5, %v1866_v34  ;;  %v8651_v34 = vld [vmem:[%s15576_s2 + $0x80] sm:$0xff] }
0x194a   :  { %9261 = vmatprep.mubr.msk.f32.mxu0 %vm10007_vm4, %v15626_v50  ;;  %9254 = vmatpush3.msra.mxu0 %v8647_v61 }
0x194b   :  { %9255 = vmatprep.subr.mxu0 %v15626_v50 }
0x194c   :  { %9256 = vmatpush3.msra.mxu0 %v8646_v62 }
0x194d   :  { %9257 = vmatprep.subr.mxu0 %v15626_v50 }
0x194e   :  { %9258 = vmatpush3.msra.mxu0 %v8645_v63 }
0x194f   :  { %9259 = vmatprep.subr.mxu0 %v15626_v50 }
0x1950   :  { %9260 = vmatpush3.msra.mxu0 %v8644_v3 }
0x1951   :  { %9264 = vmatprep.subr.mxu0 %v15626_v50 }
0x1a09   :  { %v1935_v22 = vpop.f32.mrf.mxu0 }
0x1a0a   :  { %v1936_v31 = vadd.f32 %v1935_v22, %v1549_v4 }
0x1a0b   :  { %v9252_v24 = vpop.f32.mrf.mxu0 }
0x1a0c   :  { %v1939_v54 = vmul.f32 %v1936_v31, %v10224_v0  ;;  %v1399_v24 = vrot.slane %v11123_v1, %v10886_v33 }
0x1a0e   :  { %v8642_v25 = vmul.f32 -1.442695, %v1939_v54  ;;  %v1619_v54 = vpop.f32.mrf.mxu1 }
0x1a10   :  { %9747 = vpow2.f32 %v8642_v25  ;;  %v1620_v25 = vadd.f32 %v1619_v54, %v1399_v24  ;;  %v2286_v24 = vld [vmem:[%s15577_s3 + $0x30] sm:$0xff]  ;;  %v2281_v54 = vld [vmem:[%s15577_s3 + $0x8] sm:$0xff] }
0x1a1d   :  { %v9748_v57 = vpop.eup %9747 }
0x1a1e   :  { %v1943_v43 = vadd.f32 1.0, %v9748_v57 }
0x1a20   :  { %9749 = vrcp.f32 %v1943_v43 }
0x1a2d   :  { %v9750_v58 = vpop.eup %9749 }
0x1a2e   :  { %v1946_v14 = vmul.f32 2.0, %v9750_v58  ;;  %v1948_v16 = vmul.f32 %v9750_v58, %v15643_v59 }
0x1a30   :  { %v8643_v23 = vadd.f32 -1.0, %v1946_v14 }
0x1a32   :  { %1950 = vrot.lane.b32.xlu1 %v8643_v23, %s10005_s28 }
0x1aa4   :  { %v1951_v51 = vpop.permute.xlu1 %1950 }
0x1aa5   :  { %v1953_v20 = vmul.f32 %v9750_v58, %v1951_v51 }
0x1aa7   :  { %1955 = vrot.lane.b32.xlu0 %v1953_v20, %s10006_s29 }
0x1b19   :  { %v1956_v55 = vpop.permute.xlu0 %1955 }
0x1b1a   :  { %v11412_v60 = vadd.f32 %v1956_v55, %v1948_v16 }
0x1b1c   :  { %9751 = vtanh.f32 %v11412_v60 }
0x1b29   :  { %v9752_v6 = vpop.eup %9751 }
0x1b2a   :  { %1961 = vrot.lane.b32.xlu1 %v9752_v6, %s10005_s28  ;;  %v2371_v6 = vld [vmem:[%s15577_s3 + $0x2d8] sm:$0xff] }
0x1b2b   :  { %2459 = vmatprep.subr.mxu1 %v2371_v6  ;;  %v2382_v6 = vld [vmem:[%s15577_s3 + $0x330] sm:$0xff] }
0x1b9c   :  { %v1962_v10 = vpop.permute.xlu1 %1961 }
0x1b9d   :  { %v11432_v11 = vmul.f32 %v9750_v58, %v1962_v10  ;;  %v2370_v10 = vld [vmem:[%s15577_s3 + $0x2d0] sm:$0xff] }
0x1b9e   :  { %2460 = vmatpush1.msra.mxu1 %v2370_v10  ;;  %v2377_v10 = vld [vmem:[%s15577_s3 + $0x308] sm:$0xff] }
0x1b9f   :  { %1970 = vrot.lane.b32.xlu0 %v11432_v11, %s10006_s29 }
0x1c11   :  { %v1971_v12 = vpop.permute.xlu0 %1970 }
0x1c12   :  { %9262 = vmatmul.mubr.msk.f32.vlgmr.msra.gmra.mxu0 %vm606_vm5, %v1971_v12  ;;  %v2359_v12 = vld [vmem:[%s15577_s3 + $0x278] sm:$0xff] }
0x1c13   :  { %9272 = vmatprep.mubr.msk.f32.mxu0 %vm10007_vm4, %v15626_v50  ;;  %9265 = vmatpush3.msra.mxu0 %v8654_v8  ;;  %v2305_v8 = vld [vmem:[%s15577_s3 + $0xc8] sm:$0xff] }
0x1c14   :  { %9266 = vmatprep.subr.mxu0 %v15626_v50 }
0x1c15   :  { %9267 = vmatpush3.msra.mxu0 %v8653_v29  ;;  %v2304_v29 = vld [vmem:[%s15577_s3 + $0xc0] sm:$0xff] }
0x1c16   :  { %9268 = vmatprep.subr.mxu0 %v15626_v50 }
0x1cd2   :  { %v2040_v27 = vpop.f32.mrf.mxu0 }
0x1cd3   :  { %v2041_v32 = vadd.f32 %v2040_v27, %v1618_v18  ;;  %v2352_v18 = vld [vmem:[%s15577_s3 + $0x240] sm:$0xff]  ;;  %v2347_v27 = vld [vmem:[%s15577_s3 + $0x218] sm:$0xff] }
0x1cd4   :  { %v9263_v35 = vpop.f32.mrf.mxu0 }
0x1cd5   :  { %v2044_v36 = vmul.f32 %v2041_v32, %v10224_v0  ;;  %v2346_v32 = vld [vmem:[%s15577_s3 + $0x210] sm:$0xff] }
0x1cd7   :  { %v8649_v37 = vmul.f32 -1.442695, %v2044_v36  ;;  %v2341_v36 = vld [vmem:[%s15577_s3 + $0x1e8] sm:$0xff] }
0x1cd9   :  { %9753 = vpow2.f32 %v8649_v37  ;;  %v2340_v37 = vld [vmem:[%s15577_s3 + $0x1e0] sm:$0xff] }
0x1ce6   :  { %v9754_v38 = vpop.eup %9753 }
0x1ce7   :  { %v2048_v39 = vadd.f32 1.0, %v9754_v38  ;;  %v2335_v38 = vld [vmem:[%s15577_s3 + $0x1b8] sm:$0xff] }
0x1ce9   :  { %9755 = vrcp.f32 %v2048_v39  ;;  %v2334_v39 = vld [vmem:[%s15577_s3 + $0x1b0] sm:$0xff] }
0x1cf6   :  { %v9756_v40 = vpop.eup %9755 }
0x1cf7   :  { %v2051_v41 = vmul.f32 2.0, %v9756_v40  ;;  %v2053_v30 = vmul.f32 %v9756_v40, %v10858_v56  ;;  %v8652_v56 = vld [vmem:[%s15576_s2 + $0x88] sm:$0xff] }
0x1cf8   :  { %9269 = vmatpush3.msra.mxu0 %v8652_v56  ;;  %v2299_v56 = vld [vmem:[%s15577_s3 + $0x98] sm:$0xff] }
0x1cf9   :  { %v8650_v7 = vadd.f32 -1.0, %v2051_v41  ;;  %9270 = vmatprep.subr.mxu0 %v15626_v50  ;;  %v2328_v41 = vld [vmem:[%s15577_s3 + $0x180] sm:$0xff] }
0x1cfa   :  { %9271 = vmatpush3.msra.mxu0 %v8651_v34  ;;  %v2298_v34 = vld [vmem:[%s15577_s3 + $0x90] sm:$0xff] }
0x1cfb   :  { %2055 = vrot.lane.b32.xlu1 %v8650_v7, %s10005_s28  ;;  %9275 = vmatprep.subr.mxu0 %v15626_v50  ;;  %v2323_v7 = vld [vmem:[%s15577_s3 + $0x158] sm:$0xff] }
0x1d6d   :  { %v2056_v42 = vpop.permute.xlu1 %2055 }
0x1d6e   :  { %v2058_v47 = vmul.f32 %v9756_v40, %v2056_v42  ;;  %v2322_v42 = vld [vmem:[%s15577_s3 + $0x150] sm:$0xff] }
0x1d70   :  { %2060 = vrot.lane.b32.xlu0 %v2058_v47, %s10006_s29  ;;  %v2316_v47 = vld [vmem:[%s15577_s3 + $0x120] sm:$0xff] }
0x1de2   :  { %v2061_v48 = vpop.permute.xlu0 %2060 }
0x1de3   :  { %v11445_v49 = vadd.f32 %v2061_v48, %v2053_v30  ;;  %v2311_v30 = vld [vmem:[%s15577_s3 + $0xf8] sm:$0xff]  ;;  %v2310_v48 = vld [vmem:[%s15577_s3 + $0xf0] sm:$0xff] }
0x1de5   :  { %9757 = vtanh.f32 %v11445_v49 }
0x1df2   :  { %v9758_v53 = vpop.eup %9757 }
0x1df3   :  { %2066 = vrot.lane.b32.xlu1 %v9758_v53, %s10005_s28  ;;  %v2293_v53 = vld [vmem:[%s15577_s3 + $0x68] sm:$0xff] }
0x1e65   :  { %v2067_v4 = vpop.permute.xlu1 %2066 }
0x1e66   :  { %v2069_v22 = vmul.f32 %v9756_v40, %v2067_v4  ;;  %v2329_v40 = vld [vmem:[%s15577_s3 + $0x188] sm:$0xff]  ;;  %v2292_v4 = vld [vmem:[%s15577_s3 + $0x60] sm:$0xff] }
0x1e68   :  { %2075 = vrot.lane.b32.xlu0 %v2069_v22, %s10006_s29  ;;  %v2287_v22 = vld [vmem:[%s15577_s3 + $0x38] sm:$0xff] }
0x1eda   :  { %v11466_v31 = vpop.permute.xlu0 %2075 }
0x1edb   :  { %9273 = vmatmul.mubr.msk.f32.vlgmr.msra.gmra.mxu0 %vm606_vm5, %v11466_v31 }
0x1edc   :  { %9283 = vmatprep.mubr.msk.f32.mxu0 %vm10007_vm4, %v15626_v50 }
0x1f9b   :  { %v2145_v57 = vpop.f32.mrf.mxu0 }
0x1f9c   :  { %v2146_v43 = vadd.f32 %v2145_v57, %v1620_v25  ;;  %v2280_v25 = vld [vmem:[%s15577_s3] sm:$0xff]  ;;  %v2419_v57 = vld [vmem:[%s15577_s3 + $0x458] sm:$0xff] }
0x1f9d   :  { %v9274_v58 = vpop.f32.mrf.mxu0 }
0x1f9e   :  { %v2149_v14 = vmul.f32 %v2146_v43, %v10224_v0  ;;  %v2418_v43 = vld [vmem:[%s15577_s3 + $0x450] sm:$0xff]  ;;  %v2413_v58 = vld [vmem:[%s15577_s3 + $0x428] sm:$0xff] }
0x1fa0   :  { %v8656_v23 = vmul.f32 -1.442695, %v2149_v14  ;;  %v2412_v14 = vld [vmem:[%s15577_s3 + $0x420] sm:$0xff] }
0x1fa2   :  { %9759 = vpow2.f32 %v8656_v23  ;;  %v2407_v23 = vld [vmem:[%s15577_s3 + $0x3f8] sm:$0xff] }
0x1faf   :  { %v9760_v51 = vpop.eup %9759 }
0x1fb0   :  { %v2153_v20 = vadd.f32 1.0, %v9760_v51  ;;  %v2406_v51 = vld [vmem:[%s15577_s3 + $0x3f0] sm:$0xff] }
0x1fb2   :  { %9761 = vrcp.f32 %v2153_v20  ;;  %v2401_v20 = vld [vmem:[%s15577_s3 + $0x3c8] sm:$0xff] }
0x1fbf   :  { %v11475_v59 = vpop.eup %9761 }
0x1fc0   :  { %v2156_v16 = vmul.f32 2.0, %v11475_v59  ;;  %v2158_v62 = vmul.f32 %v11475_v59, %v10900_v26  ;;  %v2364_v26 = vld [vmem:[%s15577_s3 + $0x2a0] sm:$0xff] }
0x1fc2   :  { %v8657_v55 = vadd.f32 -1.0, %v2156_v16  ;;  %v2400_v16 = vld [vmem:[%s15577_s3 + $0x3c0] sm:$0xff] }
0x1fc4   :  { %2160 = vrot.lane.b32.xlu1 %v8657_v55, %s10005_s28  ;;  %v2395_v55 = vld [vmem:[%s15577_s3 + $0x398] sm:$0xff] }
0x2036   :  { %v2161_v1 = vpop.permute.xlu1 %2160 }
0x2037   :  { %v2163_v61 = vmul.f32 %v11475_v59, %v2161_v1  ;;  %v2394_v1 = vld [vmem:[%s15577_s3 + $0x390] sm:$0xff] }
0x2039   :  { %2165 = vrot.lane.b32.xlu0 %v2163_v61, %s10006_s29  ;;  %v2389_v61 = vld [vmem:[%s15577_s3 + $0x368] sm:$0xff] }
0x203d   :  { %2266 = vrot.lane.b32.xlu0 %v11365_v5, %s10005_s28  ;;  %v2365_v5 = vld [vmem:[%s15577_s3 + $0x2a8] sm:$0xff] }
0x203e   :  { %2461 = vmatprep.subr.mxu1 %v2365_v5  ;;  %v2376_v5 = vld [vmem:[%s15577_s3 + $0x300] sm:$0xff] }
0x203f   :  { %2462 = vmatpush1.msra.mxu1 %v2364_v26  ;;  %v2375_v26 = vld [vmem:[%s15577_s3 + $0x2f8] sm:$0xff] }
0x2040   :  { %2463 = vmatprep.subr.mxu1 %v2359_v12 }
0x2041   :  { %2464 = vmatpush1.msra.mxu1 %v2358_v13 }
0x2042   :  { %2465 = vmatprep.subr.mxu1 %v2353_v15 }
0x2043   :  { %2466 = vmatpush1.msra.mxu1 %v2352_v18 }
0x2044   :  { %2467 = vmatprep.subr.mxu1 %v2347_v27 }
0x2045   :  { %2468 = vmatpush1.msra.mxu1 %v2346_v32 }
0x2046   :  { %2469 = vmatprep.subr.mxu1 %v2341_v36 }
0x2047   :  { %2470 = vmatpush1.msra.mxu1 %v2340_v37 }
0x2048   :  { %2471 = vmatprep.subr.mxu1 %v2335_v38  ;;  %v2363_v38 = vld [vmem:[%s15577_s3 + $0x298] sm:$0xff] }
0x2049   :  { %2472 = vmatpush1.msra.mxu1 %v2334_v39  ;;  %v2357_v39 = vld [vmem:[%s15577_s3 + $0x268] sm:$0xff] }
0x204a   :  { %2473 = vmatprep.subr.mxu1 %v2329_v40  ;;  %v2356_v40 = vld [vmem:[%s15577_s3 + $0x260] sm:$0xff] }
0x204b   :  { %2474 = vmatpush1.msra.mxu1 %v2328_v41  ;;  %v2351_v41 = vld [vmem:[%s15577_s3 + $0x238] sm:$0xff] }
0x204c   :  { %2475 = vmatprep.subr.mxu1 %v2323_v7  ;;  %v2350_v7 = vld [vmem:[%s15577_s3 + $0x230] sm:$0xff] }
0x204d   :  { %2476 = vmatpush1.msra.mxu1 %v2322_v42  ;;  %v2345_v42 = vld [vmem:[%s15577_s3 + $0x208] sm:$0xff] }
0x20ab   :  { %v2166_v63 = vpop.permute.xlu0 %2165 }
0x20ac   :  { %v11485_v3 = vadd.f32 %v2166_v63, %v2158_v62  ;;  %v2388_v62 = vld [vmem:[%s15577_s3 + $0x360] sm:$0xff]  ;;  %v2383_v63 = vld [vmem:[%s15577_s3 + $0x338] sm:$0xff] }
0x20ae   :  { %9763 = vtanh.f32 %v11485_v3 }
0x20af   :  { %v2267_v15 = vpop.permute.xlu0 %2266 }
0x20b0   :  { %v2276_v27 = vsel %vm606_vm5, %v11331_v17, %v2267_v15  ;;  %v2369_v17 = vld [vmem:[%s15577_s3 + $0x2c8] sm:$0xff]  ;;  %v2392_v15 = vld [vmem:[%s15577_s3 + $0x380] sm:$0xff] }
0x20bb   :  { %v9764_v35 = vpop.eup %9763 }
0x20bc   :  { %2171 = vrot.lane.b32.xlu1 %v9764_v35, %s10005_s28 }
0x20c0   :  { %2269 = vrot.lane.b32.xlu1 %v11398_v28, %s10008_s18  ;;  %v2317_v28 = vld [vmem:[%s15577_s3 + $0x128] sm:$0xff] }
0x20c1   :  { %2477 = vmatprep.subr.mxu1 %v2317_v28  ;;  %v2344_v28 = vld [vmem:[%s15577_s3 + $0x200] sm:$0xff] }
0x20c2   :  { %2478 = vmatpush1.msra.mxu1 %v2316_v47  ;;  %v2339_v47 = vld [vmem:[%s15577_s3 + $0x1d8] sm:$0xff] }
0x20c3   :  { %2479 = vmatprep.subr.mxu1 %v2311_v30  ;;  %v2338_v30 = vld [vmem:[%s15577_s3 + $0x1d0] sm:$0xff] }
0x20c4   :  { %2480 = vmatpush1.msra.mxu1 %v2310_v48  ;;  %v2333_v48 = vld [vmem:[%s15577_s3 + $0x1a8] sm:$0xff] }
0x20c5   :  { %2481 = vmatprep.subr.mxu1 %v2305_v8  ;;  %v2332_v8 = vld [vmem:[%s15577_s3 + $0x1a0] sm:$0xff] }
0x20c6   :  { %2482 = vmatpush1.msra.mxu1 %v2304_v29  ;;  %v2327_v29 = vld [vmem:[%s15577_s3 + $0x178] sm:$0xff] }
0x20c7   :  { %2483 = vmatprep.subr.mxu1 %v2299_v56  ;;  %v2326_v56 = vld [vmem:[%s15577_s3 + $0x170] sm:$0xff] }
0x20c8   :  { %2484 = vmatpush1.msra.mxu1 %v2298_v34  ;;  %v2321_v34 = vld [vmem:[%s15577_s3 + $0x148] sm:$0xff] }
0x20c9   :  { %2485 = vmatprep.subr.mxu1 %v2293_v53  ;;  %v2320_v53 = vld [vmem:[%s15577_s3 + $0x140] sm:$0xff] }
0x20ca   :  { %2486 = vmatpush1.msra.mxu1 %v2292_v4  ;;  %v2315_v4 = vld [vmem:[%s15577_s3 + $0x118] sm:$0xff] }
0x20cb   :  { %2487 = vmatprep.subr.mxu1 %v2287_v22  ;;  %v2314_v22 = vld [vmem:[%s15577_s3 + $0x110] sm:$0xff] }
0x20cc   :  { %2488 = vmatpush1.msra.mxu1 %v2286_v24  ;;  %v2309_v24 = vld [vmem:[%s15577_s3 + $0xe8] sm:$0xff] }
0x20cd   :  { %2489 = vmatprep.subr.mxu1 %v2281_v54  ;;  %v2308_v54 = vld [vmem:[%s15577_s3 + $0xe0] sm:$0xff] }
0x20ce   :  { %2490 = vmatpush1.msra.mxu1 %v2280_v25  ;;  %v2303_v25 = vld [vmem:[%s15577_s3 + $0xb8] sm:$0xff] }
0x20cf   :  { %2507 = vmatprep.subr.mxu1 %v2419_v57  ;;  %v2302_v57 = vld [vmem:[%s15577_s3 + $0xb0] sm:$0xff] }
0x20d0   :  { %2508 = vmatpush2.msra.mxu1 %v2418_v43  ;;  %v2297_v43 = vld [vmem:[%s15577_s3 + $0x88] sm:$0xff] }
0x20d1   :  { %2509 = vmatprep.subr.mxu1 %v2413_v58  ;;  %v2296_v58 = vld [vmem:[%s15577_s3 + $0x80] sm:$0xff] }
0x20d2   :  { %2510 = vmatpush2.msra.mxu1 %v2412_v14  ;;  %v2291_v14 = vld [vmem:[%s15577_s3 + $0x58] sm:$0xff] }
0x20d3   :  { %2511 = vmatprep.subr.mxu1 %v2407_v23  ;;  %v2290_v23 = vld [vmem:[%s15577_s3 + $0x50] sm:$0xff] }
0x20d4   :  { %2512 = vmatpush2.msra.mxu1 %v2406_v51  ;;  %v2285_v51 = vld [vmem:[%s15577_s3 + $0x28] sm:$0xff] }
0x20d5   :  { %2513 = vmatprep.subr.mxu1 %v2401_v20  ;;  %v2284_v20 = vld [vmem:[%s15577_s3 + $0x20] sm:$0xff] }
0x20d6   :  { %2514 = vmatpush2.msra.mxu1 %v2400_v16  ;;  %v2423_v16 = vld [vmem:[%s15577_s3 + $0x478] sm:$0xff] }
0x20d7   :  { %2515 = vmatprep.subr.mxu1 %v2395_v55  ;;  %v2422_v55 = vld [vmem:[%s15577_s3 + $0x470] sm:$0xff] }
0x20d8   :  { %2516 = vmatpush2.msra.mxu1 %v2394_v1  ;;  %v2417_v1 = vld [vmem:[%s15577_s3 + $0x448] sm:$0xff] }
0x20d9   :  { %2517 = vmatprep.subr.mxu1 %v2389_v61  ;;  %v2416_v61 = vld [vmem:[%s15577_s3 + $0x440] sm:$0xff] }
0x20da   :  { %2518 = vmatpush2.msra.mxu1 %v2388_v62  ;;  %v2411_v62 = vld [vmem:[%s15577_s3 + $0x418] sm:$0xff] }
0x20db   :  { %2519 = vmatprep.subr.mxu1 %v2383_v63  ;;  %v2410_v63 = vld [vmem:[%s15577_s3 + $0x410] sm:$0xff] }
0x20dc   :  { %2520 = vmatpush2.msra.mxu1 %v2382_v6  ;;  %v2405_v6 = vld [vmem:[%s15577_s3 + $0x3e8] sm:$0xff] }
0x20dd   :  { %2521 = vmatprep.subr.mxu1 %v2377_v10  ;;  %v2404_v10 = vld [vmem:[%s15577_s3 + $0x3e0] sm:$0xff] }
0x20de   :  { %2522 = vmatpush2.msra.mxu1 %v2376_v5  ;;  %v2399_v5 = vld [vmem:[%s15577_s3 + $0x3b8] sm:$0xff] }
0x20df   :  { %2601 = vmatprep.subr.mxu1 %v2375_v26  ;;  %v2398_v26 = vld [vmem:[%s15577_s3 + $0x3b0] sm:$0xff] }
0x212e   :  { %v2172_v12 = vpop.permute.xlu1 %2171 }
0x212f   :  { %v11639_v13 = vmul.f32 %v11475_v59, %v2172_v12  ;;  %v2374_v59 = vld [vmem:[%s15577_s3 + $0x2f0] sm:$0xff]  ;;  %v2393_v12 = vld [vmem:[%s15577_s3 + $0x388] sm:$0xff] }
0x2131   :  { %2273 = vrot.lane.b32.xlu0 %v11639_v13, %s10005_s28 }
0x2132   :  { %v2270_v18 = vpop.permute.xlu1 %2269 }
0x2133   :  { %v2277_v32 = vsel %vm354_vm6, %v2276_v27, %v2270_v18  ;;  %v2387_v18 = vld [vmem:[%s15577_s3 + $0x358] sm:$0xff]  ;;  %v2386_v27 = vld [vmem:[%s15577_s3 + $0x350] sm:$0xff] }
0x2134   :  { %v11657_v37 = vsel %vm1227_vm7, %v2277_v32, %v11432_v11  ;;  %v2362_v11 = vld [vmem:[%s15577_s3 + $0x290] sm:$0xff]  ;;  %v2381_v32 = vld [vmem:[%s15577_s3 + $0x328] sm:$0xff] }
0x21a3   :  { %v2274_v35 = vpop.permute.xlu0 %2273 }
0x21a4   :  { %v11648_v36 = vsel %vm606_vm5, %v11466_v31, %v2274_v35  ;;  %v2368_v31 = vld [vmem:[%s15577_s3 + $0x2c0] sm:$0xff] }
0x21a5   :  { %8660 = vmatprep.mubr.msk.f32.mxu1 %vm354_vm6, %v11648_v36  ;;  %v2380_v35 = vld [vmem:[%s15577_s3 + $0x320] sm:$0xff] }
0x21a6   :  { %2524 = vmatmul.mubr.f32.vlgmr.msra.gmra.mxu1 %v11657_v37 }
0x21a7   :  { %2602 = vmatpush1.msra.mxu1 %v2374_v59  ;;  %8662 = vmatprep.mubr.msk.f32.mxu1 %vm354_vm6, %v11648_v36  ;;  %v11804_v59 = vld [vmem:[%s15578_s4] sm:$0x3f] }
0x21a8   :  { %2603 = vmatprep.subr.mxu1 %v2369_v17  ;;  %v2429_v17 = vrot.slane %v11804_v59, %v15635_v2 }
0x21a9   :  { %2604 = vmatpush1.msra.mxu1 %v2368_v31 }
0x21aa   :  { %2605 = vmatprep.subr.mxu1 %v2363_v38 }
0x21ab   :  { %2606 = vmatpush1.msra.mxu1 %v2362_v11  ;;  %v15644_v11 = vld [vmem:[#allocation10_spill] sm:$0xff] }
0x21ac   :  { %2607 = vmatprep.subr.mxu1 %v2357_v39 }
0x21ad   :  { %2608 = vmatpush1.msra.mxu1 %v2356_v40 }
0x21ae   :  { %2609 = vmatprep.subr.mxu1 %v2351_v41 }
0x21af   :  { %2610 = vmatpush1.msra.mxu1 %v2350_v7 }
0x21b0   :  { %2611 = vmatprep.subr.mxu1 %v2345_v42 }
0x21b1   :  { %2612 = vmatpush1.msra.mxu1 %v2344_v28  ;;  %v2178_v28 = vld [vmem:[%s15579_s5 + $0x18] sm:$0xff] }
0x21b2   :  { %2613 = vmatprep.subr.mxu1 %v2339_v47  ;;  %v2177_v47 = vld [vmem:[%s15579_s5 + $0x10] sm:$0xff]  ;;  %9276 = vmatpush3.msra.mxu0 %v2178_v28 }
0x21b3   :  { %2614 = vmatpush1.msra.mxu1 %v2338_v30  ;;  %9277 = vmatprep.subr.mxu0 %v15626_v50  ;;  %v2414_v28 = vld [vmem:[%s15577_s3 + $0x430] sm:$0xff] }
0x21b4   :  { %2615 = vmatprep.subr.mxu1 %v2333_v48  ;;  %9278 = vmatpush3.msra.mxu0 %v2177_v47  ;;  %v2409_v47 = vld [vmem:[%s15577_s3 + $0x408] sm:$0xff] }
0x21b5   :  { %2616 = vmatpush1.msra.mxu1 %v2332_v8  ;;  %9279 = vmatprep.subr.mxu0 %v15626_v50 }
0x21b6   :  { %2617 = vmatprep.subr.mxu1 %v2327_v29  ;;  %v2176_v29 = vld [vmem:[%s15579_s5 + $0x8] sm:$0xff] }
0x21b7   :  { %2618 = vmatpush1.msra.mxu1 %v2326_v56  ;;  %9280 = vmatpush3.msra.mxu0 %v2176_v29  ;;  %v2175_v56 = vld [vmem:[%s15579_s5] sm:$0xff]  ;;  %v2402_v29 = vld [vmem:[%s15577_s3 + $0x3d0] sm:$0xff] }
0x21b8   :  { %2619 = vmatprep.subr.mxu1 %v2321_v34  ;;  %9281 = vmatprep.subr.mxu0 %v15626_v50  ;;  %v2373_v34 = vld [vmem:[%s15577_s3 + $0x2e8] sm:$0xff] }
0x21b9   :  { %2620 = vmatpush1.msra.mxu1 %v2320_v53  ;;  %9282 = vmatpush3.msra.mxu0 %v2175_v56  ;;  %v2397_v56 = vld [vmem:[%s15577_s3 + $0x3a8] sm:$0xff] }
0x21ba   :  { %2621 = vmatprep.subr.mxu1 %v2315_v4  ;;  %2530 = vmatprep.subr.mxu0 %v2373_v34  ;;  %v2396_v34 = vld [vmem:[%s15577_s3 + $0x3a0] sm:$0xff] }
0x21bb   :  { %2622 = vmatpush1.msra.mxu1 %v2314_v22 }
0x21bc   :  { %2623 = vmatprep.subr.mxu1 %v2309_v24 }
0x21bd   :  { %2624 = vmatpush1.msra.mxu1 %v2308_v54 }
0x21be   :  { %2625 = vmatprep.subr.mxu1 %v2303_v25  ;;  %v2372_v25 = vld [vmem:[%s15577_s3 + $0x2e0] sm:$0xff] }
0x21bf   :  { %2626 = vmatpush1.msra.mxu1 %v2302_v57 }
0x21c0   :  { %2627 = vmatprep.subr.mxu1 %v2297_v43  ;;  %v2367_v43 = vld [vmem:[%s15577_s3 + $0x2b8] sm:$0xff] }
0x21c1   :  { %2628 = vmatpush1.msra.mxu1 %v2296_v58  ;;  %v2360_v58 = vld [vmem:[%s15577_s3 + $0x280] sm:$0xff] }
0x21c2   :  { %2629 = vmatprep.subr.mxu1 %v2291_v14  ;;  %v2355_v14 = vld [vmem:[%s15577_s3 + $0x258] sm:$0xff] }
0x21c3   :  { %2630 = vmatpush1.msra.mxu1 %v2290_v23  ;;  %v2354_v23 = vld [vmem:[%s15577_s3 + $0x250] sm:$0xff] }
0x21c4   :  { %2631 = vmatprep.subr.mxu1 %v2285_v51  ;;  %v2348_v51 = vld [vmem:[%s15577_s3 + $0x220] sm:$0xff] }
0x21c5   :  { %2632 = vmatpush1.msra.mxu1 %v2284_v20  ;;  %v2343_v20 = vld [vmem:[%s15577_s3 + $0x1f8] sm:$0xff] }
0x21c6   :  { %2649 = vmatprep.subr.mxu1 %v2423_v16  ;;  %v2342_v16 = vld [vmem:[%s15577_s3 + $0x1f0] sm:$0xff] }
0x21c7   :  { %2650 = vmatpush2.msra.mxu1 %v2422_v55  ;;  %v2337_v55 = vld [vmem:[%s15577_s3 + $0x1c8] sm:$0xff] }
0x21c8   :  { %2651 = vmatprep.subr.mxu1 %v2417_v1  ;;  %v2336_v1 = vld [vmem:[%s15577_s3 + $0x1c0] sm:$0xff] }
0x21c9   :  { %2652 = vmatpush2.msra.mxu1 %v2416_v61 }
0x21ca   :  { %2653 = vmatprep.subr.mxu1 %v2411_v62  ;;  %v2331_v62 = vld [vmem:[%s15577_s3 + $0x198] sm:$0xff] }
0x21cb   :  { %2654 = vmatpush2.msra.mxu1 %v2410_v63  ;;  %v2330_v63 = vld [vmem:[%s15577_s3 + $0x190] sm:$0xff] }
0x21cc   :  { %2655 = vmatprep.subr.mxu1 %v2405_v6  ;;  %v2325_v6 = vld [vmem:[%s15577_s3 + $0x168] sm:$0xff] }
0x21cd   :  { %2656 = vmatpush2.msra.mxu1 %v2404_v10  ;;  %v2324_v10 = vld [vmem:[%s15577_s3 + $0x160] sm:$0xff] }
0x21ce   :  { %2657 = vmatprep.subr.mxu1 %v2399_v5  ;;  %v2319_v5 = vld [vmem:[%s15577_s3 + $0x138] sm:$0xff] }
0x21cf   :  { %2658 = vmatpush2.msra.mxu1 %v2398_v26  ;;  %v2318_v26 = vld [vmem:[%s15577_s3 + $0x130] sm:$0xff] }
0x21d0   :  { %2659 = vmatprep.subr.mxu1 %v2393_v12  ;;  %v2313_v12 = vld [vmem:[%s15577_s3 + $0x108] sm:$0xff] }
0x21d1   :  { %2660 = vmatpush2.msra.mxu1 %v2392_v15  ;;  %v2312_v15 = vld [vmem:[%s15577_s3 + $0x100] sm:$0xff] }
0x21d2   :  { %2661 = vmatprep.subr.mxu1 %v2387_v18  ;;  %v2307_v18 = vld [vmem:[%s15577_s3 + $0xd8] sm:$0xff] }
0x21d3   :  { %2662 = vmatpush2.msra.mxu1 %v2386_v27  ;;  %v2306_v27 = vld [vmem:[%s15577_s3 + $0xd0] sm:$0xff] }
0x21d4   :  { %2663 = vmatprep.subr.mxu1 %v2381_v32  ;;  %v2301_v32 = vld [vmem:[%s15577_s3 + $0xa8] sm:$0xff] }
0x21d5   :  { %2664 = vmatpush2.msra.mxu1 %v2380_v35  ;;  %v2300_v35 = vld [vmem:[%s15577_s3 + $0xa0] sm:$0xff] }
0x21d6   :  { %2666 = vmatmul.mubr.f32.vlgmr.msra.gmra.mxu1 %v11657_v37 }
0x2266   :  { %v2525_v31 = vpop.f32.mrf.mxu1 }
0x2267   :  { %v2526_v38 = vadd.f32 %v2525_v31, %v2429_v17  ;;  %v2295_v17 = vld [vmem:[%s15577_s3 + $0x78] sm:$0xff]  ;;  %v2294_v31 = vld [vmem:[%s15577_s3 + $0x70] sm:$0xff] }
0x2269   :  { %v2673_v39 = vadd.f32 %v2526_v38, %v15644_v11  ;;  %v2289_v38 = vld [vmem:[%s15577_s3 + $0x48] sm:$0xff]  ;;  %v2288_v11 = vld [vmem:[%s15577_s3 + $0x40] sm:$0xff] }
0x226b   :  { %v2674_v40 = vmul.f32 %v2673_v39, %v10224_v0  ;;  %v2283_v39 = vld [vmem:[%s15577_s3 + $0x18] sm:$0xff] }
0x226d   :  { %v8663_v41 = vmul.f32 -1.442695, %v2674_v40  ;;  %v2282_v40 = vld [vmem:[%s15577_s3 + $0x10] sm:$0xff] }
0x226f   :  { %9765 = vpow2.f32 %v8663_v41  ;;  %v2421_v41 = vld [vmem:[%s15577_s3 + $0x468] sm:$0xff] }
0x227c   :  { %v9766_v7 = vpop.eup %9765 }
0x227d   :  { %v2678_v42 = vadd.f32 1.0, %v9766_v7  ;;  %v2420_v7 = vld [vmem:[%s15577_s3 + $0x460] sm:$0xff] }
0x227f   :  { %9767 = vrcp.f32 %v2678_v42  ;;  %v2415_v42 = vld [vmem:[%s15577_s3 + $0x438] sm:$0xff] }
0x228c   :  { %v11816_v30 = vpop.eup %9767 }
0x228d   :  { %v2681_v48 = vmul.f32 2.0, %v11816_v30  ;;  %v2683_v22 = vmul.f32 %v11816_v30, %v11157_v45  ;;  %v2366_v45 = vld [vmem:[%s15577_s3 + $0x2b0] sm:$0xff] }
0x228f   :  { %v8664_v8 = vadd.f32 -1.0, %v2681_v48  ;;  %v2408_v48 = vld [vmem:[%s15577_s3 + $0x400] sm:$0xff] }
0x2291   :  { %2685 = vrot.lane.b32.xlu1 %v8664_v8, %s10005_s28  ;;  %v2403_v8 = vld [vmem:[%s15577_s3 + $0x3d8] sm:$0xff] }
0x2303   :  { %v2686_v53 = vpop.permute.xlu1 %2685 }
0x2304   :  { %v2688_v4 = vmul.f32 %v11816_v30, %v2686_v53  ;;  %v2391_v53 = vld [vmem:[%s15577_s3 + $0x378] sm:$0xff] }
0x2306   :  { %2690 = vrot.lane.b32.xlu0 %v2688_v4, %s10006_s29  ;;  %v2390_v4 = vld [vmem:[%s15577_s3 + $0x370] sm:$0xff] }
0x230a   :  { %2185 = vrot.lane.b32.xlu0 %v11639_v13, %s10006_s29  ;;  %v2361_v13 = vld [vmem:[%s15577_s3 + $0x288] sm:$0xff] }
0x2378   :  { %v2691_v24 = vpop.permute.xlu0 %2690 }
0x2379   :  { %v11838_v54 = vadd.f32 %v2691_v24, %v2683_v22  ;;  %v2385_v22 = vld [vmem:[%s15577_s3 + $0x348] sm:$0xff]  ;;  %v2384_v24 = vld [vmem:[%s15577_s3 + $0x340] sm:$0xff] }
0x237b   :  { %9769 = vtanh.f32 %v11838_v54 }
0x237c   :  { %v2186_v57 = vpop.permute.xlu0 %2185 }
0x237d   :  { %9284 = vmatmul.mubr.msk.f32.vlgmr.msra.gmra.mxu0 %vm606_vm5, %v2186_v57  ;;  %v2378_v57 = vld [vmem:[%s15577_s3 + $0x310] sm:$0xff] }
0x237e   :  { %2531 = vmatpush1.msra.mxu0 %v2372_v25  ;;  %8661 = vmatprep.mubr.msk.f32.mxu0 %vm354_vm6, %v11648_v36  ;;  %v2349_v36 = vld [vmem:[%s15577_s3 + $0x228] sm:$0xff]  ;;  %v2379_v25 = vld [vmem:[%s15577_s3 + $0x318] sm:$0xff] }
0x237f   :  { %2532 = vmatprep.subr.mxu0 %v2367_v43  ;;  %v2703_v43 = vld [vmem:[%s15576_s2 + $0x18] sm:$0xff] }
0x2380   :  { %2533 = vmatpush1.msra.mxu0 %v2366_v45  ;;  %v2702_v45 = vld [vmem:[%s15576_s2 + $0x10] sm:$0xff] }
0x2381   :  { %2534 = vmatprep.subr.mxu0 %v2361_v13  ;;  %v2700_v13 = vld [vmem:[%s15576_s2] sm:$0xff] }
0x2382   :  { %2535 = vmatpush1.msra.mxu0 %v2360_v58 }
0x2383   :  { %2536 = vmatprep.subr.mxu0 %v2355_v14 }
0x2384   :  { %2537 = vmatpush1.msra.mxu0 %v2354_v23 }
0x2385   :  { %2538 = vmatprep.subr.mxu0 %v2349_v36 }
0x2386   :  { %2539 = vmatpush1.msra.mxu0 %v2348_v51 }
0x2387   :  { %2540 = vmatprep.subr.mxu0 %v2343_v20 }
0x2388   :  { %v9770_v61 = vpop.eup %9769  ;;  %2541 = vmatpush1.msra.mxu0 %v2342_v16  ;;  %v2433_v16 = vrot.slane %v11804_v59, %v15638_v19 }
0x2389   :  { %2542 = vmatprep.subr.mxu0 %v2337_v55  ;;  %2696 = vrot.lane.b32.xlu1 %v9770_v61, %s10005_s28  ;;  %v2527_v55 = vpop.f32.mrf.mxu1 }
0x238a   :  { %2543 = vmatpush1.msra.mxu0 %v2336_v1 }
0x238b   :  { %2544 = vmatprep.subr.mxu0 %v2331_v62 }
0x238c   :  { %2545 = vmatpush1.msra.mxu0 %v2330_v63 }
0x238d   :  { %2546 = vmatprep.subr.mxu0 %v2325_v6 }
0x238e   :  { %2547 = vmatpush1.msra.mxu0 %v2324_v10 }
0x238f   :  { %2548 = vmatprep.subr.mxu0 %v2319_v5 }
0x2390   :  { %2549 = vmatpush1.msra.mxu0 %v2318_v26 }
0x2391   :  { %2550 = vmatprep.subr.mxu0 %v2313_v12 }
0x2392   :  { %2551 = vmatpush1.msra.mxu0 %v2312_v15 }
0x2393   :  { %2552 = vmatprep.subr.mxu0 %v2307_v18 }
0x2394   :  { %2553 = vmatpush1.msra.mxu0 %v2306_v27 }
0x2395   :  { %2554 = vmatprep.subr.mxu0 %v2301_v32 }
0x2396   :  { %2555 = vmatpush1.msra.mxu0 %v2300_v35 }
0x2397   :  { %2556 = vmatprep.subr.mxu0 %v2295_v17 }
0x2398   :  { %2557 = vmatpush1.msra.mxu0 %v2294_v31 }
0x2399   :  { %2558 = vmatprep.subr.mxu0 %v2289_v38  ;;  %v8671_v38 = vld [vmem:[%s15576_s2 + $0x38] sm:$0xff] }
0x239a   :  { %2559 = vmatpush1.msra.mxu0 %v2288_v11  ;;  %v8670_v11 = vld [vmem:[%s15576_s2 + $0x30] sm:$0xff] }
0x239b   :  { %2560 = vmatprep.subr.mxu0 %v2283_v39  ;;  %v8668_v39 = vld [vmem:[%s15576_s2 + $0x20] sm:$0xff] }
0x239c   :  { %2561 = vmatpush1.msra.mxu0 %v2282_v40 }
0x239d   :  { %2578 = vmatprep.subr.mxu0 %v2421_v41 }
0x239e   :  { %2579 = vmatpush2.msra.mxu0 %v2420_v7 }
0x239f   :  { %2580 = vmatprep.subr.mxu0 %v2415_v42 }
0x23a0   :  { %2581 = vmatpush2.msra.mxu0 %v2414_v28  ;;  %v2437_v28 = vrot.slane %v11804_v59, %v15640_v9 }
0x23a1   :  { %2582 = vmatprep.subr.mxu0 %v2409_v47 }
0x23a2   :  { %2583 = vmatpush2.msra.mxu0 %v2408_v48 }
0x23a3   :  { %2584 = vmatprep.subr.mxu0 %v2403_v8 }
0x23a4   :  { %2585 = vmatpush2.msra.mxu0 %v2402_v29 }
0x23a5   :  { %2586 = vmatprep.subr.mxu0 %v2397_v56 }
0x23a6   :  { %2587 = vmatpush2.msra.mxu0 %v2396_v34 }
0x23a7   :  { %2588 = vmatprep.subr.mxu0 %v2391_v53 }
0x23a8   :  { %2589 = vmatpush2.msra.mxu0 %v2390_v4 }
0x23a9   :  { %2590 = vmatprep.subr.mxu0 %v2385_v22 }
0x23aa   :  { %2591 = vmatpush2.msra.mxu0 %v2384_v24 }
0x23ab   :  { %2592 = vmatprep.subr.mxu0 %v2379_v25 }
0x23ac   :  { %2593 = vmatpush2.msra.mxu0 %v2378_v57 }
0x23ad   :  { %2595 = vmatmul.mubr.f32.vlgmr.msra.gmra.mxu0 %v11657_v37  ;;  %9286 = vmatprep.subr.mxu0 %v15626_v50  ;;  %v2701_v37 = vld [vmem:[%s15576_s2 + $0x8] sm:$0xff] }
0x23ae   :  { %9294 = vmatprep.mubr.msk.f32.mxu0 %vm10007_vm4, %v15626_v50  ;;  %9287 = vmatpush3.msra.mxu0 %v2703_v43 }
0x23af   :  { %9288 = vmatprep.subr.mxu0 %v15626_v50 }
0x23b0   :  { %9289 = vmatpush3.msra.mxu0 %v2702_v45 }
0x23b1   :  { %9290 = vmatprep.subr.mxu0 %v15626_v50 }
0x23b2   :  { %9291 = vmatpush3.msra.mxu0 %v2701_v37 }
0x23b3   :  { %9292 = vmatprep.subr.mxu0 %v15626_v50 }
0x23b4   :  { %9293 = vmatpush3.msra.mxu0 %v2700_v13 }
0x23b5   :  { %9297 = vmatprep.subr.mxu0 %v15626_v50 }
0x23fb   :  { %v2697_v58 = vpop.permute.xlu1 %2696 }
0x23fc   :  { %v2699_v14 = vmul.f32 %v11816_v30, %v2697_v58  ;;  %v2528_v30 = vadd.f32 %v2527_v55, %v2433_v16  ;;  %v8678_v58 = vld [vmem:[%s15576_s2 + $0x58] sm:$0xff] }
0x23fe   :  { %2705 = vrot.lane.b32.xlu1 %v2699_v14, %s10006_s29  ;;  %v8677_v14 = vld [vmem:[%s15576_s2 + $0x50] sm:$0xff] }
0x243d   :  { %v12008_v23 = vpop.f32.mrf.mxu0 }
0x243f   :  { %v9285_v36 = vpop.f32.mrf.mxu0 }
0x2440   :  { %v8675_v36 = vld [vmem:[%s15576_s2 + $0x40] sm:$0xff] }
0x246d   :  { %v2596_v20 = vpop.f32.mrf.mxu0 }
0x246e   :  { %v2597_v47 = vadd.f32 %v2596_v20, %v2437_v28 }
0x246f   :  { %v12018_v1 = vpop.f32.mrf.mxu0 }
0x2470   :  { %v12010_v51 = vpop.permute.xlu1 %2705 }
0x2471   :  { %9295 = vmatmul.mubr.msk.f32.vlgmr.msra.gmra.mxu0 %vm606_vm5, %v12010_v51 }
0x2472   :  { %9305 = vmatprep.mubr.msk.f32.mxu0 %vm10007_vm4, %v15626_v50  ;;  %9298 = vmatpush3.msra.mxu0 %v8671_v38 }
0x2473   :  { %9299 = vmatprep.subr.mxu0 %v15626_v50 }
0x2474   :  { %9300 = vmatpush3.msra.mxu0 %v8670_v11 }
0x2475   :  { %9301 = vmatprep.subr.mxu0 %v15626_v50 }
0x2531   :  { %v2775_v61 = vpop.f32.mrf.mxu0 }
0x2532   :  { %v2776_v62 = vadd.f32 %v2775_v61, %v2528_v30  ;;  %v2441_v61 = vrot.slane %v11804_v59, %v15642_v21 }
0x2533   :  { %v9296_v63 = vpop.f32.mrf.mxu0 }
0x2534   :  { %v2779_v6 = vmul.f32 %v2776_v62, %v10224_v0  ;;  %v2599_v62 = vadd.f32 %v12018_v1, %v2441_v61 }
0x2536   :  { %v8666_v10 = vmul.f32 -1.442695, %v2779_v6 }
0x2538   :  { %9771 = vpow2.f32 %v8666_v10 }
0x2545   :  { %v9772_v5 = vpop.eup %9771 }
0x2546   :  { %v2783_v26 = vadd.f32 1.0, %v9772_v5 }
0x2548   :  { %9773 = vrcp.f32 %v2783_v26 }
0x2555   :  { %v9774_v12 = vpop.eup %9773 }
0x2556   :  { %v2786_v15 = vmul.f32 2.0, %v9774_v12  ;;  %v2788_v35 = vmul.f32 %v9774_v12, %v11345_v52  ;;  %v8669_v52 = vld [vmem:[%s15576_s2 + $0x28] sm:$0xff] }
0x2557   :  { %9302 = vmatpush3.msra.mxu0 %v8669_v52  ;;  %v8685_v52 = vld [vmem:[%s15576_s2 + $0x78] sm:$0xff] }
0x2558   :  { %v8667_v18 = vadd.f32 -1.0, %v2786_v15  ;;  %9303 = vmatprep.subr.mxu0 %v15626_v50 }
0x2559   :  { %9304 = vmatpush3.msra.mxu0 %v8668_v39  ;;  %v8684_v39 = vld [vmem:[%s15576_s2 + $0x70] sm:$0xff] }
0x255a   :  { %2790 = vrot.lane.b32.xlu0 %v8667_v18, %s10005_s28  ;;  %9308 = vmatprep.subr.mxu0 %v15626_v50 }
0x25cc   :  { %v2791_v27 = vpop.permute.xlu0 %2790 }
0x25cd   :  { %v2793_v32 = vmul.f32 %v9774_v12, %v2791_v27 }
0x25cf   :  { %2795 = vrot.lane.b32.xlu1 %v2793_v32, %s10006_s29 }
0x2641   :  { %v2796_v17 = vpop.permute.xlu1 %2795 }
0x2642   :  { %v12024_v31 = vadd.f32 %v2796_v17, %v2788_v35 }
0x2644   :  { %9775 = vtanh.f32 %v12024_v31 }
0x2651   :  { %v9776_v40 = vpop.eup %9775 }
0x2652   :  { %2801 = vrot.lane.b32.xlu0 %v9776_v40, %s10005_s28  ;;  %v8682_v40 = vld [vmem:[%s15576_s2 + $0x60] sm:$0xff] }
0x26c4   :  { %v2802_v41 = vpop.permute.xlu0 %2801 }
0x26c5   :  { %v12044_v7 = vmul.f32 %v9774_v12, %v2802_v41 }
0x26c7   :  { %2810 = vrot.lane.b32.xlu1 %v12044_v7, %s10006_s29 }
0x2739   :  { %v2811_v42 = vpop.permute.xlu1 %2810 }
0x273a   :  { %9306 = vmatmul.mubr.msk.f32.vlgmr.msra.gmra.mxu0 %vm606_vm5, %v2811_v42 }
0x273b   :  { %9316 = vmatprep.mubr.msk.f32.mxu0 %vm10007_vm4, %v15626_v50  ;;  %9309 = vmatpush3.msra.mxu0 %v8678_v58 }
0x273c   :  { %9310 = vmatprep.subr.mxu0 %v15626_v50 }
0x273d   :  { %9311 = vmatpush3.msra.mxu0 %v8677_v14 }
0x273e   :  { %9312 = vmatprep.subr.mxu0 %v15626_v50 }
0x27fa   :  { %v2880_v48 = vpop.f32.mrf.mxu0 }
0x27fb   :  { %v2881_v8 = vadd.f32 %v2880_v48, %v2597_v47  ;;  %v2445_v48 = vrot.slane %v11804_v59, %v10851_v46 }
0x27fc   :  { %v9307_v29 = vpop.f32.mrf.mxu0 }
0x27fd   :  { %v2884_v56 = vmul.f32 %v2881_v8, %v10224_v0  ;;  %v2667_v8 = vpop.f32.mrf.mxu1 }
0x27fe   :  { %v2668_v29 = vadd.f32 %v2667_v8, %v2445_v48  ;;  %v3409_v48 = vld [vmem:[%s15577_s3 + $0x278] sm:$0xff]  ;;  %v3408_v8 = vld [vmem:[%s15577_s3 + $0x270] sm:$0xff] }
0x27ff   :  { %v8673_v34 = vmul.f32 -1.442695, %v2884_v56 }
0x2801   :  { %9777 = vpow2.f32 %v8673_v34 }
0x280e   :  { %v9778_v53 = vpop.eup %9777 }
0x280f   :  { %v2888_v4 = vadd.f32 1.0, %v9778_v53 }
0x2811   :  { %9779 = vrcp.f32 %v2888_v4 }
0x281e   :  { %v9780_v22 = vpop.eup %9779 }
0x281f   :  { %v2891_v24 = vmul.f32 2.0, %v9780_v22  ;;  %v2893_v45 = vmul.f32 %v9780_v22, %v11378_v44  ;;  %v8676_v44 = vld [vmem:[%s15576_s2 + $0x48] sm:$0xff] }
0x2820   :  { %9313 = vmatpush3.msra.mxu0 %v8676_v44 }
0x2821   :  { %v8674_v25 = vadd.f32 -1.0, %v2891_v24  ;;  %9314 = vmatprep.subr.mxu0 %v15626_v50 }
0x2822   :  { %9315 = vmatpush3.msra.mxu0 %v8675_v36 }
0x2823   :  { %2895 = vrot.lane.b32.xlu0 %v8674_v25, %s10005_s28  ;;  %9319 = vmatprep.subr.mxu0 %v15626_v50 }
0x2895   :  { %v2896_v57 = vpop.permute.xlu0 %2895 }
0x2896   :  { %v2898_v43 = vmul.f32 %v9780_v22, %v2896_v57 }
0x2898   :  { %2900 = vrot.lane.b32.xlu1 %v2898_v43, %s10006_s29 }
0x290a   :  { %v2901_v37 = vpop.permute.xlu1 %2900 }
0x290b   :  { %v12057_v13 = vadd.f32 %v2901_v37, %v2893_v45 }
0x290d   :  { %9781 = vtanh.f32 %v12057_v13 }
0x291a   :  { %v9782_v20 = vpop.eup %9781 }
0x291b   :  { %2906 = vrot.lane.b32.xlu0 %v9782_v20, %s10005_s28  ;;  %v8692_v20 = vld [vmem:[%s15576_s2 + $0x98] sm:$0xff] }
0x298d   :  { %v2907_v16 = vpop.permute.xlu0 %2906 }
0x298e   :  { %v12077_v55 = vmul.f32 %v9780_v22, %v2907_v16  ;;  %v8691_v16 = vld [vmem:[%s15576_s2 + $0x90] sm:$0xff] }
0x2990   :  { %2915 = vrot.lane.b32.xlu1 %v12077_v55, %s10006_s29 }
0x2a02   :  { %v2916_v30 = vpop.permute.xlu1 %2915 }
0x2a03   :  { %9317 = vmatmul.mubr.msk.f32.vlgmr.msra.gmra.mxu0 %vm606_vm5, %v2916_v30  ;;  %v8689_v30 = vld [vmem:[%s15576_s2 + $0x80] sm:$0xff] }
0x2a04   :  { %9327 = vmatprep.mubr.msk.f32.mxu0 %vm10007_vm4, %v15626_v50  ;;  %9320 = vmatpush3.msra.mxu0 %v8685_v52 }
0x2a05   :  { %9321 = vmatprep.subr.mxu0 %v15626_v50 }
0x2a06   :  { %9322 = vmatpush3.msra.mxu0 %v8684_v39 }
0x2a07   :  { %9323 = vmatprep.subr.mxu0 %v15626_v50 }
0x2ac3   :  { %v2985_v63 = vpop.f32.mrf.mxu0 }
0x2ac4   :  { %v2986_v6 = vadd.f32 %v2985_v63, %v2599_v62 }
0x2ac5   :  { %v9318_v10 = vpop.f32.mrf.mxu0 }
0x2ac6   :  { %v2989_v5 = vmul.f32 %v2986_v6, %v10224_v0  ;;  %v2449_v10 = vrot.slane %v11804_v59, %v10886_v33 }
0x2ac8   :  { %v8680_v26 = vmul.f32 -1.442695, %v2989_v5  ;;  %v2669_v5 = vpop.f32.mrf.mxu1 }
0x2aca   :  { %9783 = vpow2.f32 %v8680_v26  ;;  %v2670_v26 = vadd.f32 %v2669_v5, %v2449_v10  ;;  %v3337_v10 = vld [vmem:[%s15577_s3 + $0x38] sm:$0xff]  ;;  %v3336_v5 = vld [vmem:[%s15577_s3 + $0x30] sm:$0xff] }
0x2ad7   :  { %v9784_v12 = vpop.eup %9783 }
0x2ad8   :  { %v2993_v15 = vadd.f32 1.0, %v9784_v12 }
0x2ada   :  { %9785 = vrcp.f32 %v2993_v15 }
0x2ae7   :  { %v9786_v18 = vpop.eup %9785 }
0x2ae8   :  { %v2996_v27 = vmul.f32 2.0, %v9786_v18  ;;  %v2998_v1 = vmul.f32 %v9786_v18, %v11412_v60  ;;  %v8683_v60 = vld [vmem:[%s15576_s2 + $0x68] sm:$0xff] }
0x2ae9   :  { %9324 = vmatpush3.msra.mxu0 %v8683_v60 }
0x2aea   :  { %v8681_v32 = vadd.f32 -1.0, %v2996_v27  ;;  %9325 = vmatprep.subr.mxu0 %v15626_v50 }
0x2aeb   :  { %9326 = vmatpush3.msra.mxu0 %v8682_v40 }
0x2aec   :  { %3000 = vrot.lane.b32.xlu0 %v8681_v32, %s10005_s28  ;;  %9330 = vmatprep.subr.mxu0 %v15626_v50 }
0x2b5e   :  { %v3001_v35 = vpop.permute.xlu0 %3000 }
0x2b5f   :  { %v3003_v17 = vmul.f32 %v9786_v18, %v3001_v35 }
0x2b61   :  { %3005 = vrot.lane.b32.xlu1 %v3003_v17, %s10006_s29 }
0x2bd3   :  { %v3006_v38 = vpop.permute.xlu1 %3005 }
0x2bd4   :  { %v12091_v11 = vadd.f32 %v3006_v38, %v2998_v1 }
0x2bd6   :  { %9787 = vtanh.f32 %v12091_v11 }
0x2be3   :  { %v9788_v41 = vpop.eup %9787 }
0x2be4   :  { %3011 = vrot.lane.b32.xlu0 %v9788_v41, %s10005_s28 }
0x2c56   :  { %v3012_v42 = vpop.permute.xlu0 %3011 }
0x2c57   :  { %v12111_v28 = vmul.f32 %v9786_v18, %v3012_v42  ;;  %v3421_v42 = vld [vmem:[%s15577_s3 + $0x2d8] sm:$0xff] }
0x2c58   :  { %3509 = vmatprep.subr.mxu1 %v3421_v42  ;;  %v3433_v42 = vld [vmem:[%s15577_s3 + $0x338] sm:$0xff] }
0x2c59   :  { %3020 = vrot.lane.b32.xlu1 %v12111_v28, %s10006_s29 }
0x2ccb   :  { %v3021_v47 = vpop.permute.xlu1 %3020 }
0x2ccc   :  { %9328 = vmatmul.mubr.msk.f32.vlgmr.msra.gmra.mxu0 %vm606_vm5, %v3021_v47  ;;  %v3420_v47 = vld [vmem:[%s15577_s3 + $0x2d0] sm:$0xff] }
0x2ccd   :  { %9338 = vmatprep.mubr.msk.f32.mxu0 %vm10007_vm4, %v15626_v50  ;;  %9331 = vmatpush3.msra.mxu0 %v8692_v20  ;;  %v3360_v20 = vld [vmem:[%s15577_s3 + $0xf0] sm:$0xff] }
0x2cce   :  { %9332 = vmatprep.subr.mxu0 %v15626_v50  ;;  %3510 = vmatpush1.msra.mxu1 %v3420_v47  ;;  %v3432_v47 = vld [vmem:[%s15577_s3 + $0x330] sm:$0xff] }
0x2ccf   :  { %9333 = vmatpush3.msra.mxu0 %v8691_v16  ;;  %v3355_v16 = vld [vmem:[%s15577_s3 + $0xc8] sm:$0xff] }
0x2cd0   :  { %9334 = vmatprep.subr.mxu0 %v15626_v50 }
0x2d8c   :  { %v3090_v56 = vpop.f32.mrf.mxu0 }
0x2d8d   :  { %v3091_v34 = vadd.f32 %v3090_v56, %v2668_v29  ;;  %v3403_v29 = vld [vmem:[%s15577_s3 + $0x248] sm:$0xff]  ;;  %v3402_v56 = vld [vmem:[%s15577_s3 + $0x240] sm:$0xff] }
0x2d8e   :  { %v9329_v53 = vpop.f32.mrf.mxu0 }
0x2d8f   :  { %v3094_v4 = vmul.f32 %v3091_v34, %v10224_v0  ;;  %v3397_v34 = vld [vmem:[%s15577_s3 + $0x218] sm:$0xff]  ;;  %v3396_v53 = vld [vmem:[%s15577_s3 + $0x210] sm:$0xff] }
0x2d91   :  { %v8687_v22 = vmul.f32 -1.442695, %v3094_v4 }
0x2d93   :  { %9789 = vpow2.f32 %v8687_v22  ;;  %v3391_v22 = vld [vmem:[%s15577_s3 + $0x1e8] sm:$0xff] }
0x2da0   :  { %v9790_v24 = vpop.eup %9789 }
0x2da1   :  { %v3098_v25 = vadd.f32 1.0, %v9790_v24  ;;  %v3390_v24 = vld [vmem:[%s15577_s3 + $0x1e0] sm:$0xff] }
0x2da3   :  { %9791 = vrcp.f32 %v3098_v25  ;;  %v3385_v25 = vld [vmem:[%s15577_s3 + $0x1b8] sm:$0xff] }
0x2db0   :  { %v9792_v57 = vpop.eup %9791 }
0x2db1   :  { %v3101_v43 = vmul.f32 2.0, %v9792_v57  ;;  %v3103_v14 = vmul.f32 %v9792_v57, %v11445_v49  ;;  %v8690_v49 = vld [vmem:[%s15576_s2 + $0x88] sm:$0xff] }
0x2db2   :  { %9335 = vmatpush3.msra.mxu0 %v8690_v49  ;;  %v3354_v49 = vld [vmem:[%s15577_s3 + $0xc0] sm:$0xff] }
0x2db3   :  { %v8688_v45 = vadd.f32 -1.0, %v3101_v43  ;;  %9336 = vmatprep.subr.mxu0 %v15626_v50  ;;  %v3379_v43 = vld [vmem:[%s15577_s3 + $0x188] sm:$0xff] }
0x2db4   :  { %9337 = vmatpush3.msra.mxu0 %v8689_v30  ;;  %v3349_v30 = vld [vmem:[%s15577_s3 + $0x98] sm:$0xff] }
0x2db5   :  { %3105 = vrot.lane.b32.xlu0 %v8688_v45, %s10005_s28  ;;  %9341 = vmatprep.subr.mxu0 %v15626_v50  ;;  %v3378_v45 = vld [vmem:[%s15577_s3 + $0x180] sm:$0xff] }
0x2e27   :  { %v3106_v37 = vpop.permute.xlu0 %3105 }
0x2e28   :  { %v3108_v58 = vmul.f32 %v9792_v57, %v3106_v37  ;;  %v3373_v37 = vld [vmem:[%s15577_s3 + $0x158] sm:$0xff] }
0x2e2a   :  { %3110 = vrot.lane.b32.xlu1 %v3108_v58, %s10006_s29  ;;  %v3372_v58 = vld [vmem:[%s15577_s3 + $0x150] sm:$0xff] }
0x2e9c   :  { %v3111_v44 = vpop.permute.xlu1 %3110 }
0x2e9d   :  { %v12124_v36 = vadd.f32 %v3111_v44, %v3103_v14  ;;  %v3366_v14 = vld [vmem:[%s15577_s3 + $0x120] sm:$0xff]  ;;  %v3361_v44 = vld [vmem:[%s15577_s3 + $0xf8] sm:$0xff] }
0x2e9f   :  { %9793 = vtanh.f32 %v12124_v36 }
0x2eac   :  { %v9794_v61 = vpop.eup %9793 }
0x2ead   :  { %3116 = vrot.lane.b32.xlu0 %v9794_v61, %s10005_s28  ;;  %v3348_v61 = vld [vmem:[%s15577_s3 + $0x90] sm:$0xff] }
0x2f1f   :  { %v3117_v62 = vpop.permute.xlu0 %3116 }
0x2f20   :  { %v3119_v63 = vmul.f32 %v9792_v57, %v3117_v62  ;;  %v3384_v57 = vld [vmem:[%s15577_s3 + $0x1b0] sm:$0xff]  ;;  %v3343_v62 = vld [vmem:[%s15577_s3 + $0x68] sm:$0xff] }
0x2f22   :  { %3125 = vrot.lane.b32.xlu1 %v3119_v63, %s10006_s29  ;;  %v3342_v63 = vld [vmem:[%s15577_s3 + $0x60] sm:$0xff] }
0x2f94   :  { %v12145_v6 = vpop.permute.xlu1 %3125 }
0x2f95   :  { %9339 = vmatmul.mubr.msk.f32.vlgmr.msra.gmra.mxu0 %vm606_vm5, %v12145_v6 }
0x2f96   :  { %9349 = vmatprep.mubr.msk.f32.mxu0 %vm10007_vm4, %v15626_v50 }
0x3055   :  { %v3195_v12 = vpop.f32.mrf.mxu0 }
0x3056   :  { %v3196_v15 = vadd.f32 %v3195_v12, %v2670_v26  ;;  %v3331_v26 = vld [vmem:[%s15577_s3 + $0x8] sm:$0xff]  ;;  %v3330_v12 = vld [vmem:[%s15577_s3] sm:$0xff] }
0x3057   :  { %v9340_v18 = vpop.f32.mrf.mxu0 }
0x3058   :  { %v3199_v27 = vmul.f32 %v3196_v15, %v10224_v0  ;;  %v3469_v15 = vld [vmem:[%s15577_s3 + $0x458] sm:$0xff]  ;;  %v3468_v18 = vld [vmem:[%s15577_s3 + $0x450] sm:$0xff] }
0x305a   :  { %v8694_v32 = vmul.f32 -1.442695, %v3199_v27  ;;  %v3463_v27 = vld [vmem:[%s15577_s3 + $0x428] sm:$0xff] }
0x305c   :  { %9795 = vpow2.f32 %v8694_v32  ;;  %v3462_v32 = vld [vmem:[%s15577_s3 + $0x420] sm:$0xff] }
0x3069   :  { %v9796_v35 = vpop.eup %9795 }
0x306a   :  { %v3203_v17 = vadd.f32 1.0, %v9796_v35  ;;  %v3457_v35 = vld [vmem:[%s15577_s3 + $0x3f8] sm:$0xff] }
0x306c   :  { %9797 = vrcp.f32 %v3203_v17  ;;  %v3456_v17 = vld [vmem:[%s15577_s3 + $0x3f0] sm:$0xff] }
0x3079   :  { %v12154_v1 = vpop.eup %9797 }
0x307a   :  { %v3206_v38 = vmul.f32 2.0, %v12154_v1  ;;  %v3208_v60 = vmul.f32 %v12154_v1, %v11485_v3  ;;  %v3414_v3 = vld [vmem:[%s15577_s3 + $0x2a0] sm:$0xff] }
0x307c   :  { %v8695_v52 = vadd.f32 -1.0, %v3206_v38  ;;  %v3451_v38 = vld [vmem:[%s15577_s3 + $0x3c8] sm:$0xff] }
0x307e   :  { %3210 = vrot.lane.b32.xlu0 %v8695_v52, %s10005_s28  ;;  %v3450_v52 = vld [vmem:[%s15577_s3 + $0x3c0] sm:$0xff] }
0x30f0   :  { %v3211_v59 = vpop.permute.xlu0 %3210 }
0x30f1   :  { %v3213_v39 = vmul.f32 %v12154_v1, %v3211_v59  ;;  %v3445_v59 = vld [vmem:[%s15577_s3 + $0x398] sm:$0xff] }
0x30f3   :  { %3215 = vrot.lane.b32.xlu1 %v3213_v39, %s10006_s29  ;;  %v3444_v39 = vld [vmem:[%s15577_s3 + $0x390] sm:$0xff] }
0x30f7   :  { %3316 = vrot.lane.b32.xlu1 %v12044_v7, %s10005_s28  ;;  %v3415_v7 = vld [vmem:[%s15577_s3 + $0x2a8] sm:$0xff] }
0x30f8   :  { %3511 = vmatprep.subr.mxu1 %v3415_v7  ;;  %v3427_v7 = vld [vmem:[%s15577_s3 + $0x308] sm:$0xff] }
0x30f9   :  { %3512 = vmatpush1.msra.mxu1 %v3414_v3  ;;  %v3426_v3 = vld [vmem:[%s15577_s3 + $0x300] sm:$0xff] }
0x30fa   :  { %3513 = vmatprep.subr.mxu1 %v3409_v48  ;;  %v3425_v48 = vld [vmem:[%s15577_s3 + $0x2f8] sm:$0xff] }
0x30fb   :  { %3514 = vmatpush1.msra.mxu1 %v3408_v8 }
0x30fc   :  { %3515 = vmatprep.subr.mxu1 %v3403_v29 }
0x30fd   :  { %3516 = vmatpush1.msra.mxu1 %v3402_v56 }
0x30fe   :  { %3517 = vmatprep.subr.mxu1 %v3397_v34 }
0x30ff   :  { %3518 = vmatpush1.msra.mxu1 %v3396_v53 }
0x3100   :  { %3519 = vmatprep.subr.mxu1 %v3391_v22 }
0x3101   :  { %3520 = vmatpush1.msra.mxu1 %v3390_v24 }
0x3102   :  { %3521 = vmatprep.subr.mxu1 %v3385_v25 }
0x3103   :  { %3522 = vmatpush1.msra.mxu1 %v3384_v57  ;;  %v3413_v57 = vld [vmem:[%s15577_s3 + $0x298] sm:$0xff] }
0x3104   :  { %3523 = vmatprep.subr.mxu1 %v3379_v43  ;;  %v3407_v43 = vld [vmem:[%s15577_s3 + $0x268] sm:$0xff] }
0x3105   :  { %3524 = vmatpush1.msra.mxu1 %v3378_v45  ;;  %v3406_v45 = vld [vmem:[%s15577_s3 + $0x260] sm:$0xff] }
0x3106   :  { %3525 = vmatprep.subr.mxu1 %v3373_v37  ;;  %v3401_v37 = vld [vmem:[%s15577_s3 + $0x238] sm:$0xff] }
0x3107   :  { %3526 = vmatpush1.msra.mxu1 %v3372_v58  ;;  %v3400_v58 = vld [vmem:[%s15577_s3 + $0x230] sm:$0xff] }
0x3165   :  { %v3216_v40 = vpop.permute.xlu1 %3215 }
0x3166   :  { %v12164_v41 = vadd.f32 %v3216_v40, %v3208_v60  ;;  %v3439_v60 = vld [vmem:[%s15577_s3 + $0x368] sm:$0xff]  ;;  %v3438_v40 = vld [vmem:[%s15577_s3 + $0x360] sm:$0xff] }
0x3168   :  { %9799 = vtanh.f32 %v12164_v41 }
0x3169   :  { %v3317_v56 = vpop.permute.xlu1 %3316 }
0x316a   :  { %v3326_v53 = vsel %vm606_vm5, %v12010_v51, %v3317_v56  ;;  %v3419_v51 = vld [vmem:[%s15577_s3 + $0x2c8] sm:$0xff] }
0x316b   :  { %v3443_v56 = vld [vmem:[%s15577_s3 + $0x388] sm:$0xff] }
0x3175   :  { %v9800_v4 = vpop.eup %9799 }
0x3176   :  { %3221 = vrot.lane.b32.xlu0 %v9800_v4, %s10005_s28 }
0x317a   :  { %3319 = vrot.lane.b32.xlu0 %v12077_v55, %s10008_s18  ;;  %v3367_v55 = vld [vmem:[%s15577_s3 + $0x128] sm:$0xff] }
0x317b   :  { %3527 = vmatprep.subr.mxu1 %v3367_v55  ;;  %v3395_v55 = vld [vmem:[%s15577_s3 + $0x208] sm:$0xff] }
0x317c   :  { %3528 = vmatpush1.msra.mxu1 %v3366_v14  ;;  %v3394_v14 = vld [vmem:[%s15577_s3 + $0x200] sm:$0xff] }
0x317d   :  { %3529 = vmatprep.subr.mxu1 %v3361_v44  ;;  %v3389_v44 = vld [vmem:[%s15577_s3 + $0x1d8] sm:$0xff] }
0x317e   :  { %3530 = vmatpush1.msra.mxu1 %v3360_v20  ;;  %v3388_v20 = vld [vmem:[%s15577_s3 + $0x1d0] sm:$0xff] }
0x317f   :  { %3531 = vmatprep.subr.mxu1 %v3355_v16  ;;  %v3383_v16 = vld [vmem:[%s15577_s3 + $0x1a8] sm:$0xff] }
0x3180   :  { %3532 = vmatpush1.msra.mxu1 %v3354_v49  ;;  %v3382_v49 = vld [vmem:[%s15577_s3 + $0x1a0] sm:$0xff] }
0x3181   :  { %3533 = vmatprep.subr.mxu1 %v3349_v30  ;;  %v3377_v30 = vld [vmem:[%s15577_s3 + $0x178] sm:$0xff] }
0x3182   :  { %3534 = vmatpush1.msra.mxu1 %v3348_v61  ;;  %v3376_v61 = vld [vmem:[%s15577_s3 + $0x170] sm:$0xff] }
0x3183   :  { %3535 = vmatprep.subr.mxu1 %v3343_v62  ;;  %v3371_v62 = vld [vmem:[%s15577_s3 + $0x148] sm:$0xff] }
0x3184   :  { %3536 = vmatpush1.msra.mxu1 %v3342_v63  ;;  %v3370_v63 = vld [vmem:[%s15577_s3 + $0x140] sm:$0xff] }
0x3185   :  { %3537 = vmatprep.subr.mxu1 %v3337_v10  ;;  %v3365_v10 = vld [vmem:[%s15577_s3 + $0x118] sm:$0xff] }
0x3186   :  { %3538 = vmatpush1.msra.mxu1 %v3336_v5  ;;  %v3364_v5 = vld [vmem:[%s15577_s3 + $0x110] sm:$0xff] }
0x3187   :  { %3539 = vmatprep.subr.mxu1 %v3331_v26  ;;  %v3359_v26 = vld [vmem:[%s15577_s3 + $0xe8] sm:$0xff] }
0x3188   :  { %3540 = vmatpush1.msra.mxu1 %v3330_v12  ;;  %v3358_v12 = vld [vmem:[%s15577_s3 + $0xe0] sm:$0xff] }
0x3189   :  { %3557 = vmatprep.subr.mxu1 %v3469_v15  ;;  %v3353_v15 = vld [vmem:[%s15577_s3 + $0xb8] sm:$0xff] }
0x318a   :  { %3558 = vmatpush2.msra.mxu1 %v3468_v18  ;;  %v3352_v18 = vld [vmem:[%s15577_s3 + $0xb0] sm:$0xff] }
0x318b   :  { %3559 = vmatprep.subr.mxu1 %v3463_v27  ;;  %v3347_v27 = vld [vmem:[%s15577_s3 + $0x88] sm:$0xff] }
0x318c   :  { %3560 = vmatpush2.msra.mxu1 %v3462_v32  ;;  %v3346_v32 = vld [vmem:[%s15577_s3 + $0x80] sm:$0xff] }
0x318d   :  { %3561 = vmatprep.subr.mxu1 %v3457_v35  ;;  %v3341_v35 = vld [vmem:[%s15577_s3 + $0x58] sm:$0xff] }
0x318e   :  { %3562 = vmatpush2.msra.mxu1 %v3456_v17  ;;  %v3340_v17 = vld [vmem:[%s15577_s3 + $0x50] sm:$0xff] }
0x318f   :  { %3563 = vmatprep.subr.mxu1 %v3451_v38  ;;  %v3335_v38 = vld [vmem:[%s15577_s3 + $0x28] sm:$0xff] }
0x3190   :  { %3564 = vmatpush2.msra.mxu1 %v3450_v52  ;;  %v3334_v52 = vld [vmem:[%s15577_s3 + $0x20] sm:$0xff] }
0x3191   :  { %3565 = vmatprep.subr.mxu1 %v3445_v59  ;;  %v3473_v59 = vld [vmem:[%s15577_s3 + $0x478] sm:$0xff] }
0x3192   :  { %3566 = vmatpush2.msra.mxu1 %v3444_v39  ;;  %v3472_v39 = vld [vmem:[%s15577_s3 + $0x470] sm:$0xff] }
0x3193   :  { %3567 = vmatprep.subr.mxu1 %v3439_v60  ;;  %v3467_v60 = vld [vmem:[%s15577_s3 + $0x448] sm:$0xff] }
0x3194   :  { %3568 = vmatpush2.msra.mxu1 %v3438_v40  ;;  %v3466_v40 = vld [vmem:[%s15577_s3 + $0x440] sm:$0xff] }
0x3195   :  { %3569 = vmatprep.subr.mxu1 %v3433_v42  ;;  %v3461_v42 = vld [vmem:[%s15577_s3 + $0x418] sm:$0xff] }
0x3196   :  { %3570 = vmatpush2.msra.mxu1 %v3432_v47  ;;  %v3460_v47 = vld [vmem:[%s15577_s3 + $0x410] sm:$0xff] }
0x3197   :  { %3571 = vmatprep.subr.mxu1 %v3427_v7  ;;  %v3455_v7 = vld [vmem:[%s15577_s3 + $0x3e8] sm:$0xff] }
0x3198   :  { %3572 = vmatpush2.msra.mxu1 %v3426_v3  ;;  %v3454_v3 = vld [vmem:[%s15577_s3 + $0x3e0] sm:$0xff] }
0x3199   :  { %3651 = vmatprep.subr.mxu1 %v3425_v48  ;;  %v3449_v48 = vld [vmem:[%s15577_s3 + $0x3b8] sm:$0xff] }
0x31e8   :  { %v3222_v8 = vpop.permute.xlu0 %3221 }
0x31e9   :  { %v12318_v29 = vmul.f32 %v12154_v1, %v3222_v8  ;;  %v3424_v1 = vld [vmem:[%s15577_s3 + $0x2f0] sm:$0xff] }
0x31ea   :  { %v3448_v8 = vld [vmem:[%s15577_s3 + $0x3b0] sm:$0xff] }
0x31eb   :  { %3323 = vrot.lane.b32.xlu1 %v12318_v29, %s10005_s28 }
0x31ec   :  { %v3320_v34 = vpop.permute.xlu0 %3319 }
0x31ed   :  { %v3327_v4 = vsel %vm354_vm6, %v3326_v53, %v3320_v34  ;;  %v3442_v34 = vld [vmem:[%s15577_s3 + $0x380] sm:$0xff]  ;;  %v3437_v53 = vld [vmem:[%s15577_s3 + $0x358] sm:$0xff] }
0x31ee   :  { %v12336_v25 = vsel %vm1227_vm7, %v3327_v4, %v12111_v28  ;;  %v3412_v28 = vld [vmem:[%s15577_s3 + $0x290] sm:$0xff] }
0x31ef   :  { %v3436_v4 = vld [vmem:[%s15577_s3 + $0x350] sm:$0xff] }
0x325d   :  { %v3324_v22 = vpop.permute.xlu1 %3323 }
0x325e   :  { %v12327_v24 = vsel %vm606_vm5, %v12145_v6, %v3324_v22  ;;  %v3418_v6 = vld [vmem:[%s15577_s3 + $0x2c0] sm:$0xff]  ;;  %v3431_v22 = vld [vmem:[%s15577_s3 + $0x328] sm:$0xff] }
0x325f   :  { %8698 = vmatprep.mubr.msk.f32.mxu1 %vm354_vm6, %v12327_v24 }
0x3260   :  { %3574 = vmatmul.mubr.f32.vlgmr.msra.gmra.mxu1 %v12336_v25 }
0x3261   :  { %3652 = vmatpush1.msra.mxu1 %v3424_v1  ;;  %8700 = vmatprep.mubr.msk.f32.mxu1 %vm354_vm6, %v12327_v24  ;;  %v3430_v1 = vld [vmem:[%s15577_s3 + $0x320] sm:$0xff] }
0x3262   :  { %3653 = vmatprep.subr.mxu1 %v3419_v51  ;;  %v12483_v51 = vld [vmem:[%s15578_s4] sm:$0x3f] }
0x3263   :  { %3654 = vmatpush1.msra.mxu1 %v3418_v6  ;;  %v3479_v6 = vrot.slane %v12483_v51, %v15635_v2 }
0x3264   :  { %3655 = vmatprep.subr.mxu1 %v3413_v57 }
0x3265   :  { %3656 = vmatpush1.msra.mxu1 %v3412_v28 }
0x3266   :  { %3657 = vmatprep.subr.mxu1 %v3407_v43  ;;  %v15645_v43 = vld [vmem:[#allocation9_spill] sm:$0xff] }
0x3267   :  { %3658 = vmatpush1.msra.mxu1 %v3406_v45 }
0x3268   :  { %3659 = vmatprep.subr.mxu1 %v3401_v37 }
0x3269   :  { %3660 = vmatpush1.msra.mxu1 %v3400_v58 }
0x326a   :  { %3661 = vmatprep.subr.mxu1 %v3395_v55 }
0x326b   :  { %3662 = vmatpush1.msra.mxu1 %v3394_v14 }
0x326c   :  { %3663 = vmatprep.subr.mxu1 %v3389_v44  ;;  %v3228_v44 = vld [vmem:[%s15579_s5 + $0x18] sm:$0xff] }
0x326d   :  { %3664 = vmatpush1.msra.mxu1 %v3388_v20  ;;  %v3227_v20 = vld [vmem:[%s15579_s5 + $0x10] sm:$0xff]  ;;  %9342 = vmatpush3.msra.mxu0 %v3228_v44  ;;  %v3465_v44 = vld [vmem:[%s15577_s3 + $0x438] sm:$0xff] }
0x326e   :  { %3665 = vmatprep.subr.mxu1 %v3383_v16  ;;  %9343 = vmatprep.subr.mxu0 %v15626_v50 }
0x326f   :  { %3666 = vmatpush1.msra.mxu1 %v3382_v49  ;;  %9344 = vmatpush3.msra.mxu0 %v3227_v20  ;;  %v3464_v20 = vld [vmem:[%s15577_s3 + $0x430] sm:$0xff] }
0x3270   :  { %3667 = vmatprep.subr.mxu1 %v3377_v30  ;;  %9345 = vmatprep.subr.mxu0 %v15626_v50 }
0x3271   :  { %3668 = vmatpush1.msra.mxu1 %v3376_v61  ;;  %v3226_v61 = vld [vmem:[%s15579_s5 + $0x8] sm:$0xff] }
0x3272   :  { %3669 = vmatprep.subr.mxu1 %v3371_v62  ;;  %9346 = vmatpush3.msra.mxu0 %v3226_v61  ;;  %v3225_v62 = vld [vmem:[%s15579_s5] sm:$0xff]  ;;  %v3453_v61 = vld [vmem:[%s15577_s3 + $0x3d8] sm:$0xff] }
0x3273   :  { %3670 = vmatpush1.msra.mxu1 %v3370_v63  ;;  %9347 = vmatprep.subr.mxu0 %v15626_v50  ;;  %v3423_v63 = vld [vmem:[%s15577_s3 + $0x2e8] sm:$0xff] }
0x3274   :  { %3671 = vmatprep.subr.mxu1 %v3365_v10  ;;  %9348 = vmatpush3.msra.mxu0 %v3225_v62  ;;  %v3452_v62 = vld [vmem:[%s15577_s3 + $0x3d0] sm:$0xff] }
0x3275   :  { %3672 = vmatpush1.msra.mxu1 %v3364_v5  ;;  %3580 = vmatprep.subr.mxu0 %v3423_v63  ;;  %v3447_v63 = vld [vmem:[%s15577_s3 + $0x3a8] sm:$0xff] }
0x3276   :  { %3673 = vmatprep.subr.mxu1 %v3359_v26 }
0x3277   :  { %3674 = vmatpush1.msra.mxu1 %v3358_v12 }
0x3278   :  { %3675 = vmatprep.subr.mxu1 %v3353_v15 }
0x3279   :  { %3676 = vmatpush1.msra.mxu1 %v3352_v18  ;;  %v3422_v18 = vld [vmem:[%s15577_s3 + $0x2e0] sm:$0xff] }
0x327a   :  { %3677 = vmatprep.subr.mxu1 %v3347_v27 }
0x327b   :  { %3678 = vmatpush1.msra.mxu1 %v3346_v32  ;;  %v3417_v32 = vld [vmem:[%s15577_s3 + $0x2b8] sm:$0xff] }
0x327c   :  { %3679 = vmatprep.subr.mxu1 %v3341_v35  ;;  %v3410_v35 = vld [vmem:[%s15577_s3 + $0x280] sm:$0xff] }
0x327d   :  { %3680 = vmatpush1.msra.mxu1 %v3340_v17  ;;  %v3405_v17 = vld [vmem:[%s15577_s3 + $0x258] sm:$0xff] }
0x327e   :  { %3681 = vmatprep.subr.mxu1 %v3335_v38  ;;  %v3404_v38 = vld [vmem:[%s15577_s3 + $0x250] sm:$0xff] }
0x327f   :  { %3682 = vmatpush1.msra.mxu1 %v3334_v52  ;;  %v3398_v52 = vld [vmem:[%s15577_s3 + $0x220] sm:$0xff] }
0x3280   :  { %3699 = vmatprep.subr.mxu1 %v3473_v59  ;;  %v3393_v59 = vld [vmem:[%s15577_s3 + $0x1f8] sm:$0xff] }
0x3281   :  { %3700 = vmatpush2.msra.mxu1 %v3472_v39  ;;  %v3392_v39 = vld [vmem:[%s15577_s3 + $0x1f0] sm:$0xff] }
0x3282   :  { %3701 = vmatprep.subr.mxu1 %v3467_v60  ;;  %v3387_v60 = vld [vmem:[%s15577_s3 + $0x1c8] sm:$0xff] }
0x3283   :  { %3702 = vmatpush2.msra.mxu1 %v3466_v40  ;;  %v3386_v40 = vld [vmem:[%s15577_s3 + $0x1c0] sm:$0xff] }
0x3284   :  { %3703 = vmatprep.subr.mxu1 %v3461_v42 }
0x3285   :  { %3704 = vmatpush2.msra.mxu1 %v3460_v47  ;;  %v3381_v47 = vld [vmem:[%s15577_s3 + $0x198] sm:$0xff] }
0x3286   :  { %3705 = vmatprep.subr.mxu1 %v3455_v7  ;;  %v3380_v7 = vld [vmem:[%s15577_s3 + $0x190] sm:$0xff] }
0x3287   :  { %3706 = vmatpush2.msra.mxu1 %v3454_v3  ;;  %v3375_v3 = vld [vmem:[%s15577_s3 + $0x168] sm:$0xff] }
0x3288   :  { %3707 = vmatprep.subr.mxu1 %v3449_v48  ;;  %v3374_v48 = vld [vmem:[%s15577_s3 + $0x160] sm:$0xff] }
0x3289   :  { %3708 = vmatpush2.msra.mxu1 %v3448_v8  ;;  %v3369_v8 = vld [vmem:[%s15577_s3 + $0x138] sm:$0xff] }
0x328a   :  { %3709 = vmatprep.subr.mxu1 %v3443_v56  ;;  %v3368_v56 = vld [vmem:[%s15577_s3 + $0x130] sm:$0xff] }
0x328b   :  { %3710 = vmatpush2.msra.mxu1 %v3442_v34  ;;  %v3363_v34 = vld [vmem:[%s15577_s3 + $0x108] sm:$0xff] }
0x328c   :  { %3711 = vmatprep.subr.mxu1 %v3437_v53  ;;  %v3362_v53 = vld [vmem:[%s15577_s3 + $0x100] sm:$0xff] }
0x328d   :  { %3712 = vmatpush2.msra.mxu1 %v3436_v4  ;;  %v3357_v4 = vld [vmem:[%s15577_s3 + $0xd8] sm:$0xff] }
0x328e   :  { %3713 = vmatprep.subr.mxu1 %v3431_v22  ;;  %v3356_v22 = vld [vmem:[%s15577_s3 + $0xd0] sm:$0xff] }
0x328f   :  { %3714 = vmatpush2.msra.mxu1 %v3430_v1  ;;  %v3351_v1 = vld [vmem:[%s15577_s3 + $0xa8] sm:$0xff] }
0x3290   :  { %3716 = vmatmul.mubr.f32.vlgmr.msra.gmra.mxu1 %v12336_v25 }
0x3320   :  { %v3575_v57 = vpop.f32.mrf.mxu1 }
0x3321   :  { %v3576_v28 = vadd.f32 %v3575_v57, %v3479_v6  ;;  %v3350_v6 = vld [vmem:[%s15577_s3 + $0xa0] sm:$0xff]  ;;  %v3345_v57 = vld [vmem:[%s15577_s3 + $0x78] sm:$0xff] }
0x3323   :  { %v3723_v45 = vadd.f32 %v15645_v43, %v3576_v28  ;;  %v3344_v28 = vld [vmem:[%s15577_s3 + $0x70] sm:$0xff]  ;;  %v3339_v43 = vld [vmem:[%s15577_s3 + $0x48] sm:$0xff] }
0x3325   :  { %v3724_v37 = vmul.f32 %v3723_v45, %v10224_v0  ;;  %v3338_v45 = vld [vmem:[%s15577_s3 + $0x40] sm:$0xff] }
0x3327   :  { %v8701_v58 = vmul.f32 -1.442695, %v3724_v37  ;;  %v3333_v37 = vld [vmem:[%s15577_s3 + $0x18] sm:$0xff] }
0x3329   :  { %9801 = vpow2.f32 %v8701_v58  ;;  %v3332_v58 = vld [vmem:[%s15577_s3 + $0x10] sm:$0xff] }
0x3336   :  { %v9802_v55 = vpop.eup %9801 }
0x3337   :  { %v3728_v14 = vadd.f32 1.0, %v9802_v55  ;;  %v3471_v55 = vld [vmem:[%s15577_s3 + $0x468] sm:$0xff] }
0x3339   :  { %9803 = vrcp.f32 %v3728_v14  ;;  %v3470_v14 = vld [vmem:[%s15577_s3 + $0x460] sm:$0xff] }
0x3346   :  { %v12495_v16 = vpop.eup %9803 }
0x3347   :  { %v3731_v49 = vmul.f32 2.0, %v12495_v16  ;;  %v3733_v26 = vmul.f32 %v12495_v16, %v11838_v54  ;;  %v3416_v54 = vld [vmem:[%s15577_s3 + $0x2b0] sm:$0xff] }
0x3349   :  { %v8702_v30 = vadd.f32 -1.0, %v3731_v49  ;;  %v3459_v49 = vld [vmem:[%s15577_s3 + $0x408] sm:$0xff] }
0x334b   :  { %3735 = vrot.lane.b32.xlu0 %v8702_v30, %s10005_s28  ;;  %v3458_v30 = vld [vmem:[%s15577_s3 + $0x400] sm:$0xff] }
0x33bd   :  { %v3736_v10 = vpop.permute.xlu0 %3735 }
0x33be   :  { %v3738_v5 = vmul.f32 %v12495_v16, %v3736_v10  ;;  %v3446_v10 = vld [vmem:[%s15577_s3 + $0x3a0] sm:$0xff] }
0x33c0   :  { %3740 = vrot.lane.b32.xlu1 %v3738_v5, %s10006_s29  ;;  %v3441_v5 = vld [vmem:[%s15577_s3 + $0x378] sm:$0xff] }
0x33c4   :  { %3235 = vrot.lane.b32.xlu1 %v12318_v29, %s10006_s29  ;;  %v3411_v29 = vld [vmem:[%s15577_s3 + $0x288] sm:$0xff] }
0x3432   :  { %v3741_v12 = vpop.permute.xlu1 %3740 }
0x3433   :  { %v12517_v15 = vadd.f32 %v3741_v12, %v3733_v26  ;;  %v3440_v26 = vld [vmem:[%s15577_s3 + $0x370] sm:$0xff]  ;;  %v3435_v12 = vld [vmem:[%s15577_s3 + $0x348] sm:$0xff] }
0x3435   :  { %9805 = vtanh.f32 %v12517_v15 }
0x3436   :  { %v3236_v27 = vpop.permute.xlu1 %3235 }
0x3437   :  { %9350 = vmatmul.mubr.msk.f32.vlgmr.msra.gmra.mxu0 %vm606_vm5, %v3236_v27  ;;  %v3429_v27 = vld [vmem:[%s15577_s3 + $0x318] sm:$0xff] }
0x3438   :  { %3581 = vmatpush1.msra.mxu0 %v3422_v18  ;;  %8699 = vmatprep.mubr.msk.f32.mxu0 %vm354_vm6, %v12327_v24  ;;  %v3399_v24 = vld [vmem:[%s15577_s3 + $0x228] sm:$0xff]  ;;  %v3434_v18 = vld [vmem:[%s15577_s3 + $0x340] sm:$0xff] }
0x3439   :  { %3582 = vmatprep.subr.mxu0 %v3417_v32  ;;  %v3428_v32 = vld [vmem:[%s15577_s3 + $0x310] sm:$0xff] }
0x343a   :  { %3583 = vmatpush1.msra.mxu0 %v3416_v54  ;;  %v3753_v54 = vld [vmem:[%s15576_s2 + $0x18] sm:$0xff] }
0x343b   :  { %3584 = vmatprep.subr.mxu0 %v3411_v29  ;;  %v3752_v29 = vld [vmem:[%s15576_s2 + $0x10] sm:$0xff] }
0x343c   :  { %3585 = vmatpush1.msra.mxu0 %v3410_v35  ;;  %v3750_v35 = vld [vmem:[%s15576_s2] sm:$0xff] }
0x343d   :  { %3586 = vmatprep.subr.mxu0 %v3405_v17 }
0x343e   :  { %3587 = vmatpush1.msra.mxu0 %v3404_v38 }
0x343f   :  { %3588 = vmatprep.subr.mxu0 %v3399_v24 }
0x3440   :  { %3589 = vmatpush1.msra.mxu0 %v3398_v52 }
0x3441   :  { %3590 = vmatprep.subr.mxu0 %v3393_v59 }
0x3442   :  { %v9806_v42 = vpop.eup %9805  ;;  %3591 = vmatpush1.msra.mxu0 %v3392_v39 }
0x3443   :  { %3592 = vmatprep.subr.mxu0 %v3387_v60  ;;  %3746 = vrot.lane.b32.xlu0 %v9806_v42, %s10005_s28  ;;  %v3483_v60 = vrot.slane %v12483_v51, %v15638_v19 }
0x3444   :  { %3593 = vmatpush1.msra.mxu0 %v3386_v40  ;;  %v3577_v40 = vpop.f32.mrf.mxu1 }
0x3445   :  { %3594 = vmatprep.subr.mxu0 %v3381_v47 }
0x3446   :  { %3595 = vmatpush1.msra.mxu0 %v3380_v7 }
0x3447   :  { %3596 = vmatprep.subr.mxu0 %v3375_v3 }
0x3448   :  { %3597 = vmatpush1.msra.mxu0 %v3374_v48 }
0x3449   :  { %3598 = vmatprep.subr.mxu0 %v3369_v8 }
0x344a   :  { %3599 = vmatpush1.msra.mxu0 %v3368_v56 }
0x344b   :  { %3600 = vmatprep.subr.mxu0 %v3363_v34 }
0x344c   :  { %3601 = vmatpush1.msra.mxu0 %v3362_v53 }
0x344d   :  { %3602 = vmatprep.subr.mxu0 %v3357_v4 }
0x344e   :  { %3603 = vmatpush1.msra.mxu0 %v3356_v22 }
0x344f   :  { %3604 = vmatprep.subr.mxu0 %v3351_v1 }
0x3450   :  { %3605 = vmatpush1.msra.mxu0 %v3350_v6 }
0x3451   :  { %3606 = vmatprep.subr.mxu0 %v3345_v57 }
0x3452   :  { %3607 = vmatpush1.msra.mxu0 %v3344_v28 }
0x3453   :  { %3608 = vmatprep.subr.mxu0 %v3339_v43 }
0x3454   :  { %3609 = vmatpush1.msra.mxu0 %v3338_v45  ;;  %v8709_v45 = vld [vmem:[%s15576_s2 + $0x38] sm:$0xff] }
0x3455   :  { %3610 = vmatprep.subr.mxu0 %v3333_v37  ;;  %v8708_v37 = vld [vmem:[%s15576_s2 + $0x30] sm:$0xff] }
0x3456   :  { %3611 = vmatpush1.msra.mxu0 %v3332_v58  ;;  %v8706_v58 = vld [vmem:[%s15576_s2 + $0x20] sm:$0xff] }
0x3457   :  { %3628 = vmatprep.subr.mxu0 %v3471_v55 }
0x3458   :  { %3629 = vmatpush2.msra.mxu0 %v3470_v14 }
0x3459   :  { %3630 = vmatprep.subr.mxu0 %v3465_v44 }
0x345a   :  { %3631 = vmatpush2.msra.mxu0 %v3464_v20 }
0x345b   :  { %3632 = vmatprep.subr.mxu0 %v3459_v49  ;;  %v3487_v49 = vrot.slane %v12483_v51, %v15640_v9 }
0x345c   :  { %3633 = vmatpush2.msra.mxu0 %v3458_v30 }
0x345d   :  { %3634 = vmatprep.subr.mxu0 %v3453_v61 }
0x345e   :  { %3635 = vmatpush2.msra.mxu0 %v3452_v62 }
0x345f   :  { %3636 = vmatprep.subr.mxu0 %v3447_v63 }
0x3460   :  { %3637 = vmatpush2.msra.mxu0 %v3446_v10 }
0x3461   :  { %3638 = vmatprep.subr.mxu0 %v3441_v5 }
0x3462   :  { %3639 = vmatpush2.msra.mxu0 %v3440_v26 }
0x3463   :  { %3640 = vmatprep.subr.mxu0 %v3435_v12 }
0x3464   :  { %3641 = vmatpush2.msra.mxu0 %v3434_v18 }
0x3465   :  { %3642 = vmatprep.subr.mxu0 %v3429_v27 }
0x3466   :  { %3643 = vmatpush2.msra.mxu0 %v3428_v32 }
0x3467   :  { %3645 = vmatmul.mubr.f32.vlgmr.msra.gmra.mxu0 %v12336_v25  ;;  %9352 = vmatprep.subr.mxu0 %v15626_v50  ;;  %v3751_v25 = vld [vmem:[%s15576_s2 + $0x8] sm:$0xff] }
0x3468   :  { %9360 = vmatprep.mubr.msk.f32.mxu0 %vm10007_vm4, %v15626_v50  ;;  %9353 = vmatpush3.msra.mxu0 %v3753_v54 }
0x3469   :  { %9354 = vmatprep.subr.mxu0 %v15626_v50 }
0x346a   :  { %9355 = vmatpush3.msra.mxu0 %v3752_v29 }
0x346b   :  { %9356 = vmatprep.subr.mxu0 %v15626_v50 }
0x346c   :  { %9357 = vmatpush3.msra.mxu0 %v3751_v25 }
0x346d   :  { %9358 = vmatprep.subr.mxu0 %v15626_v50 }
0x346e   :  { %9359 = vmatpush3.msra.mxu0 %v3750_v35 }
0x346f   :  { %9363 = vmatprep.subr.mxu0 %v15626_v50 }
0x34b5   :  { %v3747_v17 = vpop.permute.xlu0 %3746 }
0x34b6   :  { %v3749_v38 = vmul.f32 %v12495_v16, %v3747_v17  ;;  %v3578_v16 = vadd.f32 %v3577_v40, %v3483_v60 }
0x34b8   :  { %3755 = vrot.lane.b32.xlu0 %v3749_v38, %s10006_s29  ;;  %v8716_v38 = vld [vmem:[%s15576_s2 + $0x58] sm:$0xff] }
0x34f7   :  { %v12687_v24 = vpop.f32.mrf.mxu0 }
0x34f9   :  { %v9351_v52 = vpop.f32.mrf.mxu0 }
0x34fa   :  { %v8715_v52 = vld [vmem:[%s15576_s2 + $0x50] sm:$0xff] }
0x3527   :  { %v3646_v39 = vpop.f32.mrf.mxu0 }
0x3528   :  { %v3647_v30 = vadd.f32 %v3646_v39, %v3487_v49  ;;  %v8713_v39 = vld [vmem:[%s15576_s2 + $0x40] sm:$0xff] }
0x3529   :  { %v12697_v42 = vpop.f32.mrf.mxu0 }
0x352a   :  { %v12689_v59 = vpop.permute.xlu0 %3755 }
0x352b   :  { %9361 = vmatmul.mubr.msk.f32.vlgmr.msra.gmra.mxu0 %vm606_vm5, %v12689_v59 }
0x352c   :  { %9371 = vmatprep.mubr.msk.f32.mxu0 %vm10007_vm4, %v15626_v50  ;;  %9364 = vmatpush3.msra.mxu0 %v8709_v45 }
0x352d   :  { %9365 = vmatprep.subr.mxu0 %v15626_v50 }
0x352e   :  { %9366 = vmatpush3.msra.mxu0 %v8708_v37 }
0x352f   :  { %9367 = vmatprep.subr.mxu0 %v15626_v50 }
0x35eb   :  { %v3825_v47 = vpop.f32.mrf.mxu0 }
0x35ec   :  { %v3826_v7 = vadd.f32 %v3825_v47, %v3578_v16 }
0x35ed   :  { %v9362_v3 = vpop.f32.mrf.mxu0 }
0x35ee   :  { %v3829_v48 = vmul.f32 %v3826_v7, %v10224_v0  ;;  %v3491_v7 = vrot.slane %v12483_v51, %v15642_v21 }
0x35f0   :  { %v8704_v8 = vmul.f32 -1.442695, %v3829_v48  ;;  %v3649_v3 = vadd.f32 %v12697_v42, %v3491_v7  ;;  %v8727_v7 = vld [vmem:[%s15576_s2 + $0x80] sm:$0xff] }
0x35f2   :  { %9807 = vpow2.f32 %v8704_v8 }
0x35ff   :  { %v9808_v56 = vpop.eup %9807 }
0x3600   :  { %v3833_v34 = vadd.f32 1.0, %v9808_v56 }
0x3602   :  { %9809 = vrcp.f32 %v3833_v34 }
0x360f   :  { %v9810_v53 = vpop.eup %9809 }
0x3610   :  { %v3836_v4 = vmul.f32 2.0, %v9810_v53  ;;  %v3838_v57 = vmul.f32 %v9810_v53, %v12024_v31  ;;  %v8707_v31 = vld [vmem:[%s15576_s2 + $0x28] sm:$0xff] }
0x3611   :  { %9368 = vmatpush3.msra.mxu0 %v8707_v31 }
0x3612   :  { %v8705_v22 = vadd.f32 -1.0, %v3836_v4  ;;  %9369 = vmatprep.subr.mxu0 %v15626_v50 }
0x3613   :  { %9370 = vmatpush3.msra.mxu0 %v8706_v58  ;;  %v8723_v58 = vld [vmem:[%s15576_s2 + $0x78] sm:$0xff] }
0x3614   :  { %3840 = vrot.lane.b32.xlu1 %v8705_v22, %s10005_s28  ;;  %9374 = vmatprep.subr.mxu0 %v15626_v50 }
0x3686   :  { %v3841_v1 = vpop.permute.xlu1 %3840 }
0x3687   :  { %v3843_v6 = vmul.f32 %v9810_v53, %v3841_v1 }
0x3689   :  { %3845 = vrot.lane.b32.xlu0 %v3843_v6, %s10006_s29 }
0x36fb   :  { %v3846_v28 = vpop.permute.xlu0 %3845 }
0x36fc   :  { %v12703_v43 = vadd.f32 %v3846_v28, %v3838_v57 }
0x36fe   :  { %9811 = vtanh.f32 %v12703_v43 }
0x370b   :  { %v9812_v55 = vpop.eup %9811 }
0x370c   :  { %3851 = vrot.lane.b32.xlu1 %v9812_v55, %s10005_s28  ;;  %v8722_v55 = vld [vmem:[%s15576_s2 + $0x70] sm:$0xff] }
0x377e   :  { %v3852_v14 = vpop.permute.xlu1 %3851 }
0x377f   :  { %v12723_v44 = vmul.f32 %v9810_v53, %v3852_v14  ;;  %v8720_v14 = vld [vmem:[%s15576_s2 + $0x60] sm:$0xff] }
0x3781   :  { %3860 = vrot.lane.b32.xlu0 %v12723_v44, %s10006_s29 }
0x37f3   :  { %v3861_v20 = vpop.permute.xlu0 %3860 }
0x37f4   :  { %9372 = vmatmul.mubr.msk.f32.vlgmr.msra.gmra.mxu0 %vm606_vm5, %v3861_v20 }
0x37f5   :  { %9382 = vmatprep.mubr.msk.f32.mxu0 %vm10007_vm4, %v15626_v50  ;;  %9375 = vmatpush3.msra.mxu0 %v8716_v38 }
0x37f6   :  { %9376 = vmatprep.subr.mxu0 %v15626_v50 }
0x37f7   :  { %9377 = vmatpush3.msra.mxu0 %v8715_v52 }
0x37f8   :  { %9378 = vmatprep.subr.mxu0 %v15626_v50 }
0x38b4   :  { %v3930_v61 = vpop.f32.mrf.mxu0 }
0x38b5   :  { %v3931_v62 = vadd.f32 %v3930_v61, %v3647_v30 }
0x38b6   :  { %v9373_v63 = vpop.f32.mrf.mxu0 }
0x38b7   :  { %v3934_v10 = vmul.f32 %v3931_v62, %v10224_v0  ;;  %v3495_v62 = vrot.slane %v12483_v51, %v10851_v46  ;;  %v3717_v63 = vpop.f32.mrf.mxu1 }
0x38b9   :  { %v8711_v5 = vmul.f32 -1.442695, %v3934_v10  ;;  %v3718_v10 = vadd.f32 %v3717_v63, %v3495_v62  ;;  %v4470_v62 = vld [vmem:[%s15577_s3 + $0x2d0] sm:$0xff]  ;;  %v4459_v63 = vld [vmem:[%s15577_s3 + $0x278] sm:$0xff] }
0x38bb   :  { %9813 = vpow2.f32 %v8711_v5 }
0x38c8   :  { %v9814_v26 = vpop.eup %9813 }
0x38c9   :  { %v3938_v12 = vadd.f32 1.0, %v9814_v26 }
0x38cb   :  { %9815 = vrcp.f32 %v3938_v12 }
0x38d8   :  { %v9816_v18 = vpop.eup %9815 }
0x38d9   :  { %v3941_v27 = vmul.f32 2.0, %v9816_v18  ;;  %v3943_v25 = vmul.f32 %v9816_v18, %v12057_v13  ;;  %v8714_v13 = vld [vmem:[%s15576_s2 + $0x48] sm:$0xff] }
0x38da   :  { %9379 = vmatpush3.msra.mxu0 %v8714_v13 }
0x38db   :  { %v8712_v32 = vadd.f32 -1.0, %v3941_v27  ;;  %9380 = vmatprep.subr.mxu0 %v15626_v50 }
0x38dc   :  { %9381 = vmatpush3.msra.mxu0 %v8713_v39 }
0x38dd   :  { %3945 = vrot.lane.b32.xlu1 %v8712_v32, %s10005_s28  ;;  %9385 = vmatprep.subr.mxu0 %v15626_v50 }
0x394f   :  { %v3946_v54 = vpop.permute.xlu1 %3945 }
0x3950   :  { %v3948_v29 = vmul.f32 %v9816_v18, %v3946_v54 }
0x3952   :  { %3950 = vrot.lane.b32.xlu0 %v3948_v29, %s10006_s29 }
0x39c4   :  { %v3951_v35 = vpop.permute.xlu0 %3950 }
0x39c5   :  { %v12736_v17 = vadd.f32 %v3951_v35, %v3943_v25 }
0x39c7   :  { %9817 = vtanh.f32 %v12736_v17 }
0x39d4   :  { %v9818_v60 = vpop.eup %9817 }
0x39d5   :  { %3956 = vrot.lane.b32.xlu1 %v9818_v60, %s10005_s28 }
0x3a47   :  { %v3957_v40 = vpop.permute.xlu1 %3956 }
0x3a48   :  { %v12756_v16 = vmul.f32 %v9816_v18, %v3957_v40  ;;  %v8730_v40 = vld [vmem:[%s15576_s2 + $0x98] sm:$0xff] }
0x3a4a   :  { %3965 = vrot.lane.b32.xlu0 %v12756_v16, %s10006_s29 }
0x3abc   :  { %v3966_v47 = vpop.permute.xlu0 %3965 }
0x3abd   :  { %9383 = vmatmul.mubr.msk.f32.vlgmr.msra.gmra.mxu0 %vm606_vm5, %v3966_v47  ;;  %v8729_v47 = vld [vmem:[%s15576_s2 + $0x90] sm:$0xff] }
0x3abe   :  { %9393 = vmatprep.mubr.msk.f32.mxu0 %vm10007_vm4, %v15626_v50  ;;  %9386 = vmatpush3.msra.mxu0 %v8723_v58 }
0x3abf   :  { %9387 = vmatprep.subr.mxu0 %v15626_v50 }
0x3ac0   :  { %9388 = vmatpush3.msra.mxu0 %v8722_v55 }
0x3ac1   :  { %9389 = vmatprep.subr.mxu0 %v15626_v50 }
0x3b7d   :  { %v4035_v48 = vpop.f32.mrf.mxu0 }
0x3b7e   :  { %v4036_v8 = vadd.f32 %v4035_v48, %v3649_v3 }
0x3b7f   :  { %v9384_v56 = vpop.f32.mrf.mxu0 }
0x3b80   :  { %v4039_v34 = vmul.f32 %v4036_v8, %v10224_v0 }
0x3b82   :  { %v8718_v53 = vmul.f32 -1.442695, %v4039_v34  ;;  %v3499_v34 = vrot.slane %v12483_v51, %v10886_v33 }
0x3b84   :  { %9819 = vpow2.f32 %v8718_v53  ;;  %v3719_v53 = vpop.f32.mrf.mxu1 }
0x3b91   :  { %v9820_v4 = vpop.eup %9819 }
0x3b92   :  { %v4043_v22 = vadd.f32 1.0, %v9820_v4  ;;  %v3720_v4 = vadd.f32 %v3719_v53, %v3499_v34  ;;  %v4392_v34 = vld [vmem:[%s15577_s3 + $0x60] sm:$0xff]  ;;  %v4387_v53 = vld [vmem:[%s15577_s3 + $0x38] sm:$0xff] }
0x3b94   :  { %9821 = vrcp.f32 %v4043_v22 }
0x3ba1   :  { %v9822_v1 = vpop.eup %9821 }
0x3ba2   :  { %v4046_v6 = vmul.f32 2.0, %v9822_v1  ;;  %v4048_v42 = vmul.f32 %v9822_v1, %v12091_v11  ;;  %v8721_v11 = vld [vmem:[%s15576_s2 + $0x68] sm:$0xff] }
0x3ba3   :  { %9390 = vmatpush3.msra.mxu0 %v8721_v11 }
0x3ba4   :  { %v8719_v57 = vadd.f32 -1.0, %v4046_v6  ;;  %9391 = vmatprep.subr.mxu0 %v15626_v50 }
0x3ba5   :  { %9392 = vmatpush3.msra.mxu0 %v8720_v14 }
0x3ba6   :  { %4050 = vrot.lane.b32.xlu1 %v8719_v57, %s10005_s28  ;;  %9396 = vmatprep.subr.mxu0 %v15626_v50 }
0x3c18   :  { %v4051_v28 = vpop.permute.xlu1 %4050 }
0x3c19   :  { %v4053_v45 = vmul.f32 %v9822_v1, %v4051_v28 }
0x3c1b   :  { %4055 = vrot.lane.b32.xlu0 %v4053_v45, %s10006_s29 }
0x3c8d   :  { %v4056_v37 = vpop.permute.xlu0 %4055 }
0x3c8e   :  { %v12770_v31 = vadd.f32 %v4056_v37, %v4048_v42 }
0x3c90   :  { %9823 = vtanh.f32 %v12770_v31 }
0x3c9d   :  { %v9824_v20 = vpop.eup %9823 }
0x3c9e   :  { %4061 = vrot.lane.b32.xlu1 %v9824_v20, %s10005_s28 }
0x3d10   :  { %v4062_v49 = vpop.permute.xlu1 %4061 }
0x3d11   :  { %v12790_v30 = vmul.f32 %v9822_v1, %v4062_v49 }
0x3d13   :  { %4070 = vrot.lane.b32.xlu0 %v12790_v30, %s10006_s29 }
0x3d85   :  { %v4071_v61 = vpop.permute.xlu0 %4070 }
0x3d86   :  { %9394 = vmatmul.mubr.msk.f32.vlgmr.msra.gmra.mxu0 %vm606_vm5, %v4071_v61  ;;  %v4471_v61 = vld [vmem:[%s15577_s3 + $0x2d8] sm:$0xff] }
0x3d87   :  { %9404 = vmatprep.mubr.msk.f32.mxu0 %vm10007_vm4, %v15626_v50  ;;  %9397 = vmatpush3.msra.mxu0 %v8730_v40  ;;  %v4411_v40 = vld [vmem:[%s15577_s3 + $0xf8] sm:$0xff] }
0x3d88   :  { %9398 = vmatprep.subr.mxu0 %v15626_v50  ;;  %4559 = vmatprep.subr.mxu1 %v4471_v61  ;;  %v4488_v61 = vld [vmem:[%s15577_s3 + $0x360] sm:$0xff] }
0x3d89   :  { %9399 = vmatpush3.msra.mxu0 %v8729_v47  ;;  %4560 = vmatpush1.msra.mxu1 %v4470_v62  ;;  %v4410_v47 = vld [vmem:[%s15577_s3 + $0xf0] sm:$0xff]  ;;  %v4483_v62 = vld [vmem:[%s15577_s3 + $0x338] sm:$0xff] }
0x3d8a   :  { %9400 = vmatprep.subr.mxu0 %v15626_v50 }
0x3e46   :  { %v4140_v5 = vpop.f32.mrf.mxu0 }
0x3e47   :  { %v4141_v26 = vadd.f32 %v4140_v5, %v3718_v10  ;;  %v4458_v10 = vld [vmem:[%s15577_s3 + $0x270] sm:$0xff]  ;;  %v4453_v5 = vld [vmem:[%s15577_s3 + $0x248] sm:$0xff] }
0x3e48   :  { %v9395_v12 = vpop.f32.mrf.mxu0 }
0x3e49   :  { %v4144_v18 = vmul.f32 %v4141_v26, %v10224_v0  ;;  %v4452_v26 = vld [vmem:[%s15577_s3 + $0x240] sm:$0xff]  ;;  %v4447_v12 = vld [vmem:[%s15577_s3 + $0x218] sm:$0xff] }
0x3e4b   :  { %v8725_v27 = vmul.f32 -1.442695, %v4144_v18  ;;  %v4446_v18 = vld [vmem:[%s15577_s3 + $0x210] sm:$0xff] }
0x3e4d   :  { %9825 = vpow2.f32 %v8725_v27 }
0x3e5a   :  { %v9826_v32 = vpop.eup %9825 }
0x3e5b   :  { %v4148_v54 = vadd.f32 1.0, %v9826_v32  ;;  %v4441_v32 = vld [vmem:[%s15577_s3 + $0x1e8] sm:$0xff] }
0x3e5d   :  { %9827 = vrcp.f32 %v4148_v54  ;;  %v4440_v54 = vld [vmem:[%s15577_s3 + $0x1e0] sm:$0xff] }
0x3e6a   :  { %v9828_v29 = vpop.eup %9827 }
0x3e6b   :  { %v4151_v25 = vmul.f32 2.0, %v9828_v29  ;;  %v4153_v13 = vmul.f32 %v9828_v29, %v12124_v36  ;;  %v8728_v36 = vld [vmem:[%s15576_s2 + $0x88] sm:$0xff] }
0x3e6c   :  { %9401 = vmatpush3.msra.mxu0 %v8728_v36  ;;  %v4405_v36 = vld [vmem:[%s15577_s3 + $0xc8] sm:$0xff] }
0x3e6d   :  { %v8726_v35 = vadd.f32 -1.0, %v4151_v25  ;;  %9402 = vmatprep.subr.mxu0 %v15626_v50  ;;  %v4434_v25 = vld [vmem:[%s15577_s3 + $0x1b0] sm:$0xff] }
0x3e6e   :  { %9403 = vmatpush3.msra.mxu0 %v8727_v7  ;;  %v4404_v7 = vld [vmem:[%s15577_s3 + $0xc0] sm:$0xff] }
0x3e6f   :  { %4155 = vrot.lane.b32.xlu1 %v8726_v35, %s10005_s28  ;;  %9407 = vmatprep.subr.mxu0 %v15626_v50  ;;  %v4429_v35 = vld [vmem:[%s15577_s3 + $0x188] sm:$0xff] }
0x3ee1   :  { %v4156_v38 = vpop.permute.xlu1 %4155 }
0x3ee2   :  { %v4158_v52 = vmul.f32 %v9828_v29, %v4156_v38  ;;  %v4428_v38 = vld [vmem:[%s15577_s3 + $0x180] sm:$0xff] }
0x3ee4   :  { %4160 = vrot.lane.b32.xlu0 %v4158_v52, %s10006_s29  ;;  %v4423_v52 = vld [vmem:[%s15577_s3 + $0x158] sm:$0xff] }
0x3f56   :  { %v4161_v39 = vpop.permute.xlu0 %4160 }
0x3f57   :  { %v12803_v60 = vadd.f32 %v4161_v39, %v4153_v13  ;;  %v4422_v13 = vld [vmem:[%s15577_s3 + $0x150] sm:$0xff]  ;;  %v4416_v39 = vld [vmem:[%s15577_s3 + $0x120] sm:$0xff] }
0x3f59   :  { %9829 = vtanh.f32 %v12803_v60 }
0x3f66   :  { %v9830_v3 = vpop.eup %9829 }
0x3f67   :  { %4166 = vrot.lane.b32.xlu1 %v9830_v3, %s10005_s28  ;;  %v4399_v3 = vld [vmem:[%s15577_s3 + $0x98] sm:$0xff] }
0x3fd9   :  { %v4167_v48 = vpop.permute.xlu1 %4166 }
0x3fda   :  { %v4169_v8 = vmul.f32 %v9828_v29, %v4167_v48  ;;  %v4435_v29 = vld [vmem:[%s15577_s3 + $0x1b8] sm:$0xff]  ;;  %v4398_v48 = vld [vmem:[%s15577_s3 + $0x90] sm:$0xff] }
0x3fdc   :  { %4175 = vrot.lane.b32.xlu0 %v4169_v8, %s10006_s29  ;;  %v4393_v8 = vld [vmem:[%s15577_s3 + $0x68] sm:$0xff] }
0x404e   :  { %v12824_v56 = vpop.permute.xlu0 %4175 }
0x404f   :  { %9405 = vmatmul.mubr.msk.f32.vlgmr.msra.gmra.mxu0 %vm606_vm5, %v12824_v56 }
0x4050   :  { %9415 = vmatprep.mubr.msk.f32.mxu0 %vm10007_vm4, %v15626_v50 }
0x410f   :  { %v4245_v22 = vpop.f32.mrf.mxu0 }
0x4110   :  { %v4246_v1 = vadd.f32 %v4245_v22, %v3720_v4  ;;  %v4386_v4 = vld [vmem:[%s15577_s3 + $0x30] sm:$0xff]  ;;  %v4381_v22 = vld [vmem:[%s15577_s3 + $0x8] sm:$0xff] }
0x4111   :  { %v9406_v6 = vpop.f32.mrf.mxu0 }
0x4112   :  { %v4249_v57 = vmul.f32 %v4246_v1, %v10224_v0  ;;  %v4380_v1 = vld [vmem:[%s15577_s3] sm:$0xff]  ;;  %v4519_v6 = vld [vmem:[%s15577_s3 + $0x458] sm:$0xff] }
0x4114   :  { %v8732_v28 = vmul.f32 -1.442695, %v4249_v57  ;;  %v4518_v57 = vld [vmem:[%s15577_s3 + $0x450] sm:$0xff] }
0x4116   :  { %9831 = vpow2.f32 %v8732_v28  ;;  %v4513_v28 = vld [vmem:[%s15577_s3 + $0x428] sm:$0xff] }
0x4123   :  { %v9832_v45 = vpop.eup %9831 }
0x4124   :  { %v4253_v42 = vadd.f32 1.0, %v9832_v45  ;;  %v4512_v45 = vld [vmem:[%s15577_s3 + $0x420] sm:$0xff] }
0x4126   :  { %9833 = vrcp.f32 %v4253_v42  ;;  %v4507_v42 = vld [vmem:[%s15577_s3 + $0x3f8] sm:$0xff] }
0x4133   :  { %v12833_v37 = vpop.eup %9833 }
0x4134   :  { %v4256_v58 = vmul.f32 2.0, %v12833_v37  ;;  %v4258_v14 = vmul.f32 %v12833_v37, %v12164_v41  ;;  %v4464_v41 = vld [vmem:[%s15577_s3 + $0x2a0] sm:$0xff] }
0x4136   :  { %v8733_v55 = vadd.f32 -1.0, %v4256_v58  ;;  %v4506_v58 = vld [vmem:[%s15577_s3 + $0x3f0] sm:$0xff] }
0x4138   :  { %4260 = vrot.lane.b32.xlu1 %v8733_v55, %s10005_s28  ;;  %v4501_v55 = vld [vmem:[%s15577_s3 + $0x3c8] sm:$0xff] }
0x41aa   :  { %v4261_v51 = vpop.permute.xlu1 %4260 }
0x41ab   :  { %v4263_v11 = vmul.f32 %v12833_v37, %v4261_v51  ;;  %v4500_v51 = vld [vmem:[%s15577_s3 + $0x3c0] sm:$0xff] }
0x41ad   :  { %4265 = vrot.lane.b32.xlu0 %v4263_v11, %s10006_s29  ;;  %v4495_v11 = vld [vmem:[%s15577_s3 + $0x398] sm:$0xff] }
0x41b1   :  { %4366 = vrot.lane.b32.xlu0 %v12723_v44, %s10005_s28  ;;  %v4465_v44 = vld [vmem:[%s15577_s3 + $0x2a8] sm:$0xff] }
0x41b2   :  { %4561 = vmatprep.subr.mxu1 %v4465_v44  ;;  %v4482_v44 = vld [vmem:[%s15577_s3 + $0x330] sm:$0xff] }
0x41b3   :  { %4562 = vmatpush1.msra.mxu1 %v4464_v41  ;;  %v4477_v41 = vld [vmem:[%s15577_s3 + $0x308] sm:$0xff] }
0x41b4   :  { %4563 = vmatprep.subr.mxu1 %v4459_v63  ;;  %v4476_v63 = vld [vmem:[%s15577_s3 + $0x300] sm:$0xff] }
0x41b5   :  { %4564 = vmatpush1.msra.mxu1 %v4458_v10  ;;  %v4475_v10 = vld [vmem:[%s15577_s3 + $0x2f8] sm:$0xff] }
0x41b6   :  { %4565 = vmatprep.subr.mxu1 %v4453_v5 }
0x41b7   :  { %4566 = vmatpush1.msra.mxu1 %v4452_v26 }
0x41b8   :  { %4567 = vmatprep.subr.mxu1 %v4447_v12 }
0x41b9   :  { %4568 = vmatpush1.msra.mxu1 %v4446_v18 }
0x41ba   :  { %4569 = vmatprep.subr.mxu1 %v4441_v32 }
0x41bb   :  { %4570 = vmatpush1.msra.mxu1 %v4440_v54 }
0x41bc   :  { %4571 = vmatprep.subr.mxu1 %v4435_v29 }
0x41bd   :  { %4572 = vmatpush1.msra.mxu1 %v4434_v25 }
0x41be   :  { %4573 = vmatprep.subr.mxu1 %v4429_v35  ;;  %v4463_v35 = vld [vmem:[%s15577_s3 + $0x298] sm:$0xff] }
0x41bf   :  { %4574 = vmatpush1.msra.mxu1 %v4428_v38  ;;  %v4457_v38 = vld [vmem:[%s15577_s3 + $0x268] sm:$0xff] }
0x41c0   :  { %4575 = vmatprep.subr.mxu1 %v4423_v52  ;;  %v4456_v52 = vld [vmem:[%s15577_s3 + $0x260] sm:$0xff] }
0x41c1   :  { %4576 = vmatpush1.msra.mxu1 %v4422_v13  ;;  %v4451_v13 = vld [vmem:[%s15577_s3 + $0x238] sm:$0xff] }
0x421f   :  { %v4266_v20 = vpop.permute.xlu0 %4265 }
0x4220   :  { %v12843_v49 = vadd.f32 %v4266_v20, %v4258_v14  ;;  %v4494_v14 = vld [vmem:[%s15577_s3 + $0x390] sm:$0xff]  ;;  %v4489_v20 = vld [vmem:[%s15577_s3 + $0x368] sm:$0xff] }
0x4222   :  { %9835 = vtanh.f32 %v12843_v49 }
0x4223   :  { %v4367_v12 = vpop.permute.xlu0 %4366 }
0x422f   :  { %v9836_v27 = vpop.eup %9835 }
0x4230   :  { %4271 = vrot.lane.b32.xlu1 %v9836_v27, %s10005_s28  ;;  %v4376_v27 = vsel %vm606_vm5, %v12689_v59, %v4367_v12  ;;  %v4469_v59 = vld [vmem:[%s15577_s3 + $0x2c8] sm:$0xff]  ;;  %v4498_v12 = vld [vmem:[%s15577_s3 + $0x3b0] sm:$0xff] }
0x4234   :  { %4369 = vrot.lane.b32.xlu1 %v12756_v16, %s10008_s18  ;;  %v4417_v16 = vld [vmem:[%s15577_s3 + $0x128] sm:$0xff] }
0x4235   :  { %4577 = vmatprep.subr.mxu1 %v4417_v16  ;;  %v4450_v16 = vld [vmem:[%s15577_s3 + $0x230] sm:$0xff] }
0x4236   :  { %4578 = vmatpush1.msra.mxu1 %v4416_v39  ;;  %v4445_v39 = vld [vmem:[%s15577_s3 + $0x208] sm:$0xff] }
0x4237   :  { %4579 = vmatprep.subr.mxu1 %v4411_v40  ;;  %v4444_v40 = vld [vmem:[%s15577_s3 + $0x200] sm:$0xff] }
0x4238   :  { %4580 = vmatpush1.msra.mxu1 %v4410_v47  ;;  %v4439_v47 = vld [vmem:[%s15577_s3 + $0x1d8] sm:$0xff] }
0x4239   :  { %4581 = vmatprep.subr.mxu1 %v4405_v36  ;;  %v4438_v36 = vld [vmem:[%s15577_s3 + $0x1d0] sm:$0xff] }
0x423a   :  { %4582 = vmatpush1.msra.mxu1 %v4404_v7  ;;  %v4433_v7 = vld [vmem:[%s15577_s3 + $0x1a8] sm:$0xff] }
0x423b   :  { %4583 = vmatprep.subr.mxu1 %v4399_v3  ;;  %v4432_v3 = vld [vmem:[%s15577_s3 + $0x1a0] sm:$0xff] }
0x423c   :  { %4584 = vmatpush1.msra.mxu1 %v4398_v48  ;;  %v4427_v48 = vld [vmem:[%s15577_s3 + $0x178] sm:$0xff] }
0x423d   :  { %4585 = vmatprep.subr.mxu1 %v4393_v8  ;;  %v4426_v8 = vld [vmem:[%s15577_s3 + $0x170] sm:$0xff] }
0x423e   :  { %4586 = vmatpush1.msra.mxu1 %v4392_v34  ;;  %v4421_v34 = vld [vmem:[%s15577_s3 + $0x148] sm:$0xff] }
0x423f   :  { %4587 = vmatprep.subr.mxu1 %v4387_v53  ;;  %v4420_v53 = vld [vmem:[%s15577_s3 + $0x140] sm:$0xff] }
0x4240   :  { %4588 = vmatpush1.msra.mxu1 %v4386_v4  ;;  %v4415_v4 = vld [vmem:[%s15577_s3 + $0x118] sm:$0xff] }
0x4241   :  { %4589 = vmatprep.subr.mxu1 %v4381_v22  ;;  %v4414_v22 = vld [vmem:[%s15577_s3 + $0x110] sm:$0xff] }
0x4242   :  { %4590 = vmatpush1.msra.mxu1 %v4380_v1  ;;  %v4409_v1 = vld [vmem:[%s15577_s3 + $0xe8] sm:$0xff] }
0x4243   :  { %4607 = vmatprep.subr.mxu1 %v4519_v6  ;;  %v4408_v6 = vld [vmem:[%s15577_s3 + $0xe0] sm:$0xff] }
0x4244   :  { %4608 = vmatpush2.msra.mxu1 %v4518_v57  ;;  %v4403_v57 = vld [vmem:[%s15577_s3 + $0xb8] sm:$0xff] }
0x4245   :  { %4609 = vmatprep.subr.mxu1 %v4513_v28  ;;  %v4402_v28 = vld [vmem:[%s15577_s3 + $0xb0] sm:$0xff] }
0x4246   :  { %4610 = vmatpush2.msra.mxu1 %v4512_v45  ;;  %v4397_v45 = vld [vmem:[%s15577_s3 + $0x88] sm:$0xff] }
0x4247   :  { %4611 = vmatprep.subr.mxu1 %v4507_v42  ;;  %v4396_v42 = vld [vmem:[%s15577_s3 + $0x80] sm:$0xff] }
0x4248   :  { %4612 = vmatpush2.msra.mxu1 %v4506_v58  ;;  %v4391_v58 = vld [vmem:[%s15577_s3 + $0x58] sm:$0xff] }
0x4249   :  { %4613 = vmatprep.subr.mxu1 %v4501_v55  ;;  %v4390_v55 = vld [vmem:[%s15577_s3 + $0x50] sm:$0xff] }
0x424a   :  { %4614 = vmatpush2.msra.mxu1 %v4500_v51  ;;  %v4385_v51 = vld [vmem:[%s15577_s3 + $0x28] sm:$0xff] }
0x424b   :  { %4615 = vmatprep.subr.mxu1 %v4495_v11  ;;  %v4384_v11 = vld [vmem:[%s15577_s3 + $0x20] sm:$0xff] }
0x424c   :  { %4616 = vmatpush2.msra.mxu1 %v4494_v14  ;;  %v4523_v14 = vld [vmem:[%s15577_s3 + $0x478] sm:$0xff] }
0x424d   :  { %4617 = vmatprep.subr.mxu1 %v4489_v20  ;;  %v4522_v20 = vld [vmem:[%s15577_s3 + $0x470] sm:$0xff] }
0x424e   :  { %4618 = vmatpush2.msra.mxu1 %v4488_v61  ;;  %v4517_v61 = vld [vmem:[%s15577_s3 + $0x448] sm:$0xff] }
0x424f   :  { %4619 = vmatprep.subr.mxu1 %v4483_v62  ;;  %v4516_v62 = vld [vmem:[%s15577_s3 + $0x440] sm:$0xff] }
0x4250   :  { %4620 = vmatpush2.msra.mxu1 %v4482_v44  ;;  %v4511_v44 = vld [vmem:[%s15577_s3 + $0x418] sm:$0xff] }
0x4251   :  { %4621 = vmatprep.subr.mxu1 %v4477_v41  ;;  %v4510_v41 = vld [vmem:[%s15577_s3 + $0x410] sm:$0xff] }
0x4252   :  { %4622 = vmatpush2.msra.mxu1 %v4476_v63  ;;  %v4505_v63 = vld [vmem:[%s15577_s3 + $0x3e8] sm:$0xff] }
0x4253   :  { %4701 = vmatprep.subr.mxu1 %v4475_v10  ;;  %v4504_v10 = vld [vmem:[%s15577_s3 + $0x3e0] sm:$0xff] }
0x42a2   :  { %v4272_v5 = vpop.permute.xlu1 %4271 }
0x42a3   :  { %v12997_v26 = vmul.f32 %v12833_v37, %v4272_v5  ;;  %v4474_v37 = vld [vmem:[%s15577_s3 + $0x2f0] sm:$0xff]  ;;  %v4499_v5 = vld [vmem:[%s15577_s3 + $0x3b8] sm:$0xff] }
0x42a5   :  { %4373 = vrot.lane.b32.xlu0 %v12997_v26, %s10005_s28 }
0x42a6   :  { %v4370_v18 = vpop.permute.xlu1 %4369 }
0x42a7   :  { %v4377_v32 = vsel %vm354_vm6, %v4376_v27, %v4370_v18  ;;  %v4493_v18 = vld [vmem:[%s15577_s3 + $0x388] sm:$0xff]  ;;  %v4492_v27 = vld [vmem:[%s15577_s3 + $0x380] sm:$0xff] }
0x42a8   :  { %v13015_v25 = vsel %vm1227_vm7, %v4377_v32, %v12790_v30  ;;  %v4462_v30 = vld [vmem:[%s15577_s3 + $0x290] sm:$0xff]  ;;  %v4487_v32 = vld [vmem:[%s15577_s3 + $0x358] sm:$0xff] }
0x4317   :  { %v4374_v54 = vpop.permute.xlu0 %4373 }
0x4318   :  { %v13006_v29 = vsel %vm606_vm5, %v12824_v56, %v4374_v54  ;;  %v4468_v56 = vld [vmem:[%s15577_s3 + $0x2c0] sm:$0xff]  ;;  %v4486_v54 = vld [vmem:[%s15577_s3 + $0x350] sm:$0xff] }
0x4319   :  { %8736 = vmatprep.mubr.msk.f32.mxu1 %vm354_vm6, %v13006_v29 }
0x431a   :  { %4624 = vmatmul.mubr.f32.vlgmr.msra.gmra.mxu1 %v13015_v25 }
0x431b   :  { %4702 = vmatpush1.msra.mxu1 %v4474_v37  ;;  %8738 = vmatprep.mubr.msk.f32.mxu1 %vm354_vm6, %v13006_v29  ;;  %v4481_v37 = vld [vmem:[%s15577_s3 + $0x328] sm:$0xff] }
0x431c   :  { %4703 = vmatprep.subr.mxu1 %v4469_v59  ;;  %v4480_v59 = vld [vmem:[%s15577_s3 + $0x320] sm:$0xff] }
0x431d   :  { %4704 = vmatpush1.msra.mxu1 %v4468_v56  ;;  %v13162_v56 = vld [vmem:[%s15578_s4] sm:$0x3f] }
0x431e   :  { %4705 = vmatprep.subr.mxu1 %v4463_v35  ;;  %v4529_v35 = vrot.slane %v13162_v56, %v15635_v2 }
0x431f   :  { %4706 = vmatpush1.msra.mxu1 %v4462_v30 }
0x4320   :  { %4707 = vmatprep.subr.mxu1 %v4457_v38 }
0x4321   :  { %4708 = vmatpush1.msra.mxu1 %v4456_v52  ;;  %v15646_v52 = vld [vmem:[#allocation12_spill] sm:$0xff] }
0x4322   :  { %4709 = vmatprep.subr.mxu1 %v4451_v13 }
0x4323   :  { %4710 = vmatpush1.msra.mxu1 %v4450_v16 }
0x4324   :  { %4711 = vmatprep.subr.mxu1 %v4445_v39 }
0x4325   :  { %4712 = vmatpush1.msra.mxu1 %v4444_v40 }
0x4326   :  { %4713 = vmatprep.subr.mxu1 %v4439_v47 }
0x4327   :  { %4714 = vmatpush1.msra.mxu1 %v4438_v36  ;;  %v4278_v36 = vld [vmem:[%s15579_s5 + $0x18] sm:$0xff] }
0x4328   :  { %4715 = vmatprep.subr.mxu1 %v4433_v7  ;;  %v4277_v7 = vld [vmem:[%s15579_s5 + $0x10] sm:$0xff]  ;;  %9408 = vmatpush3.msra.mxu0 %v4278_v36  ;;  %v4520_v36 = vld [vmem:[%s15577_s3 + $0x460] sm:$0xff] }
0x4329   :  { %4716 = vmatpush1.msra.mxu1 %v4432_v3  ;;  %9409 = vmatprep.subr.mxu0 %v15626_v50 }
0x432a   :  { %4717 = vmatprep.subr.mxu1 %v4427_v48  ;;  %9410 = vmatpush3.msra.mxu0 %v4277_v7  ;;  %v4515_v7 = vld [vmem:[%s15577_s3 + $0x438] sm:$0xff] }
0x432b   :  { %4718 = vmatpush1.msra.mxu1 %v4426_v8  ;;  %9411 = vmatprep.subr.mxu0 %v15626_v50 }
0x432c   :  { %4719 = vmatprep.subr.mxu1 %v4421_v34  ;;  %v4276_v34 = vld [vmem:[%s15579_s5 + $0x8] sm:$0xff] }
0x432d   :  { %4720 = vmatpush1.msra.mxu1 %v4420_v53  ;;  %9412 = vmatpush3.msra.mxu0 %v4276_v34  ;;  %v4275_v53 = vld [vmem:[%s15579_s5] sm:$0xff] }
0x432e   :  { %4721 = vmatprep.subr.mxu1 %v4415_v4  ;;  %9413 = vmatprep.subr.mxu0 %v15626_v50  ;;  %v4473_v4 = vld [vmem:[%s15577_s3 + $0x2e8] sm:$0xff]  ;;  %v4508_v34 = vld [vmem:[%s15577_s3 + $0x400] sm:$0xff] }
0x432f   :  { %4722 = vmatpush1.msra.mxu1 %v4414_v22  ;;  %9414 = vmatpush3.msra.mxu0 %v4275_v53  ;;  %v4503_v53 = vld [vmem:[%s15577_s3 + $0x3d8] sm:$0xff] }
0x4330   :  { %4723 = vmatprep.subr.mxu1 %v4409_v1  ;;  %4630 = vmatprep.subr.mxu0 %v4473_v4  ;;  %v4502_v4 = vld [vmem:[%s15577_s3 + $0x3d0] sm:$0xff] }
0x4331   :  { %4724 = vmatpush1.msra.mxu1 %v4408_v6 }
0x4332   :  { %4725 = vmatprep.subr.mxu1 %v4403_v57 }
0x4333   :  { %4726 = vmatpush1.msra.mxu1 %v4402_v28 }
0x4334   :  { %4727 = vmatprep.subr.mxu1 %v4397_v45  ;;  %v4472_v45 = vld [vmem:[%s15577_s3 + $0x2e0] sm:$0xff] }
0x4335   :  { %4728 = vmatpush1.msra.mxu1 %v4396_v42 }
0x4336   :  { %4729 = vmatprep.subr.mxu1 %v4391_v58  ;;  %v4467_v58 = vld [vmem:[%s15577_s3 + $0x2b8] sm:$0xff] }
0x4337   :  { %4730 = vmatpush1.msra.mxu1 %v4390_v55  ;;  %v4460_v55 = vld [vmem:[%s15577_s3 + $0x280] sm:$0xff] }
0x4338   :  { %4731 = vmatprep.subr.mxu1 %v4385_v51  ;;  %v4455_v51 = vld [vmem:[%s15577_s3 + $0x258] sm:$0xff] }
0x4339   :  { %4732 = vmatpush1.msra.mxu1 %v4384_v11  ;;  %v4454_v11 = vld [vmem:[%s15577_s3 + $0x250] sm:$0xff] }
0x433a   :  { %4749 = vmatprep.subr.mxu1 %v4523_v14  ;;  %v4448_v14 = vld [vmem:[%s15577_s3 + $0x220] sm:$0xff] }
0x433b   :  { %4750 = vmatpush2.msra.mxu1 %v4522_v20  ;;  %v4443_v20 = vld [vmem:[%s15577_s3 + $0x1f8] sm:$0xff] }
0x433c   :  { %4751 = vmatprep.subr.mxu1 %v4517_v61  ;;  %v4442_v61 = vld [vmem:[%s15577_s3 + $0x1f0] sm:$0xff] }
0x433d   :  { %4752 = vmatpush2.msra.mxu1 %v4516_v62  ;;  %v4437_v62 = vld [vmem:[%s15577_s3 + $0x1c8] sm:$0xff] }
0x433e   :  { %4753 = vmatprep.subr.mxu1 %v4511_v44  ;;  %v4436_v44 = vld [vmem:[%s15577_s3 + $0x1c0] sm:$0xff] }
0x433f   :  { %4754 = vmatpush2.msra.mxu1 %v4510_v41 }
0x4340   :  { %4755 = vmatprep.subr.mxu1 %v4505_v63  ;;  %v4431_v63 = vld [vmem:[%s15577_s3 + $0x198] sm:$0xff] }
0x4341   :  { %4756 = vmatpush2.msra.mxu1 %v4504_v10  ;;  %v4430_v10 = vld [vmem:[%s15577_s3 + $0x190] sm:$0xff] }
0x4342   :  { %4757 = vmatprep.subr.mxu1 %v4499_v5  ;;  %v4425_v5 = vld [vmem:[%s15577_s3 + $0x168] sm:$0xff] }
0x4343   :  { %4758 = vmatpush2.msra.mxu1 %v4498_v12  ;;  %v4424_v12 = vld [vmem:[%s15577_s3 + $0x160] sm:$0xff] }
0x4344   :  { %4759 = vmatprep.subr.mxu1 %v4493_v18  ;;  %v4419_v18 = vld [vmem:[%s15577_s3 + $0x138] sm:$0xff] }
0x4345   :  { %4760 = vmatpush2.msra.mxu1 %v4492_v27  ;;  %v4418_v27 = vld [vmem:[%s15577_s3 + $0x130] sm:$0xff] }
0x4346   :  { %4761 = vmatprep.subr.mxu1 %v4487_v32  ;;  %v4413_v32 = vld [vmem:[%s15577_s3 + $0x108] sm:$0xff] }
0x4347   :  { %4762 = vmatpush2.msra.mxu1 %v4486_v54  ;;  %v4412_v54 = vld [vmem:[%s15577_s3 + $0x100] sm:$0xff] }
0x4348   :  { %4763 = vmatprep.subr.mxu1 %v4481_v37  ;;  %v4407_v37 = vld [vmem:[%s15577_s3 + $0xd8] sm:$0xff] }
0x4349   :  { %4764 = vmatpush2.msra.mxu1 %v4480_v59  ;;  %v4406_v59 = vld [vmem:[%s15577_s3 + $0xd0] sm:$0xff] }
0x434a   :  { %4766 = vmatmul.mubr.f32.vlgmr.msra.gmra.mxu1 %v13015_v25 }
0x43da   :  { %v4625_v30 = vpop.f32.mrf.mxu1 }
0x43db   :  { %v4626_v38 = vadd.f32 %v4625_v30, %v4529_v35  ;;  %v4401_v35 = vld [vmem:[%s15577_s3 + $0xa8] sm:$0xff]  ;;  %v4400_v30 = vld [vmem:[%s15577_s3 + $0xa0] sm:$0xff] }
0x43dd   :  { %v4773_v13 = vadd.f32 %v4626_v38, %v15646_v52  ;;  %v4395_v38 = vld [vmem:[%s15577_s3 + $0x78] sm:$0xff]  ;;  %v4394_v52 = vld [vmem:[%s15577_s3 + $0x70] sm:$0xff] }
0x43df   :  { %v4774_v16 = vmul.f32 %v4773_v13, %v10224_v0  ;;  %v4389_v13 = vld [vmem:[%s15577_s3 + $0x48] sm:$0xff] }
0x43e1   :  { %v8739_v39 = vmul.f32 -1.442695, %v4774_v16  ;;  %v4388_v16 = vld [vmem:[%s15577_s3 + $0x40] sm:$0xff] }
0x43e3   :  { %9837 = vpow2.f32 %v8739_v39  ;;  %v4383_v39 = vld [vmem:[%s15577_s3 + $0x18] sm:$0xff] }
0x43f0   :  { %v9838_v40 = vpop.eup %9837 }
0x43f1   :  { %v4778_v47 = vadd.f32 1.0, %v9838_v40  ;;  %v4382_v40 = vld [vmem:[%s15577_s3 + $0x10] sm:$0xff] }
0x43f3   :  { %9839 = vrcp.f32 %v4778_v47  ;;  %v4521_v47 = vld [vmem:[%s15577_s3 + $0x468] sm:$0xff] }
0x4400   :  { %v13174_v3 = vpop.eup %9839 }
0x4401   :  { %v4781_v48 = vmul.f32 2.0, %v13174_v3  ;;  %v4783_v6 = vmul.f32 %v13174_v3, %v12517_v15  ;;  %v4466_v15 = vld [vmem:[%s15577_s3 + $0x2b0] sm:$0xff] }
0x4403   :  { %v8740_v8 = vadd.f32 -1.0, %v4781_v48  ;;  %v4514_v48 = vld [vmem:[%s15577_s3 + $0x430] sm:$0xff] }
0x4405   :  { %4785 = vrot.lane.b32.xlu1 %v8740_v8, %s10005_s28  ;;  %v4509_v8 = vld [vmem:[%s15577_s3 + $0x408] sm:$0xff] }
0x4477   :  { %v4786_v22 = vpop.permute.xlu1 %4785 }
0x4478   :  { %v4788_v1 = vmul.f32 %v13174_v3, %v4786_v22  ;;  %v4497_v22 = vld [vmem:[%s15577_s3 + $0x3a8] sm:$0xff] }
0x447a   :  { %4790 = vrot.lane.b32.xlu0 %v4788_v1, %s10006_s29  ;;  %v4496_v1 = vld [vmem:[%s15577_s3 + $0x3a0] sm:$0xff] }
0x447e   :  { %4285 = vrot.lane.b32.xlu0 %v12997_v26, %s10006_s29  ;;  %v4461_v26 = vld [vmem:[%s15577_s3 + $0x288] sm:$0xff] }
0x44ec   :  { %v4791_v57 = vpop.permute.xlu0 %4790 }
0x44ed   :  { %v13196_v28 = vadd.f32 %v4791_v57, %v4783_v6  ;;  %v4491_v6 = vld [vmem:[%s15577_s3 + $0x378] sm:$0xff]  ;;  %v4490_v57 = vld [vmem:[%s15577_s3 + $0x370] sm:$0xff] }
0x44ef   :  { %9841 = vtanh.f32 %v13196_v28 }
0x44f0   :  { %v4286_v42 = vpop.permute.xlu0 %4285 }
0x44f1   :  { %9416 = vmatmul.mubr.msk.f32.vlgmr.msra.gmra.mxu0 %vm606_vm5, %v4286_v42  ;;  %v4484_v42 = vld [vmem:[%s15577_s3 + $0x340] sm:$0xff] }
0x44f2   :  { %4631 = vmatpush1.msra.mxu0 %v4472_v45  ;;  %8737 = vmatprep.mubr.msk.f32.mxu0 %vm354_vm6, %v13006_v29  ;;  %v4449_v29 = vld [vmem:[%s15577_s3 + $0x228] sm:$0xff] }
0x44f3   :  { %4632 = vmatprep.subr.mxu0 %v4467_v58  ;;  %v4485_v45 = vld [vmem:[%s15577_s3 + $0x348] sm:$0xff]  ;;  %v4479_v58 = vld [vmem:[%s15577_s3 + $0x318] sm:$0xff] }
0x44f4   :  { %4633 = vmatpush1.msra.mxu0 %v4466_v15  ;;  %v4478_v15 = vld [vmem:[%s15577_s3 + $0x310] sm:$0xff] }
0x44f5   :  { %4634 = vmatprep.subr.mxu0 %v4461_v26  ;;  %v4803_v26 = vld [vmem:[%s15576_s2 + $0x18] sm:$0xff] }
0x44f6   :  { %4635 = vmatpush1.msra.mxu0 %v4460_v55  ;;  %v4802_v55 = vld [vmem:[%s15576_s2 + $0x10] sm:$0xff] }
0x44f7   :  { %4636 = vmatprep.subr.mxu0 %v4455_v51  ;;  %v4800_v51 = vld [vmem:[%s15576_s2] sm:$0xff] }
0x44f8   :  { %4637 = vmatpush1.msra.mxu0 %v4454_v11 }
0x44f9   :  { %4638 = vmatprep.subr.mxu0 %v4449_v29 }
0x44fa   :  { %4639 = vmatpush1.msra.mxu0 %v4448_v14 }
0x44fb   :  { %4640 = vmatprep.subr.mxu0 %v4443_v20 }
0x44fc   :  { %v9842_v41 = vpop.eup %9841  ;;  %4641 = vmatpush1.msra.mxu0 %v4442_v61 }
0x44fd   :  { %4642 = vmatprep.subr.mxu0 %v4437_v62  ;;  %4796 = vrot.lane.b32.xlu1 %v9842_v41, %s10005_s28  ;;  %v4627_v41 = vpop.f32.mrf.mxu1 }
0x44fe   :  { %4643 = vmatpush1.msra.mxu0 %v4436_v44  ;;  %v4533_v44 = vrot.slane %v13162_v56, %v15638_v19 }
0x44ff   :  { %4644 = vmatprep.subr.mxu0 %v4431_v63 }
0x4500   :  { %4645 = vmatpush1.msra.mxu0 %v4430_v10 }
0x4501   :  { %4646 = vmatprep.subr.mxu0 %v4425_v5 }
0x4502   :  { %4647 = vmatpush1.msra.mxu0 %v4424_v12 }
0x4503   :  { %4648 = vmatprep.subr.mxu0 %v4419_v18 }
0x4504   :  { %4649 = vmatpush1.msra.mxu0 %v4418_v27 }
0x4505   :  { %4650 = vmatprep.subr.mxu0 %v4413_v32 }
0x4506   :  { %4651 = vmatpush1.msra.mxu0 %v4412_v54 }
0x4507   :  { %4652 = vmatprep.subr.mxu0 %v4407_v37 }
0x4508   :  { %4653 = vmatpush1.msra.mxu0 %v4406_v59 }
0x4509   :  { %4654 = vmatprep.subr.mxu0 %v4401_v35 }
0x450a   :  { %4655 = vmatpush1.msra.mxu0 %v4400_v30 }
0x450b   :  { %4656 = vmatprep.subr.mxu0 %v4395_v38 }
0x450c   :  { %4657 = vmatpush1.msra.mxu0 %v4394_v52 }
0x450d   :  { %4658 = vmatprep.subr.mxu0 %v4389_v13 }
0x450e   :  { %4659 = vmatpush1.msra.mxu0 %v4388_v16 }
0x450f   :  { %4660 = vmatprep.subr.mxu0 %v4383_v39  ;;  %v8747_v39 = vld [vmem:[%s15576_s2 + $0x38] sm:$0xff] }
0x4510   :  { %4661 = vmatpush1.msra.mxu0 %v4382_v40  ;;  %v8746_v40 = vld [vmem:[%s15576_s2 + $0x30] sm:$0xff] }
0x4511   :  { %4678 = vmatprep.subr.mxu0 %v4521_v47  ;;  %v8744_v47 = vld [vmem:[%s15576_s2 + $0x20] sm:$0xff] }
0x4512   :  { %4679 = vmatpush2.msra.mxu0 %v4520_v36 }
0x4513   :  { %4680 = vmatprep.subr.mxu0 %v4515_v7 }
0x4514   :  { %4681 = vmatpush2.msra.mxu0 %v4514_v48 }
0x4515   :  { %4682 = vmatprep.subr.mxu0 %v4509_v8 }
0x4516   :  { %4683 = vmatpush2.msra.mxu0 %v4508_v34  ;;  %v4537_v34 = vrot.slane %v13162_v56, %v15640_v9 }
0x4517   :  { %4684 = vmatprep.subr.mxu0 %v4503_v53 }
0x4518   :  { %4685 = vmatpush2.msra.mxu0 %v4502_v4 }
0x4519   :  { %4686 = vmatprep.subr.mxu0 %v4497_v22 }
0x451a   :  { %4687 = vmatpush2.msra.mxu0 %v4496_v1 }
0x451b   :  { %4688 = vmatprep.subr.mxu0 %v4491_v6 }
0x451c   :  { %4689 = vmatpush2.msra.mxu0 %v4490_v57 }
0x451d   :  { %4690 = vmatprep.subr.mxu0 %v4485_v45 }
0x451e   :  { %4691 = vmatpush2.msra.mxu0 %v4484_v42 }
0x451f   :  { %4692 = vmatprep.subr.mxu0 %v4479_v58 }
0x4520   :  { %4693 = vmatpush2.msra.mxu0 %v4478_v15 }
0x4521   :  { %4695 = vmatmul.mubr.f32.vlgmr.msra.gmra.mxu0 %v13015_v25  ;;  %9418 = vmatprep.subr.mxu0 %v15626_v50  ;;  %v4801_v25 = vld [vmem:[%s15576_s2 + $0x8] sm:$0xff] }
0x4522   :  { %9426 = vmatprep.mubr.msk.f32.mxu0 %vm10007_vm4, %v15626_v50  ;;  %9419 = vmatpush3.msra.mxu0 %v4803_v26 }
0x4523   :  { %9420 = vmatprep.subr.mxu0 %v15626_v50 }
0x4524   :  { %9421 = vmatpush3.msra.mxu0 %v4802_v55 }
0x4525   :  { %9422 = vmatprep.subr.mxu0 %v15626_v50 }
0x4526   :  { %9423 = vmatpush3.msra.mxu0 %v4801_v25 }
0x4527   :  { %9424 = vmatprep.subr.mxu0 %v15626_v50 }
0x4528   :  { %9425 = vmatpush3.msra.mxu0 %v4800_v51 }
0x4529   :  { %9429 = vmatprep.subr.mxu0 %v15626_v50 }
0x456f   :  { %v4797_v11 = vpop.permute.xlu1 %4796 }
0x4570   :  { %v4799_v29 = vmul.f32 %v13174_v3, %v4797_v11  ;;  %v4628_v3 = vadd.f32 %v4627_v41, %v4533_v44  ;;  %v8751_v44 = vld [vmem:[%s15576_s2 + $0x40] sm:$0xff] }
0x4572   :  { %4805 = vrot.lane.b32.xlu1 %v4799_v29, %s10006_s29 }
0x45b1   :  { %v13366_v14 = vpop.f32.mrf.mxu0 }
0x45b3   :  { %v9417_v20 = vpop.f32.mrf.mxu0 }
0x45b4   :  { %v8754_v20 = vld [vmem:[%s15576_s2 + $0x58] sm:$0xff] }
0x45e1   :  { %v4696_v62 = vpop.f32.mrf.mxu0 }
0x45e2   :  { %v4697_v53 = vadd.f32 %v4696_v62, %v4537_v34  ;;  %v8753_v62 = vld [vmem:[%s15576_s2 + $0x50] sm:$0xff] }
0x45e3   :  { %v13376_v63 = vpop.f32.mrf.mxu0 }
0x45e4   :  { %v13368_v61 = vpop.permute.xlu1 %4805 }
0x45e5   :  { %9427 = vmatmul.mubr.msk.f32.vlgmr.msra.gmra.mxu0 %vm606_vm5, %v13368_v61 }
0x45e6   :  { %9437 = vmatprep.mubr.msk.f32.mxu0 %vm10007_vm4, %v15626_v50  ;;  %9430 = vmatpush3.msra.mxu0 %v8747_v39 }
0x45e7   :  { %9431 = vmatprep.subr.mxu0 %v15626_v50 }
0x45e8   :  { %9432 = vmatpush3.msra.mxu0 %v8746_v40 }
0x45e9   :  { %9433 = vmatprep.subr.mxu0 %v15626_v50 }
0x46a5   :  { %v4875_v10 = vpop.f32.mrf.mxu0 }
0x46a6   :  { %v4876_v5 = vadd.f32 %v4875_v10, %v4628_v3 }
0x46a7   :  { %v9428_v12 = vpop.f32.mrf.mxu0 }
0x46a8   :  { %v4879_v18 = vmul.f32 %v4876_v5, %v10224_v0  ;;  %v4541_v12 = vrot.slane %v13162_v56, %v15642_v21 }
0x46aa   :  { %v8742_v27 = vmul.f32 -1.442695, %v4879_v18  ;;  %v4699_v18 = vadd.f32 %v13376_v63, %v4541_v12  ;;  %v8767_v12 = vld [vmem:[%s15576_s2 + $0x90] sm:$0xff] }
0x46ac   :  { %9843 = vpow2.f32 %v8742_v27 }
0x46b9   :  { %v9844_v32 = vpop.eup %9843 }
0x46ba   :  { %v4883_v54 = vadd.f32 1.0, %v9844_v32 }
0x46bc   :  { %9845 = vrcp.f32 %v4883_v54 }
0x46c9   :  { %v9846_v37 = vpop.eup %9845 }
0x46ca   :  { %v4886_v59 = vmul.f32 2.0, %v9846_v37  ;;  %v4888_v52 = vmul.f32 %v9846_v37, %v12703_v43  ;;  %v8745_v43 = vld [vmem:[%s15576_s2 + $0x28] sm:$0xff] }
0x46cb   :  { %9434 = vmatpush3.msra.mxu0 %v8745_v43 }
0x46cc   :  { %v8743_v35 = vadd.f32 -1.0, %v4886_v59  ;;  %9435 = vmatprep.subr.mxu0 %v15626_v50 }
0x46cd   :  { %9436 = vmatpush3.msra.mxu0 %v8744_v47 }
0x46ce   :  { %4890 = vrot.lane.b32.xlu0 %v8743_v35, %s10005_s28  ;;  %9440 = vmatprep.subr.mxu0 %v15626_v50 }
0x4740   :  { %v4891_v30 = vpop.permute.xlu0 %4890 }
0x4741   :  { %v4893_v38 = vmul.f32 %v9846_v37, %v4891_v30 }
0x4743   :  { %4895 = vrot.lane.b32.xlu1 %v4893_v38, %s10006_s29 }
0x47b5   :  { %v4896_v13 = vpop.permute.xlu1 %4895 }
0x47b6   :  { %v13382_v16 = vadd.f32 %v4896_v13, %v4888_v52 }
0x47b8   :  { %9847 = vtanh.f32 %v13382_v16 }
0x47c5   :  { %v9848_v36 = vpop.eup %9847 }
0x47c6   :  { %4901 = vrot.lane.b32.xlu0 %v9848_v36, %s10005_s28  ;;  %v8761_v36 = vld [vmem:[%s15576_s2 + $0x78] sm:$0xff] }
0x4838   :  { %v4902_v7 = vpop.permute.xlu0 %4901 }
0x4839   :  { %v13402_v48 = vmul.f32 %v9846_v37, %v4902_v7  ;;  %v8760_v7 = vld [vmem:[%s15576_s2 + $0x70] sm:$0xff] }
0x483b   :  { %4910 = vrot.lane.b32.xlu1 %v13402_v48, %s10006_s29 }
0x48ad   :  { %v4911_v8 = vpop.permute.xlu1 %4910 }
0x48ae   :  { %9438 = vmatmul.mubr.msk.f32.vlgmr.msra.gmra.mxu0 %vm606_vm5, %v4911_v8  ;;  %v8758_v8 = vld [vmem:[%s15576_s2 + $0x60] sm:$0xff] }
0x48af   :  { %9448 = vmatprep.mubr.msk.f32.mxu0 %vm10007_vm4, %v15626_v50  ;;  %9441 = vmatpush3.msra.mxu0 %v8754_v20 }
0x48b0   :  { %9442 = vmatprep.subr.mxu0 %v15626_v50 }
0x48b1   :  { %9443 = vmatpush3.msra.mxu0 %v8753_v62 }
0x48b2   :  { %9444 = vmatprep.subr.mxu0 %v15626_v50 }
0x496e   :  { %v4980_v4 = vpop.f32.mrf.mxu0 }
0x496f   :  { %v4981_v22 = vadd.f32 %v4980_v4, %v4697_v53 }
0x4970   :  { %v9439_v1 = vpop.f32.mrf.mxu0 }
0x4971   :  { %v4984_v6 = vmul.f32 %v4981_v22, %v10224_v0  ;;  %v4545_v1 = vrot.slane %v13162_v56, %v10851_v46 }
0x4973   :  { %v8749_v57 = vmul.f32 -1.442695, %v4984_v6  ;;  %v4767_v6 = vpop.f32.mrf.mxu1 }
0x4975   :  { %9849 = vpow2.f32 %v8749_v57  ;;  %v4768_v57 = vadd.f32 %v4767_v6, %v4545_v1  ;;  %v5521_v1 = vld [vmem:[%s15577_s3 + $0x2d8] sm:$0xff]  ;;  %v5520_v6 = vld [vmem:[%s15577_s3 + $0x2d0] sm:$0xff] }
0x4976   :  { %5609 = vmatprep.subr.mxu1 %v5521_v1  ;;  %v5539_v1 = vld [vmem:[%s15577_s3 + $0x368] sm:$0xff] }
0x4977   :  { %5610 = vmatpush1.msra.mxu1 %v5520_v6  ;;  %v5538_v6 = vld [vmem:[%s15577_s3 + $0x360] sm:$0xff] }
0x4982   :  { %v9850_v45 = vpop.eup %9849 }
0x4983   :  { %v4988_v42 = vadd.f32 1.0, %v9850_v45 }
0x4985   :  { %9851 = vrcp.f32 %v4988_v42 }
0x4992   :  { %v9852_v58 = vpop.eup %9851 }
0x4993   :  { %v4991_v15 = vmul.f32 2.0, %v9852_v58  ;;  %v4993_v51 = vmul.f32 %v9852_v58, %v12736_v17  ;;  %v8752_v17 = vld [vmem:[%s15576_s2 + $0x48] sm:$0xff] }
0x4994   :  { %9445 = vmatpush3.msra.mxu0 %v8752_v17 }
0x4995   :  { %v8750_v26 = vadd.f32 -1.0, %v4991_v15  ;;  %9446 = vmatprep.subr.mxu0 %v15626_v50 }
0x4996   :  { %9447 = vmatpush3.msra.mxu0 %v8751_v44 }
0x4997   :  { %4995 = vrot.lane.b32.xlu0 %v8750_v26, %s10005_s28  ;;  %9451 = vmatprep.subr.mxu0 %v15626_v50 }
0x4a09   :  { %v4996_v55 = vpop.permute.xlu0 %4995 }
0x4a0a   :  { %v4998_v25 = vmul.f32 %v9852_v58, %v4996_v55 }
0x4a0c   :  { %5000 = vrot.lane.b32.xlu1 %v4998_v25, %s10006_s29 }
0x4a7e   :  { %v5001_v11 = vpop.permute.xlu1 %5000 }
0x4a7f   :  { %v13415_v29 = vadd.f32 %v5001_v11, %v4993_v51 }
0x4a81   :  { %9853 = vtanh.f32 %v13415_v29 }
0x4a8e   :  { %v9854_v41 = vpop.eup %9853 }
0x4a8f   :  { %5006 = vrot.lane.b32.xlu0 %v9854_v41, %s10005_s28 }
0x4b01   :  { %v5007_v3 = vpop.permute.xlu0 %5006 }
0x4b02   :  { %v13435_v10 = vmul.f32 %v9852_v58, %v5007_v3 }
0x4b04   :  { %5015 = vrot.lane.b32.xlu1 %v13435_v10, %s10006_s29 }
0x4b76   :  { %v5016_v5 = vpop.permute.xlu1 %5015 }
0x4b77   :  { %9449 = vmatmul.mubr.msk.f32.vlgmr.msra.gmra.mxu0 %vm606_vm5, %v5016_v5  ;;  %v8768_v5 = vld [vmem:[%s15576_s2 + $0x98] sm:$0xff] }
0x4b78   :  { %9459 = vmatprep.mubr.msk.f32.mxu0 %vm10007_vm4, %v15626_v50  ;;  %9452 = vmatpush3.msra.mxu0 %v8761_v36 }
0x4b79   :  { %9453 = vmatprep.subr.mxu0 %v15626_v50 }
0x4b7a   :  { %9454 = vmatpush3.msra.mxu0 %v8760_v7 }
0x4b7b   :  { %9455 = vmatprep.subr.mxu0 %v15626_v50 }
0x4c37   :  { %v5085_v27 = vpop.f32.mrf.mxu0 }
0x4c38   :  { %v5086_v32 = vadd.f32 %v5085_v27, %v4699_v18  ;;  %v8765_v18 = vld [vmem:[%s15576_s2 + $0x80] sm:$0xff] }
0x4c39   :  { %v9450_v54 = vpop.f32.mrf.mxu0 }
0x4c3a   :  { %v5089_v37 = vmul.f32 %v5086_v32, %v10224_v0 }
0x4c3c   :  { %v8756_v59 = vmul.f32 -1.442695, %v5089_v37 }
0x4c3e   :  { %9855 = vpow2.f32 %v8756_v59  ;;  %v4549_v59 = vrot.slane %v13162_v56, %v10886_v33 }
0x4c4b   :  { %v9856_v35 = vpop.eup %9855 }
0x4c4c   :  { %v5093_v30 = vadd.f32 1.0, %v9856_v35  ;;  %v4769_v35 = vpop.f32.mrf.mxu1 }
0x4c4e   :  { %9857 = vrcp.f32 %v5093_v30  ;;  %v4770_v30 = vadd.f32 %v4769_v35, %v4549_v59  ;;  %v5443_v59 = vld [vmem:[%s15577_s3 + $0x68] sm:$0xff]  ;;  %v5442_v35 = vld [vmem:[%s15577_s3 + $0x60] sm:$0xff] }
0x4c5b   :  { %v9858_v38 = vpop.eup %9857 }
0x4c5c   :  { %v5096_v52 = vmul.f32 2.0, %v9858_v38  ;;  %v5098_v63 = vmul.f32 %v9858_v38, %v12770_v31  ;;  %v8759_v31 = vld [vmem:[%s15576_s2 + $0x68] sm:$0xff] }
0x4c5d   :  { %9456 = vmatpush3.msra.mxu0 %v8759_v31 }
0x4c5e   :  { %v8757_v13 = vadd.f32 -1.0, %v5096_v52  ;;  %9457 = vmatprep.subr.mxu0 %v15626_v50 }
0x4c5f   :  { %9458 = vmatpush3.msra.mxu0 %v8758_v8 }
0x4c60   :  { %5100 = vrot.lane.b32.xlu0 %v8757_v13, %s10005_s28  ;;  %9462 = vmatprep.subr.mxu0 %v15626_v50 }
0x4cd2   :  { %v5101_v39 = vpop.permute.xlu0 %5100 }
0x4cd3   :  { %v5103_v40 = vmul.f32 %v9858_v38, %v5101_v39 }
0x4cd5   :  { %5105 = vrot.lane.b32.xlu1 %v5103_v40, %s10006_s29 }
0x4d47   :  { %v5106_v43 = vpop.permute.xlu1 %5105 }
0x4d48   :  { %v13449_v47 = vadd.f32 %v5106_v43, %v5098_v63 }
0x4d4a   :  { %9859 = vtanh.f32 %v13449_v47 }
0x4d57   :  { %v9860_v34 = vpop.eup %9859 }
0x4d58   :  { %5111 = vrot.lane.b32.xlu0 %v9860_v34, %s10005_s28 }
0x4dca   :  { %v5112_v53 = vpop.permute.xlu0 %5111 }
0x4dcb   :  { %v13469_v4 = vmul.f32 %v9858_v38, %v5112_v53 }
0x4dcd   :  { %5120 = vrot.lane.b32.xlu1 %v13469_v4, %s10006_s29 }
0x4e3f   :  { %v5121_v22 = vpop.permute.xlu1 %5120 }
0x4e40   :  { %9460 = vmatmul.mubr.msk.f32.vlgmr.msra.gmra.mxu0 %vm606_vm5, %v5121_v22 }
0x4e41   :  { %9470 = vmatprep.mubr.msk.f32.mxu0 %vm10007_vm4, %v15626_v50  ;;  %9463 = vmatpush3.msra.mxu0 %v8768_v5  ;;  %v5466_v5 = vld [vmem:[%s15577_s3 + $0x120] sm:$0xff] }
0x4e42   :  { %9464 = vmatprep.subr.mxu0 %v15626_v50 }
0x4e43   :  { %9465 = vmatpush3.msra.mxu0 %v8767_v12  ;;  %v5461_v12 = vld [vmem:[%s15577_s3 + $0xf8] sm:$0xff] }
0x4e44   :  { %9466 = vmatprep.subr.mxu0 %v15626_v50 }
0x4f00   :  { %v5190_v45 = vpop.f32.mrf.mxu0 }
0x4f01   :  { %v5191_v42 = vadd.f32 %v5190_v45, %v4768_v57  ;;  %v5509_v57 = vld [vmem:[%s15577_s3 + $0x278] sm:$0xff]  ;;  %v5508_v45 = vld [vmem:[%s15577_s3 + $0x270] sm:$0xff] }
0x4f02   :  { %v9461_v58 = vpop.f32.mrf.mxu0 }
0x4f03   :  { %v5194_v15 = vmul.f32 %v5191_v42, %v10224_v0  ;;  %v5503_v42 = vld [vmem:[%s15577_s3 + $0x248] sm:$0xff]  ;;  %v5502_v58 = vld [vmem:[%s15577_s3 + $0x240] sm:$0xff] }
0x4f05   :  { %v8763_v26 = vmul.f32 -1.442695, %v5194_v15  ;;  %v5497_v15 = vld [vmem:[%s15577_s3 + $0x218] sm:$0xff] }
0x4f07   :  { %9861 = vpow2.f32 %v8763_v26  ;;  %v5496_v26 = vld [vmem:[%s15577_s3 + $0x210] sm:$0xff] }
0x4f14   :  { %v9862_v55 = vpop.eup %9861 }
0x4f15   :  { %v5198_v25 = vadd.f32 1.0, %v9862_v55 }
0x4f17   :  { %9863 = vrcp.f32 %v5198_v25  ;;  %v5491_v25 = vld [vmem:[%s15577_s3 + $0x1e8] sm:$0xff] }
0x4f24   :  { %v9864_v51 = vpop.eup %9863 }
0x4f25   :  { %v5201_v11 = vmul.f32 2.0, %v9864_v51  ;;  %v5203_v44 = vmul.f32 %v9864_v51, %v12803_v60  ;;  %v8766_v60 = vld [vmem:[%s15576_s2 + $0x88] sm:$0xff] }
0x4f26   :  { %9467 = vmatpush3.msra.mxu0 %v8766_v60  ;;  %v5460_v60 = vld [vmem:[%s15577_s3 + $0xf0] sm:$0xff] }
0x4f27   :  { %v8764_v20 = vadd.f32 -1.0, %v5201_v11  ;;  %9468 = vmatprep.subr.mxu0 %v15626_v50  ;;  %v5485_v11 = vld [vmem:[%s15577_s3 + $0x1b8] sm:$0xff] }
0x4f28   :  { %9469 = vmatpush3.msra.mxu0 %v8765_v18  ;;  %v5455_v18 = vld [vmem:[%s15577_s3 + $0xc8] sm:$0xff] }
0x4f29   :  { %5205 = vrot.lane.b32.xlu0 %v8764_v20, %s10005_s28  ;;  %9473 = vmatprep.subr.mxu0 %v15626_v50  ;;  %v5484_v20 = vld [vmem:[%s15577_s3 + $0x1b0] sm:$0xff] }
0x4f9b   :  { %v5206_v62 = vpop.permute.xlu0 %5205 }
0x4f9c   :  { %v5208_v17 = vmul.f32 %v9864_v51, %v5206_v62  ;;  %v5479_v62 = vld [vmem:[%s15577_s3 + $0x188] sm:$0xff] }
0x4f9e   :  { %5210 = vrot.lane.b32.xlu1 %v5208_v17, %s10006_s29  ;;  %v5478_v17 = vld [vmem:[%s15577_s3 + $0x180] sm:$0xff] }
0x5010   :  { %v5211_v41 = vpop.permute.xlu1 %5210 }
0x5011   :  { %v13482_v3 = vadd.f32 %v5211_v41, %v5203_v44  ;;  %v5473_v44 = vld [vmem:[%s15577_s3 + $0x158] sm:$0xff]  ;;  %v5472_v41 = vld [vmem:[%s15577_s3 + $0x150] sm:$0xff] }
0x5013   :  { %9865 = vtanh.f32 %v13482_v3 }
0x5020   :  { %v9866_v27 = vpop.eup %9865 }
0x5021   :  { %5216 = vrot.lane.b32.xlu0 %v9866_v27, %s10005_s28  ;;  %v5454_v27 = vld [vmem:[%s15577_s3 + $0xc0] sm:$0xff] }
0x5093   :  { %v5217_v32 = vpop.permute.xlu0 %5216 }
0x5094   :  { %v5219_v54 = vmul.f32 %v9864_v51, %v5217_v32  ;;  %v5490_v51 = vld [vmem:[%s15577_s3 + $0x1e0] sm:$0xff]  ;;  %v5449_v32 = vld [vmem:[%s15577_s3 + $0x98] sm:$0xff] }
0x5096   :  { %5225 = vrot.lane.b32.xlu1 %v5219_v54, %s10006_s29  ;;  %v5448_v54 = vld [vmem:[%s15577_s3 + $0x90] sm:$0xff] }
0x5108   :  { %v13503_v37 = vpop.permute.xlu1 %5225 }
0x5109   :  { %9471 = vmatmul.mubr.msk.f32.vlgmr.msra.gmra.mxu0 %vm606_vm5, %v13503_v37 }
0x510a   :  { %9481 = vmatprep.mubr.msk.f32.mxu0 %vm10007_vm4, %v15626_v50 }
0x51c9   :  { %v5295_v38 = vpop.f32.mrf.mxu0 }
0x51ca   :  { %v5296_v52 = vadd.f32 %v5295_v38, %v4770_v30  ;;  %v5437_v30 = vld [vmem:[%s15577_s3 + $0x38] sm:$0xff]  ;;  %v5436_v38 = vld [vmem:[%s15577_s3 + $0x30] sm:$0xff] }
0x51cb   :  { %v9472_v13 = vpop.f32.mrf.mxu0 }
0x51cc   :  { %v5299_v39 = vmul.f32 %v5296_v52, %v10224_v0  ;;  %v5431_v52 = vld [vmem:[%s15577_s3 + $0x8] sm:$0xff]  ;;  %v5430_v13 = vld [vmem:[%s15577_s3] sm:$0xff] }
0x51ce   :  { %v8770_v40 = vmul.f32 -1.442695, %v5299_v39  ;;  %v5569_v39 = vld [vmem:[%s15577_s3 + $0x458] sm:$0xff] }
0x51d0   :  { %9867 = vpow2.f32 %v8770_v40  ;;  %v5568_v40 = vld [vmem:[%s15577_s3 + $0x450] sm:$0xff] }
0x51dd   :  { %v9868_v63 = vpop.eup %9867 }
0x51de   :  { %v5303_v43 = vadd.f32 1.0, %v9868_v63  ;;  %v5563_v63 = vld [vmem:[%s15577_s3 + $0x428] sm:$0xff] }
0x51e0   :  { %9869 = vrcp.f32 %v5303_v43  ;;  %v5562_v43 = vld [vmem:[%s15577_s3 + $0x420] sm:$0xff] }
0x51ed   :  { %v13512_v36 = vpop.eup %9869 }
0x51ee   :  { %v5306_v7 = vmul.f32 2.0, %v13512_v36  ;;  %v5308_v34 = vmul.f32 %v13512_v36, %v12843_v49  ;;  %v5514_v49 = vld [vmem:[%s15577_s3 + $0x2a0] sm:$0xff] }
0x51f0   :  { %v8771_v31 = vadd.f32 -1.0, %v5306_v7  ;;  %v5557_v7 = vld [vmem:[%s15577_s3 + $0x3f8] sm:$0xff] }
0x51f2   :  { %5310 = vrot.lane.b32.xlu0 %v8771_v31, %s10005_s28  ;;  %v5556_v31 = vld [vmem:[%s15577_s3 + $0x3f0] sm:$0xff] }
0x5264   :  { %v5311_v56 = vpop.permute.xlu0 %5310 }
0x5265   :  { %v5313_v8 = vmul.f32 %v13512_v36, %v5311_v56  ;;  %v5551_v56 = vld [vmem:[%s15577_s3 + $0x3c8] sm:$0xff] }
0x5267   :  { %5315 = vrot.lane.b32.xlu1 %v5313_v8, %s10006_s29  ;;  %v5550_v8 = vld [vmem:[%s15577_s3 + $0x3c0] sm:$0xff] }
0x526b   :  { %5416 = vrot.lane.b32.xlu1 %v13402_v48, %s10005_s28  ;;  %v5515_v48 = vld [vmem:[%s15577_s3 + $0x2a8] sm:$0xff] }
0x526c   :  { %5611 = vmatprep.subr.mxu1 %v5515_v48  ;;  %v5533_v48 = vld [vmem:[%s15577_s3 + $0x338] sm:$0xff] }
0x526d   :  { %5612 = vmatpush1.msra.mxu1 %v5514_v49  ;;  %v5532_v49 = vld [vmem:[%s15577_s3 + $0x330] sm:$0xff] }
0x526e   :  { %5613 = vmatprep.subr.mxu1 %v5509_v57  ;;  %v5527_v57 = vld [vmem:[%s15577_s3 + $0x308] sm:$0xff] }
0x526f   :  { %5614 = vmatpush1.msra.mxu1 %v5508_v45  ;;  %v5526_v45 = vld [vmem:[%s15577_s3 + $0x300] sm:$0xff] }
0x5270   :  { %5615 = vmatprep.subr.mxu1 %v5503_v42  ;;  %v5525_v42 = vld [vmem:[%s15577_s3 + $0x2f8] sm:$0xff] }
0x5271   :  { %5616 = vmatpush1.msra.mxu1 %v5502_v58 }
0x5272   :  { %5617 = vmatprep.subr.mxu1 %v5497_v15 }
0x5273   :  { %5618 = vmatpush1.msra.mxu1 %v5496_v26 }
0x5274   :  { %5619 = vmatprep.subr.mxu1 %v5491_v25 }
0x5275   :  { %5620 = vmatpush1.msra.mxu1 %v5490_v51 }
0x5276   :  { %5621 = vmatprep.subr.mxu1 %v5485_v11 }
0x5277   :  { %5622 = vmatpush1.msra.mxu1 %v5484_v20 }
0x5278   :  { %5623 = vmatprep.subr.mxu1 %v5479_v62 }
0x5279   :  { %5624 = vmatpush1.msra.mxu1 %v5478_v17  ;;  %v5513_v17 = vld [vmem:[%s15577_s3 + $0x298] sm:$0xff] }
0x527a   :  { %5625 = vmatprep.subr.mxu1 %v5473_v44  ;;  %v5507_v44 = vld [vmem:[%s15577_s3 + $0x268] sm:$0xff] }
0x527b   :  { %5626 = vmatpush1.msra.mxu1 %v5472_v41  ;;  %v5506_v41 = vld [vmem:[%s15577_s3 + $0x260] sm:$0xff] }
0x52d9   :  { %v5316_v53 = vpop.permute.xlu1 %5315 }
0x52da   :  { %v13522_v22 = vadd.f32 %v5316_v53, %v5308_v34  ;;  %v5545_v34 = vld [vmem:[%s15577_s3 + $0x398] sm:$0xff]  ;;  %v5544_v53 = vld [vmem:[%s15577_s3 + $0x390] sm:$0xff] }
0x52dc   :  { %9871 = vtanh.f32 %v13522_v22 }
0x52dd   :  { %v5417_v26 = vpop.permute.xlu1 %5416 }
0x52de   :  { %v5426_v25 = vsel %vm606_vm5, %v13368_v61, %v5417_v26  ;;  %v5519_v61 = vld [vmem:[%s15577_s3 + $0x2c8] sm:$0xff]  ;;  %v5549_v26 = vld [vmem:[%s15577_s3 + $0x3b8] sm:$0xff] }
0x52e9   :  { %v9872_v55 = vpop.eup %9871 }
0x52ea   :  { %5321 = vrot.lane.b32.xlu0 %v9872_v55, %s10005_s28 }
0x52ee   :  { %5419 = vrot.lane.b32.xlu0 %v13435_v10, %s10008_s18  ;;  %v5467_v10 = vld [vmem:[%s15577_s3 + $0x128] sm:$0xff] }
0x52ef   :  { %5627 = vmatprep.subr.mxu1 %v5467_v10  ;;  %v5501_v10 = vld [vmem:[%s15577_s3 + $0x238] sm:$0xff] }
0x52f0   :  { %5628 = vmatpush1.msra.mxu1 %v5466_v5  ;;  %v5500_v5 = vld [vmem:[%s15577_s3 + $0x230] sm:$0xff] }
0x52f1   :  { %5629 = vmatprep.subr.mxu1 %v5461_v12  ;;  %v5495_v12 = vld [vmem:[%s15577_s3 + $0x208] sm:$0xff] }
0x52f2   :  { %5630 = vmatpush1.msra.mxu1 %v5460_v60  ;;  %v5494_v60 = vld [vmem:[%s15577_s3 + $0x200] sm:$0xff] }
0x52f3   :  { %5631 = vmatprep.subr.mxu1 %v5455_v18  ;;  %v5489_v18 = vld [vmem:[%s15577_s3 + $0x1d8] sm:$0xff] }
0x52f4   :  { %5632 = vmatpush1.msra.mxu1 %v5454_v27  ;;  %v5488_v27 = vld [vmem:[%s15577_s3 + $0x1d0] sm:$0xff] }
0x52f5   :  { %5633 = vmatprep.subr.mxu1 %v5449_v32  ;;  %v5483_v32 = vld [vmem:[%s15577_s3 + $0x1a8] sm:$0xff] }
0x52f6   :  { %5634 = vmatpush1.msra.mxu1 %v5448_v54  ;;  %v5482_v54 = vld [vmem:[%s15577_s3 + $0x1a0] sm:$0xff] }
0x52f7   :  { %5635 = vmatprep.subr.mxu1 %v5443_v59  ;;  %v5477_v59 = vld [vmem:[%s15577_s3 + $0x178] sm:$0xff] }
0x52f8   :  { %5636 = vmatpush1.msra.mxu1 %v5442_v35  ;;  %v5476_v35 = vld [vmem:[%s15577_s3 + $0x170] sm:$0xff] }
0x52f9   :  { %5637 = vmatprep.subr.mxu1 %v5437_v30  ;;  %v5471_v30 = vld [vmem:[%s15577_s3 + $0x148] sm:$0xff] }
0x52fa   :  { %5638 = vmatpush1.msra.mxu1 %v5436_v38  ;;  %v5470_v38 = vld [vmem:[%s15577_s3 + $0x140] sm:$0xff] }
0x52fb   :  { %5639 = vmatprep.subr.mxu1 %v5431_v52  ;;  %v5465_v52 = vld [vmem:[%s15577_s3 + $0x118] sm:$0xff] }
0x52fc   :  { %5640 = vmatpush1.msra.mxu1 %v5430_v13  ;;  %v5464_v13 = vld [vmem:[%s15577_s3 + $0x110] sm:$0xff] }
0x52fd   :  { %5657 = vmatprep.subr.mxu1 %v5569_v39  ;;  %v5459_v39 = vld [vmem:[%s15577_s3 + $0xe8] sm:$0xff] }
0x52fe   :  { %5658 = vmatpush2.msra.mxu1 %v5568_v40  ;;  %v5458_v40 = vld [vmem:[%s15577_s3 + $0xe0] sm:$0xff] }
0x52ff   :  { %5659 = vmatprep.subr.mxu1 %v5563_v63  ;;  %v5453_v63 = vld [vmem:[%s15577_s3 + $0xb8] sm:$0xff] }
0x5300   :  { %5660 = vmatpush2.msra.mxu1 %v5562_v43  ;;  %v5452_v43 = vld [vmem:[%s15577_s3 + $0xb0] sm:$0xff] }
0x5301   :  { %5661 = vmatprep.subr.mxu1 %v5557_v7  ;;  %v5447_v7 = vld [vmem:[%s15577_s3 + $0x88] sm:$0xff] }
0x5302   :  { %5662 = vmatpush2.msra.mxu1 %v5556_v31  ;;  %v5446_v31 = vld [vmem:[%s15577_s3 + $0x80] sm:$0xff] }
0x5303   :  { %5663 = vmatprep.subr.mxu1 %v5551_v56  ;;  %v5441_v56 = vld [vmem:[%s15577_s3 + $0x58] sm:$0xff] }
0x5304   :  { %5664 = vmatpush2.msra.mxu1 %v5550_v8  ;;  %v5440_v8 = vld [vmem:[%s15577_s3 + $0x50] sm:$0xff] }
0x5305   :  { %5665 = vmatprep.subr.mxu1 %v5545_v34  ;;  %v5435_v34 = vld [vmem:[%s15577_s3 + $0x28] sm:$0xff] }
0x5306   :  { %5666 = vmatpush2.msra.mxu1 %v5544_v53  ;;  %v5434_v53 = vld [vmem:[%s15577_s3 + $0x20] sm:$0xff] }
0x5307   :  { %5667 = vmatprep.subr.mxu1 %v5539_v1  ;;  %v5573_v1 = vld [vmem:[%s15577_s3 + $0x478] sm:$0xff] }
0x5308   :  { %5668 = vmatpush2.msra.mxu1 %v5538_v6  ;;  %v5572_v6 = vld [vmem:[%s15577_s3 + $0x470] sm:$0xff] }
0x5309   :  { %5669 = vmatprep.subr.mxu1 %v5533_v48  ;;  %v5567_v48 = vld [vmem:[%s15577_s3 + $0x448] sm:$0xff] }
0x530a   :  { %5670 = vmatpush2.msra.mxu1 %v5532_v49  ;;  %v5566_v49 = vld [vmem:[%s15577_s3 + $0x440] sm:$0xff] }
0x530b   :  { %5671 = vmatprep.subr.mxu1 %v5527_v57  ;;  %v5561_v57 = vld [vmem:[%s15577_s3 + $0x418] sm:$0xff] }
0x530c   :  { %5672 = vmatpush2.msra.mxu1 %v5526_v45  ;;  %v5560_v45 = vld [vmem:[%s15577_s3 + $0x410] sm:$0xff] }
0x530d   :  { %5751 = vmatprep.subr.mxu1 %v5525_v42  ;;  %v5555_v42 = vld [vmem:[%s15577_s3 + $0x3e8] sm:$0xff] }
0x535c   :  { %v5322_v58 = vpop.permute.xlu0 %5321 }
0x535d   :  { %v13676_v15 = vmul.f32 %v13512_v36, %v5322_v58  ;;  %v5524_v36 = vld [vmem:[%s15577_s3 + $0x2f0] sm:$0xff]  ;;  %v5554_v58 = vld [vmem:[%s15577_s3 + $0x3e0] sm:$0xff] }
0x535f   :  { %5423 = vrot.lane.b32.xlu1 %v13676_v15, %s10005_s28 }
0x5360   :  { %v5420_v55 = vpop.permute.xlu0 %5419 }
0x5361   :  { %v5427_v51 = vsel %vm354_vm6, %v5426_v25, %v5420_v55  ;;  %v5548_v55 = vld [vmem:[%s15577_s3 + $0x3b0] sm:$0xff]  ;;  %v5543_v25 = vld [vmem:[%s15577_s3 + $0x388] sm:$0xff] }
0x5362   :  { %v13694_v62 = vsel %vm1227_vm7, %v5427_v51, %v13469_v4  ;;  %v5512_v4 = vld [vmem:[%s15577_s3 + $0x290] sm:$0xff]  ;;  %v5542_v51 = vld [vmem:[%s15577_s3 + $0x380] sm:$0xff] }
0x53d1   :  { %v5424_v11 = vpop.permute.xlu1 %5423 }
0x53d2   :  { %v13685_v20 = vsel %vm606_vm5, %v13503_v37, %v5424_v11  ;;  %v5518_v37 = vld [vmem:[%s15577_s3 + $0x2c0] sm:$0xff]  ;;  %v5537_v11 = vld [vmem:[%s15577_s3 + $0x358] sm:$0xff] }
0x53d3   :  { %8774 = vmatprep.mubr.msk.f32.mxu1 %vm354_vm6, %v13685_v20 }
0x53d4   :  { %5674 = vmatmul.mubr.f32.vlgmr.msra.gmra.mxu1 %v13694_v62 }
0x53d5   :  { %5752 = vmatpush1.msra.mxu1 %v5524_v36  ;;  %8776 = vmatprep.mubr.msk.f32.mxu1 %vm354_vm6, %v13685_v20  ;;  %v5536_v36 = vld [vmem:[%s15577_s3 + $0x350] sm:$0xff] }
0x53d6   :  { %5753 = vmatprep.subr.mxu1 %v5519_v61  ;;  %v5531_v61 = vld [vmem:[%s15577_s3 + $0x328] sm:$0xff] }
0x53d7   :  { %5754 = vmatpush1.msra.mxu1 %v5518_v37  ;;  %v5530_v37 = vld [vmem:[%s15577_s3 + $0x320] sm:$0xff] }
0x53d8   :  { %5755 = vmatprep.subr.mxu1 %v5513_v17  ;;  %v13841_v17 = vld [vmem:[%s15578_s4] sm:$0x3f] }
0x53d9   :  { %5756 = vmatpush1.msra.mxu1 %v5512_v4  ;;  %v5579_v4 = vrot.slane %v13841_v17, %v15635_v2 }
0x53da   :  { %5757 = vmatprep.subr.mxu1 %v5507_v44 }
0x53db   :  { %5758 = vmatpush1.msra.mxu1 %v5506_v41 }
0x53dc   :  { %5759 = vmatprep.subr.mxu1 %v5501_v10  ;;  %v15647_v10 = vld [vmem:[#allocation11_spill] sm:$0xff] }
0x53dd   :  { %5760 = vmatpush1.msra.mxu1 %v5500_v5 }
0x53de   :  { %5761 = vmatprep.subr.mxu1 %v5495_v12 }
0x53df   :  { %5762 = vmatpush1.msra.mxu1 %v5494_v60 }
0x53e0   :  { %5763 = vmatprep.subr.mxu1 %v5489_v18 }
0x53e1   :  { %5764 = vmatpush1.msra.mxu1 %v5488_v27 }
0x53e2   :  { %5765 = vmatprep.subr.mxu1 %v5483_v32  ;;  %v5328_v32 = vld [vmem:[%s15579_s5 + $0x18] sm:$0xff] }
0x53e3   :  { %5766 = vmatpush1.msra.mxu1 %v5482_v54  ;;  %v5327_v54 = vld [vmem:[%s15579_s5 + $0x10] sm:$0xff]  ;;  %9474 = vmatpush3.msra.mxu0 %v5328_v32  ;;  %v5571_v32 = vld [vmem:[%s15577_s3 + $0x468] sm:$0xff] }
0x53e4   :  { %5767 = vmatprep.subr.mxu1 %v5477_v59  ;;  %9475 = vmatprep.subr.mxu0 %v15626_v50 }
0x53e5   :  { %5768 = vmatpush1.msra.mxu1 %v5476_v35  ;;  %9476 = vmatpush3.msra.mxu0 %v5327_v54  ;;  %v5570_v54 = vld [vmem:[%s15577_s3 + $0x460] sm:$0xff] }
0x53e6   :  { %5769 = vmatprep.subr.mxu1 %v5471_v30  ;;  %9477 = vmatprep.subr.mxu0 %v15626_v50 }
0x53e7   :  { %5770 = vmatpush1.msra.mxu1 %v5470_v38  ;;  %v5326_v38 = vld [vmem:[%s15579_s5 + $0x8] sm:$0xff] }
0x53e8   :  { %5771 = vmatprep.subr.mxu1 %v5465_v52  ;;  %9478 = vmatpush3.msra.mxu0 %v5326_v38  ;;  %v5325_v52 = vld [vmem:[%s15579_s5] sm:$0xff]  ;;  %v5559_v38 = vld [vmem:[%s15577_s3 + $0x408] sm:$0xff] }
0x53e9   :  { %5772 = vmatpush1.msra.mxu1 %v5464_v13  ;;  %9479 = vmatprep.subr.mxu0 %v15626_v50  ;;  %v5523_v13 = vld [vmem:[%s15577_s3 + $0x2e8] sm:$0xff] }
0x53ea   :  { %5773 = vmatprep.subr.mxu1 %v5459_v39  ;;  %9480 = vmatpush3.msra.mxu0 %v5325_v52  ;;  %v5558_v52 = vld [vmem:[%s15577_s3 + $0x400] sm:$0xff] }
0x53eb   :  { %5774 = vmatpush1.msra.mxu1 %v5458_v40  ;;  %5680 = vmatprep.subr.mxu0 %v5523_v13  ;;  %v5553_v13 = vld [vmem:[%s15577_s3 + $0x3d8] sm:$0xff] }
0x53ec   :  { %5775 = vmatprep.subr.mxu1 %v5453_v63 }
0x53ed   :  { %5776 = vmatpush1.msra.mxu1 %v5452_v43 }
0x53ee   :  { %5777 = vmatprep.subr.mxu1 %v5447_v7 }
0x53ef   :  { %5778 = vmatpush1.msra.mxu1 %v5446_v31  ;;  %v5522_v31 = vld [vmem:[%s15577_s3 + $0x2e0] sm:$0xff] }
0x53f0   :  { %5779 = vmatprep.subr.mxu1 %v5441_v56 }
0x53f1   :  { %5780 = vmatpush1.msra.mxu1 %v5440_v8  ;;  %v5517_v8 = vld [vmem:[%s15577_s3 + $0x2b8] sm:$0xff] }
0x53f2   :  { %5781 = vmatprep.subr.mxu1 %v5435_v34  ;;  %v5510_v34 = vld [vmem:[%s15577_s3 + $0x280] sm:$0xff] }
0x53f3   :  { %5782 = vmatpush1.msra.mxu1 %v5434_v53  ;;  %v5505_v53 = vld [vmem:[%s15577_s3 + $0x258] sm:$0xff] }
0x53f4   :  { %5799 = vmatprep.subr.mxu1 %v5573_v1  ;;  %v5504_v1 = vld [vmem:[%s15577_s3 + $0x250] sm:$0xff] }
0x53f5   :  { %5800 = vmatpush2.msra.mxu1 %v5572_v6  ;;  %v5498_v6 = vld [vmem:[%s15577_s3 + $0x220] sm:$0xff] }
0x53f6   :  { %5801 = vmatprep.subr.mxu1 %v5567_v48  ;;  %v5493_v48 = vld [vmem:[%s15577_s3 + $0x1f8] sm:$0xff] }
0x53f7   :  { %5802 = vmatpush2.msra.mxu1 %v5566_v49  ;;  %v5492_v49 = vld [vmem:[%s15577_s3 + $0x1f0] sm:$0xff] }
0x53f8   :  { %5803 = vmatprep.subr.mxu1 %v5561_v57  ;;  %v5487_v57 = vld [vmem:[%s15577_s3 + $0x1c8] sm:$0xff] }
0x53f9   :  { %5804 = vmatpush2.msra.mxu1 %v5560_v45  ;;  %v5486_v45 = vld [vmem:[%s15577_s3 + $0x1c0] sm:$0xff] }
0x53fa   :  { %5805 = vmatprep.subr.mxu1 %v5555_v42 }
0x53fb   :  { %5806 = vmatpush2.msra.mxu1 %v5554_v58  ;;  %v5481_v58 = vld [vmem:[%s15577_s3 + $0x198] sm:$0xff] }
0x53fc   :  { %5807 = vmatprep.subr.mxu1 %v5549_v26  ;;  %v5480_v26 = vld [vmem:[%s15577_s3 + $0x190] sm:$0xff] }
0x53fd   :  { %5808 = vmatpush2.msra.mxu1 %v5548_v55  ;;  %v5475_v55 = vld [vmem:[%s15577_s3 + $0x168] sm:$0xff] }
0x53fe   :  { %5809 = vmatprep.subr.mxu1 %v5543_v25  ;;  %v5474_v25 = vld [vmem:[%s15577_s3 + $0x160] sm:$0xff] }
0x53ff   :  { %5810 = vmatpush2.msra.mxu1 %v5542_v51  ;;  %v5469_v51 = vld [vmem:[%s15577_s3 + $0x138] sm:$0xff] }
0x5400   :  { %5811 = vmatprep.subr.mxu1 %v5537_v11  ;;  %v5468_v11 = vld [vmem:[%s15577_s3 + $0x130] sm:$0xff] }
0x5401   :  { %5812 = vmatpush2.msra.mxu1 %v5536_v36  ;;  %v5463_v36 = vld [vmem:[%s15577_s3 + $0x108] sm:$0xff] }
0x5402   :  { %5813 = vmatprep.subr.mxu1 %v5531_v61  ;;  %v5462_v61 = vld [vmem:[%s15577_s3 + $0x100] sm:$0xff] }
0x5403   :  { %5814 = vmatpush2.msra.mxu1 %v5530_v37  ;;  %v5457_v37 = vld [vmem:[%s15577_s3 + $0xd8] sm:$0xff] }
0x5404   :  { %5816 = vmatmul.mubr.f32.vlgmr.msra.gmra.mxu1 %v13694_v62 }
0x5494   :  { %v5675_v44 = vpop.f32.mrf.mxu1 }
0x5495   :  { %v5676_v41 = vadd.f32 %v5675_v44, %v5579_v4  ;;  %v5456_v4 = vld [vmem:[%s15577_s3 + $0xd0] sm:$0xff]  ;;  %v5451_v44 = vld [vmem:[%s15577_s3 + $0xa8] sm:$0xff] }
0x5497   :  { %v5823_v5 = vadd.f32 %v15647_v10, %v5676_v41  ;;  %v5450_v41 = vld [vmem:[%s15577_s3 + $0xa0] sm:$0xff]  ;;  %v5445_v10 = vld [vmem:[%s15577_s3 + $0x78] sm:$0xff] }
0x5499   :  { %v5824_v12 = vmul.f32 %v5823_v5, %v10224_v0  ;;  %v5444_v5 = vld [vmem:[%s15577_s3 + $0x70] sm:$0xff] }
0x549b   :  { %v8777_v60 = vmul.f32 -1.442695, %v5824_v12  ;;  %v5439_v12 = vld [vmem:[%s15577_s3 + $0x48] sm:$0xff] }
0x549d   :  { %9873 = vpow2.f32 %v8777_v60  ;;  %v5438_v60 = vld [vmem:[%s15577_s3 + $0x40] sm:$0xff] }
0x54aa   :  { %v9874_v18 = vpop.eup %9873 }
0x54ab   :  { %v5828_v27 = vadd.f32 1.0, %v9874_v18  ;;  %v5433_v18 = vld [vmem:[%s15577_s3 + $0x18] sm:$0xff] }
0x54ad   :  { %9875 = vrcp.f32 %v5828_v27  ;;  %v5432_v27 = vld [vmem:[%s15577_s3 + $0x10] sm:$0xff] }
0x54ba   :  { %v13853_v59 = vpop.eup %9875 }
0x54bb   :  { %v5831_v35 = vmul.f32 2.0, %v13853_v59  ;;  %v5833_v63 = vmul.f32 %v13853_v59, %v13196_v28  ;;  %v5516_v28 = vld [vmem:[%s15577_s3 + $0x2b0] sm:$0xff] }
0x54bd   :  { %v8778_v30 = vadd.f32 -1.0, %v5831_v35  ;;  %v5565_v35 = vld [vmem:[%s15577_s3 + $0x438] sm:$0xff] }
0x54bf   :  { %5835 = vrot.lane.b32.xlu0 %v8778_v30, %s10005_s28  ;;  %v5564_v30 = vld [vmem:[%s15577_s3 + $0x430] sm:$0xff] }
0x5531   :  { %v5836_v39 = vpop.permute.xlu0 %5835 }
0x5532   :  { %v5838_v40 = vmul.f32 %v13853_v59, %v5836_v39  ;;  %v5552_v39 = vld [vmem:[%s15577_s3 + $0x3d0] sm:$0xff] }
0x5534   :  { %5840 = vrot.lane.b32.xlu1 %v5838_v40, %s10006_s29  ;;  %v5547_v40 = vld [vmem:[%s15577_s3 + $0x3a8] sm:$0xff] }
0x5538   :  { %5335 = vrot.lane.b32.xlu1 %v13676_v15, %s10006_s29  ;;  %v5511_v15 = vld [vmem:[%s15577_s3 + $0x288] sm:$0xff] }
0x55a6   :  { %v5841_v43 = vpop.permute.xlu1 %5840 }
0x55a7   :  { %v13875_v7 = vadd.f32 %v5841_v43, %v5833_v63  ;;  %v5546_v63 = vld [vmem:[%s15577_s3 + $0x3a0] sm:$0xff]  ;;  %v5541_v43 = vld [vmem:[%s15577_s3 + $0x378] sm:$0xff] }
0x55a9   :  { %9877 = vtanh.f32 %v13875_v7 }
0x55aa   :  { %v5336_v56 = vpop.permute.xlu1 %5335 }
0x55ab   :  { %9482 = vmatmul.mubr.msk.f32.vlgmr.msra.gmra.mxu0 %vm606_vm5, %v5336_v56  ;;  %v5535_v56 = vld [vmem:[%s15577_s3 + $0x348] sm:$0xff] }
0x55ac   :  { %5681 = vmatpush1.msra.mxu0 %v5522_v31  ;;  %8775 = vmatprep.mubr.msk.f32.mxu0 %vm354_vm6, %v13685_v20  ;;  %v5499_v20 = vld [vmem:[%s15577_s3 + $0x228] sm:$0xff]  ;;  %v5540_v31 = vld [vmem:[%s15577_s3 + $0x370] sm:$0xff] }
0x55ad   :  { %5682 = vmatprep.subr.mxu0 %v5517_v8  ;;  %v5534_v8 = vld [vmem:[%s15577_s3 + $0x340] sm:$0xff] }
0x55ae   :  { %5683 = vmatpush1.msra.mxu0 %v5516_v28  ;;  %v5529_v28 = vld [vmem:[%s15577_s3 + $0x318] sm:$0xff] }
0x55af   :  { %5684 = vmatprep.subr.mxu0 %v5511_v15  ;;  %v5528_v15 = vld [vmem:[%s15577_s3 + $0x310] sm:$0xff] }
0x55b0   :  { %5685 = vmatpush1.msra.mxu0 %v5510_v34  ;;  %v5853_v34 = vld [vmem:[%s15576_s2 + $0x18] sm:$0xff] }
0x55b1   :  { %5686 = vmatprep.subr.mxu0 %v5505_v53  ;;  %v5852_v53 = vld [vmem:[%s15576_s2 + $0x10] sm:$0xff] }
0x55b2   :  { %5687 = vmatpush1.msra.mxu0 %v5504_v1  ;;  %v5850_v1 = vld [vmem:[%s15576_s2] sm:$0xff] }
0x55b3   :  { %5688 = vmatprep.subr.mxu0 %v5499_v20 }
0x55b4   :  { %5689 = vmatpush1.msra.mxu0 %v5498_v6 }
0x55b5   :  { %5690 = vmatprep.subr.mxu0 %v5493_v48 }
0x55b6   :  { %v9878_v42 = vpop.eup %9877  ;;  %5691 = vmatpush1.msra.mxu0 %v5492_v49 }
0x55b7   :  { %5692 = vmatprep.subr.mxu0 %v5487_v57  ;;  %5846 = vrot.lane.b32.xlu0 %v9878_v42, %s10005_s28  ;;  %v5583_v42 = vrot.slane %v13841_v17, %v15638_v19 }
0x55b8   :  { %5693 = vmatpush1.msra.mxu0 %v5486_v45 }
0x55b9   :  { %5694 = vmatprep.subr.mxu0 %v5481_v58  ;;  %v5677_v58 = vpop.f32.mrf.mxu1 }
0x55ba   :  { %5695 = vmatpush1.msra.mxu0 %v5480_v26 }
0x55bb   :  { %5696 = vmatprep.subr.mxu0 %v5475_v55 }
0x55bc   :  { %5697 = vmatpush1.msra.mxu0 %v5474_v25 }
0x55bd   :  { %5698 = vmatprep.subr.mxu0 %v5469_v51 }
0x55be   :  { %5699 = vmatpush1.msra.mxu0 %v5468_v11 }
0x55bf   :  { %5700 = vmatprep.subr.mxu0 %v5463_v36 }
0x55c0   :  { %5701 = vmatpush1.msra.mxu0 %v5462_v61 }
0x55c1   :  { %5702 = vmatprep.subr.mxu0 %v5457_v37 }
0x55c2   :  { %5703 = vmatpush1.msra.mxu0 %v5456_v4 }
0x55c3   :  { %5704 = vmatprep.subr.mxu0 %v5451_v44 }
0x55c4   :  { %5705 = vmatpush1.msra.mxu0 %v5450_v41 }
0x55c5   :  { %5706 = vmatprep.subr.mxu0 %v5445_v10 }
0x55c6   :  { %5707 = vmatpush1.msra.mxu0 %v5444_v5 }
0x55c7   :  { %5708 = vmatprep.subr.mxu0 %v5439_v12 }
0x55c8   :  { %5709 = vmatpush1.msra.mxu0 %v5438_v60 }
0x55c9   :  { %5710 = vmatprep.subr.mxu0 %v5433_v18 }
0x55ca   :  { %5711 = vmatpush1.msra.mxu0 %v5432_v27  ;;  %v8785_v27 = vld [vmem:[%s15576_s2 + $0x38] sm:$0xff] }
0x55cb   :  { %5728 = vmatprep.subr.mxu0 %v5571_v32  ;;  %v8784_v32 = vld [vmem:[%s15576_s2 + $0x30] sm:$0xff] }
0x55cc   :  { %5729 = vmatpush2.msra.mxu0 %v5570_v54  ;;  %v8782_v54 = vld [vmem:[%s15576_s2 + $0x20] sm:$0xff] }
0x55cd   :  { %5730 = vmatprep.subr.mxu0 %v5565_v35 }
0x55ce   :  { %5731 = vmatpush2.msra.mxu0 %v5564_v30 }
0x55cf   :  { %5732 = vmatprep.subr.mxu0 %v5559_v38 }
0x55d0   :  { %5733 = vmatpush2.msra.mxu0 %v5558_v52 }
0x55d1   :  { %5734 = vmatprep.subr.mxu0 %v5553_v13  ;;  %v5587_v13 = vrot.slane %v13841_v17, %v15640_v9 }
0x55d2   :  { %5735 = vmatpush2.msra.mxu0 %v5552_v39 }
0x55d3   :  { %5736 = vmatprep.subr.mxu0 %v5547_v40 }
0x55d4   :  { %5737 = vmatpush2.msra.mxu0 %v5546_v63 }
0x55d5   :  { %5738 = vmatprep.subr.mxu0 %v5541_v43 }
0x55d6   :  { %5739 = vmatpush2.msra.mxu0 %v5540_v31 }
0x55d7   :  { %5740 = vmatprep.subr.mxu0 %v5535_v56 }
0x55d8   :  { %5741 = vmatpush2.msra.mxu0 %v5534_v8 }
0x55d9   :  { %5742 = vmatprep.subr.mxu0 %v5529_v28 }
0x55da   :  { %5743 = vmatpush2.msra.mxu0 %v5528_v15 }
0x55db   :  { %5745 = vmatmul.mubr.f32.vlgmr.msra.gmra.mxu0 %v13694_v62  ;;  %9484 = vmatprep.subr.mxu0 %v15626_v50  ;;  %v5851_v62 = vld [vmem:[%s15576_s2 + $0x8] sm:$0xff] }
0x55dc   :  { %9492 = vmatprep.mubr.msk.f32.mxu0 %vm10007_vm4, %v15626_v50  ;;  %9485 = vmatpush3.msra.mxu0 %v5853_v34 }
0x55dd   :  { %9486 = vmatprep.subr.mxu0 %v15626_v50 }
0x55de   :  { %9487 = vmatpush3.msra.mxu0 %v5852_v53 }
0x55df   :  { %9488 = vmatprep.subr.mxu0 %v15626_v50 }
0x55e0   :  { %9489 = vmatpush3.msra.mxu0 %v5851_v62 }
0x55e1   :  { %9490 = vmatprep.subr.mxu0 %v15626_v50 }
0x55e2   :  { %9491 = vmatpush3.msra.mxu0 %v5850_v1 }
0x55e3   :  { %9495 = vmatprep.subr.mxu0 %v15626_v50 }
0x5629   :  { %v5847_v20 = vpop.permute.xlu0 %5846 }
0x562a   :  { %v5849_v6 = vmul.f32 %v13853_v59, %v5847_v20  ;;  %v5678_v59 = vadd.f32 %v5677_v58, %v5583_v42  ;;  %v8791_v42 = vld [vmem:[%s15576_s2 + $0x50] sm:$0xff]  ;;  %v8789_v58 = vld [vmem:[%s15576_s2 + $0x40] sm:$0xff] }
0x562c   :  { %5855 = vrot.lane.b32.xlu0 %v5849_v6, %s10006_s29 }
0x566b   :  { %v14045_v48 = vpop.f32.mrf.mxu0 }
0x566d   :  { %v9483_v49 = vpop.f32.mrf.mxu0 }
0x569b   :  { %v5746_v45 = vpop.f32.mrf.mxu0 }
0x569c   :  { %v5747_v39 = vadd.f32 %v5746_v45, %v5587_v13  ;;  %v8792_v45 = vld [vmem:[%s15576_s2 + $0x58] sm:$0xff]  ;;  %v8796_v13 = vld [vmem:[%s15576_s2 + $0x60] sm:$0xff] }
0x569d   :  { %v14055_v26 = vpop.f32.mrf.mxu0 }
0x569e   :  { %v14047_v57 = vpop.permute.xlu0 %5855 }
0x569f   :  { %9493 = vmatmul.mubr.msk.f32.vlgmr.msra.gmra.mxu0 %vm606_vm5, %v14047_v57 }
0x56a0   :  { %9503 = vmatprep.mubr.msk.f32.mxu0 %vm10007_vm4, %v15626_v50  ;;  %9496 = vmatpush3.msra.mxu0 %v8785_v27 }
0x56a1   :  { %9497 = vmatprep.subr.mxu0 %v15626_v50 }
0x56a2   :  { %9498 = vmatpush3.msra.mxu0 %v8784_v32 }
0x56a3   :  { %9499 = vmatprep.subr.mxu0 %v15626_v50 }
0x575f   :  { %v5925_v55 = vpop.f32.mrf.mxu0 }
0x5760   :  { %v5926_v25 = vadd.f32 %v5925_v55, %v5678_v59 }
0x5761   :  { %v9494_v51 = vpop.f32.mrf.mxu0 }
0x5762   :  { %v5929_v11 = vmul.f32 %v5926_v25, %v10224_v0 }
0x5764   :  { %v8780_v36 = vmul.f32 -1.442695, %v5929_v11  ;;  %v5591_v11 = vrot.slane %v13841_v17, %v15642_v21 }
0x5766   :  { %9879 = vpow2.f32 %v8780_v36  ;;  %v5749_v36 = vadd.f32 %v14055_v26, %v5591_v11  ;;  %v8806_v11 = vld [vmem:[%s15576_s2 + $0x98] sm:$0xff] }
0x5773   :  { %v9880_v61 = vpop.eup %9879 }
0x5774   :  { %v5933_v37 = vadd.f32 1.0, %v9880_v61 }
0x5776   :  { %9881 = vrcp.f32 %v5933_v37 }
0x5783   :  { %v9882_v4 = vpop.eup %9881 }
0x5784   :  { %v5936_v44 = vmul.f32 2.0, %v9882_v4  ;;  %v5938_v12 = vmul.f32 %v9882_v4, %v13382_v16  ;;  %v8783_v16 = vld [vmem:[%s15576_s2 + $0x28] sm:$0xff] }
0x5785   :  { %9500 = vmatpush3.msra.mxu0 %v8783_v16 }
0x5786   :  { %v8781_v41 = vadd.f32 -1.0, %v5936_v44  ;;  %9501 = vmatprep.subr.mxu0 %v15626_v50 }
0x5787   :  { %9502 = vmatpush3.msra.mxu0 %v8782_v54 }
0x5788   :  { %5940 = vrot.lane.b32.xlu1 %v8781_v41, %s10005_s28  ;;  %9506 = vmatprep.subr.mxu0 %v15626_v50 }
0x57fa   :  { %v5941_v10 = vpop.permute.xlu1 %5940 }
0x57fb   :  { %v5943_v5 = vmul.f32 %v9882_v4, %v5941_v10 }
0x57fd   :  { %5945 = vrot.lane.b32.xlu0 %v5943_v5, %s10006_s29 }
0x586f   :  { %v5946_v60 = vpop.permute.xlu0 %5945 }
0x5870   :  { %v14061_v18 = vadd.f32 %v5946_v60, %v5938_v12 }
0x5872   :  { %9883 = vtanh.f32 %v14061_v18 }
0x587f   :  { %v9884_v35 = vpop.eup %9883 }
0x5880   :  { %5951 = vrot.lane.b32.xlu1 %v9884_v35, %s10005_s28 }
0x58f2   :  { %v5952_v30 = vpop.permute.xlu1 %5951 }
0x58f3   :  { %v14081_v38 = vmul.f32 %v9882_v4, %v5952_v30  ;;  %v8799_v30 = vld [vmem:[%s15576_s2 + $0x78] sm:$0xff] }
0x58f5   :  { %5960 = vrot.lane.b32.xlu0 %v14081_v38, %s10006_s29 }
0x5967   :  { %v5961_v52 = vpop.permute.xlu0 %5960 }
0x5968   :  { %9504 = vmatmul.mubr.msk.f32.vlgmr.msra.gmra.mxu0 %vm606_vm5, %v5961_v52  ;;  %v8798_v52 = vld [vmem:[%s15576_s2 + $0x70] sm:$0xff] }
0x5969   :  { %9514 = vmatprep.mubr.msk.f32.mxu0 %vm10007_vm4, %v15626_v50  ;;  %9507 = vmatpush3.msra.mxu0 %v8792_v45 }
0x596a   :  { %9508 = vmatprep.subr.mxu0 %v15626_v50 }
0x596b   :  { %9509 = vmatpush3.msra.mxu0 %v8791_v42 }
0x596c   :  { %9510 = vmatprep.subr.mxu0 %v15626_v50 }
0x5a28   :  { %v6030_v40 = vpop.f32.mrf.mxu0 }
0x5a29   :  { %v6031_v63 = vadd.f32 %v6030_v40, %v5747_v39 }
0x5a2a   :  { %v9505_v43 = vpop.f32.mrf.mxu0 }
0x5a2b   :  { %v6034_v31 = vmul.f32 %v6031_v63, %v10224_v0 }
0x5a2d   :  { %v8787_v56 = vmul.f32 -1.442695, %v6034_v31  ;;  %v5595_v31 = vrot.slane %v13841_v17, %v10851_v46 }
0x5a2f   :  { %9885 = vpow2.f32 %v8787_v56  ;;  %v5817_v56 = vpop.f32.mrf.mxu1 }
0x5a3c   :  { %v9886_v8 = vpop.eup %9885 }
0x5a3d   :  { %v6038_v28 = vadd.f32 1.0, %v9886_v8  ;;  %v5818_v8 = vadd.f32 %v5817_v56, %v5595_v31  ;;  %v6571_v56 = vld [vmem:[%s15577_s3 + $0x2d8] sm:$0xff] }
0x5a3e   :  { %6659 = vmatprep.subr.mxu1 %v6571_v56  ;;  %v6594_v56 = vld [vmem:[%s15577_s3 + $0x390] sm:$0xff] }
0x5a3f   :  { %9887 = vrcp.f32 %v6038_v28 }
0x5a4c   :  { %v9888_v15 = vpop.eup %9887 }
0x5a4d   :  { %v6041_v34 = vmul.f32 2.0, %v9888_v15  ;;  %v6043_v20 = vmul.f32 %v9888_v15, %v13415_v29  ;;  %v8790_v29 = vld [vmem:[%s15576_s2 + $0x48] sm:$0xff] }
0x5a4e   :  { %9511 = vmatpush3.msra.mxu0 %v8790_v29 }
0x5a4f   :  { %v8788_v53 = vadd.f32 -1.0, %v6041_v34  ;;  %9512 = vmatprep.subr.mxu0 %v15626_v50 }
0x5a50   :  { %9513 = vmatpush3.msra.mxu0 %v8789_v58 }
0x5a51   :  { %6045 = vrot.lane.b32.xlu1 %v8788_v53, %s10005_s28  ;;  %9517 = vmatprep.subr.mxu0 %v15626_v50 }
0x5ac3   :  { %v6046_v62 = vpop.permute.xlu1 %6045 }
0x5ac4   :  { %v6048_v1 = vmul.f32 %v9888_v15, %v6046_v62 }
0x5ac6   :  { %6050 = vrot.lane.b32.xlu0 %v6048_v1, %s10006_s29 }
0x5b38   :  { %v6051_v6 = vpop.permute.xlu0 %6050 }
0x5b39   :  { %v14094_v49 = vadd.f32 %v6051_v6, %v6043_v20 }
0x5b3b   :  { %9889 = vtanh.f32 %v14094_v49 }
0x5b48   :  { %v9890_v59 = vpop.eup %9889 }
0x5b49   :  { %6056 = vrot.lane.b32.xlu1 %v9890_v59, %s10005_s28 }
0x5bbb   :  { %v6057_v55 = vpop.permute.xlu1 %6056 }
0x5bbc   :  { %v14114_v25 = vmul.f32 %v9888_v15, %v6057_v55 }
0x5bbe   :  { %6065 = vrot.lane.b32.xlu0 %v14114_v25, %s10006_s29 }
0x5c30   :  { %v6066_v51 = vpop.permute.xlu0 %6065 }
0x5c31   :  { %9515 = vmatmul.mubr.msk.f32.vlgmr.msra.gmra.mxu0 %vm606_vm5, %v6066_v51 }
0x5c32   :  { %9525 = vmatprep.mubr.msk.f32.mxu0 %vm10007_vm4, %v15626_v50  ;;  %9518 = vmatpush3.msra.mxu0 %v8799_v30 }
0x5c33   :  { %9519 = vmatprep.subr.mxu0 %v15626_v50 }
0x5c34   :  { %9520 = vmatpush3.msra.mxu0 %v8798_v52 }
0x5c35   :  { %9521 = vmatprep.subr.mxu0 %v15626_v50 }
0x5cf1   :  { %v6135_v61 = vpop.f32.mrf.mxu0 }
0x5cf2   :  { %v6136_v37 = vadd.f32 %v6135_v61, %v5749_v36  ;;  %v8805_v36 = vld [vmem:[%s15576_s2 + $0x90] sm:$0xff]  ;;  %v8803_v61 = vld [vmem:[%s15576_s2 + $0x80] sm:$0xff] }
0x5cf3   :  { %v9516_v4 = vpop.f32.mrf.mxu0 }
0x5cf4   :  { %v6139_v44 = vmul.f32 %v6136_v37, %v10224_v0 }
0x5cf6   :  { %v8794_v41 = vmul.f32 -1.442695, %v6139_v44 }
0x5cf8   :  { %9891 = vpow2.f32 %v8794_v41 }
0x5d05   :  { %v9892_v10 = vpop.eup %9891 }
0x5d06   :  { %v6143_v5 = vadd.f32 1.0, %v9892_v10  ;;  %v5599_v10 = vrot.slane %v13841_v17, %v10886_v33 }
0x5d08   :  { %9893 = vrcp.f32 %v6143_v5  ;;  %v5819_v5 = vpop.f32.mrf.mxu1 }
0x5d15   :  { %v9894_v12 = vpop.eup %9893 }
0x5d16   :  { %v6146_v60 = vmul.f32 2.0, %v9894_v12  ;;  %v6148_v26 = vmul.f32 %v9894_v12, %v13449_v47  ;;  %v8797_v47 = vld [vmem:[%s15576_s2 + $0x68] sm:$0xff] }
0x5d17   :  { %9522 = vmatpush3.msra.mxu0 %v8797_v47 }
0x5d18   :  { %v8795_v27 = vadd.f32 -1.0, %v6146_v60  ;;  %9523 = vmatprep.subr.mxu0 %v15626_v50 }
0x5d19   :  { %9524 = vmatpush3.msra.mxu0 %v8796_v13 }
0x5d1a   :  { %6150 = vrot.lane.b32.xlu1 %v8795_v27, %s10005_s28  ;;  %9528 = vmatprep.subr.mxu0 %v15626_v50 }
0x5d8c   :  { %v6151_v32 = vpop.permute.xlu1 %6150 }
0x5d8d   :  { %v6153_v16 = vmul.f32 %v9894_v12, %v6151_v32 }
0x5d8f   :  { %6155 = vrot.lane.b32.xlu0 %v6153_v16, %s10006_s29 }
0x5e01   :  { %v6156_v54 = vpop.permute.xlu0 %6155 }
0x5e02   :  { %v14128_v35 = vadd.f32 %v6156_v54, %v6148_v26 }
0x5e04   :  { %9895 = vtanh.f32 %v14128_v35 }
0x5e11   :  { %v9896_v39 = vpop.eup %9895 }
0x5e12   :  { %6161 = vrot.lane.b32.xlu1 %v9896_v39, %s10005_s28 }
0x5e84   :  { %v6162_v40 = vpop.permute.xlu1 %6161 }
0x5e85   :  { %v14148_v63 = vmul.f32 %v9894_v12, %v6162_v40  ;;  %v5820_v12 = vadd.f32 %v5819_v5, %v5599_v10  ;;  %v6498_v10 = vld [vmem:[%s15577_s3 + $0x90] sm:$0xff]  ;;  %v6493_v5 = vld [vmem:[%s15577_s3 + $0x68] sm:$0xff] }
0x5e87   :  { %6170 = vrot.lane.b32.xlu0 %v14148_v63, %s10006_s29 }
0x5ef9   :  { %v6171_v43 = vpop.permute.xlu0 %6170 }
0x5efa   :  { %9526 = vmatmul.mubr.msk.f32.vlgmr.msra.gmra.mxu0 %vm606_vm5, %v6171_v43 }
0x5efb   :  { %9536 = vmatprep.mubr.msk.f32.mxu0 %vm10007_vm4, %v15626_v50  ;;  %9529 = vmatpush3.msra.mxu0 %v8806_v11  ;;  %v6522_v11 = vld [vmem:[%s15577_s3 + $0x150] sm:$0xff] }
0x5efc   :  { %9530 = vmatprep.subr.mxu0 %v15626_v50 }
0x5efd   :  { %9531 = vmatpush3.msra.mxu0 %v8805_v36  ;;  %v6516_v36 = vld [vmem:[%s15577_s3 + $0x120] sm:$0xff] }
0x5efe   :  { %9532 = vmatprep.subr.mxu0 %v15626_v50 }
0x5fba   :  { %v6240_v28 = vpop.f32.mrf.mxu0 }
0x5fbb   :  { %v6241_v15 = vadd.f32 %v6240_v28, %v5818_v8  ;;  %v6570_v8 = vld [vmem:[%s15577_s3 + $0x2d0] sm:$0xff]  ;;  %v6559_v28 = vld [vmem:[%s15577_s3 + $0x278] sm:$0xff] }
0x5fbc   :  { %v9527_v34 = vpop.f32.mrf.mxu0  ;;  %6660 = vmatpush1.msra.mxu1 %v6570_v8  ;;  %v6589_v8 = vld [vmem:[%s15577_s3 + $0x368] sm:$0xff] }
0x5fbd   :  { %v6244_v53 = vmul.f32 %v6241_v15, %v10224_v0  ;;  %v6558_v15 = vld [vmem:[%s15577_s3 + $0x270] sm:$0xff]  ;;  %v6553_v34 = vld [vmem:[%s15577_s3 + $0x248] sm:$0xff] }
0x5fbf   :  { %v8801_v62 = vmul.f32 -1.442695, %v6244_v53  ;;  %v6552_v53 = vld [vmem:[%s15577_s3 + $0x240] sm:$0xff] }
0x5fc1   :  { %9897 = vpow2.f32 %v8801_v62  ;;  %v6547_v62 = vld [vmem:[%s15577_s3 + $0x218] sm:$0xff] }
0x5fce   :  { %v9898_v1 = vpop.eup %9897 }
0x5fcf   :  { %v6248_v20 = vadd.f32 1.0, %v9898_v1  ;;  %v6546_v1 = vld [vmem:[%s15577_s3 + $0x210] sm:$0xff] }
0x5fd1   :  { %9899 = vrcp.f32 %v6248_v20 }
0x5fde   :  { %v9900_v6 = vpop.eup %9899 }
0x5fdf   :  { %v6251_v45 = vmul.f32 2.0, %v9900_v6  ;;  %v6253_v59 = vmul.f32 %v9900_v6, %v13482_v3  ;;  %v8804_v3 = vld [vmem:[%s15576_s2 + $0x88] sm:$0xff] }
0x5fe0   :  { %9533 = vmatpush3.msra.mxu0 %v8804_v3  ;;  %v6511_v3 = vld [vmem:[%s15577_s3 + $0xf8] sm:$0xff] }
0x5fe1   :  { %v8802_v42 = vadd.f32 -1.0, %v6251_v45  ;;  %9534 = vmatprep.subr.mxu0 %v15626_v50  ;;  %v6540_v45 = vld [vmem:[%s15577_s3 + $0x1e0] sm:$0xff] }
0x5fe2   :  { %9535 = vmatpush3.msra.mxu0 %v8803_v61  ;;  %v6510_v61 = vld [vmem:[%s15577_s3 + $0xf0] sm:$0xff] }
0x5fe3   :  { %6255 = vrot.lane.b32.xlu1 %v8802_v42, %s10005_s28  ;;  %9539 = vmatprep.subr.mxu0 %v15626_v50  ;;  %v6535_v42 = vld [vmem:[%s15577_s3 + $0x1b8] sm:$0xff] }
0x6055   :  { %v6256_v29 = vpop.permute.xlu1 %6255 }
0x6056   :  { %v6258_v58 = vmul.f32 %v9900_v6, %v6256_v29  ;;  %v6534_v29 = vld [vmem:[%s15577_s3 + $0x1b0] sm:$0xff] }
0x6058   :  { %6260 = vrot.lane.b32.xlu0 %v6258_v58, %s10006_s29  ;;  %v6529_v58 = vld [vmem:[%s15577_s3 + $0x188] sm:$0xff] }
0x60ca   :  { %v6261_v55 = vpop.permute.xlu0 %6260 }
0x60cb   :  { %v14161_v51 = vadd.f32 %v6261_v55, %v6253_v59  ;;  %v6528_v59 = vld [vmem:[%s15577_s3 + $0x180] sm:$0xff]  ;;  %v6523_v55 = vld [vmem:[%s15577_s3 + $0x158] sm:$0xff] }
0x60cd   :  { %9901 = vtanh.f32 %v14161_v51 }
0x60da   :  { %v9902_v37 = vpop.eup %9901 }
0x60db   :  { %6266 = vrot.lane.b32.xlu1 %v9902_v37, %s10005_s28  ;;  %v6505_v37 = vld [vmem:[%s15577_s3 + $0xc8] sm:$0xff] }
0x614d   :  { %v6267_v4 = vpop.permute.xlu1 %6266 }
0x614e   :  { %v6269_v44 = vmul.f32 %v9900_v6, %v6267_v4  ;;  %v6541_v6 = vld [vmem:[%s15577_s3 + $0x1e8] sm:$0xff]  ;;  %v6504_v4 = vld [vmem:[%s15577_s3 + $0xc0] sm:$0xff] }
0x6150   :  { %6275 = vrot.lane.b32.xlu0 %v6269_v44, %s10006_s29  ;;  %v6499_v44 = vld [vmem:[%s15577_s3 + $0x98] sm:$0xff] }
0x61c2   :  { %v14182_v41 = vpop.permute.xlu0 %6275 }
0x61c3   :  { %9537 = vmatmul.mubr.msk.f32.vlgmr.msra.gmra.mxu0 %vm606_vm5, %v14182_v41 }
0x61c4   :  { %9547 = vmatprep.mubr.msk.f32.mxu0 %vm10007_vm4, %v15626_v50 }
0x6283   :  { %v6345_v60 = vpop.f32.mrf.mxu0 }
0x6284   :  { %v6346_v27 = vadd.f32 %v6345_v60, %v5820_v12  ;;  %v6492_v12 = vld [vmem:[%s15577_s3 + $0x60] sm:$0xff]  ;;  %v6487_v60 = vld [vmem:[%s15577_s3 + $0x38] sm:$0xff] }
0x6285   :  { %v9538_v32 = vpop.f32.mrf.mxu0 }
0x6286   :  { %v6349_v16 = vmul.f32 %v6346_v27, %v10224_v0  ;;  %v6486_v27 = vld [vmem:[%s15577_s3 + $0x30] sm:$0xff]  ;;  %v6481_v32 = vld [vmem:[%s15577_s3 + $0x8] sm:$0xff] }
0x6288   :  { %v8808_v26 = vmul.f32 -1.442695, %v6349_v16  ;;  %v6480_v16 = vld [vmem:[%s15577_s3] sm:$0xff] }
0x628a   :  { %9903 = vpow2.f32 %v8808_v26  ;;  %v6619_v26 = vld [vmem:[%s15577_s3 + $0x458] sm:$0xff] }
0x6297   :  { %v9904_v54 = vpop.eup %9903 }
0x6298   :  { %v6353_v30 = vadd.f32 1.0, %v9904_v54  ;;  %v6618_v54 = vld [vmem:[%s15577_s3 + $0x450] sm:$0xff] }
0x629a   :  { %9905 = vrcp.f32 %v6353_v30  ;;  %v6613_v30 = vld [vmem:[%s15577_s3 + $0x428] sm:$0xff] }
0x62a7   :  { %v14191_v52 = vpop.eup %9905 }
0x62a8   :  { %v6356_v47 = vmul.f32 2.0, %v14191_v52  ;;  %v6358_v40 = vmul.f32 %v14191_v52, %v13522_v22  ;;  %v6564_v22 = vld [vmem:[%s15577_s3 + $0x2a0] sm:$0xff] }
0x62aa   :  { %v8809_v13 = vadd.f32 -1.0, %v6356_v47  ;;  %v6612_v47 = vld [vmem:[%s15577_s3 + $0x420] sm:$0xff] }
0x62ac   :  { %6360 = vrot.lane.b32.xlu1 %v8809_v13, %s10005_s28  ;;  %v6607_v13 = vld [vmem:[%s15577_s3 + $0x3f8] sm:$0xff] }
0x631e   :  { %v6361_v17 = vpop.permute.xlu1 %6360 }
0x631f   :  { %v6363_v39 = vmul.f32 %v14191_v52, %v6361_v17  ;;  %v6606_v17 = vld [vmem:[%s15577_s3 + $0x3f0] sm:$0xff] }
0x6321   :  { %6365 = vrot.lane.b32.xlu0 %v6363_v39, %s10006_s29  ;;  %v6601_v39 = vld [vmem:[%s15577_s3 + $0x3c8] sm:$0xff] }
0x6325   :  { %6466 = vrot.lane.b32.xlu0 %v14081_v38, %s10005_s28  ;;  %v6565_v38 = vld [vmem:[%s15577_s3 + $0x2a8] sm:$0xff] }
0x6326   :  { %6661 = vmatprep.subr.mxu1 %v6565_v38  ;;  %v6588_v38 = vld [vmem:[%s15577_s3 + $0x360] sm:$0xff] }
0x6327   :  { %6662 = vmatpush1.msra.mxu1 %v6564_v22  ;;  %v6583_v22 = vld [vmem:[%s15577_s3 + $0x338] sm:$0xff] }
0x6328   :  { %6663 = vmatprep.subr.mxu1 %v6559_v28  ;;  %v6582_v28 = vld [vmem:[%s15577_s3 + $0x330] sm:$0xff] }
0x6329   :  { %6664 = vmatpush1.msra.mxu1 %v6558_v15  ;;  %v6577_v15 = vld [vmem:[%s15577_s3 + $0x308] sm:$0xff] }
0x632a   :  { %6665 = vmatprep.subr.mxu1 %v6553_v34  ;;  %v6576_v34 = vld [vmem:[%s15577_s3 + $0x300] sm:$0xff] }
0x632b   :  { %6666 = vmatpush1.msra.mxu1 %v6552_v53  ;;  %v6575_v53 = vld [vmem:[%s15577_s3 + $0x2f8] sm:$0xff] }
0x632c   :  { %6667 = vmatprep.subr.mxu1 %v6547_v62 }
0x632d   :  { %6668 = vmatpush1.msra.mxu1 %v6546_v1 }
0x632e   :  { %6669 = vmatprep.subr.mxu1 %v6541_v6 }
0x632f   :  { %6670 = vmatpush1.msra.mxu1 %v6540_v45 }
0x6330   :  { %6671 = vmatprep.subr.mxu1 %v6535_v42 }
0x6331   :  { %6672 = vmatpush1.msra.mxu1 %v6534_v29 }
0x6332   :  { %6673 = vmatprep.subr.mxu1 %v6529_v58 }
0x6333   :  { %6674 = vmatpush1.msra.mxu1 %v6528_v59 }
0x6334   :  { %6675 = vmatprep.subr.mxu1 %v6523_v55  ;;  %v6563_v55 = vld [vmem:[%s15577_s3 + $0x298] sm:$0xff] }
0x6335   :  { %6676 = vmatpush1.msra.mxu1 %v6522_v11  ;;  %v6557_v11 = vld [vmem:[%s15577_s3 + $0x268] sm:$0xff] }
0x6393   :  { %v6366_v43 = vpop.permute.xlu0 %6365 }
0x6394   :  { %v14201_v31 = vadd.f32 %v6366_v43, %v6358_v40  ;;  %v6600_v40 = vld [vmem:[%s15577_s3 + $0x3c0] sm:$0xff]  ;;  %v6595_v43 = vld [vmem:[%s15577_s3 + $0x398] sm:$0xff] }
0x6396   :  { %9907 = vtanh.f32 %v14201_v31 }
0x63a3   :  { %v9908_v20 = vpop.eup %9907 }
0x63a4   :  { %6371 = vrot.lane.b32.xlu1 %v9908_v20, %s10005_s28  ;;  %v6467_v20 = vpop.permute.xlu0 %6466 }
0x63a5   :  { %v6476_v45 = vsel %vm606_vm5, %v14047_v57, %v6467_v20  ;;  %v6569_v57 = vld [vmem:[%s15577_s3 + $0x2c8] sm:$0xff]  ;;  %v6604_v20 = vld [vmem:[%s15577_s3 + $0x3e0] sm:$0xff] }
0x63a8   :  { %6469 = vrot.lane.b32.xlu1 %v14114_v25, %s10008_s18  ;;  %v6517_v25 = vld [vmem:[%s15577_s3 + $0x128] sm:$0xff] }
0x63a9   :  { %6677 = vmatprep.subr.mxu1 %v6517_v25  ;;  %v6556_v25 = vld [vmem:[%s15577_s3 + $0x260] sm:$0xff] }
0x63aa   :  { %6678 = vmatpush1.msra.mxu1 %v6516_v36  ;;  %v6551_v36 = vld [vmem:[%s15577_s3 + $0x238] sm:$0xff] }
0x63ab   :  { %6679 = vmatprep.subr.mxu1 %v6511_v3  ;;  %v6550_v3 = vld [vmem:[%s15577_s3 + $0x230] sm:$0xff] }
0x63ac   :  { %6680 = vmatpush1.msra.mxu1 %v6510_v61  ;;  %v6545_v61 = vld [vmem:[%s15577_s3 + $0x208] sm:$0xff] }
0x63ad   :  { %6681 = vmatprep.subr.mxu1 %v6505_v37  ;;  %v6544_v37 = vld [vmem:[%s15577_s3 + $0x200] sm:$0xff] }
0x63ae   :  { %6682 = vmatpush1.msra.mxu1 %v6504_v4  ;;  %v6539_v4 = vld [vmem:[%s15577_s3 + $0x1d8] sm:$0xff] }
0x63af   :  { %6683 = vmatprep.subr.mxu1 %v6499_v44  ;;  %v6538_v44 = vld [vmem:[%s15577_s3 + $0x1d0] sm:$0xff] }
0x63b0   :  { %6684 = vmatpush1.msra.mxu1 %v6498_v10  ;;  %v6533_v10 = vld [vmem:[%s15577_s3 + $0x1a8] sm:$0xff] }
0x63b1   :  { %6685 = vmatprep.subr.mxu1 %v6493_v5  ;;  %v6532_v5 = vld [vmem:[%s15577_s3 + $0x1a0] sm:$0xff] }
0x63b2   :  { %6686 = vmatpush1.msra.mxu1 %v6492_v12  ;;  %v6527_v12 = vld [vmem:[%s15577_s3 + $0x178] sm:$0xff] }
0x63b3   :  { %6687 = vmatprep.subr.mxu1 %v6487_v60  ;;  %v6526_v60 = vld [vmem:[%s15577_s3 + $0x170] sm:$0xff] }
0x63b4   :  { %6688 = vmatpush1.msra.mxu1 %v6486_v27  ;;  %v6521_v27 = vld [vmem:[%s15577_s3 + $0x148] sm:$0xff] }
0x63b5   :  { %6689 = vmatprep.subr.mxu1 %v6481_v32  ;;  %v6520_v32 = vld [vmem:[%s15577_s3 + $0x140] sm:$0xff] }
0x63b6   :  { %6690 = vmatpush1.msra.mxu1 %v6480_v16  ;;  %v6515_v16 = vld [vmem:[%s15577_s3 + $0x118] sm:$0xff] }
0x63b7   :  { %6707 = vmatprep.subr.mxu1 %v6619_v26  ;;  %v6514_v26 = vld [vmem:[%s15577_s3 + $0x110] sm:$0xff] }
0x63b8   :  { %6708 = vmatpush2.msra.mxu1 %v6618_v54  ;;  %v6509_v54 = vld [vmem:[%s15577_s3 + $0xe8] sm:$0xff] }
0x63b9   :  { %6709 = vmatprep.subr.mxu1 %v6613_v30  ;;  %v6508_v30 = vld [vmem:[%s15577_s3 + $0xe0] sm:$0xff] }
0x63ba   :  { %6710 = vmatpush2.msra.mxu1 %v6612_v47  ;;  %v6503_v47 = vld [vmem:[%s15577_s3 + $0xb8] sm:$0xff] }
0x63bb   :  { %6711 = vmatprep.subr.mxu1 %v6607_v13  ;;  %v6502_v13 = vld [vmem:[%s15577_s3 + $0xb0] sm:$0xff] }
0x63bc   :  { %6712 = vmatpush2.msra.mxu1 %v6606_v17  ;;  %v6497_v17 = vld [vmem:[%s15577_s3 + $0x88] sm:$0xff] }
0x63bd   :  { %6713 = vmatprep.subr.mxu1 %v6601_v39  ;;  %v6496_v39 = vld [vmem:[%s15577_s3 + $0x80] sm:$0xff] }
0x63be   :  { %6714 = vmatpush2.msra.mxu1 %v6600_v40  ;;  %v6491_v40 = vld [vmem:[%s15577_s3 + $0x58] sm:$0xff] }
0x63bf   :  { %6715 = vmatprep.subr.mxu1 %v6595_v43  ;;  %v6490_v43 = vld [vmem:[%s15577_s3 + $0x50] sm:$0xff] }
0x63c0   :  { %6716 = vmatpush2.msra.mxu1 %v6594_v56  ;;  %v6485_v56 = vld [vmem:[%s15577_s3 + $0x28] sm:$0xff] }
0x63c1   :  { %6717 = vmatprep.subr.mxu1 %v6589_v8  ;;  %v6484_v8 = vld [vmem:[%s15577_s3 + $0x20] sm:$0xff] }
0x63c2   :  { %6718 = vmatpush2.msra.mxu1 %v6588_v38  ;;  %v6623_v38 = vld [vmem:[%s15577_s3 + $0x478] sm:$0xff] }
0x63c3   :  { %6719 = vmatprep.subr.mxu1 %v6583_v22  ;;  %v6622_v22 = vld [vmem:[%s15577_s3 + $0x470] sm:$0xff] }
0x63c4   :  { %6720 = vmatpush2.msra.mxu1 %v6582_v28  ;;  %v6617_v28 = vld [vmem:[%s15577_s3 + $0x448] sm:$0xff] }
0x63c5   :  { %6721 = vmatprep.subr.mxu1 %v6577_v15  ;;  %v6616_v15 = vld [vmem:[%s15577_s3 + $0x440] sm:$0xff] }
0x63c6   :  { %6722 = vmatpush2.msra.mxu1 %v6576_v34  ;;  %v6611_v34 = vld [vmem:[%s15577_s3 + $0x418] sm:$0xff] }
0x63c7   :  { %6801 = vmatprep.subr.mxu1 %v6575_v53  ;;  %v6610_v53 = vld [vmem:[%s15577_s3 + $0x410] sm:$0xff] }
0x6416   :  { %v6372_v62 = vpop.permute.xlu1 %6371 }
0x6417   :  { %v14355_v1 = vmul.f32 %v14191_v52, %v6372_v62  ;;  %v6574_v52 = vld [vmem:[%s15577_s3 + $0x2f0] sm:$0xff]  ;;  %v6605_v62 = vld [vmem:[%s15577_s3 + $0x3e8] sm:$0xff] }
0x6419   :  { %6473 = vrot.lane.b32.xlu0 %v14355_v1, %s10005_s28 }
0x641a   :  { %v6470_v6 = vpop.permute.xlu1 %6469 }
0x641b   :  { %v6477_v42 = vsel %vm354_vm6, %v6476_v45, %v6470_v6  ;;  %v6599_v6 = vld [vmem:[%s15577_s3 + $0x3b8] sm:$0xff]  ;;  %v6598_v45 = vld [vmem:[%s15577_s3 + $0x3b0] sm:$0xff] }
0x641c   :  { %v14373_v59 = vsel %vm1227_vm7, %v6477_v42, %v14148_v63  ;;  %v6562_v63 = vld [vmem:[%s15577_s3 + $0x290] sm:$0xff]  ;;  %v6593_v42 = vld [vmem:[%s15577_s3 + $0x388] sm:$0xff] }
0x648b   :  { %v6474_v29 = vpop.permute.xlu0 %6473 }
0x648c   :  { %v14364_v58 = vsel %vm606_vm5, %v14182_v41, %v6474_v29  ;;  %v6568_v41 = vld [vmem:[%s15577_s3 + $0x2c0] sm:$0xff] }
0x648d   :  { %8812 = vmatprep.mubr.msk.f32.mxu1 %vm354_vm6, %v14364_v58  ;;  %v6592_v29 = vld [vmem:[%s15577_s3 + $0x380] sm:$0xff] }
0x648e   :  { %6724 = vmatmul.mubr.f32.vlgmr.msra.gmra.mxu1 %v14373_v59 }
0x648f   :  { %6802 = vmatpush1.msra.mxu1 %v6574_v52  ;;  %8814 = vmatprep.mubr.msk.f32.mxu1 %vm354_vm6, %v14364_v58  ;;  %v6587_v52 = vld [vmem:[%s15577_s3 + $0x358] sm:$0xff] }
0x6490   :  { %6803 = vmatprep.subr.mxu1 %v6569_v57  ;;  %v6586_v57 = vld [vmem:[%s15577_s3 + $0x350] sm:$0xff] }
0x6491   :  { %6804 = vmatpush1.msra.mxu1 %v6568_v41  ;;  %v6581_v41 = vld [vmem:[%s15577_s3 + $0x328] sm:$0xff] }
0x6492   :  { %6805 = vmatprep.subr.mxu1 %v6563_v55  ;;  %v6580_v55 = vld [vmem:[%s15577_s3 + $0x320] sm:$0xff] }
0x6493   :  { %6806 = vmatpush1.msra.mxu1 %v6562_v63  ;;  %v14520_v63 = vld [vmem:[%s15578_s4] sm:$0x3f] }
0x6494   :  { %6807 = vmatprep.subr.mxu1 %v6557_v11  ;;  %v6629_v11 = vrot.slane %v14520_v63, %v15635_v2 }
0x6495   :  { %6808 = vmatpush1.msra.mxu1 %v6556_v25 }
0x6496   :  { %6809 = vmatprep.subr.mxu1 %v6551_v36 }
0x6497   :  { %6810 = vmatpush1.msra.mxu1 %v6550_v3  ;;  %v15648_v3 = vld [vmem:[#allocation14_spill] sm:$0xff] }
0x6498   :  { %6811 = vmatprep.subr.mxu1 %v6545_v61 }
0x6499   :  { %6812 = vmatpush1.msra.mxu1 %v6544_v37 }
0x649a   :  { %6813 = vmatprep.subr.mxu1 %v6539_v4 }
0x649b   :  { %6814 = vmatpush1.msra.mxu1 %v6538_v44 }
0x649c   :  { %6815 = vmatprep.subr.mxu1 %v6533_v10 }
0x649d   :  { %6816 = vmatpush1.msra.mxu1 %v6532_v5  ;;  %v6378_v5 = vld [vmem:[%s15579_s5 + $0x18] sm:$0xff] }
0x649e   :  { %6817 = vmatprep.subr.mxu1 %v6527_v12  ;;  %v6377_v12 = vld [vmem:[%s15579_s5 + $0x10] sm:$0xff]  ;;  %9540 = vmatpush3.msra.mxu0 %v6378_v5 }
0x649f   :  { %6818 = vmatpush1.msra.mxu1 %v6526_v60  ;;  %9541 = vmatprep.subr.mxu0 %v15626_v50  ;;  %v6482_v5 = vld [vmem:[%s15577_s3 + $0x10] sm:$0xff] }
0x64a0   :  { %6819 = vmatprep.subr.mxu1 %v6521_v27  ;;  %9542 = vmatpush3.msra.mxu0 %v6377_v12  ;;  %v6621_v12 = vld [vmem:[%s15577_s3 + $0x468] sm:$0xff] }
0x64a1   :  { %6820 = vmatpush1.msra.mxu1 %v6520_v32  ;;  %9543 = vmatprep.subr.mxu0 %v15626_v50 }
0x64a2   :  { %6821 = vmatprep.subr.mxu1 %v6515_v16  ;;  %v6376_v16 = vld [vmem:[%s15579_s5 + $0x8] sm:$0xff] }
0x64a3   :  { %6822 = vmatpush1.msra.mxu1 %v6514_v26  ;;  %9544 = vmatpush3.msra.mxu0 %v6376_v16  ;;  %v6375_v26 = vld [vmem:[%s15579_s5] sm:$0xff]  ;;  %v6614_v16 = vld [vmem:[%s15577_s3 + $0x430] sm:$0xff] }
0x64a4   :  { %6823 = vmatprep.subr.mxu1 %v6509_v54  ;;  %9545 = vmatprep.subr.mxu0 %v15626_v50  ;;  %v6573_v54 = vld [vmem:[%s15577_s3 + $0x2e8] sm:$0xff] }
0x64a5   :  { %6824 = vmatpush1.msra.mxu1 %v6508_v30  ;;  %9546 = vmatpush3.msra.mxu0 %v6375_v26  ;;  %v6609_v26 = vld [vmem:[%s15577_s3 + $0x408] sm:$0xff] }
0x64a6   :  { %6825 = vmatprep.subr.mxu1 %v6503_v47  ;;  %6730 = vmatprep.subr.mxu0 %v6573_v54  ;;  %v6608_v54 = vld [vmem:[%s15577_s3 + $0x400] sm:$0xff] }
0x64a7   :  { %6826 = vmatpush1.msra.mxu1 %v6502_v13 }
0x64a8   :  { %6827 = vmatprep.subr.mxu1 %v6497_v17 }
0x64a9   :  { %6828 = vmatpush1.msra.mxu1 %v6496_v39 }
0x64aa   :  { %6829 = vmatprep.subr.mxu1 %v6491_v40  ;;  %v6572_v40 = vld [vmem:[%s15577_s3 + $0x2e0] sm:$0xff] }
0x64ab   :  { %6830 = vmatpush1.msra.mxu1 %v6490_v43 }
0x64ac   :  { %6831 = vmatprep.subr.mxu1 %v6485_v56  ;;  %v6567_v56 = vld [vmem:[%s15577_s3 + $0x2b8] sm:$0xff] }
0x64ad   :  { %6832 = vmatpush1.msra.mxu1 %v6484_v8  ;;  %v6560_v8 = vld [vmem:[%s15577_s3 + $0x280] sm:$0xff] }
0x64ae   :  { %6849 = vmatprep.subr.mxu1 %v6623_v38  ;;  %v6555_v38 = vld [vmem:[%s15577_s3 + $0x258] sm:$0xff] }
0x64af   :  { %6850 = vmatpush2.msra.mxu1 %v6622_v22  ;;  %v6554_v22 = vld [vmem:[%s15577_s3 + $0x250] sm:$0xff] }
0x64b0   :  { %6851 = vmatprep.subr.mxu1 %v6617_v28  ;;  %v6548_v28 = vld [vmem:[%s15577_s3 + $0x220] sm:$0xff] }
0x64b1   :  { %6852 = vmatpush2.msra.mxu1 %v6616_v15  ;;  %v6543_v15 = vld [vmem:[%s15577_s3 + $0x1f8] sm:$0xff] }
0x64b2   :  { %6853 = vmatprep.subr.mxu1 %v6611_v34  ;;  %v6542_v34 = vld [vmem:[%s15577_s3 + $0x1f0] sm:$0xff] }
0x64b3   :  { %6854 = vmatpush2.msra.mxu1 %v6610_v53  ;;  %v6537_v53 = vld [vmem:[%s15577_s3 + $0x1c8] sm:$0xff] }
0x64b4   :  { %6855 = vmatprep.subr.mxu1 %v6605_v62  ;;  %v6536_v62 = vld [vmem:[%s15577_s3 + $0x1c0] sm:$0xff] }
0x64b5   :  { %6856 = vmatpush2.msra.mxu1 %v6604_v20 }
0x64b6   :  { %6857 = vmatprep.subr.mxu1 %v6599_v6  ;;  %v6531_v6 = vld [vmem:[%s15577_s3 + $0x198] sm:$0xff] }
0x64b7   :  { %6858 = vmatpush2.msra.mxu1 %v6598_v45  ;;  %v6530_v45 = vld [vmem:[%s15577_s3 + $0x190] sm:$0xff] }
0x64b8   :  { %6859 = vmatprep.subr.mxu1 %v6593_v42  ;;  %v6525_v42 = vld [vmem:[%s15577_s3 + $0x168] sm:$0xff] }
0x64b9   :  { %6860 = vmatpush2.msra.mxu1 %v6592_v29  ;;  %v6524_v29 = vld [vmem:[%s15577_s3 + $0x160] sm:$0xff] }
0x64ba   :  { %6861 = vmatprep.subr.mxu1 %v6587_v52  ;;  %v6519_v52 = vld [vmem:[%s15577_s3 + $0x138] sm:$0xff] }
0x64bb   :  { %6862 = vmatpush2.msra.mxu1 %v6586_v57  ;;  %v6518_v57 = vld [vmem:[%s15577_s3 + $0x130] sm:$0xff] }
0x64bc   :  { %6863 = vmatprep.subr.mxu1 %v6581_v41  ;;  %v6513_v41 = vld [vmem:[%s15577_s3 + $0x108] sm:$0xff] }
0x64bd   :  { %6864 = vmatpush2.msra.mxu1 %v6580_v55  ;;  %v6512_v55 = vld [vmem:[%s15577_s3 + $0x100] sm:$0xff] }
0x64be   :  { %6866 = vmatmul.mubr.f32.vlgmr.msra.gmra.mxu1 %v14373_v59 }
0x654e   :  { %v6725_v25 = vpop.f32.mrf.mxu1 }
0x654f   :  { %v6726_v36 = vadd.f32 %v6725_v25, %v6629_v11  ;;  %v6507_v11 = vld [vmem:[%s15577_s3 + $0xd8] sm:$0xff]  ;;  %v6506_v25 = vld [vmem:[%s15577_s3 + $0xd0] sm:$0xff] }
0x6551   :  { %v6873_v61 = vadd.f32 %v6726_v36, %v15648_v3  ;;  %v6501_v36 = vld [vmem:[%s15577_s3 + $0xa8] sm:$0xff]  ;;  %v6500_v3 = vld [vmem:[%s15577_s3 + $0xa0] sm:$0xff] }
0x6553   :  { %v6874_v37 = vmul.f32 %v6873_v61, %v10224_v0  ;;  %v6495_v61 = vld [vmem:[%s15577_s3 + $0x78] sm:$0xff] }
0x6555   :  { %v8815_v4 = vmul.f32 -1.442695, %v6874_v37  ;;  %v6494_v37 = vld [vmem:[%s15577_s3 + $0x70] sm:$0xff] }
0x6557   :  { %9909 = vpow2.f32 %v8815_v4  ;;  %v6489_v4 = vld [vmem:[%s15577_s3 + $0x48] sm:$0xff] }
0x6564   :  { %v9910_v44 = vpop.eup %9909 }
0x6565   :  { %v6878_v10 = vadd.f32 1.0, %v9910_v44  ;;  %v6488_v44 = vld [vmem:[%s15577_s3 + $0x40] sm:$0xff] }
0x6567   :  { %9911 = vrcp.f32 %v6878_v10  ;;  %v6483_v10 = vld [vmem:[%s15577_s3 + $0x18] sm:$0xff] }
0x6574   :  { %v14532_v60 = vpop.eup %9911 }
0x6575   :  { %v6881_v27 = vmul.f32 2.0, %v14532_v60  ;;  %v6883_v13 = vmul.f32 %v14532_v60, %v13875_v7  ;;  %v6566_v7 = vld [vmem:[%s15577_s3 + $0x2b0] sm:$0xff] }
0x6577   :  { %v8816_v32 = vadd.f32 -1.0, %v6881_v27  ;;  %v6620_v27 = vld [vmem:[%s15577_s3 + $0x460] sm:$0xff] }
0x6579   :  { %6885 = vrot.lane.b32.xlu1 %v8816_v32, %s10005_s28  ;;  %v6615_v32 = vld [vmem:[%s15577_s3 + $0x438] sm:$0xff] }
0x65eb   :  { %v6886_v30 = vpop.permute.xlu1 %6885 }
0x65ec   :  { %v6888_v47 = vmul.f32 %v14532_v60, %v6886_v30  ;;  %v6603_v30 = vld [vmem:[%s15577_s3 + $0x3d8] sm:$0xff] }
0x65ee   :  { %6890 = vrot.lane.b32.xlu0 %v6888_v47, %s10006_s29  ;;  %v6602_v47 = vld [vmem:[%s15577_s3 + $0x3d0] sm:$0xff] }
0x65f2   :  { %6385 = vrot.lane.b32.xlu0 %v14355_v1, %s10006_s29  ;;  %v6561_v1 = vld [vmem:[%s15577_s3 + $0x288] sm:$0xff] }
0x6660   :  { %v6891_v17 = vpop.permute.xlu0 %6890 }
0x6661   :  { %v14554_v39 = vadd.f32 %v6891_v17, %v6883_v13  ;;  %v6597_v13 = vld [vmem:[%s15577_s3 + $0x3a8] sm:$0xff]  ;;  %v6596_v17 = vld [vmem:[%s15577_s3 + $0x3a0] sm:$0xff] }
0x6663   :  { %9913 = vtanh.f32 %v14554_v39 }
0x6664   :  { %v6386_v43 = vpop.permute.xlu0 %6385 }
0x6665   :  { %9548 = vmatmul.mubr.msk.f32.vlgmr.msra.gmra.mxu0 %vm606_vm5, %v6386_v43  ;;  %v6590_v43 = vld [vmem:[%s15577_s3 + $0x370] sm:$0xff] }
0x6666   :  { %6731 = vmatpush1.msra.mxu0 %v6572_v40  ;;  %8813 = vmatprep.mubr.msk.f32.mxu0 %vm354_vm6, %v14364_v58  ;;  %v6549_v58 = vld [vmem:[%s15577_s3 + $0x228] sm:$0xff]  ;;  %v6591_v40 = vld [vmem:[%s15577_s3 + $0x378] sm:$0xff] }
0x6667   :  { %6732 = vmatprep.subr.mxu0 %v6567_v56  ;;  %v6585_v56 = vld [vmem:[%s15577_s3 + $0x348] sm:$0xff] }
0x6668   :  { %6733 = vmatpush1.msra.mxu0 %v6566_v7  ;;  %v6584_v7 = vld [vmem:[%s15577_s3 + $0x340] sm:$0xff] }
0x6669   :  { %6734 = vmatprep.subr.mxu0 %v6561_v1  ;;  %v6579_v1 = vld [vmem:[%s15577_s3 + $0x318] sm:$0xff] }
0x666a   :  { %6735 = vmatpush1.msra.mxu0 %v6560_v8  ;;  %v6578_v8 = vld [vmem:[%s15577_s3 + $0x310] sm:$0xff] }
0x666b   :  { %6736 = vmatprep.subr.mxu0 %v6555_v38  ;;  %v6903_v38 = vld [vmem:[%s15576_s2 + $0x18] sm:$0xff] }
0x666c   :  { %6737 = vmatpush1.msra.mxu0 %v6554_v22  ;;  %v6902_v22 = vld [vmem:[%s15576_s2 + $0x10] sm:$0xff] }
0x666d   :  { %6738 = vmatprep.subr.mxu0 %v6549_v58  ;;  %v6900_v58 = vld [vmem:[%s15576_s2] sm:$0xff] }
0x666e   :  { %6739 = vmatpush1.msra.mxu0 %v6548_v28 }
0x666f   :  { %6740 = vmatprep.subr.mxu0 %v6543_v15 }
0x6670   :  { %v9914_v20 = vpop.eup %9913  ;;  %6741 = vmatpush1.msra.mxu0 %v6542_v34 }
0x6671   :  { %6742 = vmatprep.subr.mxu0 %v6537_v53  ;;  %6896 = vrot.lane.b32.xlu1 %v9914_v20, %s10005_s28 }
0x6672   :  { %6743 = vmatpush1.msra.mxu0 %v6536_v62 }
0x6673   :  { %6744 = vmatprep.subr.mxu0 %v6531_v6  ;;  %v6633_v6 = vrot.slane %v14520_v63, %v15638_v19 }
0x6674   :  { %6745 = vmatpush1.msra.mxu0 %v6530_v45  ;;  %v6727_v45 = vpop.f32.mrf.mxu1 }
0x6675   :  { %6746 = vmatprep.subr.mxu0 %v6525_v42 }
0x6676   :  { %6747 = vmatpush1.msra.mxu0 %v6524_v29 }
0x6677   :  { %6748 = vmatprep.subr.mxu0 %v6519_v52 }
0x6678   :  { %6749 = vmatpush1.msra.mxu0 %v6518_v57 }
0x6679   :  { %6750 = vmatprep.subr.mxu0 %v6513_v41 }
0x667a   :  { %6751 = vmatpush1.msra.mxu0 %v6512_v55 }
0x667b   :  { %6752 = vmatprep.subr.mxu0 %v6507_v11 }
0x667c   :  { %6753 = vmatpush1.msra.mxu0 %v6506_v25 }
0x667d   :  { %6754 = vmatprep.subr.mxu0 %v6501_v36 }
0x667e   :  { %6755 = vmatpush1.msra.mxu0 %v6500_v3 }
0x667f   :  { %6756 = vmatprep.subr.mxu0 %v6495_v61 }
0x6680   :  { %6757 = vmatpush1.msra.mxu0 %v6494_v37 }
0x6681   :  { %6758 = vmatprep.subr.mxu0 %v6489_v4 }
0x6682   :  { %6759 = vmatpush1.msra.mxu0 %v6488_v44 }
0x6683   :  { %6760 = vmatprep.subr.mxu0 %v6483_v10 }
0x6684   :  { %6761 = vmatpush1.msra.mxu0 %v6482_v5 }
0x6685   :  { %6778 = vmatprep.subr.mxu0 %v6621_v12  ;;  %v8823_v12 = vld [vmem:[%s15576_s2 + $0x38] sm:$0xff] }
0x6686   :  { %6779 = vmatpush2.msra.mxu0 %v6620_v27  ;;  %v8822_v27 = vld [vmem:[%s15576_s2 + $0x30] sm:$0xff] }
0x6687   :  { %6780 = vmatprep.subr.mxu0 %v6615_v32  ;;  %v8820_v32 = vld [vmem:[%s15576_s2 + $0x20] sm:$0xff] }
0x6688   :  { %6781 = vmatpush2.msra.mxu0 %v6614_v16 }
0x6689   :  { %6782 = vmatprep.subr.mxu0 %v6609_v26 }
0x668a   :  { %6783 = vmatpush2.msra.mxu0 %v6608_v54 }
0x668b   :  { %6784 = vmatprep.subr.mxu0 %v6603_v30 }
0x668c   :  { %6785 = vmatpush2.msra.mxu0 %v6602_v47  ;;  %v6637_v47 = vrot.slane %v14520_v63, %v15640_v9 }
0x668d   :  { %6786 = vmatprep.subr.mxu0 %v6597_v13 }
0x668e   :  { %6787 = vmatpush2.msra.mxu0 %v6596_v17 }
0x668f   :  { %6788 = vmatprep.subr.mxu0 %v6591_v40 }
0x6690   :  { %6789 = vmatpush2.msra.mxu0 %v6590_v43 }
0x6691   :  { %6790 = vmatprep.subr.mxu0 %v6585_v56 }
0x6692   :  { %6791 = vmatpush2.msra.mxu0 %v6584_v7 }
0x6693   :  { %6792 = vmatprep.subr.mxu0 %v6579_v1 }
0x6694   :  { %6793 = vmatpush2.msra.mxu0 %v6578_v8 }
0x6695   :  { %6795 = vmatmul.mubr.f32.vlgmr.msra.gmra.mxu0 %v14373_v59  ;;  %9550 = vmatprep.subr.mxu0 %v15626_v50  ;;  %v6901_v59 = vld [vmem:[%s15576_s2 + $0x8] sm:$0xff] }
0x6696   :  { %9558 = vmatprep.mubr.msk.f32.mxu0 %vm10007_vm4, %v15626_v50  ;;  %9551 = vmatpush3.msra.mxu0 %v6903_v38 }
0x6697   :  { %9552 = vmatprep.subr.mxu0 %v15626_v50 }
0x6698   :  { %9553 = vmatpush3.msra.mxu0 %v6902_v22 }
0x6699   :  { %9554 = vmatprep.subr.mxu0 %v15626_v50 }
0x669a   :  { %9555 = vmatpush3.msra.mxu0 %v6901_v59 }
0x669b   :  { %9556 = vmatprep.subr.mxu0 %v15626_v50 }
0x669c   :  { %9557 = vmatpush3.msra.mxu0 %v6900_v58 }
0x669d   :  { %9561 = vmatprep.subr.mxu0 %v15626_v50 }
0x66e3   :  { %v6897_v28 = vpop.permute.xlu1 %6896 }
0x66e4   :  { %v6899_v15 = vmul.f32 %v14532_v60, %v6897_v28  ;;  %v6728_v60 = vadd.f32 %v6727_v45, %v6633_v6  ;;  %v8830_v6 = vld [vmem:[%s15576_s2 + $0x58] sm:$0xff]  ;;  %v8829_v45 = vld [vmem:[%s15576_s2 + $0x50] sm:$0xff] }
0x66e6   :  { %6905 = vrot.lane.b32.xlu1 %v6899_v15, %s10006_s29 }
0x6725   :  { %v14724_v34 = vpop.f32.mrf.mxu0 }
0x6727   :  { %v9549_v53 = vpop.f32.mrf.mxu0 }
0x6755   :  { %v6796_v20 = vpop.f32.mrf.mxu0 }
0x6756   :  { %v6797_v13 = vadd.f32 %v6796_v20, %v6637_v47  ;;  %v8836_v47 = vld [vmem:[%s15576_s2 + $0x70] sm:$0xff] }
0x6757   :  { %v14734_v42 = vpop.f32.mrf.mxu0 }
0x6758   :  { %v14726_v62 = vpop.permute.xlu1 %6905 }
0x6759   :  { %9559 = vmatmul.mubr.msk.f32.vlgmr.msra.gmra.mxu0 %vm606_vm5, %v14726_v62 }
0x675a   :  { %9569 = vmatprep.mubr.msk.f32.mxu0 %vm10007_vm4, %v15626_v50  ;;  %9562 = vmatpush3.msra.mxu0 %v8823_v12 }
0x675b   :  { %9563 = vmatprep.subr.mxu0 %v15626_v50 }
0x675c   :  { %9564 = vmatpush3.msra.mxu0 %v8822_v27 }
0x675d   :  { %9565 = vmatprep.subr.mxu0 %v15626_v50 }
0x6819   :  { %v6975_v29 = vpop.f32.mrf.mxu0 }
0x681a   :  { %v6976_v52 = vadd.f32 %v6975_v29, %v6728_v60  ;;  %v8827_v60 = vld [vmem:[%s15576_s2 + $0x40] sm:$0xff] }
0x681b   :  { %v9560_v57 = vpop.f32.mrf.mxu0 }
0x681c   :  { %v6979_v41 = vmul.f32 %v6976_v52, %v10224_v0 }
0x681e   :  { %v8818_v55 = vmul.f32 -1.442695, %v6979_v41 }
0x6820   :  { %9915 = vpow2.f32 %v8818_v55  ;;  %v6641_v55 = vrot.slane %v14520_v63, %v15642_v21 }
0x682d   :  { %v9916_v11 = vpop.eup %9915 }
0x682e   :  { %v6983_v25 = vadd.f32 1.0, %v9916_v11  ;;  %v6799_v11 = vadd.f32 %v14734_v42, %v6641_v55 }
0x6830   :  { %9917 = vrcp.f32 %v6983_v25 }
0x683d   :  { %v9918_v36 = vpop.eup %9917 }
0x683e   :  { %v6986_v3 = vmul.f32 2.0, %v9918_v36  ;;  %v6988_v44 = vmul.f32 %v9918_v36, %v14061_v18  ;;  %v8821_v18 = vld [vmem:[%s15576_s2 + $0x28] sm:$0xff] }
0x683f   :  { %9566 = vmatpush3.msra.mxu0 %v8821_v18 }
0x6840   :  { %v8819_v61 = vadd.f32 -1.0, %v6986_v3  ;;  %9567 = vmatprep.subr.mxu0 %v15626_v50 }
0x6841   :  { %9568 = vmatpush3.msra.mxu0 %v8820_v32 }
0x6842   :  { %6990 = vrot.lane.b32.xlu0 %v8819_v61, %s10005_s28  ;;  %9572 = vmatprep.subr.mxu0 %v15626_v50 }
0x68b4   :  { %v6991_v37 = vpop.permute.xlu0 %6990 }
0x68b5   :  { %v6993_v4 = vmul.f32 %v9918_v36, %v6991_v37 }
0x68b7   :  { %6995 = vrot.lane.b32.xlu1 %v6993_v4, %s10006_s29 }
0x6929   :  { %v6996_v10 = vpop.permute.xlu1 %6995 }
0x692a   :  { %v14740_v5 = vadd.f32 %v6996_v10, %v6988_v44 }
0x692c   :  { %9919 = vtanh.f32 %v14740_v5 }
0x6939   :  { %v9920_v16 = vpop.eup %9919 }
0x693a   :  { %7001 = vrot.lane.b32.xlu0 %v9920_v16, %s10005_s28 }
0x69ac   :  { %v7002_v26 = vpop.permute.xlu0 %7001 }
0x69ad   :  { %v14760_v54 = vmul.f32 %v9918_v36, %v7002_v26 }
0x69af   :  { %7010 = vrot.lane.b32.xlu1 %v14760_v54, %s10006_s29 }
0x6a21   :  { %v7011_v30 = vpop.permute.xlu1 %7010 }
0x6a22   :  { %9570 = vmatmul.mubr.msk.f32.vlgmr.msra.gmra.mxu0 %vm606_vm5, %v7011_v30  ;;  %v8837_v30 = vld [vmem:[%s15576_s2 + $0x78] sm:$0xff] }
0x6a23   :  { %9580 = vmatprep.mubr.msk.f32.mxu0 %vm10007_vm4, %v15626_v50  ;;  %9573 = vmatpush3.msra.mxu0 %v8830_v6 }
0x6a24   :  { %9574 = vmatprep.subr.mxu0 %v15626_v50 }
0x6a25   :  { %9575 = vmatpush3.msra.mxu0 %v8829_v45 }
0x6a26   :  { %9576 = vmatprep.subr.mxu0 %v15626_v50 }
0x6ae2   :  { %v7080_v17 = vpop.f32.mrf.mxu0 }
0x6ae3   :  { %v7081_v40 = vadd.f32 %v7080_v17, %v6797_v13  ;;  %v8834_v13 = vld [vmem:[%s15576_s2 + $0x60] sm:$0xff] }
0x6ae4   :  { %v9571_v43 = vpop.f32.mrf.mxu0 }
0x6ae5   :  { %v7084_v56 = vmul.f32 %v7081_v40, %v10224_v0 }
0x6ae7   :  { %v8825_v7 = vmul.f32 -1.442695, %v7084_v56 }
0x6ae9   :  { %9921 = vpow2.f32 %v8825_v7  ;;  %v6645_v7 = vrot.slane %v14520_v63, %v10851_v46 }
0x6af6   :  { %v9922_v1 = vpop.eup %9921 }
0x6af7   :  { %v7088_v8 = vadd.f32 1.0, %v9922_v1  ;;  %v6867_v1 = vpop.f32.mrf.mxu1 }
0x6af9   :  { %9923 = vrcp.f32 %v7088_v8  ;;  %v6868_v8 = vadd.f32 %v6867_v1, %v6645_v7 }
0x6b06   :  { %v9924_v38 = vpop.eup %9923 }
0x6b07   :  { %v7091_v22 = vmul.f32 2.0, %v9924_v38  ;;  %v7093_v15 = vmul.f32 %v9924_v38, %v14094_v49  ;;  %v8828_v49 = vld [vmem:[%s15576_s2 + $0x48] sm:$0xff] }
0x6b08   :  { %9577 = vmatpush3.msra.mxu0 %v8828_v49 }
0x6b09   :  { %v8826_v59 = vadd.f32 -1.0, %v7091_v22  ;;  %9578 = vmatprep.subr.mxu0 %v15626_v50 }
0x6b0a   :  { %9579 = vmatpush3.msra.mxu0 %v8827_v60 }
0x6b0b   :  { %7095 = vrot.lane.b32.xlu0 %v8826_v59, %s10005_s28  ;;  %9583 = vmatprep.subr.mxu0 %v15626_v50 }
0x6b7d   :  { %v7096_v58 = vpop.permute.xlu0 %7095 }
0x6b7e   :  { %v7098_v28 = vmul.f32 %v9924_v38, %v7096_v58 }
0x6b80   :  { %7100 = vrot.lane.b32.xlu1 %v7098_v28, %s10006_s29 }
0x6bf2   :  { %v7101_v53 = vpop.permute.xlu1 %7100 }
0x6bf3   :  { %v14773_v20 = vadd.f32 %v7101_v53, %v7093_v15 }
0x6bf5   :  { %9925 = vtanh.f32 %v14773_v20 }
0x6c02   :  { %v9926_v29 = vpop.eup %9925 }
0x6c03   :  { %7106 = vrot.lane.b32.xlu0 %v9926_v29, %s10005_s28 }
0x6c75   :  { %v7107_v52 = vpop.permute.xlu0 %7106 }
0x6c76   :  { %v14793_v57 = vmul.f32 %v9924_v38, %v7107_v52 }
0x6c78   :  { %7115 = vrot.lane.b32.xlu1 %v14793_v57, %s10006_s29 }
0x6cea   :  { %v7116_v41 = vpop.permute.xlu1 %7115 }
0x6ceb   :  { %9581 = vmatmul.mubr.msk.f32.vlgmr.msra.gmra.mxu0 %vm606_vm5, %v7116_v41 }
0x6cec   :  { %9591 = vmatprep.mubr.msk.f32.mxu0 %vm10007_vm4, %v15626_v50  ;;  %9584 = vmatpush3.msra.mxu0 %v8837_v30 }
0x6ced   :  { %9585 = vmatprep.subr.mxu0 %v15626_v50 }
0x6cee   :  { %9586 = vmatpush3.msra.mxu0 %v8836_v47 }
0x6cef   :  { %9587 = vmatprep.subr.mxu0 %v15626_v50 }
0x6dab   :  { %v7185_v25 = vpop.f32.mrf.mxu0 }
0x6dac   :  { %v7186_v36 = vadd.f32 %v7185_v25, %v6799_v11  ;;  %v8844_v11 = vld [vmem:[%s15576_s2 + $0x98] sm:$0xff]  ;;  %v8843_v25 = vld [vmem:[%s15576_s2 + $0x90] sm:$0xff] }
0x6dad   :  { %v9582_v3 = vpop.f32.mrf.mxu0 }
0x6dae   :  { %v7189_v61 = vmul.f32 %v7186_v36, %v10224_v0  ;;  %v8841_v36 = vld [vmem:[%s15576_s2 + $0x80] sm:$0xff] }
0x6db0   :  { %v8832_v37 = vmul.f32 -1.442695, %v7189_v61 }
0x6db2   :  { %9927 = vpow2.f32 %v8832_v37 }
0x6dbf   :  { %v9928_v4 = vpop.eup %9927 }
0x6dc0   :  { %v7193_v44 = vadd.f32 1.0, %v9928_v4 }
0x6dc2   :  { %9929 = vrcp.f32 %v7193_v44  ;;  %v6649_v44 = vrot.slane %v14520_v63, %v10886_v33 }
0x6dcf   :  { %v9930_v10 = vpop.eup %9929 }
0x6dd0   :  { %v7196_v12 = vmul.f32 2.0, %v9930_v10  ;;  %v7198_v42 = vmul.f32 %v9930_v10, %v14128_v35  ;;  %v8835_v35 = vld [vmem:[%s15576_s2 + $0x68] sm:$0xff] }
0x6dd1   :  { %9588 = vmatpush3.msra.mxu0 %v8835_v35 }
0x6dd2   :  { %v8833_v27 = vadd.f32 -1.0, %v7196_v12  ;;  %9589 = vmatprep.subr.mxu0 %v15626_v50 }
0x6dd3   :  { %9590 = vmatpush3.msra.mxu0 %v8834_v13 }
0x6dd4   :  { %7200 = vrot.lane.b32.xlu0 %v8833_v27, %s10005_s28  ;;  %9594 = vmatprep.subr.mxu0 %v15626_v50 }
0x6e46   :  { %v7201_v18 = vpop.permute.xlu0 %7200 }
0x6e47   :  { %v7203_v32 = vmul.f32 %v9930_v10, %v7201_v18 }
0x6e49   :  { %7205 = vrot.lane.b32.xlu1 %v7203_v32, %s10006_s29 }
0x6ebb   :  { %v7206_v16 = vpop.permute.xlu1 %7205 }
0x6ebc   :  { %v14807_v26 = vadd.f32 %v7206_v16, %v7198_v42 }
0x6ebe   :  { %9931 = vtanh.f32 %v14807_v26 }
0x6ecb   :  { %v9932_v17 = vpop.eup %9931 }
0x6ecc   :  { %7211 = vrot.lane.b32.xlu0 %v9932_v17, %s10005_s28 }
0x6f3e   :  { %v7212_v40 = vpop.permute.xlu0 %7211 }
0x6f3f   :  { %v14827_v43 = vmul.f32 %v9930_v10, %v7212_v40  ;;  %v6869_v10 = vpop.f32.mrf.mxu1 }
0x6f40   :  { %v6870_v12 = vadd.f32 %v6869_v10, %v6649_v44  ;;  %v7549_v44 = vld [vmem:[%s15577_s3 + $0x98] sm:$0xff]  ;;  %v7548_v10 = vld [vmem:[%s15577_s3 + $0x90] sm:$0xff] }
0x6f41   :  { %7220 = vrot.lane.b32.xlu1 %v14827_v43, %s10006_s29 }
0x6fb3   :  { %v7221_v56 = vpop.permute.xlu1 %7220 }
0x6fb4   :  { %9592 = vmatmul.mubr.msk.f32.vlgmr.msra.gmra.mxu0 %vm606_vm5, %v7221_v56 }
0x6fb5   :  { %9602 = vmatprep.mubr.msk.f32.mxu0 %vm10007_vm4, %v15626_v50  ;;  %9595 = vmatpush3.msra.mxu0 %v8844_v11  ;;  %v7573_v11 = vld [vmem:[%s15577_s3 + $0x158] sm:$0xff] }
0x6fb6   :  { %9596 = vmatprep.subr.mxu0 %v15626_v50 }
0x6fb7   :  { %9597 = vmatpush3.msra.mxu0 %v8843_v25  ;;  %v7572_v25 = vld [vmem:[%s15577_s3 + $0x150] sm:$0xff] }
0x6fb8   :  { %9598 = vmatprep.subr.mxu0 %v15626_v50 }
0x7074   :  { %v7290_v38 = vpop.f32.mrf.mxu0 }
0x7075   :  { %v7291_v22 = vadd.f32 %v7290_v38, %v6868_v8  ;;  %v7621_v8 = vld [vmem:[%s15577_s3 + $0x2d8] sm:$0xff]  ;;  %v7620_v38 = vld [vmem:[%s15577_s3 + $0x2d0] sm:$0xff] }
0x7076   :  { %v9593_v59 = vpop.f32.mrf.mxu0  ;;  %7709 = vmatprep.subr.mxu1 %v7621_v8  ;;  %v7645_v8 = vld [vmem:[%s15577_s3 + $0x398] sm:$0xff] }
0x7077   :  { %v7294_v58 = vmul.f32 %v7291_v22, %v10224_v0  ;;  %7710 = vmatpush1.msra.mxu1 %v7620_v38  ;;  %v7609_v22 = vld [vmem:[%s15577_s3 + $0x278] sm:$0xff]  ;;  %v7608_v59 = vld [vmem:[%s15577_s3 + $0x270] sm:$0xff] }
0x7078   :  { %v7644_v38 = vld [vmem:[%s15577_s3 + $0x390] sm:$0xff] }
0x7079   :  { %v8839_v28 = vmul.f32 -1.442695, %v7294_v58  ;;  %v7603_v58 = vld [vmem:[%s15577_s3 + $0x248] sm:$0xff] }
0x707b   :  { %9933 = vpow2.f32 %v8839_v28  ;;  %v7602_v28 = vld [vmem:[%s15577_s3 + $0x240] sm:$0xff] }
0x7088   :  { %v9934_v15 = vpop.eup %9933 }
0x7089   :  { %v7298_v53 = vadd.f32 1.0, %v9934_v15  ;;  %v7597_v15 = vld [vmem:[%s15577_s3 + $0x218] sm:$0xff] }
0x708b   :  { %9935 = vrcp.f32 %v7298_v53  ;;  %v7596_v53 = vld [vmem:[%s15577_s3 + $0x210] sm:$0xff] }
0x7098   :  { %v9936_v6 = vpop.eup %9935 }
0x7099   :  { %v7301_v45 = vmul.f32 2.0, %v9936_v6  ;;  %v7303_v52 = vmul.f32 %v9936_v6, %v14161_v51  ;;  %v8842_v51 = vld [vmem:[%s15576_s2 + $0x88] sm:$0xff] }
0x709a   :  { %9599 = vmatpush3.msra.mxu0 %v8842_v51  ;;  %v7566_v51 = vld [vmem:[%s15577_s3 + $0x120] sm:$0xff] }
0x709b   :  { %v8840_v49 = vadd.f32 -1.0, %v7301_v45  ;;  %9600 = vmatprep.subr.mxu0 %v15626_v50  ;;  %v7591_v45 = vld [vmem:[%s15577_s3 + $0x1e8] sm:$0xff] }
0x709c   :  { %9601 = vmatpush3.msra.mxu0 %v8841_v36  ;;  %v7561_v36 = vld [vmem:[%s15577_s3 + $0xf8] sm:$0xff] }
0x709d   :  { %7305 = vrot.lane.b32.xlu0 %v8840_v49, %s10005_s28  ;;  %9605 = vmatprep.subr.mxu0 %v15626_v50  ;;  %v7590_v49 = vld [vmem:[%s15577_s3 + $0x1e0] sm:$0xff] }
0x710f   :  { %v7306_v60 = vpop.permute.xlu0 %7305 }
0x7110   :  { %v7308_v29 = vmul.f32 %v9936_v6, %v7306_v60  ;;  %v7585_v60 = vld [vmem:[%s15577_s3 + $0x1b8] sm:$0xff] }
0x7112   :  { %7310 = vrot.lane.b32.xlu1 %v7308_v29, %s10006_s29  ;;  %v7584_v29 = vld [vmem:[%s15577_s3 + $0x1b0] sm:$0xff] }
0x7184   :  { %v7311_v41 = vpop.permute.xlu1 %7310 }
0x7185   :  { %v14840_v55 = vadd.f32 %v7311_v41, %v7303_v52  ;;  %v7579_v52 = vld [vmem:[%s15577_s3 + $0x188] sm:$0xff]  ;;  %v7578_v41 = vld [vmem:[%s15577_s3 + $0x180] sm:$0xff] }
0x7187   :  { %9937 = vtanh.f32 %v14840_v55 }
0x7194   :  { %v9938_v3 = vpop.eup %9937 }
0x7195   :  { %7316 = vrot.lane.b32.xlu0 %v9938_v3, %s10005_s28  ;;  %v7560_v3 = vld [vmem:[%s15577_s3 + $0xf0] sm:$0xff] }
0x7207   :  { %v7317_v61 = vpop.permute.xlu0 %7316 }
0x7208   :  { %v7319_v37 = vmul.f32 %v9936_v6, %v7317_v61  ;;  %v7555_v61 = vld [vmem:[%s15577_s3 + $0xc8] sm:$0xff] }
0x720a   :  { %7325 = vrot.lane.b32.xlu1 %v7319_v37, %s10006_s29  ;;  %v7554_v37 = vld [vmem:[%s15577_s3 + $0xc0] sm:$0xff] }
0x727c   :  { %v14861_v4 = vpop.permute.xlu1 %7325 }
0x727d   :  { %9603 = vmatmul.mubr.msk.f32.vlgmr.msra.gmra.mxu0 %vm606_vm5, %v14861_v4 }
0x727e   :  { %9613 = vmatprep.mubr.msk.f32.mxu0 %vm10007_vm4, %v15626_v50 }
0x733d   :  { %v7395_v27 = vpop.f32.mrf.mxu0 }
0x733e   :  { %v7396_v18 = vadd.f32 %v7395_v27, %v6870_v12  ;;  %v7543_v12 = vld [vmem:[%s15577_s3 + $0x68] sm:$0xff]  ;;  %v7542_v27 = vld [vmem:[%s15577_s3 + $0x60] sm:$0xff] }
0x733f   :  { %v9604_v32 = vpop.f32.mrf.mxu0 }
0x7340   :  { %v7399_v42 = vmul.f32 %v7396_v18, %v10224_v0  ;;  %v7537_v18 = vld [vmem:[%s15577_s3 + $0x38] sm:$0xff]  ;;  %v7536_v32 = vld [vmem:[%s15577_s3 + $0x30] sm:$0xff] }
0x7342   :  { %v8846_v16 = vmul.f32 -1.442695, %v7399_v42  ;;  %v7531_v42 = vld [vmem:[%s15577_s3 + $0x8] sm:$0xff] }
0x7344   :  { %9939 = vpow2.f32 %v8846_v16  ;;  %v7530_v16 = vld [vmem:[%s15577_s3] sm:$0xff] }
0x7351   :  { %v9940_v30 = vpop.eup %9939 }
0x7352   :  { %v7403_v47 = vadd.f32 1.0, %v9940_v30  ;;  %v7669_v30 = vld [vmem:[%s15577_s3 + $0x458] sm:$0xff] }
0x7354   :  { %9941 = vrcp.f32 %v7403_v47  ;;  %v7668_v47 = vld [vmem:[%s15577_s3 + $0x450] sm:$0xff] }
0x7361   :  { %v14870_v35 = vpop.eup %9941 }
0x7362   :  { %v7406_v13 = vmul.f32 2.0, %v14870_v35  ;;  %v7408_v56 = vmul.f32 %v14870_v35, %v14201_v31  ;;  %v7614_v31 = vld [vmem:[%s15577_s3 + $0x2a0] sm:$0xff] }
0x7364   :  { %v8847_v17 = vadd.f32 -1.0, %v7406_v13  ;;  %v7663_v13 = vld [vmem:[%s15577_s3 + $0x428] sm:$0xff] }
0x7366   :  { %7410 = vrot.lane.b32.xlu0 %v8847_v17, %s10005_s28  ;;  %v7662_v17 = vld [vmem:[%s15577_s3 + $0x420] sm:$0xff] }
0x73d8   :  { %v7411_v63 = vpop.permute.xlu0 %7410 }
0x73d9   :  { %v7413_v40 = vmul.f32 %v14870_v35, %v7411_v63  ;;  %v7657_v63 = vld [vmem:[%s15577_s3 + $0x3f8] sm:$0xff] }
0x73db   :  { %7415 = vrot.lane.b32.xlu1 %v7413_v40, %s10006_s29  ;;  %v7656_v40 = vld [vmem:[%s15577_s3 + $0x3f0] sm:$0xff] }
0x73df   :  { %7516 = vrot.lane.b32.xlu1 %v14760_v54, %s10005_s28  ;;  %v7615_v54 = vld [vmem:[%s15577_s3 + $0x2a8] sm:$0xff] }
0x73e0   :  { %7711 = vmatprep.subr.mxu1 %v7615_v54  ;;  %v7639_v54 = vld [vmem:[%s15577_s3 + $0x368] sm:$0xff] }
0x73e1   :  { %7712 = vmatpush1.msra.mxu1 %v7614_v31  ;;  %v7638_v31 = vld [vmem:[%s15577_s3 + $0x360] sm:$0xff] }
0x73e2   :  { %7713 = vmatprep.subr.mxu1 %v7609_v22  ;;  %v7633_v22 = vld [vmem:[%s15577_s3 + $0x338] sm:$0xff] }
0x73e3   :  { %7714 = vmatpush1.msra.mxu1 %v7608_v59  ;;  %v7632_v59 = vld [vmem:[%s15577_s3 + $0x330] sm:$0xff] }
0x73e4   :  { %7715 = vmatprep.subr.mxu1 %v7603_v58  ;;  %v7627_v58 = vld [vmem:[%s15577_s3 + $0x308] sm:$0xff] }
0x73e5   :  { %7716 = vmatpush1.msra.mxu1 %v7602_v28  ;;  %v7626_v28 = vld [vmem:[%s15577_s3 + $0x300] sm:$0xff] }
0x73e6   :  { %7717 = vmatprep.subr.mxu1 %v7597_v15  ;;  %v7625_v15 = vld [vmem:[%s15577_s3 + $0x2f8] sm:$0xff] }
0x73e7   :  { %7718 = vmatpush1.msra.mxu1 %v7596_v53 }
0x73e8   :  { %7719 = vmatprep.subr.mxu1 %v7591_v45 }
0x73e9   :  { %7720 = vmatpush1.msra.mxu1 %v7590_v49 }
0x73ea   :  { %7721 = vmatprep.subr.mxu1 %v7585_v60 }
0x73eb   :  { %7722 = vmatpush1.msra.mxu1 %v7584_v29 }
0x73ec   :  { %7723 = vmatprep.subr.mxu1 %v7579_v52 }
0x73ed   :  { %7724 = vmatpush1.msra.mxu1 %v7578_v41 }
0x73ee   :  { %7725 = vmatprep.subr.mxu1 %v7573_v11 }
0x73ef   :  { %7726 = vmatpush1.msra.mxu1 %v7572_v25  ;;  %v7613_v25 = vld [vmem:[%s15577_s3 + $0x298] sm:$0xff] }
0x744d   :  { %v7416_v7 = vpop.permute.xlu1 %7415 }
0x744e   :  { %v14880_v1 = vadd.f32 %v7416_v7, %v7408_v56  ;;  %v7651_v56 = vld [vmem:[%s15577_s3 + $0x3c8] sm:$0xff]  ;;  %v7650_v7 = vld [vmem:[%s15577_s3 + $0x3c0] sm:$0xff] }
0x7450   :  { %9943 = vtanh.f32 %v14880_v1 }
0x7451   :  { %v7517_v45 = vpop.permute.xlu1 %7516 }
0x7452   :  { %v7526_v60 = vsel %vm606_vm5, %v14726_v62, %v7517_v45  ;;  %v7619_v62 = vld [vmem:[%s15577_s3 + $0x2c8] sm:$0xff] }
0x7453   :  { %v7655_v45 = vld [vmem:[%s15577_s3 + $0x3e8] sm:$0xff] }
0x745d   :  { %v9944_v6 = vpop.eup %9943 }
0x745e   :  { %7421 = vrot.lane.b32.xlu0 %v9944_v6, %s10005_s28 }
0x7462   :  { %7519 = vrot.lane.b32.xlu0 %v14793_v57, %s10008_s18  ;;  %v7567_v57 = vld [vmem:[%s15577_s3 + $0x128] sm:$0xff] }
0x7463   :  { %7727 = vmatprep.subr.mxu1 %v7567_v57  ;;  %v7607_v57 = vld [vmem:[%s15577_s3 + $0x268] sm:$0xff] }
0x7464   :  { %7728 = vmatpush1.msra.mxu1 %v7566_v51  ;;  %v7606_v51 = vld [vmem:[%s15577_s3 + $0x260] sm:$0xff] }
0x7465   :  { %7729 = vmatprep.subr.mxu1 %v7561_v36  ;;  %v7601_v36 = vld [vmem:[%s15577_s3 + $0x238] sm:$0xff] }
0x7466   :  { %7730 = vmatpush1.msra.mxu1 %v7560_v3  ;;  %v7600_v3 = vld [vmem:[%s15577_s3 + $0x230] sm:$0xff] }
0x7467   :  { %7731 = vmatprep.subr.mxu1 %v7555_v61  ;;  %v7595_v61 = vld [vmem:[%s15577_s3 + $0x208] sm:$0xff] }
0x7468   :  { %7732 = vmatpush1.msra.mxu1 %v7554_v37  ;;  %v7594_v37 = vld [vmem:[%s15577_s3 + $0x200] sm:$0xff] }
0x7469   :  { %7733 = vmatprep.subr.mxu1 %v7549_v44  ;;  %v7589_v44 = vld [vmem:[%s15577_s3 + $0x1d8] sm:$0xff] }
0x746a   :  { %7734 = vmatpush1.msra.mxu1 %v7548_v10  ;;  %v7588_v10 = vld [vmem:[%s15577_s3 + $0x1d0] sm:$0xff] }
0x746b   :  { %7735 = vmatprep.subr.mxu1 %v7543_v12  ;;  %v7583_v12 = vld [vmem:[%s15577_s3 + $0x1a8] sm:$0xff] }
0x746c   :  { %7736 = vmatpush1.msra.mxu1 %v7542_v27  ;;  %v7582_v27 = vld [vmem:[%s15577_s3 + $0x1a0] sm:$0xff] }
0x746d   :  { %7737 = vmatprep.subr.mxu1 %v7537_v18  ;;  %v7577_v18 = vld [vmem:[%s15577_s3 + $0x178] sm:$0xff] }
0x746e   :  { %7738 = vmatpush1.msra.mxu1 %v7536_v32  ;;  %v7576_v32 = vld [vmem:[%s15577_s3 + $0x170] sm:$0xff] }
0x746f   :  { %7739 = vmatprep.subr.mxu1 %v7531_v42  ;;  %v7571_v42 = vld [vmem:[%s15577_s3 + $0x148] sm:$0xff] }
0x7470   :  { %7740 = vmatpush1.msra.mxu1 %v7530_v16  ;;  %v7570_v16 = vld [vmem:[%s15577_s3 + $0x140] sm:$0xff] }
0x7471   :  { %7757 = vmatprep.subr.mxu1 %v7669_v30  ;;  %v7565_v30 = vld [vmem:[%s15577_s3 + $0x118] sm:$0xff] }
0x7472   :  { %7758 = vmatpush2.msra.mxu1 %v7668_v47  ;;  %v7564_v47 = vld [vmem:[%s15577_s3 + $0x110] sm:$0xff] }
0x7473   :  { %7759 = vmatprep.subr.mxu1 %v7663_v13  ;;  %v7559_v13 = vld [vmem:[%s15577_s3 + $0xe8] sm:$0xff] }
0x7474   :  { %7760 = vmatpush2.msra.mxu1 %v7662_v17  ;;  %v7558_v17 = vld [vmem:[%s15577_s3 + $0xe0] sm:$0xff] }
0x7475   :  { %7761 = vmatprep.subr.mxu1 %v7657_v63  ;;  %v7553_v63 = vld [vmem:[%s15577_s3 + $0xb8] sm:$0xff] }
0x7476   :  { %7762 = vmatpush2.msra.mxu1 %v7656_v40  ;;  %v7552_v40 = vld [vmem:[%s15577_s3 + $0xb0] sm:$0xff] }
0x7477   :  { %7763 = vmatprep.subr.mxu1 %v7651_v56  ;;  %v7547_v56 = vld [vmem:[%s15577_s3 + $0x88] sm:$0xff] }
0x7478   :  { %7764 = vmatpush2.msra.mxu1 %v7650_v7  ;;  %v7546_v7 = vld [vmem:[%s15577_s3 + $0x80] sm:$0xff] }
0x7479   :  { %7765 = vmatprep.subr.mxu1 %v7645_v8  ;;  %v7541_v8 = vld [vmem:[%s15577_s3 + $0x58] sm:$0xff] }
0x747a   :  { %7766 = vmatpush2.msra.mxu1 %v7644_v38  ;;  %v7540_v38 = vld [vmem:[%s15577_s3 + $0x50] sm:$0xff] }
0x747b   :  { %7767 = vmatprep.subr.mxu1 %v7639_v54  ;;  %v7535_v54 = vld [vmem:[%s15577_s3 + $0x28] sm:$0xff] }
0x747c   :  { %7768 = vmatpush2.msra.mxu1 %v7638_v31  ;;  %v7534_v31 = vld [vmem:[%s15577_s3 + $0x20] sm:$0xff] }
0x747d   :  { %7769 = vmatprep.subr.mxu1 %v7633_v22  ;;  %v7673_v22 = vld [vmem:[%s15577_s3 + $0x478] sm:$0xff] }
0x747e   :  { %7770 = vmatpush2.msra.mxu1 %v7632_v59  ;;  %v7672_v59 = vld [vmem:[%s15577_s3 + $0x470] sm:$0xff] }
0x747f   :  { %7771 = vmatprep.subr.mxu1 %v7627_v58  ;;  %v7667_v58 = vld [vmem:[%s15577_s3 + $0x448] sm:$0xff] }
0x7480   :  { %7772 = vmatpush2.msra.mxu1 %v7626_v28  ;;  %v7666_v28 = vld [vmem:[%s15577_s3 + $0x440] sm:$0xff] }
0x7481   :  { %7851 = vmatprep.subr.mxu1 %v7625_v15  ;;  %v7661_v15 = vld [vmem:[%s15577_s3 + $0x418] sm:$0xff] }
0x74d0   :  { %v7422_v53 = vpop.permute.xlu0 %7421 }
0x74d1   :  { %v15034_v6 = vmul.f32 %v14870_v35, %v7422_v53  ;;  %v7624_v35 = vld [vmem:[%s15577_s3 + $0x2f0] sm:$0xff] }
0x74d2   :  { %v7660_v53 = vld [vmem:[%s15577_s3 + $0x410] sm:$0xff] }
0x74d3   :  { %7523 = vrot.lane.b32.xlu1 %v15034_v6, %s10005_s28 }
0x74d4   :  { %v7520_v49 = vpop.permute.xlu0 %7519 }
0x74d5   :  { %v7527_v29 = vsel %vm354_vm6, %v7526_v60, %v7520_v49  ;;  %v7654_v49 = vld [vmem:[%s15577_s3 + $0x3e0] sm:$0xff]  ;;  %v7649_v60 = vld [vmem:[%s15577_s3 + $0x3b8] sm:$0xff] }
0x74d6   :  { %v15052_v11 = vsel %vm1227_vm7, %v7527_v29, %v14827_v43  ;;  %v7612_v43 = vld [vmem:[%s15577_s3 + $0x290] sm:$0xff] }
0x74d7   :  { %v7648_v29 = vld [vmem:[%s15577_s3 + $0x3b0] sm:$0xff] }
0x7545   :  { %v7524_v52 = vpop.permute.xlu1 %7523 }
0x7546   :  { %v15043_v41 = vsel %vm606_vm5, %v14861_v4, %v7524_v52  ;;  %v7618_v4 = vld [vmem:[%s15577_s3 + $0x2c0] sm:$0xff]  ;;  %v7643_v52 = vld [vmem:[%s15577_s3 + $0x388] sm:$0xff] }
0x7547   :  { %8850 = vmatprep.mubr.msk.f32.mxu1 %vm354_vm6, %v15043_v41 }
0x7548   :  { %7774 = vmatmul.mubr.f32.vlgmr.msra.gmra.mxu1 %v15052_v11 }
0x7549   :  { %7852 = vmatpush1.msra.mxu1 %v7624_v35  ;;  %8852 = vmatprep.mubr.msk.f32.mxu1 %vm354_vm6, %v15043_v41  ;;  %v7642_v35 = vld [vmem:[%s15577_s3 + $0x380] sm:$0xff] }
0x754a   :  { %7853 = vmatprep.subr.mxu1 %v7619_v62  ;;  %v7637_v62 = vld [vmem:[%s15577_s3 + $0x358] sm:$0xff] }
0x754b   :  { %7854 = vmatpush1.msra.mxu1 %v7618_v4  ;;  %v7636_v4 = vld [vmem:[%s15577_s3 + $0x350] sm:$0xff] }
0x754c   :  { %7855 = vmatprep.subr.mxu1 %v7613_v25  ;;  %v7631_v25 = vld [vmem:[%s15577_s3 + $0x328] sm:$0xff] }
0x754d   :  { %7856 = vmatpush1.msra.mxu1 %v7612_v43  ;;  %v7630_v43 = vld [vmem:[%s15577_s3 + $0x320] sm:$0xff] }
0x754e   :  { %7857 = vmatprep.subr.mxu1 %v7607_v57  ;;  %v15199_v57 = vld [vmem:[%s15578_s4] sm:$0x3f] }
0x754f   :  { %7858 = vmatpush1.msra.mxu1 %v7606_v51  ;;  %v7679_v51 = vrot.slane %v15199_v57, %v15635_v2  ;;  %v15213_v2 = vld [vmem:[%s15579_s5 + $0x10] sm:$0xff] }
0x7550   :  { %7859 = vmatprep.subr.mxu1 %v7601_v36 }
0x7551   :  { %7860 = vmatpush1.msra.mxu1 %v7600_v3 }
0x7552   :  { %7861 = vmatprep.subr.mxu1 %v7595_v61  ;;  %v15649_v61 = vld [vmem:[#allocation13_spill] sm:$0xff] }
0x7553   :  { %7862 = vmatpush1.msra.mxu1 %v7594_v37 }
0x7554   :  { %7863 = vmatprep.subr.mxu1 %v7589_v44 }
0x7555   :  { %7864 = vmatpush1.msra.mxu1 %v7588_v10 }
0x7556   :  { %7865 = vmatprep.subr.mxu1 %v7583_v12 }
0x7557   :  { %7866 = vmatpush1.msra.mxu1 %v7582_v27 }
0x7558   :  { %7867 = vmatprep.subr.mxu1 %v7577_v18  ;;  %v15208_v18 = vld [vmem:[%s15579_s5 + $0x18] sm:$0xff] }
0x7559   :  { %7868 = vmatpush1.msra.mxu1 %v7576_v32  ;;  %9606 = vmatpush3.msra.mxu0 %v15208_v18 }
0x755a   :  { %7869 = vmatprep.subr.mxu1 %v7571_v42  ;;  %9607 = vmatprep.subr.mxu0 %v15626_v50 }
0x755b   :  { %7870 = vmatpush1.msra.mxu1 %v7570_v16  ;;  %9608 = vmatpush3.msra.mxu0 %v15213_v2 }
0x755c   :  { %7871 = vmatprep.subr.mxu1 %v7565_v30  ;;  %9609 = vmatprep.subr.mxu0 %v15626_v50  ;;  %v15226_v30 = vld [vmem:[%s15579_s5 + $0x8] sm:$0xff] }
0x755d   :  { %7872 = vmatpush1.msra.mxu1 %v7564_v47  ;;  %9610 = vmatpush3.msra.mxu0 %v15226_v30  ;;  %v15233_v47 = vld [vmem:[%s15579_s5] sm:$0xff] }
0x755e   :  { %7873 = vmatprep.subr.mxu1 %v7559_v13  ;;  %9611 = vmatprep.subr.mxu0 %v15626_v50  ;;  %v7623_v13 = vld [vmem:[%s15577_s3 + $0x2e8] sm:$0xff] }
0x755f   :  { %7874 = vmatpush1.msra.mxu1 %v7558_v17  ;;  %9612 = vmatpush3.msra.mxu0 %v15233_v47 }
0x7560   :  { %7875 = vmatprep.subr.mxu1 %v7553_v63  ;;  %7780 = vmatprep.subr.mxu0 %v7623_v13  ;;  %v7670_v13 = vld [vmem:[%s15577_s3 + $0x460] sm:$0xff] }
0x7561   :  { %7876 = vmatpush1.msra.mxu1 %v7552_v40 }
0x7562   :  { %7877 = vmatprep.subr.mxu1 %v7547_v56 }
0x7563   :  { %7878 = vmatpush1.msra.mxu1 %v7546_v7 }
0x7564   :  { %7879 = vmatprep.subr.mxu1 %v7541_v8  ;;  %v7622_v8 = vld [vmem:[%s15577_s3 + $0x2e0] sm:$0xff] }
0x7565   :  { %7880 = vmatpush1.msra.mxu1 %v7540_v38 }
0x7566   :  { %7881 = vmatprep.subr.mxu1 %v7535_v54  ;;  %v7617_v54 = vld [vmem:[%s15577_s3 + $0x2b8] sm:$0xff] }
0x7567   :  { %7882 = vmatpush1.msra.mxu1 %v7534_v31  ;;  %v7610_v31 = vld [vmem:[%s15577_s3 + $0x280] sm:$0xff] }
0x7568   :  { %7899 = vmatprep.subr.mxu1 %v7673_v22  ;;  %v7605_v22 = vld [vmem:[%s15577_s3 + $0x258] sm:$0xff] }
0x7569   :  { %7900 = vmatpush2.msra.mxu1 %v7672_v59  ;;  %v7604_v59 = vld [vmem:[%s15577_s3 + $0x250] sm:$0xff] }
0x756a   :  { %7901 = vmatprep.subr.mxu1 %v7667_v58  ;;  %v7598_v58 = vld [vmem:[%s15577_s3 + $0x220] sm:$0xff] }
0x756b   :  { %7902 = vmatpush2.msra.mxu1 %v7666_v28  ;;  %v7593_v28 = vld [vmem:[%s15577_s3 + $0x1f8] sm:$0xff] }
0x756c   :  { %7903 = vmatprep.subr.mxu1 %v7661_v15  ;;  %v7592_v15 = vld [vmem:[%s15577_s3 + $0x1f0] sm:$0xff] }
0x756d   :  { %7904 = vmatpush2.msra.mxu1 %v7660_v53  ;;  %v7587_v53 = vld [vmem:[%s15577_s3 + $0x1c8] sm:$0xff] }
0x756e   :  { %7905 = vmatprep.subr.mxu1 %v7655_v45  ;;  %v7586_v45 = vld [vmem:[%s15577_s3 + $0x1c0] sm:$0xff] }
0x756f   :  { %7906 = vmatpush2.msra.mxu1 %v7654_v49 }
0x7570   :  { %7907 = vmatprep.subr.mxu1 %v7649_v60  ;;  %v7581_v60 = vld [vmem:[%s15577_s3 + $0x198] sm:$0xff] }
0x7571   :  { %7908 = vmatpush2.msra.mxu1 %v7648_v29  ;;  %v7580_v29 = vld [vmem:[%s15577_s3 + $0x190] sm:$0xff] }
0x7572   :  { %7909 = vmatprep.subr.mxu1 %v7643_v52  ;;  %v7575_v52 = vld [vmem:[%s15577_s3 + $0x168] sm:$0xff] }
0x7573   :  { %7910 = vmatpush2.msra.mxu1 %v7642_v35  ;;  %v7574_v35 = vld [vmem:[%s15577_s3 + $0x160] sm:$0xff] }
0x7574   :  { %7911 = vmatprep.subr.mxu1 %v7637_v62  ;;  %v7569_v62 = vld [vmem:[%s15577_s3 + $0x138] sm:$0xff] }
0x7575   :  { %7912 = vmatpush2.msra.mxu1 %v7636_v4  ;;  %v7568_v4 = vld [vmem:[%s15577_s3 + $0x130] sm:$0xff] }
0x7576   :  { %7913 = vmatprep.subr.mxu1 %v7631_v25  ;;  %v7563_v25 = vld [vmem:[%s15577_s3 + $0x108] sm:$0xff] }
0x7577   :  { %7914 = vmatpush2.msra.mxu1 %v7630_v43  ;;  %v7562_v43 = vld [vmem:[%s15577_s3 + $0x100] sm:$0xff] }
0x7578   :  { %7916 = vmatmul.mubr.f32.vlgmr.msra.gmra.mxu1 %v15052_v11 }
0x7608   :  { %v7775_v36 = vpop.f32.mrf.mxu1 }
0x7609   :  { %v7776_v3 = vadd.f32 %v7775_v36, %v7679_v51  ;;  %v7557_v51 = vld [vmem:[%s15577_s3 + $0xd8] sm:$0xff]  ;;  %v7556_v36 = vld [vmem:[%s15577_s3 + $0xd0] sm:$0xff] }
0x760b   :  { %v7923_v37 = vadd.f32 %v15649_v61, %v7776_v3  ;;  %v7551_v3 = vld [vmem:[%s15577_s3 + $0xa8] sm:$0xff]  ;;  %v7550_v61 = vld [vmem:[%s15577_s3 + $0xa0] sm:$0xff] }
0x760d   :  { %v7924_v44 = vmul.f32 %v7923_v37, %v10224_v0  ;;  %v7545_v37 = vld [vmem:[%s15577_s3 + $0x78] sm:$0xff] }
0x760f   :  { %v8853_v10 = vmul.f32 -1.442695, %v7924_v44  ;;  %v7544_v44 = vld [vmem:[%s15577_s3 + $0x70] sm:$0xff] }
0x7611   :  { %9945 = vpow2.f32 %v8853_v10  ;;  %v7539_v10 = vld [vmem:[%s15577_s3 + $0x48] sm:$0xff] }
0x761e   :  { %v9946_v12 = vpop.eup %9945 }
0x761f   :  { %v7928_v27 = vadd.f32 1.0, %v9946_v12  ;;  %v7538_v12 = vld [vmem:[%s15577_s3 + $0x40] sm:$0xff] }
0x7621   :  { %9947 = vrcp.f32 %v7928_v27  ;;  %v7533_v27 = vld [vmem:[%s15577_s3 + $0x18] sm:$0xff] }
0x762e   :  { %v15216_v32 = vpop.eup %9947 }
0x762f   :  { %v7931_v42 = vmul.f32 2.0, %v15216_v32  ;;  %v7933_v40 = vmul.f32 %v15216_v32, %v14554_v39  ;;  %v7611_v39 = vld [vmem:[%s15577_s3 + $0x288] sm:$0xff] }
0x7631   :  { %v8854_v16 = vadd.f32 -1.0, %v7931_v42  ;;  %v7532_v42 = vld [vmem:[%s15577_s3 + $0x10] sm:$0xff] }
0x7633   :  { %7935 = vrot.lane.b32.xlu0 %v8854_v16, %s10005_s28  ;;  %v7671_v16 = vld [vmem:[%s15577_s3 + $0x468] sm:$0xff] }
0x76a5   :  { %v7936_v17 = vpop.permute.xlu0 %7935 }
0x76a6   :  { %v7938_v63 = vmul.f32 %v15216_v32, %v7936_v17  ;;  %v7665_v17 = vld [vmem:[%s15577_s3 + $0x438] sm:$0xff] }
0x76a8   :  { %7940 = vrot.lane.b32.xlu1 %v7938_v63, %s10006_s29  ;;  %v7664_v63 = vld [vmem:[%s15577_s3 + $0x430] sm:$0xff] }
0x76ac   :  { %7435 = vrot.lane.b32.xlu1 %v15034_v6, %s10006_s29  ;;  %v7616_v6 = vld [vmem:[%s15577_s3 + $0x2b0] sm:$0xff] }
0x771a   :  { %v7941_v56 = vpop.permute.xlu1 %7940 }
0x771b   :  { %v7943_v7 = vadd.f32 %v7941_v56, %v7933_v40  ;;  %v7659_v40 = vld [vmem:[%s15577_s3 + $0x408] sm:$0xff]  ;;  %v7658_v56 = vld [vmem:[%s15577_s3 + $0x400] sm:$0xff] }
0x771d   :  { %9949 = vtanh.f32 %v7943_v7  ;;  %v7653_v7 = vld [vmem:[%s15577_s3 + $0x3d8] sm:$0xff] }
0x771e   :  { %v7436_v38 = vpop.permute.xlu1 %7435 }
0x771f   :  { %9614 = vmatmul.mubr.msk.f32.vlgmr.msra.gmra.mxu0 %vm606_vm5, %v7436_v38  ;;  %v7647_v38 = vld [vmem:[%s15577_s3 + $0x3a8] sm:$0xff] }
0x7720   :  { %7781 = vmatpush1.msra.mxu0 %v7622_v8  ;;  %8851 = vmatprep.mubr.msk.f32.mxu0 %vm354_vm6, %v15043_v41  ;;  %v7599_v41 = vld [vmem:[%s15577_s3 + $0x228] sm:$0xff]  ;;  %v7652_v8 = vld [vmem:[%s15577_s3 + $0x3d0] sm:$0xff] }
0x7721   :  { %7782 = vmatprep.subr.mxu0 %v7617_v54  ;;  %v7646_v54 = vld [vmem:[%s15577_s3 + $0x3a0] sm:$0xff] }
0x7722   :  { %7783 = vmatpush1.msra.mxu0 %v7616_v6  ;;  %v7641_v6 = vld [vmem:[%s15577_s3 + $0x378] sm:$0xff] }
0x7723   :  { %7784 = vmatprep.subr.mxu0 %v7611_v39  ;;  %v7640_v39 = vld [vmem:[%s15577_s3 + $0x370] sm:$0xff] }
0x7724   :  { %7785 = vmatpush1.msra.mxu0 %v7610_v31  ;;  %v7635_v31 = vld [vmem:[%s15577_s3 + $0x348] sm:$0xff] }
0x7725   :  { %7786 = vmatprep.subr.mxu0 %v7605_v22  ;;  %v7634_v22 = vld [vmem:[%s15577_s3 + $0x340] sm:$0xff] }
0x7726   :  { %7787 = vmatpush1.msra.mxu0 %v7604_v59  ;;  %v7629_v59 = vld [vmem:[%s15577_s3 + $0x318] sm:$0xff] }
0x7727   :  { %7788 = vmatprep.subr.mxu0 %v7599_v41  ;;  %v7628_v41 = vld [vmem:[%s15577_s3 + $0x310] sm:$0xff] }
0x7728   :  { %7789 = vmatpush1.msra.mxu0 %v7598_v58  ;;  %v7953_v58 = vld [vmem:[%s15576_s2 + $0x18] sm:$0xff] }
0x7729   :  { %7790 = vmatprep.subr.mxu0 %v7593_v28  ;;  %v7952_v28 = vld [vmem:[%s15576_s2 + $0x10] sm:$0xff] }
0x772a   :  { %v9950_v49 = vpop.eup %9949  ;;  %7791 = vmatpush1.msra.mxu0 %v7592_v15  ;;  %v7950_v15 = vld [vmem:[%s15576_s2] sm:$0xff] }
0x772b   :  { %7792 = vmatprep.subr.mxu0 %v7587_v53  ;;  %7946 = vrot.lane.b32.xlu0 %v9950_v49, %s10005_s28 }
0x772c   :  { %7793 = vmatpush1.msra.mxu0 %v7586_v45 }
0x772d   :  { %7794 = vmatprep.subr.mxu0 %v7581_v60 }
0x772e   :  { %7795 = vmatpush1.msra.mxu0 %v7580_v29 }
0x772f   :  { %7796 = vmatprep.subr.mxu0 %v7575_v52 }
0x7730   :  { %7797 = vmatpush1.msra.mxu0 %v7574_v35  ;;  %v7683_v35 = vrot.slane %v15199_v57, %v15638_v19 }
0x7731   :  { %7798 = vmatprep.subr.mxu0 %v7569_v62  ;;  %v7777_v62 = vpop.f32.mrf.mxu1 }
0x7732   :  { %7799 = vmatpush1.msra.mxu0 %v7568_v4 }
0x7733   :  { %7800 = vmatprep.subr.mxu0 %v7563_v25  ;;  %v7778_v25 = vadd.f32 %v7777_v62, %v7683_v35  ;;  %v8868_v35 = vld [vmem:[%s15576_s2 + $0x58] sm:$0xff]  ;;  %v8867_v62 = vld [vmem:[%s15576_s2 + $0x50] sm:$0xff] }
0x7734   :  { %7801 = vmatpush1.msra.mxu0 %v7562_v43 }
0x7735   :  { %7802 = vmatprep.subr.mxu0 %v7557_v51 }
0x7736   :  { %7803 = vmatpush1.msra.mxu0 %v7556_v36 }
0x7737   :  { %7804 = vmatprep.subr.mxu0 %v7551_v3 }
0x7738   :  { %7805 = vmatpush1.msra.mxu0 %v7550_v61 }
0x7739   :  { %7806 = vmatprep.subr.mxu0 %v7545_v37 }
0x773a   :  { %7807 = vmatpush1.msra.mxu0 %v7544_v44 }
0x773b   :  { %7808 = vmatprep.subr.mxu0 %v7539_v10 }
0x773c   :  { %7809 = vmatpush1.msra.mxu0 %v7538_v12 }
0x773d   :  { %7810 = vmatprep.subr.mxu0 %v7533_v27 }
0x773e   :  { %7811 = vmatpush1.msra.mxu0 %v7532_v42 }
0x773f   :  { %7828 = vmatprep.subr.mxu0 %v7671_v16 }
0x7740   :  { %7829 = vmatpush2.msra.mxu0 %v7670_v13 }
0x7741   :  { %7830 = vmatprep.subr.mxu0 %v7665_v17  ;;  %v8861_v17 = vld [vmem:[%s15576_s2 + $0x38] sm:$0xff] }
0x7742   :  { %7831 = vmatpush2.msra.mxu0 %v7664_v63  ;;  %v8860_v63 = vld [vmem:[%s15576_s2 + $0x30] sm:$0xff] }
0x7743   :  { %7832 = vmatprep.subr.mxu0 %v7659_v40  ;;  %v8859_v40 = vld [vmem:[%s15576_s2 + $0x28] sm:$0xff] }
0x7744   :  { %7833 = vmatpush2.msra.mxu0 %v7658_v56 }
0x7745   :  { %7834 = vmatprep.subr.mxu0 %v7653_v7 }
0x7746   :  { %7835 = vmatpush2.msra.mxu0 %v7652_v8 }
0x7747   :  { %7836 = vmatprep.subr.mxu0 %v7647_v38 }
0x7748   :  { %7837 = vmatpush2.msra.mxu0 %v7646_v54  ;;  %v7687_v54 = vrot.slane %v15199_v57, %v15640_v9 }
0x7749   :  { %7838 = vmatprep.subr.mxu0 %v7641_v6 }
0x774a   :  { %7839 = vmatpush2.msra.mxu0 %v7640_v39 }
0x774b   :  { %7840 = vmatprep.subr.mxu0 %v7635_v31 }
0x774c   :  { %7841 = vmatpush2.msra.mxu0 %v7634_v22 }
0x774d   :  { %7842 = vmatprep.subr.mxu0 %v7629_v59 }
0x774e   :  { %7843 = vmatpush2.msra.mxu0 %v7628_v41 }
0x774f   :  { %7845 = vmatmul.mubr.f32.vlgmr.msra.gmra.mxu0 %v15052_v11  ;;  %9616 = vmatprep.subr.mxu0 %v15626_v50  ;;  %v7951_v11 = vld [vmem:[%s15576_s2 + $0x8] sm:$0xff] }
0x7750   :  { %9624 = vmatprep.mubr.msk.f32.mxu0 %vm10007_vm4, %v15626_v50  ;;  %9617 = vmatpush3.msra.mxu0 %v7953_v58 }
0x7751   :  { %9618 = vmatprep.subr.mxu0 %v15626_v50 }
0x7752   :  { %9619 = vmatpush3.msra.mxu0 %v7952_v28 }
0x7753   :  { %9620 = vmatprep.subr.mxu0 %v15626_v50 }
0x7754   :  { %9621 = vmatpush3.msra.mxu0 %v7951_v11 }
0x7755   :  { %9622 = vmatprep.subr.mxu0 %v15626_v50 }
0x7756   :  { %9623 = vmatpush3.msra.mxu0 %v7950_v15 }
0x7757   :  { %9627 = vmatprep.subr.mxu0 %v15626_v50 }
0x779d   :  { %v7947_v53 = vpop.permute.xlu0 %7946 }
0x779e   :  { %v7949_v45 = vmul.f32 %v15216_v32, %v7947_v53 }
0x77a0   :  { %7955 = vrot.lane.b32.xlu0 %v7949_v45, %s10006_s29 }
0x77df   :  { %v15412_v49 = vpop.f32.mrf.mxu0 }
0x77e1   :  { %v9615_v60 = vpop.f32.mrf.mxu0 }
0x780f   :  { %v7846_v52 = vpop.f32.mrf.mxu0 }
0x7810   :  { %v7847_v6 = vadd.f32 %v7846_v52, %v7687_v54 }
0x7811   :  { %v15419_v4 = vpop.f32.mrf.mxu0 }
0x7812   :  { %v7956_v29 = vpop.permute.xlu0 %7955 }
0x7813   :  { %9625 = vmatmul.mubr.msk.f32.vlgmr.msra.gmra.mxu0 %vm606_vm5, %v7956_v29 }
0x7814   :  { %9635 = vmatprep.mubr.msk.f32.mxu0 %vm10007_vm4, %v15626_v50  ;;  %9628 = vmatpush3.msra.mxu0 %v8861_v17 }
0x7815   :  { %9629 = vmatprep.subr.mxu0 %v15626_v50 }
0x7816   :  { %9630 = vmatpush3.msra.mxu0 %v8860_v63 }
0x7817   :  { %9631 = vmatprep.subr.mxu0 %v15626_v50 }
0x7818   :  { %9632 = vmatpush3.msra.mxu0 %v8859_v40 }
0x7819   :  { %9633 = vmatprep.subr.mxu0 %v15626_v50 }
0x78d3   :  { %v8025_v32 = vpop.f32.mrf.mxu0 }
0x78d4   :  { %v8026_v43 = vadd.f32 %v8025_v32, %v7778_v25  ;;  %v8866_v25 = vld [vmem:[%s15576_s2 + $0x48] sm:$0xff] }
0x78d5   :  { %v9626_v51 = vpop.f32.mrf.mxu0 }
0x78d6   :  { %v8029_v36 = vmul.f32 %v8026_v43, %v10224_v0 }
0x78d8   :  { %v8856_v3 = vmul.f32 -1.442695, %v8029_v36 }
0x78da   :  { %9951 = vpow2.f32 %v8856_v3  ;;  %v7691_v3 = vrot.slane %v15199_v57, %v15642_v21 }
0x78e7   :  { %v9952_v61 = vpop.eup %9951 }
0x78e8   :  { %v8033_v37 = vadd.f32 1.0, %v9952_v61  ;;  %v7849_v61 = vadd.f32 %v15419_v4, %v7691_v3 }
0x78ea   :  { %9953 = vrcp.f32 %v8033_v37 }
0x78f7   :  { %v9954_v44 = vpop.eup %9953 }
0x78f8   :  { %v8036_v10 = vmul.f32 2.0, %v9954_v44  ;;  %v8038_v42 = vmul.f32 %v9954_v44, %v14740_v5  ;;  %v8858_v5 = vld [vmem:[%s15576_s2 + $0x20] sm:$0xff] }
0x78f9   :  { %9634 = vmatpush3.msra.mxu0 %v8858_v5 }
0x78fa   :  { %v8857_v12 = vadd.f32 -1.0, %v8036_v10  ;;  %9638 = vmatprep.subr.mxu0 %v15626_v50 }
0x78fc   :  { %8040 = vrot.lane.b32.xlu1 %v8857_v12, %s10005_s28 }
0x796e   :  { %v8041_v19 = vpop.permute.xlu1 %8040 }
0x796f   :  { %v8043_v27 = vmul.f32 %v9954_v44, %v8041_v19 }
0x7971   :  { %8045 = vrot.lane.b32.xlu0 %v8043_v27, %s10006_s29 }
0x79e3   :  { %v8046_v16 = vpop.permute.xlu0 %8045 }
0x79e4   :  { %v8048_v13 = vadd.f32 %v8046_v16, %v8038_v42 }
0x79e6   :  { %9955 = vtanh.f32 %v8048_v13 }
0x79f3   :  { %v9956_v56 = vpop.eup %9955 }
0x79f4   :  { %8051 = vrot.lane.b32.xlu1 %v9956_v56, %s10005_s28  ;;  %v8875_v56 = vld [vmem:[%s15576_s2 + $0x78] sm:$0xff] }
0x7a66   :  { %v8052_v7 = vpop.permute.xlu1 %8051 }
0x7a67   :  { %v8054_v8 = vmul.f32 %v9954_v44, %v8052_v7  ;;  %v8874_v7 = vld [vmem:[%s15576_s2 + $0x70] sm:$0xff] }
0x7a69   :  { %8060 = vrot.lane.b32.xlu0 %v8054_v8, %s10006_s29  ;;  %v8873_v8 = vld [vmem:[%s15576_s2 + $0x68] sm:$0xff] }
0x7adb   :  { %v8061_v38 = vpop.permute.xlu0 %8060 }
0x7adc   :  { %9636 = vmatmul.mubr.msk.f32.vlgmr.msra.gmra.mxu0 %vm606_vm5, %v8061_v38 }
0x7add   :  { %9646 = vmatprep.mubr.msk.f32.mxu0 %vm10007_vm4, %v15626_v50  ;;  %9639 = vmatpush3.msra.mxu0 %v8868_v35 }
0x7ade   :  { %9640 = vmatprep.subr.mxu0 %v15626_v50 }
0x7adf   :  { %9641 = vmatpush3.msra.mxu0 %v8867_v62 }
0x7ae0   :  { %9642 = vmatprep.subr.mxu0 %v15626_v50 }
0x7ae1   :  { %9643 = vmatpush3.msra.mxu0 %v8866_v25 }
0x7ae2   :  { %9644 = vmatprep.subr.mxu0 %v15626_v50 }
0x7b9c   :  { %v8130_v39 = vpop.f32.mrf.mxu0 }
0x7b9d   :  { %v8131_v31 = vadd.f32 %v8130_v39, %v7847_v6 }
0x7b9e   :  { %v9637_v22 = vpop.f32.mrf.mxu0 }
0x7b9f   :  { %v8134_v59 = vmul.f32 %v8131_v31, %v10224_v0  ;;  %v7695_v31 = vrot.slane %v15199_v57, %v10851_v46  ;;  %v7917_v22 = vpop.f32.mrf.mxu1 }
0x7ba1   :  { %v8863_v41 = vmul.f32 -1.442695, %v8134_v59  ;;  %v7918_v59 = vadd.f32 %v7917_v22, %v7695_v31 }
0x7ba3   :  { %9957 = vpow2.f32 %v8863_v41 }
0x7bb0   :  { %v9958_v58 = vpop.eup %9957 }
0x7bb1   :  { %v8138_v28 = vadd.f32 1.0, %v9958_v58 }
0x7bb3   :  { %9959 = vrcp.f32 %v8138_v28 }
0x7bc0   :  { %v9960_v11 = vpop.eup %9959 }
0x7bc1   :  { %v8141_v15 = vmul.f32 2.0, %v9960_v11  ;;  %v8143_v9 = vmul.f32 %v9960_v11, %v14773_v20  ;;  %v8865_v20 = vld [vmem:[%s15576_s2 + $0x40] sm:$0xff] }
0x7bc2   :  { %9645 = vmatpush3.msra.mxu0 %v8865_v20  ;;  %v8882_v20 = vld [vmem:[%s15576_s2 + $0x98] sm:$0xff] }
0x7bc3   :  { %v8864_v53 = vadd.f32 -1.0, %v8141_v15  ;;  %9649 = vmatprep.subr.mxu0 %v15626_v50 }
0x7bc5   :  { %8145 = vrot.lane.b32.xlu1 %v8864_v53, %s10005_s28 }
0x7c37   :  { %v8146_v45 = vpop.permute.xlu1 %8145 }
0x7c38   :  { %v8148_v60 = vmul.f32 %v9960_v11, %v8146_v45 }
0x7c3a   :  { %8150 = vrot.lane.b32.xlu0 %v8148_v60, %s10006_s29 }
0x7cac   :  { %v8151_v29 = vpop.permute.xlu0 %8150 }
0x7cad   :  { %v8153_v52 = vadd.f32 %v8151_v29, %v8143_v9 }
0x7caf   :  { %9961 = vtanh.f32 %v8153_v52 }
0x7cbc   :  { %v9962_v32 = vpop.eup %9961 }
0x7cbd   :  { %8156 = vrot.lane.b32.xlu1 %v9962_v32, %s10005_s28  ;;  %v8881_v32 = vld [vmem:[%s15576_s2 + $0x90] sm:$0xff] }
0x7d2f   :  { %v8157_v43 = vpop.permute.xlu1 %8156 }
0x7d30   :  { %v8159_v51 = vmul.f32 %v9960_v11, %v8157_v43  ;;  %v8880_v43 = vld [vmem:[%s15576_s2 + $0x88] sm:$0xff] }
0x7d32   :  { %8165 = vrot.lane.b32.xlu0 %v8159_v51, %s10006_s29 }
0x7da4   :  { %v8166_v36 = vpop.permute.xlu0 %8165 }
0x7da5   :  { %9647 = vmatmul.mubr.msk.f32.vlgmr.msra.gmra.mxu0 %vm606_vm5, %v8166_v36 }
0x7da6   :  { %9657 = vmatprep.mubr.msk.f32.mxu0 %vm10007_vm4, %v15626_v50  ;;  %9650 = vmatpush3.msra.mxu0 %v8875_v56 }
0x7da7   :  { %9651 = vmatprep.subr.mxu0 %v15626_v50 }
0x7da8   :  { %9652 = vmatpush3.msra.mxu0 %v8874_v7 }
0x7da9   :  { %9653 = vmatprep.subr.mxu0 %v15626_v50 }
0x7daa   :  { %9654 = vmatpush3.msra.mxu0 %v8873_v8  ;;  %v8696_v8 = vld [vmem:[%s15579_s5 + $0x20] ss:$0 sm:$0xff] }
0x7dab   :  { %9655 = vmatprep.subr.mxu0 %v15626_v50 }
0x7e65   :  { %v8235_v37 = vpop.f32.mrf.mxu0 }
0x7e66   :  { %v8236_v44 = vadd.f32 %v8235_v37, %v7849_v61  ;;  %v7699_v37 = vrot.slane %v15199_v57, %v10886_v33 }
0x7e67   :  { %v9648_v10 = vpop.f32.mrf.mxu0 }
0x7e68   :  { %v8239_v12 = vmul.f32 %v8236_v44, %v10224_v0  ;;  %v7919_v44 = vpop.f32.mrf.mxu1 }
0x7e6a   :  { %v8870_v19 = vmul.f32 -1.442695, %v8239_v12 }
0x7e6c   :  { %9963 = vpow2.f32 %v8870_v19 }
0x7e79   :  { %v9964_v27 = vpop.eup %9963 }
0x7e7a   :  { %v8243_v42 = vadd.f32 1.0, %v9964_v27 }
0x7e7c   :  { %9965 = vrcp.f32 %v8243_v42 }
0x7e89   :  { %v9966_v16 = vpop.eup %9965 }
0x7e8a   :  { %v8246_v13 = vmul.f32 2.0, %v9966_v16  ;;  %v8248_v21 = vmul.f32 %v9966_v16, %v14807_v26  ;;  %v8872_v26 = vld [vmem:[%s15576_s2 + $0x60] sm:$0xff] }
0x7e8b   :  { %9656 = vmatpush3.msra.mxu0 %v8872_v26  ;;  %v3306_v26 = vadd.f32 %v8696_v8, %v12687_v24 }
0x7e8c   :  { %v8871_v17 = vadd.f32 -1.0, %v8246_v13  ;;  %9660 = vmatprep.subr.mxu0 %v15626_v50 }
0x7e8e   :  { %8250 = vrot.lane.b32.xlu1 %v8871_v17, %s10005_s28 }
0x7f00   :  { %v8251_v63 = vpop.permute.xlu1 %8250 }
0x7f01   :  { %v8253_v40 = vmul.f32 %v9966_v16, %v8251_v63 }
0x7f03   :  { %8255 = vrot.lane.b32.xlu0 %v8253_v40, %s10006_s29  ;;  %v8658_v40 = vld [vmem:[%s15579_s5 + $0x20] ss:$0 sm:$0xff] }
0x7f75   :  { %v8256_v4 = vpop.permute.xlu0 %8255 }
0x7f76   :  { %v8258_v5 = vadd.f32 %v8256_v4, %v8248_v21  ;;  %v2256_v21 = vadd.f32 %v8658_v40, %v12008_v23  ;;  %v8734_v4 = vld [vmem:[%s15579_s5 + $0x20] ss:$0 sm:$0xff] }
0x7f78   :  { %9967 = vtanh.f32 %v8258_v5  ;;  %v8810_v5 = vld [vmem:[%s15579_s5 + $0x20] ss:$0 sm:$0xff] }
0x7f79   :  { %v6456_v56 = vadd.f32 %v8810_v5, %v14724_v34 }
0x7f85   :  { %v9968_v38 = vpop.eup %9967 }
0x7f86   :  { %8261 = vrot.lane.b32.xlu1 %v9968_v38, %s10005_s28  ;;  %v8772_v38 = vld [vmem:[%s15579_s5 + $0x20] ss:$0 sm:$0xff] }
0x7f87   :  { %v5406_v34 = vadd.f32 %v8772_v38, %v14045_v48 }
0x7ff8   :  { %v8262_v54 = vpop.permute.xlu1 %8261 }
0x7ff9   :  { %v8264_v6 = vmul.f32 %v9966_v16, %v8262_v54  ;;  %v8848_v54 = vld [vmem:[%s15579_s5 + $0x20] ss:$0 sm:$0xff]  ;;  %s10012_s5 = smov 112  }
0x7ffb   :  { %8270 = vrot.lane.b32.xlu0 %v8264_v6, %s10006_s29  ;;  %v7506_v6 = vadd.f32 %v8848_v54, %v15412_v49 }
0x806d   :  { %v8271_v39 = vpop.permute.xlu0 %8270 }
0x806e   :  { %9658 = vmatmul.mubr.msk.f32.vlgmr.msra.gmra.mxu0 %vm606_vm5, %v8271_v39 }
0x806f   :  { %9668 = vmatprep.mubr.msk.f32.mxu0 %vm10007_vm4, %v15626_v50  ;;  %9661 = vmatpush3.msra.mxu0 %v8882_v20 }
0x8070   :  { %9662 = vmatprep.subr.mxu0 %v15626_v50 }
0x8071   :  { %9663 = vmatpush3.msra.mxu0 %v8881_v32 }
0x8072   :  { %9664 = vmatprep.subr.mxu0 %v15626_v50 }
0x8073   :  { %9665 = vmatpush3.msra.mxu0 %v8880_v43 }
0x8074   :  { %9666 = vmatprep.subr.mxu0 %v15626_v50 }
0x812e   :  { %v8340_v41 = vpop.f32.mrf.mxu0 }
0x812f   :  { %v8341_v58 = vadd.f32 %v8340_v41, %v7918_v59 }
0x8130   :  { %v9659_v28 = vpop.f32.mrf.mxu0 }
0x8131   :  { %v8344_v11 = vmul.f32 %v8341_v58, %v10224_v0 }
0x8133   :  { %v8877_v15 = vmul.f32 -1.442695, %v8344_v11 }
0x8135   :  { %9969 = vpow2.f32 %v8877_v15 }
0x8142   :  { %v9970_v53 = vpop.eup %9969 }
0x8143   :  { %v8348_v45 = vadd.f32 1.0, %v9970_v53 }
0x8145   :  { %9971 = vrcp.f32 %v8348_v45 }
0x8152   :  { %v9972_v60 = vpop.eup %9971 }
0x8153   :  { %v8351_v9 = vmul.f32 2.0, %v9972_v60  ;;  %v8353_v46 = vmul.f32 %v9972_v60, %v14840_v55  ;;  %v8879_v55 = vld [vmem:[%s15576_s2 + $0x80] sm:$0xff] }
0x8154   :  { %9667 = vmatpush3.msra.mxu0 %v8879_v55 }
0x8155   :  { %v8878_v29 = vadd.f32 -1.0, %v8351_v9  ;;  %9671 = vmatprep.subr.mxu0 %v15626_v50 }
0x8157   :  { %8355 = vrot.lane.b32.xlu1 %v8878_v29, %s10005_s28 }
0x81c9   :  { %v8356_v52 = vpop.permute.xlu1 %8355 }
0x81ca   :  { %v8358_v35 = vmul.f32 %v9972_v60, %v8356_v52 }
0x81cc   :  { %8360 = vrot.lane.b32.xlu0 %v8358_v35, %s10006_s29 }
0x823e   :  { %v8361_v62 = vpop.permute.xlu0 %8360 }
0x823f   :  { %v8363_v25 = vadd.f32 %v8361_v62, %v8353_v46 }
0x8241   :  { %9973 = vtanh.f32 %v8363_v25 }
0x824e   :  { %v9974_v51 = vpop.eup %9973 }
0x824f   :  { %8366 = vrot.lane.b32.xlu1 %v9974_v51, %s10005_s28 }
0x82c1   :  { %v8367_v36 = vpop.permute.xlu1 %8366 }
0x82c2   :  { %v8369_v3 = vmul.f32 %v9972_v60, %v8367_v36 }
0x82c4   :  { %8375 = vrot.lane.b32.xlu0 %v8369_v3, %s10006_s29 }
0x8336   :  { %v8376_v61 = vpop.permute.xlu0 %8375 }
0x8337   :  { %9669 = vmatmul.mubr.msk.f32.vlgmr.msra.gmra.mxu0 %vm606_vm5, %v8376_v61 }
0x8338   :  { %9672 = vmatpush3.msra.mxu0 %v15208_v18  ;;  %9679 = vmatprep.mubr.msk.f32.mxu0 %vm10007_vm4, %v15626_v50  ;;  %v7920_v18 = vadd.f32 %v7919_v44, %v7699_v37 }
0x8339   :  { %9673 = vmatprep.subr.mxu0 %v15626_v50 }
0x833a   :  { %9674 = vmatpush3.msra.mxu0 %v15213_v2 }
0x833b   :  { %9675 = vmatprep.subr.mxu0 %v15626_v50 }
0x833c   :  { %9676 = vmatpush3.msra.mxu0 %v15226_v30 }
0x833d   :  { %9677 = vmatprep.subr.mxu0 %v15626_v50 }
0x833e   :  { %9678 = vmatpush3.msra.mxu0 %v15233_v47 }
0x83f7   :  { %v8445_v10 = vpop.f32.mrf.mxu0 }
0x83f8   :  { %v8446_v12 = vadd.f32 %v8445_v10, %v7920_v18 }
0x83f9   :  { %v9670_v19 = vpop.f32.mrf.mxu0 }
0x83fa   :  { %v8449_v27 = vmul.f32 %v8446_v12, %v10224_v0 }
0x83fc   :  { %v8884_v42 = vmul.f32 -1.442695, %v8449_v27 }
0x83fe   :  { %9975 = vpow2.f32 %v8884_v42 }
0x840b   :  { %v9976_v2 = vpop.eup %9975 }
0x840c   :  { %v8453_v16 = vadd.f32 1.0, %v9976_v2 }
0x840e   :  { %9977 = vrcp.f32 %v8453_v16 }
0x841b   :  { %v9978_v30 = vpop.eup %9977 }
0x841c   :  { %v8456_v13 = vmul.f32 2.0, %v9978_v30  ;;  %v8458_v33 = vmul.f32 %v9978_v30, %v14880_v1  ;;  %v4356_v1 = vadd.f32 %v8734_v4, %v13366_v14 }
0x841e   :  { %v8885_v50 = vadd.f32 -1.0, %v8456_v13 }
0x8420   :  { %8460 = vrot.lane.b32.xlu1 %v8885_v50, %s10005_s28 }
0x8492   :  { %v8461_v47 = vpop.permute.xlu1 %8460 }
0x8493   :  { %v8463_v17 = vmul.f32 %v9978_v30, %v8461_v47 }
0x8495   :  { %8465 = vrot.lane.b32.xlu0 %v8463_v17, %s10006_s29 }
0x8507   :  { %v8466_v57 = vpop.permute.xlu0 %8465 }
0x8508   :  { %v8468_v63 = vadd.f32 %v8466_v57, %v8458_v33 }
0x850a   :  { %9979 = vtanh.f32 %v8468_v63 }
0x8517   :  { %v9980_v0 = vpop.eup %9979 }
0x8518   :  { %8471 = vrot.lane.b32.xlu1 %v9980_v0, %s10005_s28 }
0x851c   :  { %2260 = vrot.lane.b32.xlu1 %v2256_v21, %s10009_s23 }
0x8520   :  { %4360 = vrot.lane.b32.xlu1 %v4356_v1, %s10010_s25 }
0x8524   :  { %6460 = vrot.lane.b32.xlu1 %v6456_v56, %s10011_s26 }
0x858a   :  { %v8472_v7 = vpop.permute.xlu1 %8471 }
0x858b   :  { %v8474_v23 = vmul.f32 %v9978_v30, %v8472_v7 }
0x858d   :  { %8485 = vrot.lane.b32.xlu0 %v8474_v23, %s10006_s29 }
0x858e   :  { %v2261_v14 = vpop.permute.xlu1 %2260 }
0x858f   :  { %2264 = vst.msk [vmem:[#allocation3] sm:$0xff] %vm2263_vm8, %v2261_v14 }
0x8591   :  { %3310 = vrot.lane.b32.xlu0 %v3306_v26, %s10006_s29 }
0x8592   :  { %v4361_v39 = vpop.permute.xlu1 %4360 }
0x8595   :  { %5410 = vrot.lane.b32.xlu0 %v5406_v34, %s10005_s28  ;;  %s10013_s28 = smov [#allocation3]  }
0x8596   :  { %v6461_v22 = vpop.permute.xlu1 %6460  ;;  %s8571_s29 = sshll.u32 %s10013_s28, 4  ;;  %s8572_s29 = int_to_ptr.vmem [resolvable:$true] %s8571_s29 }
0x8597   :  { %p9986_p1 = scmp.lt.s32.totalorder %s8572_s29, %s8572_s29 }
0x8599   :  { %7510 = vrot.lane.b32.xlu0 %v7506_v6, %s10008_s18  ;;  %s9981_s18 = scalar_lea.vmem %s8572_s29, 128 }
0x859a   :  { %p9982_p0 = scmp.ne.s32.totalorder %s8572_s29, %s9981_s18  ;;  %p9987_p2 = scmp.lt.s32.totalorder %s9981_s18, %s9981_s18 }
0x859c   :  { %p9988_p3 = por %p9987_p2, %p9986_p1 }
0x859e   :  { %p9989_p4 = pnand %p9988_p3, %p9982_p0 }
0x85ff   :  { %v8486_v24 = vpop.permute.xlu0 %8485 }
0x8600   :  { %9680 = vmatmul.mubr.msk.f32.vlgmr.msra.gmra.mxu0 %vm606_vm5, %v8486_v24 }
0x8603   :  { %v3311_v31 = vpop.permute.xlu0 %3310 }
0x8604   :  { %3314 = vst.msk [vmem:[#allocation3] sm:$0xff] %vm3313_vm9, %v3311_v31 }
0x8605   :  { %4364 = vst.msk [vmem:[#allocation3] sm:$0xff] %vm4363_vm10, %v4361_v39 }
0x8607   :  { %v5411_v48 = vpop.permute.xlu0 %5410 }
0x8608   :  { %5414 = vst.msk [vmem:[#allocation3] sm:$0xff] %vm5413_vm11, %v5411_v48 }
0x8609   :  { %6464 = vst.msk [vmem:[#allocation3] sm:$0xff] %vm6463_vm12, %v6461_v22 }
0x860b   :  { %v7511_v59 = vpop.permute.xlu0 %7510 }
0x860c   :  { %7514 = vst.msk [vmem:[#allocation3] sm:$0xff] %vm7513_vm13, %v7511_v59 }
0x86c0   :  { %v8555_v49 = vpop.f32.mrf.mxu0 }
0x86c1   :  { %v8556_v41 = vadd.f32 %v8848_v54, %v8555_v49 }
0x86c2   :  { %v9681_v58 = vpop.f32.mrf.mxu0 }
0x86c3   :  { %8560 = vrot.lane.b32.xlu1 %v8556_v41, %s10012_s5 }
0x8735   :  { %v8561_v28 = vpop.permute.xlu1 %8560 }
0x8736   :  { %8564 = vst.msk [vmem:[#allocation3] sm:$0xff] %vm8563_vm14, %v8561_v28 }
0x8737   :  { %9992 = shalt.err (!%p9989_p4)
}
0x8738   :  { %8574 = dma.vmem_to_hbm [thread:$0]  %s8572_s29, 128, %s15580_s6, [#allocation4]  }
0x8739   :  { %10001 = dma.done.wait [#allocation4], 128  }
0x873a   :  { %10002 = vsyncadd [#allocation4], 4294967168 }
0x873b   :  { %8578 = vsyncpa [#allocation4], 1 }

</bundles_post_ra>
